<compile_context>
chip_gen: v6e
topology: v6e:2x2x1
jax: 0.10.0
libtpu: 0.0.40
codegen_flags: <defaults>
</compile_context>

<pallas_src>
import math

import jax
import jax.numpy as jnp
from jax import lax
from jax.experimental import pallas as pl
from jax.experimental.pallas import tpu as pltpu  # noqa: F401  (TPU backend)

BN_EPS = 1e-5
HIDDEN = 32          # LSTM hidden / bottleneck width fixed by the module
KSIZE = 25           # series_decomp moving-average kernel size


# ----------------------------------------------------------------------------
# Single fused kernel: decomposition+linears, conv stack, 3 LSTMs, interaction
# bottlenecks, interaction linears and the final sum -- all in VMEM.
# ----------------------------------------------------------------------------
def _fused_forward_kernel(
    x_ref, wst_ref, bst_ref,
    wc1_ref, bc1_ref, wc2_ref, bc2_ref, wc3_ref, bc3_ref,
    wih1_ref, wih2_ref, wih3_ref, whh_ref, bl1_ref, bl2_ref, bl3_ref,
    wpw_ref, wb22_ref, wb23_ref,
    il1_ref, il1b_ref, il2_ref, il2b_ref, wim3_ref,
    out_ref,
):
    f32 = jnp.float32
    B, S, C = x_ref.shape
    H = whh_ref.shape[1]
    x = x_ref[...]                                            # (B, S, C)

    # ---- ConvolutionalModule x3: Conv1d(C, C, k=3, pad=1) + bias + ReLU ------------
    # im2col over time (zero padding), one MXU matmul per layer, channels-last.
    def conv_module(z, w_r, b_r):
        cin = z.shape[2]
        zl = jnp.concatenate([jnp.zeros((B, 1, cin), f32), z[:, :S - 1, :]], axis=1)
        zr = jnp.concatenate([z[:, 1:, :], jnp.zeros((B, 1, cin), f32)], axis=1)
        zcol = jnp.concatenate([zl, z, zr], axis=2)           # (B, S, 3*cin)
        y = jnp.dot(zcol.reshape(B * S, 3 * cin), w_r[...],
                    preferred_element_type=f32) + b_r[...]
        return jnp.maximum(y, 0.0).reshape(B, S, C)

    conv1 = conv_module(x, wc1_ref, bc1_ref)
    conv2 = conv_module(conv1, wc2_ref, bc2_ref)
    conv3 = conv_module(conv2, wc3_ref, bc3_ref)

    # ---- three LSTMs: x @ W_ih hoisted out of the recurrence, recurrence batched ---
    def in_proj(z, wih_r, bl_r):
        g = jnp.dot(z.reshape(B * S, C), wih_r[...],
                    preferred_element_type=f32) + bl_r[...]
        return g.reshape(B, S, 4 * H)

    gx1 = in_proj(conv1, wih1_ref, bl1_ref)                   # (B, S, 4H)
    gx2 = in_proj(conv2, wih2_ref, bl2_ref)
    gx3 = in_proj(conv3, wih3_ref, bl3_ref)

    whh = whh_ref[...]                                        # (3, H, 4H)
    h = jnp.zeros((3, B, H), f32)
    c = jnp.zeros((3, B, H), f32)
    hs = []
    for t in range(S):                                        # short static recurrence
        gxt = jnp.stack([gx1[:, t, :], gx2[:, t, :], gx3[:, t, :]], axis=0)  # (3,B,4H)
        gates = gxt + lax.dot_general(                        # batched (3,B,H)@(3,H,4H)
            h, whh, dimension_numbers=(((2,), (1,)), ((0,), (0,))),
            preferred_element_type=f32)
        i_g = jax.nn.sigmoid(gates[..., 0:H])
        f_g = jax.nn.sigmoid(gates[..., H:2 * H])
        g_g = jnp.tanh(gates[..., 2 * H:3 * H])
        o_g = jax.nn.sigmoid(gates[..., 3 * H:4 * H])
        c = f_g * c + i_g * g_g
        h = o_g * jnp.tanh(c)
        hs.append(h)
    l1 = jnp.stack([hs[t][0] for t in range(S)], axis=1)      # (B, S, H)
    l2 = jnp.stack([hs[t][1] for t in range(S)], axis=1)
    l3 = jnp.stack([hs[t][2] for t in range(S)], axis=1)

    # ---- interaction tail (B is tiny & static -> per-sample 2-D matmuls) -----------
    wpw = wpw_ref[...]
    wb22 = wb22_ref[...]
    wb23 = wb23_ref[...]
    il1 = il1_ref[...]
    il2 = il2_ref[...]
    wim3 = wim3_ref[...]
    wst = wst_ref[...]

    def bottleneck2(z):                                       # Bottleneck_2(32,32), 2-D
        L = z.shape[0]
        zpad = jnp.concatenate(
            [jnp.zeros((2, H), f32), z, jnp.zeros((2, H), f32)], axis=0)  # (L+4, H)
        col2 = jnp.concatenate([zpad[0:L + 2], zpad[1:L + 3], zpad[2:L + 4]], axis=1)
        y = jnp.maximum(jnp.dot(col2, wb22, preferred_element_type=f32), 0.0)  # (L+2,H)
        col3 = jnp.concatenate([y[0:L], y[1:L + 1], y[2:L + 2]], axis=1)
        out = jnp.dot(col3, wb23, preferred_element_type=f32) + z            # +residual
        return jnp.maximum(out, 0.0)                          # (L, H)

    for b in range(B):
        l1b, l2b, l3b = l1[b], l2[b], l3[b]                   # (S, H)
        i12 = jnp.concatenate([l1b, l2b], axis=0)             # (2S, H)
        i23 = jnp.concatenate([l2b, l3b], axis=0)
        # interactionmodule: pointwise conv (BN folded into wpw) + ReLU
        i12i = jnp.maximum(jnp.dot(i12, wpw, preferred_element_type=f32), 0.0)
        i23i = jnp.maximum(jnp.dot(i23, wpw, preferred_element_type=f32), 0.0)
        i12_2 = bottleneck2(jnp.concatenate([l1b, i12i], axis=0))   # (3S, H)
        i23_2 = bottleneck2(jnp.concatenate([l2b, i23i], axis=0))
        # Interaction_Linear1/2 (contract over time) -> (P, H)
        inter = (jnp.dot(il1, i12_2, preferred_element_type=f32) + il1b_ref[...]
                 + jnp.dot(il2, i23_2, preferred_element_type=f32) + il2b_ref[...])
        # interactionmodule_3: pointwise conv 32->C (BN folded), ReLU -> (P, C)
        i3 = jnp.maximum(jnp.dot(inter, wim3, preferred_element_type=f32), 0.0)
        # seasonal + trend path (decomp + linears folded into wst) -> (P, C)
        st = jnp.dot(wst, x[b], preferred_element_type=f32) + bst_ref[...]
        out_ref[b] = st + i3                                  # final (B, P, C) output


# ----------------------------------------------------------------------------
# Wrapper: fold constants, reshape params, one pallas_call.
# ----------------------------------------------------------------------------
def model_forward(params, x):
    B, S, C = x.shape
    P = params["Ws_T"].shape[1]

    # Fold series_decomp (25-tap edge-replicated moving average) + Linear_Seasonal
    # + Linear_Trend into one (P, S) matrix acting on x[b] (S, C):
    #   trend = M @ x_b, seasonal = (I - M) @ x_b
    #   seasonal_out + trend_out = [(I - M)^T Ws^T + M^T Wt^T]^T @ x_b + (bs + bt)
    pad = (KSIZE - 1) // 2
    src = jnp.clip(jnp.arange(S)[:, None] - pad + jnp.arange(KSIZE)[None, :], 0, S - 1)
    M = jax.nn.one_hot(src, S, dtype=jnp.float32).sum(axis=1) / float(KSIZE)   # (S, S)
    eye = jnp.eye(S, dtype=jnp.float32)
    wst = ((eye - M).T @ params["Ws_T"] + M.T @ params["Wt_T"]).T              # (P, S)
    bst = (params["bs"] + params["bt"]).reshape(P, 1)

    # Fold eval-mode BatchNorm (gamma=1, beta=0, mean=0, var=1) into conv weights.
    bn_c = 1.0 / math.sqrt(1.0 + BN_EPS)

    args = (
        x, wst, bst,
        params["cw1"], params["cb1"].reshape(1, C),
        params["cw2"], params["cb2"].reshape(1, C),
        params["cw3"], params["cb3"].reshape(1, C),
        params["wih1"], params["wih2"], params["wih3"],
        jnp.stack([params["whh1"], params["whh2"], params["whh3"]], axis=0),
        params["blstm1"], params["blstm2"], params["blstm3"],
        params["im1_w"] * bn_c, params["b2_w2"] * bn_c, params["b2_w3"] * bn_c,
        params["IL1_T"].T, params["IL1_b"].reshape(P, 1),
        params["IL2_T"].T, params["IL2_b"].reshape(P, 1),
        params["im3_w"] * bn_c,
    )
    return pl.pallas_call(
        _fused_forward_kernel,
        out_shape=jax.ShapeDtypeStruct((B, P, C), jnp.float32),
    )(*args)


# ----------------------------------------------------------------------------
# Deterministic parameter construction
# ----------------------------------------------------------------------------
def init_params(key, seq_len, pred_len, enc_in):
    ks = iter(jax.random.split(key, 32))

    def nrm(shape, scale=0.1):
        return jax.random.normal(next(ks), shape, jnp.float32) * scale

    H4 = 4 * HIDDEN
    return {
        # seasonal / trend linears (seq_len -> pred_len), stored transposed (S, P)
        "Ws_T": nrm((seq_len, pred_len)), "bs": nrm((pred_len,)),
        "Wt_T": nrm((seq_len, pred_len)), "bt": nrm((pred_len,)),
        # ConvolutionalModule convs in im2col layout (K*C_in, C_out);
        # row k*C_in+ci corresponds to torch weight[c_out, ci, k].
        "cw1": nrm((3 * enc_in, enc_in)), "cb1": nrm((enc_in,)),
        "cw2": nrm((3 * enc_in, enc_in)), "cb2": nrm((enc_in,)),
        "cw3": nrm((3 * enc_in, enc_in)), "cb3": nrm((enc_in,)),
        # LSTMs: W_ih^T (C, 4H), W_hh^T (H, 4H), combined bias b_ih+b_hh (1, 4H)
        "wih1": nrm((enc_in, H4)), "whh1": nrm((HIDDEN, H4)), "blstm1": nrm((1, H4)),
        "wih2": nrm((enc_in, H4)), "whh2": nrm((HIDDEN, H4)), "blstm2": nrm((1, H4)),
        "wih3": nrm((enc_in, H4)), "whh3": nrm((HIDDEN, H4)), "blstm3": nrm((1, H4)),
        # interactionmodule: Bottleneck(32,32) pointwise conv, (C_in, C_out), no bias
        "im1_w": nrm((HIDDEN, HIDDEN)),
        # interactionmodule_2: Bottleneck_2 convs (k=3, no bias), im2col (3H, H)
        "b2_w2": nrm((3 * HIDDEN, HIDDEN)),
        "b2_w3": nrm((3 * HIDDEN, HIDDEN)),
        # interactionmodule_3: Bottleneck(32, enc_in) pointwise conv, (C_in, C_out)
        "im3_w": nrm((HIDDEN, enc_in)),
        # Interaction_Linear1/2: Linear(3*seq_len, pred_len), stored transposed
        "IL1_T": nrm((3 * seq_len, pred_len)), "IL1_b": nrm((pred_len,)),
        "IL2_T": nrm((3 * seq_len, pred_len)), "IL2_b": nrm((pred_len,)),
    }


if __name__ == "__main__":
    B, SEQ_LEN, ENC_IN, PRED_LEN = 2, 16, 8, 8
    x = jax.random.normal(jax.random.PRNGKey(0), (B, SEQ_LEN, ENC_IN), jnp.float32)
    params = init_params(jax.random.PRNGKey(42), SEQ_LEN, PRED_LEN, ENC_IN)

    fwd = jax.jit(model_forward)
    out = jax.block_until_ready(fwd(params, x))
    assert out.shape == (B, PRED_LEN, ENC_IN), out.shape
    assert bool(jnp.all(jnp.isfinite(out)))
    print("KERNEL_OK")
</pallas_src>

<mosaic_0001>
module attributes {stable_mosaic.version = 11 : i64} {
  func.func @_fused_forward_kernel(%arg0: memref<2x16x8xf32, #tpu.memory_space<vmem>>, %arg1: memref<8x16xf32, #tpu.memory_space<vmem>>, %arg2: memref<8x1xf32, #tpu.memory_space<vmem>>, %arg3: memref<24x8xf32, #tpu.memory_space<vmem>>, %arg4: memref<1x8xf32, #tpu.memory_space<vmem>>, %arg5: memref<24x8xf32, #tpu.memory_space<vmem>>, %arg6: memref<1x8xf32, #tpu.memory_space<vmem>>, %arg7: memref<24x8xf32, #tpu.memory_space<vmem>>, %arg8: memref<1x8xf32, #tpu.memory_space<vmem>>, %arg9: memref<8x128xf32, #tpu.memory_space<vmem>>, %arg10: memref<8x128xf32, #tpu.memory_space<vmem>>, %arg11: memref<8x128xf32, #tpu.memory_space<vmem>>, %arg12: memref<3x32x128xf32, #tpu.memory_space<vmem>>, %arg13: memref<1x128xf32, #tpu.memory_space<vmem>>, %arg14: memref<1x128xf32, #tpu.memory_space<vmem>>, %arg15: memref<1x128xf32, #tpu.memory_space<vmem>>, %arg16: memref<32x32xf32, #tpu.memory_space<vmem>>, %arg17: memref<96x32xf32, #tpu.memory_space<vmem>>, %arg18: memref<96x32xf32, #tpu.memory_space<vmem>>, %arg19: memref<8x48xf32, #tpu.memory_space<vmem>>, %arg20: memref<8x1xf32, #tpu.memory_space<vmem>>, %arg21: memref<8x48xf32, #tpu.memory_space<vmem>>, %arg22: memref<8x1xf32, #tpu.memory_space<vmem>>, %arg23: memref<32x8xf32, #tpu.memory_space<vmem>>, %arg24: memref<2x8x8xf32, #tpu.memory_space<vmem>>) attributes {dimension_semantics = [], scalar_prefetch = 0 : i64, scratch_operands = 0 : i64, tpu.core_type = #tpu.core_type<tc>} {
    %c0 = arith.constant 0 : index
    %c0_0 = arith.constant 0 : index
    %c0_1 = arith.constant 0 : index
    %0 = vector.load %arg0[%c0, %c0_0, %c0_1] : memref<2x16x8xf32, #tpu.memory_space<vmem>>, vector<2x16x8xf32>
    %cst = arith.constant 0.000000e+00 : f32
    %1 = vector.broadcast %cst : f32 to vector<2x1x8xf32>
    %2 = vector.extract_strided_slice %0 {offsets = [0, 0, 0], sizes = [2, 15, 8], strides = [1, 1, 1]} : vector<2x16x8xf32> to vector<2x15x8xf32>
    %3 = tpu.concatenate %1, %2 in 1 : vector<2x1x8xf32>, vector<2x15x8xf32> -> vector<2x16x8xf32>
    %4 = vector.extract_strided_slice %0 {offsets = [0, 1, 0], sizes = [2, 15, 8], strides = [1, 1, 1]} : vector<2x16x8xf32> to vector<2x15x8xf32>
    %cst_2 = arith.constant 0.000000e+00 : f32
    %5 = vector.broadcast %cst_2 : f32 to vector<2x1x8xf32>
    %6 = tpu.concatenate %4, %5 in 1 : vector<2x15x8xf32>, vector<2x1x8xf32> -> vector<2x16x8xf32>
    %7 = tpu.concatenate %3, %0, %6 in 2 : vector<2x16x8xf32>, vector<2x16x8xf32>, vector<2x16x8xf32> -> vector<2x16x24xf32>
    %8 = vector.shape_cast %7 : vector<2x16x24xf32> to vector<32x24xf32>
    %c0_3 = arith.constant 0 : index
    %c0_4 = arith.constant 0 : index
    %9 = vector.load %arg3[%c0_3, %c0_4] : memref<24x8xf32, #tpu.memory_space<vmem>>, vector<24x8xf32>
    %cst_5 = arith.constant dense<0.000000e+00> : vector<32x8xf32>
    %10 = tpu.matmul %8, %9, %cst_5 {dimension_numbers = #tpu.dot_dimension_numbers<[1], [0], [0], [1], [0, 0, 1, 1], [], []>} : vector<32x24xf32>, vector<24x8xf32>, vector<32x8xf32> -> vector<32x8xf32>
    %c0_6 = arith.constant 0 : index
    %c0_7 = arith.constant 0 : index
    %11 = vector.load %arg4[%c0_6, %c0_7] : memref<1x8xf32, #tpu.memory_space<vmem>>, vector<1x8xf32>
    %12 = vector.broadcast %11 : vector<1x8xf32> to vector<32x8xf32>
    %13 = arith.addf %10, %12 : vector<32x8xf32>
    %cst_8 = arith.constant 0.000000e+00 : f32
    %14 = vector.broadcast %cst_8 : f32 to vector<32x8xf32>
    %15 = arith.maximumf %13, %14 : vector<32x8xf32>
    %16 = vector.shape_cast %15 : vector<32x8xf32> to vector<2x16x8xf32>
    %cst_9 = arith.constant 0.000000e+00 : f32
    %17 = vector.broadcast %cst_9 : f32 to vector<2x1x8xf32>
    %18 = vector.extract_strided_slice %16 {offsets = [0, 0, 0], sizes = [2, 15, 8], strides = [1, 1, 1]} : vector<2x16x8xf32> to vector<2x15x8xf32>
    %19 = tpu.concatenate %17, %18 in 1 : vector<2x1x8xf32>, vector<2x15x8xf32> -> vector<2x16x8xf32>
    %20 = vector.extract_strided_slice %16 {offsets = [0, 1, 0], sizes = [2, 15, 8], strides = [1, 1, 1]} : vector<2x16x8xf32> to vector<2x15x8xf32>
    %cst_10 = arith.constant 0.000000e+00 : f32
    %21 = vector.broadcast %cst_10 : f32 to vector<2x1x8xf32>
    %22 = tpu.concatenate %20, %21 in 1 : vector<2x15x8xf32>, vector<2x1x8xf32> -> vector<2x16x8xf32>
    %23 = tpu.concatenate %19, %16, %22 in 2 : vector<2x16x8xf32>, vector<2x16x8xf32>, vector<2x16x8xf32> -> vector<2x16x24xf32>
    %24 = vector.shape_cast %23 : vector<2x16x24xf32> to vector<32x24xf32>
    %c0_11 = arith.constant 0 : index
    %c0_12 = arith.constant 0 : index
    %25 = vector.load %arg5[%c0_11, %c0_12] : memref<24x8xf32, #tpu.memory_space<vmem>>, vector<24x8xf32>
    %cst_13 = arith.constant dense<0.000000e+00> : vector<32x8xf32>
    %26 = tpu.matmul %24, %25, %cst_13 {dimension_numbers = #tpu.dot_dimension_numbers<[1], [0], [0], [1], [0, 0, 1, 1], [], []>} : vector<32x24xf32>, vector<24x8xf32>, vector<32x8xf32> -> vector<32x8xf32>
    %c0_14 = arith.constant 0 : index
    %c0_15 = arith.constant 0 : index
    %27 = vector.load %arg6[%c0_14, %c0_15] : memref<1x8xf32, #tpu.memory_space<vmem>>, vector<1x8xf32>
    %28 = vector.broadcast %27 : vector<1x8xf32> to vector<32x8xf32>
    %29 = arith.addf %26, %28 : vector<32x8xf32>
    %cst_16 = arith.constant 0.000000e+00 : f32
    %30 = vector.broadcast %cst_16 : f32 to vector<32x8xf32>
    %31 = arith.maximumf %29, %30 : vector<32x8xf32>
    %32 = vector.shape_cast %31 : vector<32x8xf32> to vector<2x16x8xf32>
    %cst_17 = arith.constant 0.000000e+00 : f32
    %33 = vector.broadcast %cst_17 : f32 to vector<2x1x8xf32>
    %34 = vector.extract_strided_slice %32 {offsets = [0, 0, 0], sizes = [2, 15, 8], strides = [1, 1, 1]} : vector<2x16x8xf32> to vector<2x15x8xf32>
    %35 = tpu.concatenate %33, %34 in 1 : vector<2x1x8xf32>, vector<2x15x8xf32> -> vector<2x16x8xf32>
    %36 = vector.extract_strided_slice %32 {offsets = [0, 1, 0], sizes = [2, 15, 8], strides = [1, 1, 1]} : vector<2x16x8xf32> to vector<2x15x8xf32>
    %cst_18 = arith.constant 0.000000e+00 : f32
    %37 = vector.broadcast %cst_18 : f32 to vector<2x1x8xf32>
    %38 = tpu.concatenate %36, %37 in 1 : vector<2x15x8xf32>, vector<2x1x8xf32> -> vector<2x16x8xf32>
    %39 = tpu.concatenate %35, %32, %38 in 2 : vector<2x16x8xf32>, vector<2x16x8xf32>, vector<2x16x8xf32> -> vector<2x16x24xf32>
    %40 = vector.shape_cast %39 : vector<2x16x24xf32> to vector<32x24xf32>
    %c0_19 = arith.constant 0 : index
    %c0_20 = arith.constant 0 : index
    %41 = vector.load %arg7[%c0_19, %c0_20] : memref<24x8xf32, #tpu.memory_space<vmem>>, vector<24x8xf32>
    %cst_21 = arith.constant dense<0.000000e+00> : vector<32x8xf32>
    %42 = tpu.matmul %40, %41, %cst_21 {dimension_numbers = #tpu.dot_dimension_numbers<[1], [0], [0], [1], [0, 0, 1, 1], [], []>} : vector<32x24xf32>, vector<24x8xf32>, vector<32x8xf32> -> vector<32x8xf32>
    %c0_22 = arith.constant 0 : index
    %c0_23 = arith.constant 0 : index
    %43 = vector.load %arg8[%c0_22, %c0_23] : memref<1x8xf32, #tpu.memory_space<vmem>>, vector<1x8xf32>
    %44 = vector.broadcast %43 : vector<1x8xf32> to vector<32x8xf32>
    %45 = arith.addf %42, %44 : vector<32x8xf32>
    %cst_24 = arith.constant 0.000000e+00 : f32
    %46 = vector.broadcast %cst_24 : f32 to vector<32x8xf32>
    %47 = arith.maximumf %45, %46 : vector<32x8xf32>
    %48 = vector.shape_cast %47 : vector<32x8xf32> to vector<2x16x8xf32>
    %49 = vector.shape_cast %16 : vector<2x16x8xf32> to vector<32x8xf32>
    %c0_25 = arith.constant 0 : index
    %c0_26 = arith.constant 0 : index
    %50 = vector.load %arg9[%c0_25, %c0_26] : memref<8x128xf32, #tpu.memory_space<vmem>>, vector<8x128xf32>
    %cst_27 = arith.constant dense<0.000000e+00> : vector<32x128xf32>
    %51 = tpu.matmul %49, %50, %cst_27 {dimension_numbers = #tpu.dot_dimension_numbers<[1], [0], [0], [1], [0, 0, 1, 1], [], []>} : vector<32x8xf32>, vector<8x128xf32>, vector<32x128xf32> -> vector<32x128xf32>
    %c0_28 = arith.constant 0 : index
    %c0_29 = arith.constant 0 : index
    %52 = vector.load %arg13[%c0_28, %c0_29] : memref<1x128xf32, #tpu.memory_space<vmem>>, vector<1x128xf32>
    %53 = vector.broadcast %52 : vector<1x128xf32> to vector<32x128xf32>
    %54 = arith.addf %51, %53 : vector<32x128xf32>
    %55 = vector.shape_cast %54 : vector<32x128xf32> to vector<2x16x128xf32>
    %56 = vector.shape_cast %32 : vector<2x16x8xf32> to vector<32x8xf32>
    %c0_30 = arith.constant 0 : index
    %c0_31 = arith.constant 0 : index
    %57 = vector.load %arg10[%c0_30, %c0_31] : memref<8x128xf32, #tpu.memory_space<vmem>>, vector<8x128xf32>
    %cst_32 = arith.constant dense<0.000000e+00> : vector<32x128xf32>
    %58 = tpu.matmul %56, %57, %cst_32 {dimension_numbers = #tpu.dot_dimension_numbers<[1], [0], [0], [1], [0, 0, 1, 1], [], []>} : vector<32x8xf32>, vector<8x128xf32>, vector<32x128xf32> -> vector<32x128xf32>
    %c0_33 = arith.constant 0 : index
    %c0_34 = arith.constant 0 : index
    %59 = vector.load %arg14[%c0_33, %c0_34] : memref<1x128xf32, #tpu.memory_space<vmem>>, vector<1x128xf32>
    %60 = vector.broadcast %59 : vector<1x128xf32> to vector<32x128xf32>
    %61 = arith.addf %58, %60 : vector<32x128xf32>
    %62 = vector.shape_cast %61 : vector<32x128xf32> to vector<2x16x128xf32>
    %63 = vector.shape_cast %48 : vector<2x16x8xf32> to vector<32x8xf32>
    %c0_35 = arith.constant 0 : index
    %c0_36 = arith.constant 0 : index
    %64 = vector.load %arg11[%c0_35, %c0_36] : memref<8x128xf32, #tpu.memory_space<vmem>>, vector<8x128xf32>
    %cst_37 = arith.constant dense<0.000000e+00> : vector<32x128xf32>
    %65 = tpu.matmul %63, %64, %cst_37 {dimension_numbers = #tpu.dot_dimension_numbers<[1], [0], [0], [1], [0, 0, 1, 1], [], []>} : vector<32x8xf32>, vector<8x128xf32>, vector<32x128xf32> -> vector<32x128xf32>
    %c0_38 = arith.constant 0 : index
    %c0_39 = arith.constant 0 : index
    %66 = vector.load %arg15[%c0_38, %c0_39] : memref<1x128xf32, #tpu.memory_space<vmem>>, vector<1x128xf32>
    %67 = vector.broadcast %66 : vector<1x128xf32> to vector<32x128xf32>
    %68 = arith.addf %65, %67 : vector<32x128xf32>
    %69 = vector.shape_cast %68 : vector<32x128xf32> to vector<2x16x128xf32>
    %c0_40 = arith.constant 0 : index
    %c0_41 = arith.constant 0 : index
    %c0_42 = arith.constant 0 : index
    %70 = vector.load %arg12[%c0_40, %c0_41, %c0_42] : memref<3x32x128xf32, #tpu.memory_space<vmem>>, vector<3x32x128xf32>
    %cst_43 = arith.constant 0.000000e+00 : f32
    %71 = vector.broadcast %cst_43 : f32 to vector<3x2x32xf32>
    %cst_44 = arith.constant 0.000000e+00 : f32
    %72 = vector.broadcast %cst_44 : f32 to vector<3x2x32xf32>
    %73 = vector.extract_strided_slice %55 {offsets = [0, 0, 0], sizes = [2, 1, 128], strides = [1, 1, 1]} : vector<2x16x128xf32> to vector<2x1x128xf32>
    %74 = vector.shape_cast %73 : vector<2x1x128xf32> to vector<2x128xf32>
    %75 = vector.extract_strided_slice %62 {offsets = [0, 0, 0], sizes = [2, 1, 128], strides = [1, 1, 1]} : vector<2x16x128xf32> to vector<2x1x128xf32>
    %76 = vector.shape_cast %75 : vector<2x1x128xf32> to vector<2x128xf32>
    %77 = vector.extract_strided_slice %69 {offsets = [0, 0, 0], sizes = [2, 1, 128], strides = [1, 1, 1]} : vector<2x16x128xf32> to vector<2x1x128xf32>
    %78 = vector.shape_cast %77 : vector<2x1x128xf32> to vector<2x128xf32>
    %79 = vector.shape_cast %74 : vector<2x128xf32> to vector<1x2x128xf32>
    %80 = vector.shape_cast %76 : vector<2x128xf32> to vector<1x2x128xf32>
    %81 = vector.shape_cast %78 : vector<2x128xf32> to vector<1x2x128xf32>
    %82 = tpu.concatenate %79, %80, %81 in 0 : vector<1x2x128xf32>, vector<1x2x128xf32>, vector<1x2x128xf32> -> vector<3x2x128xf32>
    %cst_45 = arith.constant dense<0.000000e+00> : vector<3x2x128xf32>
    %83 = tpu.matmul %71, %70, %cst_45 {dimension_numbers = #tpu.dot_dimension_numbers<[2], [1], [1], [2], [0, 0, 0, 1, 1, 2], [0], [0]>} : vector<3x2x32xf32>, vector<3x32x128xf32>, vector<3x2x128xf32> -> vector<3x2x128xf32>
    %84 = arith.addf %82, %83 : vector<3x2x128xf32>
    %85 = vector.extract_strided_slice %84 {offsets = [0, 0, 0], sizes = [3, 2, 32], strides = [1, 1, 1]} : vector<3x2x128xf32> to vector<3x2x32xf32>
    %86 = arith.negf %85 : vector<3x2x32xf32>
    %87 = math.exp %86 : vector<3x2x32xf32>
    %cst_46 = arith.constant 1.000000e+00 : f32
    %88 = vector.broadcast %cst_46 : f32 to vector<3x2x32xf32>
    %89 = arith.addf %88, %87 : vector<3x2x32xf32>
    %90 = arith.divf %88, %89 : vector<3x2x32xf32>
    %91 = vector.extract_strided_slice %84 {offsets = [0, 0, 32], sizes = [3, 2, 32], strides = [1, 1, 1]} : vector<3x2x128xf32> to vector<3x2x32xf32>
    %92 = arith.negf %91 : vector<3x2x32xf32>
    %93 = math.exp %92 : vector<3x2x32xf32>
    %cst_47 = arith.constant 1.000000e+00 : f32
    %94 = vector.broadcast %cst_47 : f32 to vector<3x2x32xf32>
    %95 = arith.addf %94, %93 : vector<3x2x32xf32>
    %96 = arith.divf %94, %95 : vector<3x2x32xf32>
    %97 = vector.extract_strided_slice %84 {offsets = [0, 0, 64], sizes = [3, 2, 32], strides = [1, 1, 1]} : vector<3x2x128xf32> to vector<3x2x32xf32>
    %98 = math.tanh %97 : vector<3x2x32xf32>
    %99 = vector.extract_strided_slice %84 {offsets = [0, 0, 96], sizes = [3, 2, 32], strides = [1, 1, 1]} : vector<3x2x128xf32> to vector<3x2x32xf32>
    %100 = arith.negf %99 : vector<3x2x32xf32>
    %101 = math.exp %100 : vector<3x2x32xf32>
    %cst_48 = arith.constant 1.000000e+00 : f32
    %102 = vector.broadcast %cst_48 : f32 to vector<3x2x32xf32>
    %103 = arith.addf %102, %101 : vector<3x2x32xf32>
    %104 = arith.divf %102, %103 : vector<3x2x32xf32>
    %105 = arith.mulf %96, %72 : vector<3x2x32xf32>
    %106 = arith.mulf %90, %98 : vector<3x2x32xf32>
    %107 = arith.addf %105, %106 : vector<3x2x32xf32>
    %108 = math.tanh %107 : vector<3x2x32xf32>
    %109 = arith.mulf %104, %108 : vector<3x2x32xf32>
    %110 = vector.extract_strided_slice %55 {offsets = [0, 1, 0], sizes = [2, 1, 128], strides = [1, 1, 1]} : vector<2x16x128xf32> to vector<2x1x128xf32>
    %111 = vector.shape_cast %110 : vector<2x1x128xf32> to vector<2x128xf32>
    %112 = vector.extract_strided_slice %62 {offsets = [0, 1, 0], sizes = [2, 1, 128], strides = [1, 1, 1]} : vector<2x16x128xf32> to vector<2x1x128xf32>
    %113 = vector.shape_cast %112 : vector<2x1x128xf32> to vector<2x128xf32>
    %114 = vector.extract_strided_slice %69 {offsets = [0, 1, 0], sizes = [2, 1, 128], strides = [1, 1, 1]} : vector<2x16x128xf32> to vector<2x1x128xf32>
    %115 = vector.shape_cast %114 : vector<2x1x128xf32> to vector<2x128xf32>
    %116 = vector.shape_cast %111 : vector<2x128xf32> to vector<1x2x128xf32>
    %117 = vector.shape_cast %113 : vector<2x128xf32> to vector<1x2x128xf32>
    %118 = vector.shape_cast %115 : vector<2x128xf32> to vector<1x2x128xf32>
    %119 = tpu.concatenate %116, %117, %118 in 0 : vector<1x2x128xf32>, vector<1x2x128xf32>, vector<1x2x128xf32> -> vector<3x2x128xf32>
    %cst_49 = arith.constant dense<0.000000e+00> : vector<3x2x128xf32>
    %120 = tpu.matmul %109, %70, %cst_49 {dimension_numbers = #tpu.dot_dimension_numbers<[2], [1], [1], [2], [0, 0, 0, 1, 1, 2], [0], [0]>} : vector<3x2x32xf32>, vector<3x32x128xf32>, vector<3x2x128xf32> -> vector<3x2x128xf32>
    %121 = arith.addf %119, %120 : vector<3x2x128xf32>
    %122 = vector.extract_strided_slice %121 {offsets = [0, 0, 0], sizes = [3, 2, 32], strides = [1, 1, 1]} : vector<3x2x128xf32> to vector<3x2x32xf32>
    %123 = arith.negf %122 : vector<3x2x32xf32>
    %124 = math.exp %123 : vector<3x2x32xf32>
    %cst_50 = arith.constant 1.000000e+00 : f32
    %125 = vector.broadcast %cst_50 : f32 to vector<3x2x32xf32>
    %126 = arith.addf %125, %124 : vector<3x2x32xf32>
    %127 = arith.divf %125, %126 : vector<3x2x32xf32>
    %128 = vector.extract_strided_slice %121 {offsets = [0, 0, 32], sizes = [3, 2, 32], strides = [1, 1, 1]} : vector<3x2x128xf32> to vector<3x2x32xf32>
    %129 = arith.negf %128 : vector<3x2x32xf32>
    %130 = math.exp %129 : vector<3x2x32xf32>
    %cst_51 = arith.constant 1.000000e+00 : f32
    %131 = vector.broadcast %cst_51 : f32 to vector<3x2x32xf32>
    %132 = arith.addf %131, %130 : vector<3x2x32xf32>
    %133 = arith.divf %131, %132 : vector<3x2x32xf32>
    %134 = vector.extract_strided_slice %121 {offsets = [0, 0, 64], sizes = [3, 2, 32], strides = [1, 1, 1]} : vector<3x2x128xf32> to vector<3x2x32xf32>
    %135 = math.tanh %134 : vector<3x2x32xf32>
    %136 = vector.extract_strided_slice %121 {offsets = [0, 0, 96], sizes = [3, 2, 32], strides = [1, 1, 1]} : vector<3x2x128xf32> to vector<3x2x32xf32>
    %137 = arith.negf %136 : vector<3x2x32xf32>
    %138 = math.exp %137 : vector<3x2x32xf32>
    %cst_52 = arith.constant 1.000000e+00 : f32
    %139 = vector.broadcast %cst_52 : f32 to vector<3x2x32xf32>
    %140 = arith.addf %139, %138 : vector<3x2x32xf32>
    %141 = arith.divf %139, %140 : vector<3x2x32xf32>
    %142 = arith.mulf %133, %107 : vector<3x2x32xf32>
    %143 = arith.mulf %127, %135 : vector<3x2x32xf32>
    %144 = arith.addf %142, %143 : vector<3x2x32xf32>
    %145 = math.tanh %144 : vector<3x2x32xf32>
    %146 = arith.mulf %141, %145 : vector<3x2x32xf32>
    %147 = vector.extract_strided_slice %55 {offsets = [0, 2, 0], sizes = [2, 1, 128], strides = [1, 1, 1]} : vector<2x16x128xf32> to vector<2x1x128xf32>
    %148 = vector.shape_cast %147 : vector<2x1x128xf32> to vector<2x128xf32>
    %149 = vector.extract_strided_slice %62 {offsets = [0, 2, 0], sizes = [2, 1, 128], strides = [1, 1, 1]} : vector<2x16x128xf32> to vector<2x1x128xf32>
    %150 = vector.shape_cast %149 : vector<2x1x128xf32> to vector<2x128xf32>
    %151 = vector.extract_strided_slice %69 {offsets = [0, 2, 0], sizes = [2, 1, 128], strides = [1, 1, 1]} : vector<2x16x128xf32> to vector<2x1x128xf32>
    %152 = vector.shape_cast %151 : vector<2x1x128xf32> to vector<2x128xf32>
    %153 = vector.shape_cast %148 : vector<2x128xf32> to vector<1x2x128xf32>
    %154 = vector.shape_cast %150 : vector<2x128xf32> to vector<1x2x128xf32>
    %155 = vector.shape_cast %152 : vector<2x128xf32> to vector<1x2x128xf32>
    %156 = tpu.concatenate %153, %154, %155 in 0 : vector<1x2x128xf32>, vector<1x2x128xf32>, vector<1x2x128xf32> -> vector<3x2x128xf32>
    %cst_53 = arith.constant dense<0.000000e+00> : vector<3x2x128xf32>
    %157 = tpu.matmul %146, %70, %cst_53 {dimension_numbers = #tpu.dot_dimension_numbers<[2], [1], [1], [2], [0, 0, 0, 1, 1, 2], [0], [0]>} : vector<3x2x32xf32>, vector<3x32x128xf32>, vector<3x2x128xf32> -> vector<3x2x128xf32>
    %158 = arith.addf %156, %157 : vector<3x2x128xf32>
    %159 = vector.extract_strided_slice %158 {offsets = [0, 0, 0], sizes = [3, 2, 32], strides = [1, 1, 1]} : vector<3x2x128xf32> to vector<3x2x32xf32>
    %160 = arith.negf %159 : vector<3x2x32xf32>
    %161 = math.exp %160 : vector<3x2x32xf32>
    %cst_54 = arith.constant 1.000000e+00 : f32
    %162 = vector.broadcast %cst_54 : f32 to vector<3x2x32xf32>
    %163 = arith.addf %162, %161 : vector<3x2x32xf32>
    %164 = arith.divf %162, %163 : vector<3x2x32xf32>
    %165 = vector.extract_strided_slice %158 {offsets = [0, 0, 32], sizes = [3, 2, 32], strides = [1, 1, 1]} : vector<3x2x128xf32> to vector<3x2x32xf32>
    %166 = arith.negf %165 : vector<3x2x32xf32>
    %167 = math.exp %166 : vector<3x2x32xf32>
    %cst_55 = arith.constant 1.000000e+00 : f32
    %168 = vector.broadcast %cst_55 : f32 to vector<3x2x32xf32>
    %169 = arith.addf %168, %167 : vector<3x2x32xf32>
    %170 = arith.divf %168, %169 : vector<3x2x32xf32>
    %171 = vector.extract_strided_slice %158 {offsets = [0, 0, 64], sizes = [3, 2, 32], strides = [1, 1, 1]} : vector<3x2x128xf32> to vector<3x2x32xf32>
    %172 = math.tanh %171 : vector<3x2x32xf32>
    %173 = vector.extract_strided_slice %158 {offsets = [0, 0, 96], sizes = [3, 2, 32], strides = [1, 1, 1]} : vector<3x2x128xf32> to vector<3x2x32xf32>
    %174 = arith.negf %173 : vector<3x2x32xf32>
    %175 = math.exp %174 : vector<3x2x32xf32>
    %cst_56 = arith.constant 1.000000e+00 : f32
    %176 = vector.broadcast %cst_56 : f32 to vector<3x2x32xf32>
    %177 = arith.addf %176, %175 : vector<3x2x32xf32>
    %178 = arith.divf %176, %177 : vector<3x2x32xf32>
    %179 = arith.mulf %170, %144 : vector<3x2x32xf32>
    %180 = arith.mulf %164, %172 : vector<3x2x32xf32>
    %181 = arith.addf %179, %180 : vector<3x2x32xf32>
    %182 = math.tanh %181 : vector<3x2x32xf32>
    %183 = arith.mulf %178, %182 : vector<3x2x32xf32>
    %184 = vector.extract_strided_slice %55 {offsets = [0, 3, 0], sizes = [2, 1, 128], strides = [1, 1, 1]} : vector<2x16x128xf32> to vector<2x1x128xf32>
    %185 = vector.shape_cast %184 : vector<2x1x128xf32> to vector<2x128xf32>
    %186 = vector.extract_strided_slice %62 {offsets = [0, 3, 0], sizes = [2, 1, 128], strides = [1, 1, 1]} : vector<2x16x128xf32> to vector<2x1x128xf32>
    %187 = vector.shape_cast %186 : vector<2x1x128xf32> to vector<2x128xf32>
    %188 = vector.extract_strided_slice %69 {offsets = [0, 3, 0], sizes = [2, 1, 128], strides = [1, 1, 1]} : vector<2x16x128xf32> to vector<2x1x128xf32>
    %189 = vector.shape_cast %188 : vector<2x1x128xf32> to vector<2x128xf32>
    %190 = vector.shape_cast %185 : vector<2x128xf32> to vector<1x2x128xf32>
    %191 = vector.shape_cast %187 : vector<2x128xf32> to vector<1x2x128xf32>
    %192 = vector.shape_cast %189 : vector<2x128xf32> to vector<1x2x128xf32>
    %193 = tpu.concatenate %190, %191, %192 in 0 : vector<1x2x128xf32>, vector<1x2x128xf32>, vector<1x2x128xf32> -> vector<3x2x128xf32>
    %cst_57 = arith.constant dense<0.000000e+00> : vector<3x2x128xf32>
    %194 = tpu.matmul %183, %70, %cst_57 {dimension_numbers = #tpu.dot_dimension_numbers<[2], [1], [1], [2], [0, 0, 0, 1, 1, 2], [0], [0]>} : vector<3x2x32xf32>, vector<3x32x128xf32>, vector<3x2x128xf32> -> vector<3x2x128xf32>
    %195 = arith.addf %193, %194 : vector<3x2x128xf32>
    %196 = vector.extract_strided_slice %195 {offsets = [0, 0, 0], sizes = [3, 2, 32], strides = [1, 1, 1]} : vector<3x2x128xf32> to vector<3x2x32xf32>
    %197 = arith.negf %196 : vector<3x2x32xf32>
    %198 = math.exp %197 : vector<3x2x32xf32>
    %cst_58 = arith.constant 1.000000e+00 : f32
    %199 = vector.broadcast %cst_58 : f32 to vector<3x2x32xf32>
    %200 = arith.addf %199, %198 : vector<3x2x32xf32>
    %201 = arith.divf %199, %200 : vector<3x2x32xf32>
    %202 = vector.extract_strided_slice %195 {offsets = [0, 0, 32], sizes = [3, 2, 32], strides = [1, 1, 1]} : vector<3x2x128xf32> to vector<3x2x32xf32>
    %203 = arith.negf %202 : vector<3x2x32xf32>
    %204 = math.exp %203 : vector<3x2x32xf32>
    %cst_59 = arith.constant 1.000000e+00 : f32
    %205 = vector.broadcast %cst_59 : f32 to vector<3x2x32xf32>
    %206 = arith.addf %205, %204 : vector<3x2x32xf32>
    %207 = arith.divf %205, %206 : vector<3x2x32xf32>
    %208 = vector.extract_strided_slice %195 {offsets = [0, 0, 64], sizes = [3, 2, 32], strides = [1, 1, 1]} : vector<3x2x128xf32> to vector<3x2x32xf32>
    %209 = math.tanh %208 : vector<3x2x32xf32>
    %210 = vector.extract_strided_slice %195 {offsets = [0, 0, 96], sizes = [3, 2, 32], strides = [1, 1, 1]} : vector<3x2x128xf32> to vector<3x2x32xf32>
    %211 = arith.negf %210 : vector<3x2x32xf32>
    %212 = math.exp %211 : vector<3x2x32xf32>
    %cst_60 = arith.constant 1.000000e+00 : f32
    %213 = vector.broadcast %cst_60 : f32 to vector<3x2x32xf32>
    %214 = arith.addf %213, %212 : vector<3x2x32xf32>
    %215 = arith.divf %213, %214 : vector<3x2x32xf32>
    %216 = arith.mulf %207, %181 : vector<3x2x32xf32>
    %217 = arith.mulf %201, %209 : vector<3x2x32xf32>
    %218 = arith.addf %216, %217 : vector<3x2x32xf32>
    %219 = math.tanh %218 : vector<3x2x32xf32>
    %220 = arith.mulf %215, %219 : vector<3x2x32xf32>
    %221 = vector.extract_strided_slice %55 {offsets = [0, 4, 0], sizes = [2, 1, 128], strides = [1, 1, 1]} : vector<2x16x128xf32> to vector<2x1x128xf32>
    %222 = vector.shape_cast %221 : vector<2x1x128xf32> to vector<2x128xf32>
    %223 = vector.extract_strided_slice %62 {offsets = [0, 4, 0], sizes = [2, 1, 128], strides = [1, 1, 1]} : vector<2x16x128xf32> to vector<2x1x128xf32>
    %224 = vector.shape_cast %223 : vector<2x1x128xf32> to vector<2x128xf32>
    %225 = vector.extract_strided_slice %69 {offsets = [0, 4, 0], sizes = [2, 1, 128], strides = [1, 1, 1]} : vector<2x16x128xf32> to vector<2x1x128xf32>
    %226 = vector.shape_cast %225 : vector<2x1x128xf32> to vector<2x128xf32>
    %227 = vector.shape_cast %222 : vector<2x128xf32> to vector<1x2x128xf32>
    %228 = vector.shape_cast %224 : vector<2x128xf32> to vector<1x2x128xf32>
    %229 = vector.shape_cast %226 : vector<2x128xf32> to vector<1x2x128xf32>
    %230 = tpu.concatenate %227, %228, %229 in 0 : vector<1x2x128xf32>, vector<1x2x128xf32>, vector<1x2x128xf32> -> vector<3x2x128xf32>
    %cst_61 = arith.constant dense<0.000000e+00> : vector<3x2x128xf32>
    %231 = tpu.matmul %220, %70, %cst_61 {dimension_numbers = #tpu.dot_dimension_numbers<[2], [1], [1], [2], [0, 0, 0, 1, 1, 2], [0], [0]>} : vector<3x2x32xf32>, vector<3x32x128xf32>, vector<3x2x128xf32> -> vector<3x2x128xf32>
    %232 = arith.addf %230, %231 : vector<3x2x128xf32>
    %233 = vector.extract_strided_slice %232 {offsets = [0, 0, 0], sizes = [3, 2, 32], strides = [1, 1, 1]} : vector<3x2x128xf32> to vector<3x2x32xf32>
    %234 = arith.negf %233 : vector<3x2x32xf32>
    %235 = math.exp %234 : vector<3x2x32xf32>
    %cst_62 = arith.constant 1.000000e+00 : f32
    %236 = vector.broadcast %cst_62 : f32 to vector<3x2x32xf32>
    %237 = arith.addf %236, %235 : vector<3x2x32xf32>
    %238 = arith.divf %236, %237 : vector<3x2x32xf32>
    %239 = vector.extract_strided_slice %232 {offsets = [0, 0, 32], sizes = [3, 2, 32], strides = [1, 1, 1]} : vector<3x2x128xf32> to vector<3x2x32xf32>
    %240 = arith.negf %239 : vector<3x2x32xf32>
    %241 = math.exp %240 : vector<3x2x32xf32>
    %cst_63 = arith.constant 1.000000e+00 : f32
    %242 = vector.broadcast %cst_63 : f32 to vector<3x2x32xf32>
    %243 = arith.addf %242, %241 : vector<3x2x32xf32>
    %244 = arith.divf %242, %243 : vector<3x2x32xf32>
    %245 = vector.extract_strided_slice %232 {offsets = [0, 0, 64], sizes = [3, 2, 32], strides = [1, 1, 1]} : vector<3x2x128xf32> to vector<3x2x32xf32>
    %246 = math.tanh %245 : vector<3x2x32xf32>
    %247 = vector.extract_strided_slice %232 {offsets = [0, 0, 96], sizes = [3, 2, 32], strides = [1, 1, 1]} : vector<3x2x128xf32> to vector<3x2x32xf32>
    %248 = arith.negf %247 : vector<3x2x32xf32>
    %249 = math.exp %248 : vector<3x2x32xf32>
    %cst_64 = arith.constant 1.000000e+00 : f32
    %250 = vector.broadcast %cst_64 : f32 to vector<3x2x32xf32>
    %251 = arith.addf %250, %249 : vector<3x2x32xf32>
    %252 = arith.divf %250, %251 : vector<3x2x32xf32>
    %253 = arith.mulf %244, %218 : vector<3x2x32xf32>
    %254 = arith.mulf %238, %246 : vector<3x2x32xf32>
    %255 = arith.addf %253, %254 : vector<3x2x32xf32>
    %256 = math.tanh %255 : vector<3x2x32xf32>
    %257 = arith.mulf %252, %256 : vector<3x2x32xf32>
    %258 = vector.extract_strided_slice %55 {offsets = [0, 5, 0], sizes = [2, 1, 128], strides = [1, 1, 1]} : vector<2x16x128xf32> to vector<2x1x128xf32>
    %259 = vector.shape_cast %258 : vector<2x1x128xf32> to vector<2x128xf32>
    %260 = vector.extract_strided_slice %62 {offsets = [0, 5, 0], sizes = [2, 1, 128], strides = [1, 1, 1]} : vector<2x16x128xf32> to vector<2x1x128xf32>
    %261 = vector.shape_cast %260 : vector<2x1x128xf32> to vector<2x128xf32>
    %262 = vector.extract_strided_slice %69 {offsets = [0, 5, 0], sizes = [2, 1, 128], strides = [1, 1, 1]} : vector<2x16x128xf32> to vector<2x1x128xf32>
    %263 = vector.shape_cast %262 : vector<2x1x128xf32> to vector<2x128xf32>
    %264 = vector.shape_cast %259 : vector<2x128xf32> to vector<1x2x128xf32>
    %265 = vector.shape_cast %261 : vector<2x128xf32> to vector<1x2x128xf32>
    %266 = vector.shape_cast %263 : vector<2x128xf32> to vector<1x2x128xf32>
    %267 = tpu.concatenate %264, %265, %266 in 0 : vector<1x2x128xf32>, vector<1x2x128xf32>, vector<1x2x128xf32> -> vector<3x2x128xf32>
    %cst_65 = arith.constant dense<0.000000e+00> : vector<3x2x128xf32>
    %268 = tpu.matmul %257, %70, %cst_65 {dimension_numbers = #tpu.dot_dimension_numbers<[2], [1], [1], [2], [0, 0, 0, 1, 1, 2], [0], [0]>} : vector<3x2x32xf32>, vector<3x32x128xf32>, vector<3x2x128xf32> -> vector<3x2x128xf32>
    %269 = arith.addf %267, %268 : vector<3x2x128xf32>
    %270 = vector.extract_strided_slice %269 {offsets = [0, 0, 0], sizes = [3, 2, 32], strides = [1, 1, 1]} : vector<3x2x128xf32> to vector<3x2x32xf32>
    %271 = arith.negf %270 : vector<3x2x32xf32>
    %272 = math.exp %271 : vector<3x2x32xf32>
    %cst_66 = arith.constant 1.000000e+00 : f32
    %273 = vector.broadcast %cst_66 : f32 to vector<3x2x32xf32>
    %274 = arith.addf %273, %272 : vector<3x2x32xf32>
    %275 = arith.divf %273, %274 : vector<3x2x32xf32>
    %276 = vector.extract_strided_slice %269 {offsets = [0, 0, 32], sizes = [3, 2, 32], strides = [1, 1, 1]} : vector<3x2x128xf32> to vector<3x2x32xf32>
    %277 = arith.negf %276 : vector<3x2x32xf32>
    %278 = math.exp %277 : vector<3x2x32xf32>
    %cst_67 = arith.constant 1.000000e+00 : f32
    %279 = vector.broadcast %cst_67 : f32 to vector<3x2x32xf32>
    %280 = arith.addf %279, %278 : vector<3x2x32xf32>
    %281 = arith.divf %279, %280 : vector<3x2x32xf32>
    %282 = vector.extract_strided_slice %269 {offsets = [0, 0, 64], sizes = [3, 2, 32], strides = [1, 1, 1]} : vector<3x2x128xf32> to vector<3x2x32xf32>
    %283 = math.tanh %282 : vector<3x2x32xf32>
    %284 = vector.extract_strided_slice %269 {offsets = [0, 0, 96], sizes = [3, 2, 32], strides = [1, 1, 1]} : vector<3x2x128xf32> to vector<3x2x32xf32>
    %285 = arith.negf %284 : vector<3x2x32xf32>
    %286 = math.exp %285 : vector<3x2x32xf32>
    %cst_68 = arith.constant 1.000000e+00 : f32
    %287 = vector.broadcast %cst_68 : f32 to vector<3x2x32xf32>
    %288 = arith.addf %287, %286 : vector<3x2x32xf32>
    %289 = arith.divf %287, %288 : vector<3x2x32xf32>
    %290 = arith.mulf %281, %255 : vector<3x2x32xf32>
    %291 = arith.mulf %275, %283 : vector<3x2x32xf32>
    %292 = arith.addf %290, %291 : vector<3x2x32xf32>
    %293 = math.tanh %292 : vector<3x2x32xf32>
    %294 = arith.mulf %289, %293 : vector<3x2x32xf32>
    %295 = vector.extract_strided_slice %55 {offsets = [0, 6, 0], sizes = [2, 1, 128], strides = [1, 1, 1]} : vector<2x16x128xf32> to vector<2x1x128xf32>
    %296 = vector.shape_cast %295 : vector<2x1x128xf32> to vector<2x128xf32>
    %297 = vector.extract_strided_slice %62 {offsets = [0, 6, 0], sizes = [2, 1, 128], strides = [1, 1, 1]} : vector<2x16x128xf32> to vector<2x1x128xf32>
    %298 = vector.shape_cast %297 : vector<2x1x128xf32> to vector<2x128xf32>
    %299 = vector.extract_strided_slice %69 {offsets = [0, 6, 0], sizes = [2, 1, 128], strides = [1, 1, 1]} : vector<2x16x128xf32> to vector<2x1x128xf32>
    %300 = vector.shape_cast %299 : vector<2x1x128xf32> to vector<2x128xf32>
    %301 = vector.shape_cast %296 : vector<2x128xf32> to vector<1x2x128xf32>
    %302 = vector.shape_cast %298 : vector<2x128xf32> to vector<1x2x128xf32>
    %303 = vector.shape_cast %300 : vector<2x128xf32> to vector<1x2x128xf32>
    %304 = tpu.concatenate %301, %302, %303 in 0 : vector<1x2x128xf32>, vector<1x2x128xf32>, vector<1x2x128xf32> -> vector<3x2x128xf32>
    %cst_69 = arith.constant dense<0.000000e+00> : vector<3x2x128xf32>
    %305 = tpu.matmul %294, %70, %cst_69 {dimension_numbers = #tpu.dot_dimension_numbers<[2], [1], [1], [2], [0, 0, 0, 1, 1, 2], [0], [0]>} : vector<3x2x32xf32>, vector<3x32x128xf32>, vector<3x2x128xf32> -> vector<3x2x128xf32>
    %306 = arith.addf %304, %305 : vector<3x2x128xf32>
    %307 = vector.extract_strided_slice %306 {offsets = [0, 0, 0], sizes = [3, 2, 32], strides = [1, 1, 1]} : vector<3x2x128xf32> to vector<3x2x32xf32>
    %308 = arith.negf %307 : vector<3x2x32xf32>
    %309 = math.exp %308 : vector<3x2x32xf32>
    %cst_70 = arith.constant 1.000000e+00 : f32
    %310 = vector.broadcast %cst_70 : f32 to vector<3x2x32xf32>
    %311 = arith.addf %310, %309 : vector<3x2x32xf32>
    %312 = arith.divf %310, %311 : vector<3x2x32xf32>
    %313 = vector.extract_strided_slice %306 {offsets = [0, 0, 32], sizes = [3, 2, 32], strides = [1, 1, 1]} : vector<3x2x128xf32> to vector<3x2x32xf32>
    %314 = arith.negf %313 : vector<3x2x32xf32>
    %315 = math.exp %314 : vector<3x2x32xf32>
    %cst_71 = arith.constant 1.000000e+00 : f32
    %316 = vector.broadcast %cst_71 : f32 to vector<3x2x32xf32>
    %317 = arith.addf %316, %315 : vector<3x2x32xf32>
    %318 = arith.divf %316, %317 : vector<3x2x32xf32>
    %319 = vector.extract_strided_slice %306 {offsets = [0, 0, 64], sizes = [3, 2, 32], strides = [1, 1, 1]} : vector<3x2x128xf32> to vector<3x2x32xf32>
    %320 = math.tanh %319 : vector<3x2x32xf32>
    %321 = vector.extract_strided_slice %306 {offsets = [0, 0, 96], sizes = [3, 2, 32], strides = [1, 1, 1]} : vector<3x2x128xf32> to vector<3x2x32xf32>
    %322 = arith.negf %321 : vector<3x2x32xf32>
    %323 = math.exp %322 : vector<3x2x32xf32>
    %cst_72 = arith.constant 1.000000e+00 : f32
    %324 = vector.broadcast %cst_72 : f32 to vector<3x2x32xf32>
    %325 = arith.addf %324, %323 : vector<3x2x32xf32>
    %326 = arith.divf %324, %325 : vector<3x2x32xf32>
    %327 = arith.mulf %318, %292 : vector<3x2x32xf32>
    %328 = arith.mulf %312, %320 : vector<3x2x32xf32>
    %329 = arith.addf %327, %328 : vector<3x2x32xf32>
    %330 = math.tanh %329 : vector<3x2x32xf32>
    %331 = arith.mulf %326, %330 : vector<3x2x32xf32>
    %332 = vector.extract_strided_slice %55 {offsets = [0, 7, 0], sizes = [2, 1, 128], strides = [1, 1, 1]} : vector<2x16x128xf32> to vector<2x1x128xf32>
    %333 = vector.shape_cast %332 : vector<2x1x128xf32> to vector<2x128xf32>
    %334 = vector.extract_strided_slice %62 {offsets = [0, 7, 0], sizes = [2, 1, 128], strides = [1, 1, 1]} : vector<2x16x128xf32> to vector<2x1x128xf32>
    %335 = vector.shape_cast %334 : vector<2x1x128xf32> to vector<2x128xf32>
    %336 = vector.extract_strided_slice %69 {offsets = [0, 7, 0], sizes = [2, 1, 128], strides = [1, 1, 1]} : vector<2x16x128xf32> to vector<2x1x128xf32>
    %337 = vector.shape_cast %336 : vector<2x1x128xf32> to vector<2x128xf32>
    %338 = vector.shape_cast %333 : vector<2x128xf32> to vector<1x2x128xf32>
    %339 = vector.shape_cast %335 : vector<2x128xf32> to vector<1x2x128xf32>
    %340 = vector.shape_cast %337 : vector<2x128xf32> to vector<1x2x128xf32>
    %341 = tpu.concatenate %338, %339, %340 in 0 : vector<1x2x128xf32>, vector<1x2x128xf32>, vector<1x2x128xf32> -> vector<3x2x128xf32>
    %cst_73 = arith.constant dense<0.000000e+00> : vector<3x2x128xf32>
    %342 = tpu.matmul %331, %70, %cst_73 {dimension_numbers = #tpu.dot_dimension_numbers<[2], [1], [1], [2], [0, 0, 0, 1, 1, 2], [0], [0]>} : vector<3x2x32xf32>, vector<3x32x128xf32>, vector<3x2x128xf32> -> vector<3x2x128xf32>
    %343 = arith.addf %341, %342 : vector<3x2x128xf32>
    %344 = vector.extract_strided_slice %343 {offsets = [0, 0, 0], sizes = [3, 2, 32], strides = [1, 1, 1]} : vector<3x2x128xf32> to vector<3x2x32xf32>
    %345 = arith.negf %344 : vector<3x2x32xf32>
    %346 = math.exp %345 : vector<3x2x32xf32>
    %cst_74 = arith.constant 1.000000e+00 : f32
    %347 = vector.broadcast %cst_74 : f32 to vector<3x2x32xf32>
    %348 = arith.addf %347, %346 : vector<3x2x32xf32>
    %349 = arith.divf %347, %348 : vector<3x2x32xf32>
    %350 = vector.extract_strided_slice %343 {offsets = [0, 0, 32], sizes = [3, 2, 32], strides = [1, 1, 1]} : vector<3x2x128xf32> to vector<3x2x32xf32>
    %351 = arith.negf %350 : vector<3x2x32xf32>
    %352 = math.exp %351 : vector<3x2x32xf32>
    %cst_75 = arith.constant 1.000000e+00 : f32
    %353 = vector.broadcast %cst_75 : f32 to vector<3x2x32xf32>
    %354 = arith.addf %353, %352 : vector<3x2x32xf32>
    %355 = arith.divf %353, %354 : vector<3x2x32xf32>
    %356 = vector.extract_strided_slice %343 {offsets = [0, 0, 64], sizes = [3, 2, 32], strides = [1, 1, 1]} : vector<3x2x128xf32> to vector<3x2x32xf32>
    %357 = math.tanh %356 : vector<3x2x32xf32>
    %358 = vector.extract_strided_slice %343 {offsets = [0, 0, 96], sizes = [3, 2, 32], strides = [1, 1, 1]} : vector<3x2x128xf32> to vector<3x2x32xf32>
    %359 = arith.negf %358 : vector<3x2x32xf32>
    %360 = math.exp %359 : vector<3x2x32xf32>
    %cst_76 = arith.constant 1.000000e+00 : f32
    %361 = vector.broadcast %cst_76 : f32 to vector<3x2x32xf32>
    %362 = arith.addf %361, %360 : vector<3x2x32xf32>
    %363 = arith.divf %361, %362 : vector<3x2x32xf32>
    %364 = arith.mulf %355, %329 : vector<3x2x32xf32>
    %365 = arith.mulf %349, %357 : vector<3x2x32xf32>
    %366 = arith.addf %364, %365 : vector<3x2x32xf32>
    %367 = math.tanh %366 : vector<3x2x32xf32>
    %368 = arith.mulf %363, %367 : vector<3x2x32xf32>
    %369 = vector.extract_strided_slice %55 {offsets = [0, 8, 0], sizes = [2, 1, 128], strides = [1, 1, 1]} : vector<2x16x128xf32> to vector<2x1x128xf32>
    %370 = vector.shape_cast %369 : vector<2x1x128xf32> to vector<2x128xf32>
    %371 = vector.extract_strided_slice %62 {offsets = [0, 8, 0], sizes = [2, 1, 128], strides = [1, 1, 1]} : vector<2x16x128xf32> to vector<2x1x128xf32>
    %372 = vector.shape_cast %371 : vector<2x1x128xf32> to vector<2x128xf32>
    %373 = vector.extract_strided_slice %69 {offsets = [0, 8, 0], sizes = [2, 1, 128], strides = [1, 1, 1]} : vector<2x16x128xf32> to vector<2x1x128xf32>
    %374 = vector.shape_cast %373 : vector<2x1x128xf32> to vector<2x128xf32>
    %375 = vector.shape_cast %370 : vector<2x128xf32> to vector<1x2x128xf32>
    %376 = vector.shape_cast %372 : vector<2x128xf32> to vector<1x2x128xf32>
    %377 = vector.shape_cast %374 : vector<2x128xf32> to vector<1x2x128xf32>
    %378 = tpu.concatenate %375, %376, %377 in 0 : vector<1x2x128xf32>, vector<1x2x128xf32>, vector<1x2x128xf32> -> vector<3x2x128xf32>
    %cst_77 = arith.constant dense<0.000000e+00> : vector<3x2x128xf32>
    %379 = tpu.matmul %368, %70, %cst_77 {dimension_numbers = #tpu.dot_dimension_numbers<[2], [1], [1], [2], [0, 0, 0, 1, 1, 2], [0], [0]>} : vector<3x2x32xf32>, vector<3x32x128xf32>, vector<3x2x128xf32> -> vector<3x2x128xf32>
    %380 = arith.addf %378, %379 : vector<3x2x128xf32>
    %381 = vector.extract_strided_slice %380 {offsets = [0, 0, 0], sizes = [3, 2, 32], strides = [1, 1, 1]} : vector<3x2x128xf32> to vector<3x2x32xf32>
    %382 = arith.negf %381 : vector<3x2x32xf32>
    %383 = math.exp %382 : vector<3x2x32xf32>
    %cst_78 = arith.constant 1.000000e+00 : f32
    %384 = vector.broadcast %cst_78 : f32 to vector<3x2x32xf32>
    %385 = arith.addf %384, %383 : vector<3x2x32xf32>
    %386 = arith.divf %384, %385 : vector<3x2x32xf32>
    %387 = vector.extract_strided_slice %380 {offsets = [0, 0, 32], sizes = [3, 2, 32], strides = [1, 1, 1]} : vector<3x2x128xf32> to vector<3x2x32xf32>
    %388 = arith.negf %387 : vector<3x2x32xf32>
    %389 = math.exp %388 : vector<3x2x32xf32>
    %cst_79 = arith.constant 1.000000e+00 : f32
    %390 = vector.broadcast %cst_79 : f32 to vector<3x2x32xf32>
    %391 = arith.addf %390, %389 : vector<3x2x32xf32>
    %392 = arith.divf %390, %391 : vector<3x2x32xf32>
    %393 = vector.extract_strided_slice %380 {offsets = [0, 0, 64], sizes = [3, 2, 32], strides = [1, 1, 1]} : vector<3x2x128xf32> to vector<3x2x32xf32>
    %394 = math.tanh %393 : vector<3x2x32xf32>
    %395 = vector.extract_strided_slice %380 {offsets = [0, 0, 96], sizes = [3, 2, 32], strides = [1, 1, 1]} : vector<3x2x128xf32> to vector<3x2x32xf32>
    %396 = arith.negf %395 : vector<3x2x32xf32>
    %397 = math.exp %396 : vector<3x2x32xf32>
    %cst_80 = arith.constant 1.000000e+00 : f32
    %398 = vector.broadcast %cst_80 : f32 to vector<3x2x32xf32>
    %399 = arith.addf %398, %397 : vector<3x2x32xf32>
    %400 = arith.divf %398, %399 : vector<3x2x32xf32>
    %401 = arith.mulf %392, %366 : vector<3x2x32xf32>
    %402 = arith.mulf %386, %394 : vector<3x2x32xf32>
    %403 = arith.addf %401, %402 : vector<3x2x32xf32>
    %404 = math.tanh %403 : vector<3x2x32xf32>
    %405 = arith.mulf %400, %404 : vector<3x2x32xf32>
    %406 = vector.extract_strided_slice %55 {offsets = [0, 9, 0], sizes = [2, 1, 128], strides = [1, 1, 1]} : vector<2x16x128xf32> to vector<2x1x128xf32>
    %407 = vector.shape_cast %406 : vector<2x1x128xf32> to vector<2x128xf32>
    %408 = vector.extract_strided_slice %62 {offsets = [0, 9, 0], sizes = [2, 1, 128], strides = [1, 1, 1]} : vector<2x16x128xf32> to vector<2x1x128xf32>
    %409 = vector.shape_cast %408 : vector<2x1x128xf32> to vector<2x128xf32>
    %410 = vector.extract_strided_slice %69 {offsets = [0, 9, 0], sizes = [2, 1, 128], strides = [1, 1, 1]} : vector<2x16x128xf32> to vector<2x1x128xf32>
    %411 = vector.shape_cast %410 : vector<2x1x128xf32> to vector<2x128xf32>
    %412 = vector.shape_cast %407 : vector<2x128xf32> to vector<1x2x128xf32>
    %413 = vector.shape_cast %409 : vector<2x128xf32> to vector<1x2x128xf32>
    %414 = vector.shape_cast %411 : vector<2x128xf32> to vector<1x2x128xf32>
    %415 = tpu.concatenate %412, %413, %414 in 0 : vector<1x2x128xf32>, vector<1x2x128xf32>, vector<1x2x128xf32> -> vector<3x2x128xf32>
    %cst_81 = arith.constant dense<0.000000e+00> : vector<3x2x128xf32>
    %416 = tpu.matmul %405, %70, %cst_81 {dimension_numbers = #tpu.dot_dimension_numbers<[2], [1], [1], [2], [0, 0, 0, 1, 1, 2], [0], [0]>} : vector<3x2x32xf32>, vector<3x32x128xf32>, vector<3x2x128xf32> -> vector<3x2x128xf32>
    %417 = arith.addf %415, %416 : vector<3x2x128xf32>
    %418 = vector.extract_strided_slice %417 {offsets = [0, 0, 0], sizes = [3, 2, 32], strides = [1, 1, 1]} : vector<3x2x128xf32> to vector<3x2x32xf32>
    %419 = arith.negf %418 : vector<3x2x32xf32>
    %420 = math.exp %419 : vector<3x2x32xf32>
    %cst_82 = arith.constant 1.000000e+00 : f32
    %421 = vector.broadcast %cst_82 : f32 to vector<3x2x32xf32>
    %422 = arith.addf %421, %420 : vector<3x2x32xf32>
    %423 = arith.divf %421, %422 : vector<3x2x32xf32>
    %424 = vector.extract_strided_slice %417 {offsets = [0, 0, 32], sizes = [3, 2, 32], strides = [1, 1, 1]} : vector<3x2x128xf32> to vector<3x2x32xf32>
    %425 = arith.negf %424 : vector<3x2x32xf32>
    %426 = math.exp %425 : vector<3x2x32xf32>
    %cst_83 = arith.constant 1.000000e+00 : f32
    %427 = vector.broadcast %cst_83 : f32 to vector<3x2x32xf32>
    %428 = arith.addf %427, %426 : vector<3x2x32xf32>
    %429 = arith.divf %427, %428 : vector<3x2x32xf32>
    %430 = vector.extract_strided_slice %417 {offsets = [0, 0, 64], sizes = [3, 2, 32], strides = [1, 1, 1]} : vector<3x2x128xf32> to vector<3x2x32xf32>
    %431 = math.tanh %430 : vector<3x2x32xf32>
    %432 = vector.extract_strided_slice %417 {offsets = [0, 0, 96], sizes = [3, 2, 32], strides = [1, 1, 1]} : vector<3x2x128xf32> to vector<3x2x32xf32>
    %433 = arith.negf %432 : vector<3x2x32xf32>
    %434 = math.exp %433 : vector<3x2x32xf32>
    %cst_84 = arith.constant 1.000000e+00 : f32
    %435 = vector.broadcast %cst_84 : f32 to vector<3x2x32xf32>
    %436 = arith.addf %435, %434 : vector<3x2x32xf32>
    %437 = arith.divf %435, %436 : vector<3x2x32xf32>
    %438 = arith.mulf %429, %403 : vector<3x2x32xf32>
    %439 = arith.mulf %423, %431 : vector<3x2x32xf32>
    %440 = arith.addf %438, %439 : vector<3x2x32xf32>
    %441 = math.tanh %440 : vector<3x2x32xf32>
    %442 = arith.mulf %437, %441 : vector<3x2x32xf32>
    %443 = vector.extract_strided_slice %55 {offsets = [0, 10, 0], sizes = [2, 1, 128], strides = [1, 1, 1]} : vector<2x16x128xf32> to vector<2x1x128xf32>
    %444 = vector.shape_cast %443 : vector<2x1x128xf32> to vector<2x128xf32>
    %445 = vector.extract_strided_slice %62 {offsets = [0, 10, 0], sizes = [2, 1, 128], strides = [1, 1, 1]} : vector<2x16x128xf32> to vector<2x1x128xf32>
    %446 = vector.shape_cast %445 : vector<2x1x128xf32> to vector<2x128xf32>
    %447 = vector.extract_strided_slice %69 {offsets = [0, 10, 0], sizes = [2, 1, 128], strides = [1, 1, 1]} : vector<2x16x128xf32> to vector<2x1x128xf32>
    %448 = vector.shape_cast %447 : vector<2x1x128xf32> to vector<2x128xf32>
    %449 = vector.shape_cast %444 : vector<2x128xf32> to vector<1x2x128xf32>
    %450 = vector.shape_cast %446 : vector<2x128xf32> to vector<1x2x128xf32>
    %451 = vector.shape_cast %448 : vector<2x128xf32> to vector<1x2x128xf32>
    %452 = tpu.concatenate %449, %450, %451 in 0 : vector<1x2x128xf32>, vector<1x2x128xf32>, vector<1x2x128xf32> -> vector<3x2x128xf32>
    %cst_85 = arith.constant dense<0.000000e+00> : vector<3x2x128xf32>
    %453 = tpu.matmul %442, %70, %cst_85 {dimension_numbers = #tpu.dot_dimension_numbers<[2], [1], [1], [2], [0, 0, 0, 1, 1, 2], [0], [0]>} : vector<3x2x32xf32>, vector<3x32x128xf32>, vector<3x2x128xf32> -> vector<3x2x128xf32>
    %454 = arith.addf %452, %453 : vector<3x2x128xf32>
    %455 = vector.extract_strided_slice %454 {offsets = [0, 0, 0], sizes = [3, 2, 32], strides = [1, 1, 1]} : vector<3x2x128xf32> to vector<3x2x32xf32>
    %456 = arith.negf %455 : vector<3x2x32xf32>
    %457 = math.exp %456 : vector<3x2x32xf32>
    %cst_86 = arith.constant 1.000000e+00 : f32
    %458 = vector.broadcast %cst_86 : f32 to vector<3x2x32xf32>
    %459 = arith.addf %458, %457 : vector<3x2x32xf32>
    %460 = arith.divf %458, %459 : vector<3x2x32xf32>
    %461 = vector.extract_strided_slice %454 {offsets = [0, 0, 32], sizes = [3, 2, 32], strides = [1, 1, 1]} : vector<3x2x128xf32> to vector<3x2x32xf32>
    %462 = arith.negf %461 : vector<3x2x32xf32>
    %463 = math.exp %462 : vector<3x2x32xf32>
    %cst_87 = arith.constant 1.000000e+00 : f32
    %464 = vector.broadcast %cst_87 : f32 to vector<3x2x32xf32>
    %465 = arith.addf %464, %463 : vector<3x2x32xf32>
    %466 = arith.divf %464, %465 : vector<3x2x32xf32>
    %467 = vector.extract_strided_slice %454 {offsets = [0, 0, 64], sizes = [3, 2, 32], strides = [1, 1, 1]} : vector<3x2x128xf32> to vector<3x2x32xf32>
    %468 = math.tanh %467 : vector<3x2x32xf32>
    %469 = vector.extract_strided_slice %454 {offsets = [0, 0, 96], sizes = [3, 2, 32], strides = [1, 1, 1]} : vector<3x2x128xf32> to vector<3x2x32xf32>
    %470 = arith.negf %469 : vector<3x2x32xf32>
    %471 = math.exp %470 : vector<3x2x32xf32>
    %cst_88 = arith.constant 1.000000e+00 : f32
    %472 = vector.broadcast %cst_88 : f32 to vector<3x2x32xf32>
    %473 = arith.addf %472, %471 : vector<3x2x32xf32>
    %474 = arith.divf %472, %473 : vector<3x2x32xf32>
    %475 = arith.mulf %466, %440 : vector<3x2x32xf32>
    %476 = arith.mulf %460, %468 : vector<3x2x32xf32>
    %477 = arith.addf %475, %476 : vector<3x2x32xf32>
    %478 = math.tanh %477 : vector<3x2x32xf32>
    %479 = arith.mulf %474, %478 : vector<3x2x32xf32>
    %480 = vector.extract_strided_slice %55 {offsets = [0, 11, 0], sizes = [2, 1, 128], strides = [1, 1, 1]} : vector<2x16x128xf32> to vector<2x1x128xf32>
    %481 = vector.shape_cast %480 : vector<2x1x128xf32> to vector<2x128xf32>
    %482 = vector.extract_strided_slice %62 {offsets = [0, 11, 0], sizes = [2, 1, 128], strides = [1, 1, 1]} : vector<2x16x128xf32> to vector<2x1x128xf32>
    %483 = vector.shape_cast %482 : vector<2x1x128xf32> to vector<2x128xf32>
    %484 = vector.extract_strided_slice %69 {offsets = [0, 11, 0], sizes = [2, 1, 128], strides = [1, 1, 1]} : vector<2x16x128xf32> to vector<2x1x128xf32>
    %485 = vector.shape_cast %484 : vector<2x1x128xf32> to vector<2x128xf32>
    %486 = vector.shape_cast %481 : vector<2x128xf32> to vector<1x2x128xf32>
    %487 = vector.shape_cast %483 : vector<2x128xf32> to vector<1x2x128xf32>
    %488 = vector.shape_cast %485 : vector<2x128xf32> to vector<1x2x128xf32>
    %489 = tpu.concatenate %486, %487, %488 in 0 : vector<1x2x128xf32>, vector<1x2x128xf32>, vector<1x2x128xf32> -> vector<3x2x128xf32>
    %cst_89 = arith.constant dense<0.000000e+00> : vector<3x2x128xf32>
    %490 = tpu.matmul %479, %70, %cst_89 {dimension_numbers = #tpu.dot_dimension_numbers<[2], [1], [1], [2], [0, 0, 0, 1, 1, 2], [0], [0]>} : vector<3x2x32xf32>, vector<3x32x128xf32>, vector<3x2x128xf32> -> vector<3x2x128xf32>
    %491 = arith.addf %489, %490 : vector<3x2x128xf32>
    %492 = vector.extract_strided_slice %491 {offsets = [0, 0, 0], sizes = [3, 2, 32], strides = [1, 1, 1]} : vector<3x2x128xf32> to vector<3x2x32xf32>
    %493 = arith.negf %492 : vector<3x2x32xf32>
    %494 = math.exp %493 : vector<3x2x32xf32>
    %cst_90 = arith.constant 1.000000e+00 : f32
    %495 = vector.broadcast %cst_90 : f32 to vector<3x2x32xf32>
    %496 = arith.addf %495, %494 : vector<3x2x32xf32>
    %497 = arith.divf %495, %496 : vector<3x2x32xf32>
    %498 = vector.extract_strided_slice %491 {offsets = [0, 0, 32], sizes = [3, 2, 32], strides = [1, 1, 1]} : vector<3x2x128xf32> to vector<3x2x32xf32>
    %499 = arith.negf %498 : vector<3x2x32xf32>
    %500 = math.exp %499 : vector<3x2x32xf32>
    %cst_91 = arith.constant 1.000000e+00 : f32
    %501 = vector.broadcast %cst_91 : f32 to vector<3x2x32xf32>
    %502 = arith.addf %501, %500 : vector<3x2x32xf32>
    %503 = arith.divf %501, %502 : vector<3x2x32xf32>
    %504 = vector.extract_strided_slice %491 {offsets = [0, 0, 64], sizes = [3, 2, 32], strides = [1, 1, 1]} : vector<3x2x128xf32> to vector<3x2x32xf32>
    %505 = math.tanh %504 : vector<3x2x32xf32>
    %506 = vector.extract_strided_slice %491 {offsets = [0, 0, 96], sizes = [3, 2, 32], strides = [1, 1, 1]} : vector<3x2x128xf32> to vector<3x2x32xf32>
    %507 = arith.negf %506 : vector<3x2x32xf32>
    %508 = math.exp %507 : vector<3x2x32xf32>
    %cst_92 = arith.constant 1.000000e+00 : f32
    %509 = vector.broadcast %cst_92 : f32 to vector<3x2x32xf32>
    %510 = arith.addf %509, %508 : vector<3x2x32xf32>
    %511 = arith.divf %509, %510 : vector<3x2x32xf32>
    %512 = arith.mulf %503, %477 : vector<3x2x32xf32>
    %513 = arith.mulf %497, %505 : vector<3x2x32xf32>
    %514 = arith.addf %512, %513 : vector<3x2x32xf32>
    %515 = math.tanh %514 : vector<3x2x32xf32>
    %516 = arith.mulf %511, %515 : vector<3x2x32xf32>
    %517 = vector.extract_strided_slice %55 {offsets = [0, 12, 0], sizes = [2, 1, 128], strides = [1, 1, 1]} : vector<2x16x128xf32> to vector<2x1x128xf32>
    %518 = vector.shape_cast %517 : vector<2x1x128xf32> to vector<2x128xf32>
    %519 = vector.extract_strided_slice %62 {offsets = [0, 12, 0], sizes = [2, 1, 128], strides = [1, 1, 1]} : vector<2x16x128xf32> to vector<2x1x128xf32>
    %520 = vector.shape_cast %519 : vector<2x1x128xf32> to vector<2x128xf32>
    %521 = vector.extract_strided_slice %69 {offsets = [0, 12, 0], sizes = [2, 1, 128], strides = [1, 1, 1]} : vector<2x16x128xf32> to vector<2x1x128xf32>
    %522 = vector.shape_cast %521 : vector<2x1x128xf32> to vector<2x128xf32>
    %523 = vector.shape_cast %518 : vector<2x128xf32> to vector<1x2x128xf32>
    %524 = vector.shape_cast %520 : vector<2x128xf32> to vector<1x2x128xf32>
    %525 = vector.shape_cast %522 : vector<2x128xf32> to vector<1x2x128xf32>
    %526 = tpu.concatenate %523, %524, %525 in 0 : vector<1x2x128xf32>, vector<1x2x128xf32>, vector<1x2x128xf32> -> vector<3x2x128xf32>
    %cst_93 = arith.constant dense<0.000000e+00> : vector<3x2x128xf32>
    %527 = tpu.matmul %516, %70, %cst_93 {dimension_numbers = #tpu.dot_dimension_numbers<[2], [1], [1], [2], [0, 0, 0, 1, 1, 2], [0], [0]>} : vector<3x2x32xf32>, vector<3x32x128xf32>, vector<3x2x128xf32> -> vector<3x2x128xf32>
    %528 = arith.addf %526, %527 : vector<3x2x128xf32>
    %529 = vector.extract_strided_slice %528 {offsets = [0, 0, 0], sizes = [3, 2, 32], strides = [1, 1, 1]} : vector<3x2x128xf32> to vector<3x2x32xf32>
    %530 = arith.negf %529 : vector<3x2x32xf32>
    %531 = math.exp %530 : vector<3x2x32xf32>
    %cst_94 = arith.constant 1.000000e+00 : f32
    %532 = vector.broadcast %cst_94 : f32 to vector<3x2x32xf32>
    %533 = arith.addf %532, %531 : vector<3x2x32xf32>
    %534 = arith.divf %532, %533 : vector<3x2x32xf32>
    %535 = vector.extract_strided_slice %528 {offsets = [0, 0, 32], sizes = [3, 2, 32], strides = [1, 1, 1]} : vector<3x2x128xf32> to vector<3x2x32xf32>
    %536 = arith.negf %535 : vector<3x2x32xf32>
    %537 = math.exp %536 : vector<3x2x32xf32>
    %cst_95 = arith.constant 1.000000e+00 : f32
    %538 = vector.broadcast %cst_95 : f32 to vector<3x2x32xf32>
    %539 = arith.addf %538, %537 : vector<3x2x32xf32>
    %540 = arith.divf %538, %539 : vector<3x2x32xf32>
    %541 = vector.extract_strided_slice %528 {offsets = [0, 0, 64], sizes = [3, 2, 32], strides = [1, 1, 1]} : vector<3x2x128xf32> to vector<3x2x32xf32>
    %542 = math.tanh %541 : vector<3x2x32xf32>
    %543 = vector.extract_strided_slice %528 {offsets = [0, 0, 96], sizes = [3, 2, 32], strides = [1, 1, 1]} : vector<3x2x128xf32> to vector<3x2x32xf32>
    %544 = arith.negf %543 : vector<3x2x32xf32>
    %545 = math.exp %544 : vector<3x2x32xf32>
    %cst_96 = arith.constant 1.000000e+00 : f32
    %546 = vector.broadcast %cst_96 : f32 to vector<3x2x32xf32>
    %547 = arith.addf %546, %545 : vector<3x2x32xf32>
    %548 = arith.divf %546, %547 : vector<3x2x32xf32>
    %549 = arith.mulf %540, %514 : vector<3x2x32xf32>
    %550 = arith.mulf %534, %542 : vector<3x2x32xf32>
    %551 = arith.addf %549, %550 : vector<3x2x32xf32>
    %552 = math.tanh %551 : vector<3x2x32xf32>
    %553 = arith.mulf %548, %552 : vector<3x2x32xf32>
    %554 = vector.extract_strided_slice %55 {offsets = [0, 13, 0], sizes = [2, 1, 128], strides = [1, 1, 1]} : vector<2x16x128xf32> to vector<2x1x128xf32>
    %555 = vector.shape_cast %554 : vector<2x1x128xf32> to vector<2x128xf32>
    %556 = vector.extract_strided_slice %62 {offsets = [0, 13, 0], sizes = [2, 1, 128], strides = [1, 1, 1]} : vector<2x16x128xf32> to vector<2x1x128xf32>
    %557 = vector.shape_cast %556 : vector<2x1x128xf32> to vector<2x128xf32>
    %558 = vector.extract_strided_slice %69 {offsets = [0, 13, 0], sizes = [2, 1, 128], strides = [1, 1, 1]} : vector<2x16x128xf32> to vector<2x1x128xf32>
    %559 = vector.shape_cast %558 : vector<2x1x128xf32> to vector<2x128xf32>
    %560 = vector.shape_cast %555 : vector<2x128xf32> to vector<1x2x128xf32>
    %561 = vector.shape_cast %557 : vector<2x128xf32> to vector<1x2x128xf32>
    %562 = vector.shape_cast %559 : vector<2x128xf32> to vector<1x2x128xf32>
    %563 = tpu.concatenate %560, %561, %562 in 0 : vector<1x2x128xf32>, vector<1x2x128xf32>, vector<1x2x128xf32> -> vector<3x2x128xf32>
    %cst_97 = arith.constant dense<0.000000e+00> : vector<3x2x128xf32>
    %564 = tpu.matmul %553, %70, %cst_97 {dimension_numbers = #tpu.dot_dimension_numbers<[2], [1], [1], [2], [0, 0, 0, 1, 1, 2], [0], [0]>} : vector<3x2x32xf32>, vector<3x32x128xf32>, vector<3x2x128xf32> -> vector<3x2x128xf32>
    %565 = arith.addf %563, %564 : vector<3x2x128xf32>
    %566 = vector.extract_strided_slice %565 {offsets = [0, 0, 0], sizes = [3, 2, 32], strides = [1, 1, 1]} : vector<3x2x128xf32> to vector<3x2x32xf32>
    %567 = arith.negf %566 : vector<3x2x32xf32>
    %568 = math.exp %567 : vector<3x2x32xf32>
    %cst_98 = arith.constant 1.000000e+00 : f32
    %569 = vector.broadcast %cst_98 : f32 to vector<3x2x32xf32>
    %570 = arith.addf %569, %568 : vector<3x2x32xf32>
    %571 = arith.divf %569, %570 : vector<3x2x32xf32>
    %572 = vector.extract_strided_slice %565 {offsets = [0, 0, 32], sizes = [3, 2, 32], strides = [1, 1, 1]} : vector<3x2x128xf32> to vector<3x2x32xf32>
    %573 = arith.negf %572 : vector<3x2x32xf32>
    %574 = math.exp %573 : vector<3x2x32xf32>
    %cst_99 = arith.constant 1.000000e+00 : f32
    %575 = vector.broadcast %cst_99 : f32 to vector<3x2x32xf32>
    %576 = arith.addf %575, %574 : vector<3x2x32xf32>
    %577 = arith.divf %575, %576 : vector<3x2x32xf32>
    %578 = vector.extract_strided_slice %565 {offsets = [0, 0, 64], sizes = [3, 2, 32], strides = [1, 1, 1]} : vector<3x2x128xf32> to vector<3x2x32xf32>
    %579 = math.tanh %578 : vector<3x2x32xf32>
    %580 = vector.extract_strided_slice %565 {offsets = [0, 0, 96], sizes = [3, 2, 32], strides = [1, 1, 1]} : vector<3x2x128xf32> to vector<3x2x32xf32>
    %581 = arith.negf %580 : vector<3x2x32xf32>
    %582 = math.exp %581 : vector<3x2x32xf32>
    %cst_100 = arith.constant 1.000000e+00 : f32
    %583 = vector.broadcast %cst_100 : f32 to vector<3x2x32xf32>
    %584 = arith.addf %583, %582 : vector<3x2x32xf32>
    %585 = arith.divf %583, %584 : vector<3x2x32xf32>
    %586 = arith.mulf %577, %551 : vector<3x2x32xf32>
    %587 = arith.mulf %571, %579 : vector<3x2x32xf32>
    %588 = arith.addf %586, %587 : vector<3x2x32xf32>
    %589 = math.tanh %588 : vector<3x2x32xf32>
    %590 = arith.mulf %585, %589 : vector<3x2x32xf32>
    %591 = vector.extract_strided_slice %55 {offsets = [0, 14, 0], sizes = [2, 1, 128], strides = [1, 1, 1]} : vector<2x16x128xf32> to vector<2x1x128xf32>
    %592 = vector.shape_cast %591 : vector<2x1x128xf32> to vector<2x128xf32>
    %593 = vector.extract_strided_slice %62 {offsets = [0, 14, 0], sizes = [2, 1, 128], strides = [1, 1, 1]} : vector<2x16x128xf32> to vector<2x1x128xf32>
    %594 = vector.shape_cast %593 : vector<2x1x128xf32> to vector<2x128xf32>
    %595 = vector.extract_strided_slice %69 {offsets = [0, 14, 0], sizes = [2, 1, 128], strides = [1, 1, 1]} : vector<2x16x128xf32> to vector<2x1x128xf32>
    %596 = vector.shape_cast %595 : vector<2x1x128xf32> to vector<2x128xf32>
    %597 = vector.shape_cast %592 : vector<2x128xf32> to vector<1x2x128xf32>
    %598 = vector.shape_cast %594 : vector<2x128xf32> to vector<1x2x128xf32>
    %599 = vector.shape_cast %596 : vector<2x128xf32> to vector<1x2x128xf32>
    %600 = tpu.concatenate %597, %598, %599 in 0 : vector<1x2x128xf32>, vector<1x2x128xf32>, vector<1x2x128xf32> -> vector<3x2x128xf32>
    %cst_101 = arith.constant dense<0.000000e+00> : vector<3x2x128xf32>
    %601 = tpu.matmul %590, %70, %cst_101 {dimension_numbers = #tpu.dot_dimension_numbers<[2], [1], [1], [2], [0, 0, 0, 1, 1, 2], [0], [0]>} : vector<3x2x32xf32>, vector<3x32x128xf32>, vector<3x2x128xf32> -> vector<3x2x128xf32>
    %602 = arith.addf %600, %601 : vector<3x2x128xf32>
    %603 = vector.extract_strided_slice %602 {offsets = [0, 0, 0], sizes = [3, 2, 32], strides = [1, 1, 1]} : vector<3x2x128xf32> to vector<3x2x32xf32>
    %604 = arith.negf %603 : vector<3x2x32xf32>
    %605 = math.exp %604 : vector<3x2x32xf32>
    %cst_102 = arith.constant 1.000000e+00 : f32
    %606 = vector.broadcast %cst_102 : f32 to vector<3x2x32xf32>
    %607 = arith.addf %606, %605 : vector<3x2x32xf32>
    %608 = arith.divf %606, %607 : vector<3x2x32xf32>
    %609 = vector.extract_strided_slice %602 {offsets = [0, 0, 32], sizes = [3, 2, 32], strides = [1, 1, 1]} : vector<3x2x128xf32> to vector<3x2x32xf32>
    %610 = arith.negf %609 : vector<3x2x32xf32>
    %611 = math.exp %610 : vector<3x2x32xf32>
    %cst_103 = arith.constant 1.000000e+00 : f32
    %612 = vector.broadcast %cst_103 : f32 to vector<3x2x32xf32>
    %613 = arith.addf %612, %611 : vector<3x2x32xf32>
    %614 = arith.divf %612, %613 : vector<3x2x32xf32>
    %615 = vector.extract_strided_slice %602 {offsets = [0, 0, 64], sizes = [3, 2, 32], strides = [1, 1, 1]} : vector<3x2x128xf32> to vector<3x2x32xf32>
    %616 = math.tanh %615 : vector<3x2x32xf32>
    %617 = vector.extract_strided_slice %602 {offsets = [0, 0, 96], sizes = [3, 2, 32], strides = [1, 1, 1]} : vector<3x2x128xf32> to vector<3x2x32xf32>
    %618 = arith.negf %617 : vector<3x2x32xf32>
    %619 = math.exp %618 : vector<3x2x32xf32>
    %cst_104 = arith.constant 1.000000e+00 : f32
    %620 = vector.broadcast %cst_104 : f32 to vector<3x2x32xf32>
    %621 = arith.addf %620, %619 : vector<3x2x32xf32>
    %622 = arith.divf %620, %621 : vector<3x2x32xf32>
    %623 = arith.mulf %614, %588 : vector<3x2x32xf32>
    %624 = arith.mulf %608, %616 : vector<3x2x32xf32>
    %625 = arith.addf %623, %624 : vector<3x2x32xf32>
    %626 = math.tanh %625 : vector<3x2x32xf32>
    %627 = arith.mulf %622, %626 : vector<3x2x32xf32>
    %628 = vector.extract_strided_slice %55 {offsets = [0, 15, 0], sizes = [2, 1, 128], strides = [1, 1, 1]} : vector<2x16x128xf32> to vector<2x1x128xf32>
    %629 = vector.shape_cast %628 : vector<2x1x128xf32> to vector<2x128xf32>
    %630 = vector.extract_strided_slice %62 {offsets = [0, 15, 0], sizes = [2, 1, 128], strides = [1, 1, 1]} : vector<2x16x128xf32> to vector<2x1x128xf32>
    %631 = vector.shape_cast %630 : vector<2x1x128xf32> to vector<2x128xf32>
    %632 = vector.extract_strided_slice %69 {offsets = [0, 15, 0], sizes = [2, 1, 128], strides = [1, 1, 1]} : vector<2x16x128xf32> to vector<2x1x128xf32>
    %633 = vector.shape_cast %632 : vector<2x1x128xf32> to vector<2x128xf32>
    %634 = vector.shape_cast %629 : vector<2x128xf32> to vector<1x2x128xf32>
    %635 = vector.shape_cast %631 : vector<2x128xf32> to vector<1x2x128xf32>
    %636 = vector.shape_cast %633 : vector<2x128xf32> to vector<1x2x128xf32>
    %637 = tpu.concatenate %634, %635, %636 in 0 : vector<1x2x128xf32>, vector<1x2x128xf32>, vector<1x2x128xf32> -> vector<3x2x128xf32>
    %cst_105 = arith.constant dense<0.000000e+00> : vector<3x2x128xf32>
    %638 = tpu.matmul %627, %70, %cst_105 {dimension_numbers = #tpu.dot_dimension_numbers<[2], [1], [1], [2], [0, 0, 0, 1, 1, 2], [0], [0]>} : vector<3x2x32xf32>, vector<3x32x128xf32>, vector<3x2x128xf32> -> vector<3x2x128xf32>
    %639 = arith.addf %637, %638 : vector<3x2x128xf32>
    %640 = vector.extract_strided_slice %639 {offsets = [0, 0, 0], sizes = [3, 2, 32], strides = [1, 1, 1]} : vector<3x2x128xf32> to vector<3x2x32xf32>
    %641 = arith.negf %640 : vector<3x2x32xf32>
    %642 = math.exp %641 : vector<3x2x32xf32>
    %cst_106 = arith.constant 1.000000e+00 : f32
    %643 = vector.broadcast %cst_106 : f32 to vector<3x2x32xf32>
    %644 = arith.addf %643, %642 : vector<3x2x32xf32>
    %645 = arith.divf %643, %644 : vector<3x2x32xf32>
    %646 = vector.extract_strided_slice %639 {offsets = [0, 0, 32], sizes = [3, 2, 32], strides = [1, 1, 1]} : vector<3x2x128xf32> to vector<3x2x32xf32>
    %647 = arith.negf %646 : vector<3x2x32xf32>
    %648 = math.exp %647 : vector<3x2x32xf32>
    %cst_107 = arith.constant 1.000000e+00 : f32
    %649 = vector.broadcast %cst_107 : f32 to vector<3x2x32xf32>
    %650 = arith.addf %649, %648 : vector<3x2x32xf32>
    %651 = arith.divf %649, %650 : vector<3x2x32xf32>
    %652 = vector.extract_strided_slice %639 {offsets = [0, 0, 64], sizes = [3, 2, 32], strides = [1, 1, 1]} : vector<3x2x128xf32> to vector<3x2x32xf32>
    %653 = math.tanh %652 : vector<3x2x32xf32>
    %654 = vector.extract_strided_slice %639 {offsets = [0, 0, 96], sizes = [3, 2, 32], strides = [1, 1, 1]} : vector<3x2x128xf32> to vector<3x2x32xf32>
    %655 = arith.negf %654 : vector<3x2x32xf32>
    %656 = math.exp %655 : vector<3x2x32xf32>
    %cst_108 = arith.constant 1.000000e+00 : f32
    %657 = vector.broadcast %cst_108 : f32 to vector<3x2x32xf32>
    %658 = arith.addf %657, %656 : vector<3x2x32xf32>
    %659 = arith.divf %657, %658 : vector<3x2x32xf32>
    %660 = arith.mulf %651, %625 : vector<3x2x32xf32>
    %661 = arith.mulf %645, %653 : vector<3x2x32xf32>
    %662 = arith.addf %660, %661 : vector<3x2x32xf32>
    %663 = math.tanh %662 : vector<3x2x32xf32>
    %664 = arith.mulf %659, %663 : vector<3x2x32xf32>
    %665 = vector.extract_strided_slice %109 {offsets = [0, 0, 0], sizes = [1, 2, 32], strides = [1, 1, 1]} : vector<3x2x32xf32> to vector<1x2x32xf32>
    %666 = vector.shape_cast %665 : vector<1x2x32xf32> to vector<2x32xf32>
    %667 = vector.extract_strided_slice %146 {offsets = [0, 0, 0], sizes = [1, 2, 32], strides = [1, 1, 1]} : vector<3x2x32xf32> to vector<1x2x32xf32>
    %668 = vector.shape_cast %667 : vector<1x2x32xf32> to vector<2x32xf32>
    %669 = vector.extract_strided_slice %183 {offsets = [0, 0, 0], sizes = [1, 2, 32], strides = [1, 1, 1]} : vector<3x2x32xf32> to vector<1x2x32xf32>
    %670 = vector.shape_cast %669 : vector<1x2x32xf32> to vector<2x32xf32>
    %671 = vector.extract_strided_slice %220 {offsets = [0, 0, 0], sizes = [1, 2, 32], strides = [1, 1, 1]} : vector<3x2x32xf32> to vector<1x2x32xf32>
    %672 = vector.shape_cast %671 : vector<1x2x32xf32> to vector<2x32xf32>
    %673 = vector.extract_strided_slice %257 {offsets = [0, 0, 0], sizes = [1, 2, 32], strides = [1, 1, 1]} : vector<3x2x32xf32> to vector<1x2x32xf32>
    %674 = vector.shape_cast %673 : vector<1x2x32xf32> to vector<2x32xf32>
    %675 = vector.extract_strided_slice %294 {offsets = [0, 0, 0], sizes = [1, 2, 32], strides = [1, 1, 1]} : vector<3x2x32xf32> to vector<1x2x32xf32>
    %676 = vector.shape_cast %675 : vector<1x2x32xf32> to vector<2x32xf32>
    %677 = vector.extract_strided_slice %331 {offsets = [0, 0, 0], sizes = [1, 2, 32], strides = [1, 1, 1]} : vector<3x2x32xf32> to vector<1x2x32xf32>
    %678 = vector.shape_cast %677 : vector<1x2x32xf32> to vector<2x32xf32>
    %679 = vector.extract_strided_slice %368 {offsets = [0, 0, 0], sizes = [1, 2, 32], strides = [1, 1, 1]} : vector<3x2x32xf32> to vector<1x2x32xf32>
    %680 = vector.shape_cast %679 : vector<1x2x32xf32> to vector<2x32xf32>
    %681 = vector.extract_strided_slice %405 {offsets = [0, 0, 0], sizes = [1, 2, 32], strides = [1, 1, 1]} : vector<3x2x32xf32> to vector<1x2x32xf32>
    %682 = vector.shape_cast %681 : vector<1x2x32xf32> to vector<2x32xf32>
    %683 = vector.extract_strided_slice %442 {offsets = [0, 0, 0], sizes = [1, 2, 32], strides = [1, 1, 1]} : vector<3x2x32xf32> to vector<1x2x32xf32>
    %684 = vector.shape_cast %683 : vector<1x2x32xf32> to vector<2x32xf32>
    %685 = vector.extract_strided_slice %479 {offsets = [0, 0, 0], sizes = [1, 2, 32], strides = [1, 1, 1]} : vector<3x2x32xf32> to vector<1x2x32xf32>
    %686 = vector.shape_cast %685 : vector<1x2x32xf32> to vector<2x32xf32>
    %687 = vector.extract_strided_slice %516 {offsets = [0, 0, 0], sizes = [1, 2, 32], strides = [1, 1, 1]} : vector<3x2x32xf32> to vector<1x2x32xf32>
    %688 = vector.shape_cast %687 : vector<1x2x32xf32> to vector<2x32xf32>
    %689 = vector.extract_strided_slice %553 {offsets = [0, 0, 0], sizes = [1, 2, 32], strides = [1, 1, 1]} : vector<3x2x32xf32> to vector<1x2x32xf32>
    %690 = vector.shape_cast %689 : vector<1x2x32xf32> to vector<2x32xf32>
    %691 = vector.extract_strided_slice %590 {offsets = [0, 0, 0], sizes = [1, 2, 32], strides = [1, 1, 1]} : vector<3x2x32xf32> to vector<1x2x32xf32>
    %692 = vector.shape_cast %691 : vector<1x2x32xf32> to vector<2x32xf32>
    %693 = vector.extract_strided_slice %627 {offsets = [0, 0, 0], sizes = [1, 2, 32], strides = [1, 1, 1]} : vector<3x2x32xf32> to vector<1x2x32xf32>
    %694 = vector.shape_cast %693 : vector<1x2x32xf32> to vector<2x32xf32>
    %695 = vector.extract_strided_slice %664 {offsets = [0, 0, 0], sizes = [1, 2, 32], strides = [1, 1, 1]} : vector<3x2x32xf32> to vector<1x2x32xf32>
    %696 = vector.shape_cast %695 : vector<1x2x32xf32> to vector<2x32xf32>
    %697 = vector.shape_cast %666 : vector<2x32xf32> to vector<2x1x32xf32>
    %698 = vector.shape_cast %668 : vector<2x32xf32> to vector<2x1x32xf32>
    %699 = vector.shape_cast %670 : vector<2x32xf32> to vector<2x1x32xf32>
    %700 = vector.shape_cast %672 : vector<2x32xf32> to vector<2x1x32xf32>
    %701 = vector.shape_cast %674 : vector<2x32xf32> to vector<2x1x32xf32>
    %702 = vector.shape_cast %676 : vector<2x32xf32> to vector<2x1x32xf32>
    %703 = vector.shape_cast %678 : vector<2x32xf32> to vector<2x1x32xf32>
    %704 = vector.shape_cast %680 : vector<2x32xf32> to vector<2x1x32xf32>
    %705 = vector.shape_cast %682 : vector<2x32xf32> to vector<2x1x32xf32>
    %706 = vector.shape_cast %684 : vector<2x32xf32> to vector<2x1x32xf32>
    %707 = vector.shape_cast %686 : vector<2x32xf32> to vector<2x1x32xf32>
    %708 = vector.shape_cast %688 : vector<2x32xf32> to vector<2x1x32xf32>
    %709 = vector.shape_cast %690 : vector<2x32xf32> to vector<2x1x32xf32>
    %710 = vector.shape_cast %692 : vector<2x32xf32> to vector<2x1x32xf32>
    %711 = vector.shape_cast %694 : vector<2x32xf32> to vector<2x1x32xf32>
    %712 = vector.shape_cast %696 : vector<2x32xf32> to vector<2x1x32xf32>
    %713 = tpu.concatenate %697, %698, %699, %700, %701, %702, %703, %704, %705, %706, %707, %708, %709, %710, %711, %712 in 1 : vector<2x1x32xf32>, vector<2x1x32xf32>, vector<2x1x32xf32>, vector<2x1x32xf32>, vector<2x1x32xf32>, vector<2x1x32xf32>, vector<2x1x32xf32>, vector<2x1x32xf32>, vector<2x1x32xf32>, vector<2x1x32xf32>, vector<2x1x32xf32>, vector<2x1x32xf32>, vector<2x1x32xf32>, vector<2x1x32xf32>, vector<2x1x32xf32>, vector<2x1x32xf32> -> vector<2x16x32xf32>
    %714 = vector.extract_strided_slice %109 {offsets = [1, 0, 0], sizes = [1, 2, 32], strides = [1, 1, 1]} : vector<3x2x32xf32> to vector<1x2x32xf32>
    %715 = vector.shape_cast %714 : vector<1x2x32xf32> to vector<2x32xf32>
    %716 = vector.extract_strided_slice %146 {offsets = [1, 0, 0], sizes = [1, 2, 32], strides = [1, 1, 1]} : vector<3x2x32xf32> to vector<1x2x32xf32>
    %717 = vector.shape_cast %716 : vector<1x2x32xf32> to vector<2x32xf32>
    %718 = vector.extract_strided_slice %183 {offsets = [1, 0, 0], sizes = [1, 2, 32], strides = [1, 1, 1]} : vector<3x2x32xf32> to vector<1x2x32xf32>
    %719 = vector.shape_cast %718 : vector<1x2x32xf32> to vector<2x32xf32>
    %720 = vector.extract_strided_slice %220 {offsets = [1, 0, 0], sizes = [1, 2, 32], strides = [1, 1, 1]} : vector<3x2x32xf32> to vector<1x2x32xf32>
    %721 = vector.shape_cast %720 : vector<1x2x32xf32> to vector<2x32xf32>
    %722 = vector.extract_strided_slice %257 {offsets = [1, 0, 0], sizes = [1, 2, 32], strides = [1, 1, 1]} : vector<3x2x32xf32> to vector<1x2x32xf32>
    %723 = vector.shape_cast %722 : vector<1x2x32xf32> to vector<2x32xf32>
    %724 = vector.extract_strided_slice %294 {offsets = [1, 0, 0], sizes = [1, 2, 32], strides = [1, 1, 1]} : vector<3x2x32xf32> to vector<1x2x32xf32>
    %725 = vector.shape_cast %724 : vector<1x2x32xf32> to vector<2x32xf32>
    %726 = vector.extract_strided_slice %331 {offsets = [1, 0, 0], sizes = [1, 2, 32], strides = [1, 1, 1]} : vector<3x2x32xf32> to vector<1x2x32xf32>
    %727 = vector.shape_cast %726 : vector<1x2x32xf32> to vector<2x32xf32>
    %728 = vector.extract_strided_slice %368 {offsets = [1, 0, 0], sizes = [1, 2, 32], strides = [1, 1, 1]} : vector<3x2x32xf32> to vector<1x2x32xf32>
    %729 = vector.shape_cast %728 : vector<1x2x32xf32> to vector<2x32xf32>
    %730 = vector.extract_strided_slice %405 {offsets = [1, 0, 0], sizes = [1, 2, 32], strides = [1, 1, 1]} : vector<3x2x32xf32> to vector<1x2x32xf32>
    %731 = vector.shape_cast %730 : vector<1x2x32xf32> to vector<2x32xf32>
    %732 = vector.extract_strided_slice %442 {offsets = [1, 0, 0], sizes = [1, 2, 32], strides = [1, 1, 1]} : vector<3x2x32xf32> to vector<1x2x32xf32>
    %733 = vector.shape_cast %732 : vector<1x2x32xf32> to vector<2x32xf32>
    %734 = vector.extract_strided_slice %479 {offsets = [1, 0, 0], sizes = [1, 2, 32], strides = [1, 1, 1]} : vector<3x2x32xf32> to vector<1x2x32xf32>
    %735 = vector.shape_cast %734 : vector<1x2x32xf32> to vector<2x32xf32>
    %736 = vector.extract_strided_slice %516 {offsets = [1, 0, 0], sizes = [1, 2, 32], strides = [1, 1, 1]} : vector<3x2x32xf32> to vector<1x2x32xf32>
    %737 = vector.shape_cast %736 : vector<1x2x32xf32> to vector<2x32xf32>
    %738 = vector.extract_strided_slice %553 {offsets = [1, 0, 0], sizes = [1, 2, 32], strides = [1, 1, 1]} : vector<3x2x32xf32> to vector<1x2x32xf32>
    %739 = vector.shape_cast %738 : vector<1x2x32xf32> to vector<2x32xf32>
    %740 = vector.extract_strided_slice %590 {offsets = [1, 0, 0], sizes = [1, 2, 32], strides = [1, 1, 1]} : vector<3x2x32xf32> to vector<1x2x32xf32>
    %741 = vector.shape_cast %740 : vector<1x2x32xf32> to vector<2x32xf32>
    %742 = vector.extract_strided_slice %627 {offsets = [1, 0, 0], sizes = [1, 2, 32], strides = [1, 1, 1]} : vector<3x2x32xf32> to vector<1x2x32xf32>
    %743 = vector.shape_cast %742 : vector<1x2x32xf32> to vector<2x32xf32>
    %744 = vector.extract_strided_slice %664 {offsets = [1, 0, 0], sizes = [1, 2, 32], strides = [1, 1, 1]} : vector<3x2x32xf32> to vector<1x2x32xf32>
    %745 = vector.shape_cast %744 : vector<1x2x32xf32> to vector<2x32xf32>
    %746 = vector.shape_cast %715 : vector<2x32xf32> to vector<2x1x32xf32>
    %747 = vector.shape_cast %717 : vector<2x32xf32> to vector<2x1x32xf32>
    %748 = vector.shape_cast %719 : vector<2x32xf32> to vector<2x1x32xf32>
    %749 = vector.shape_cast %721 : vector<2x32xf32> to vector<2x1x32xf32>
    %750 = vector.shape_cast %723 : vector<2x32xf32> to vector<2x1x32xf32>
    %751 = vector.shape_cast %725 : vector<2x32xf32> to vector<2x1x32xf32>
    %752 = vector.shape_cast %727 : vector<2x32xf32> to vector<2x1x32xf32>
    %753 = vector.shape_cast %729 : vector<2x32xf32> to vector<2x1x32xf32>
    %754 = vector.shape_cast %731 : vector<2x32xf32> to vector<2x1x32xf32>
    %755 = vector.shape_cast %733 : vector<2x32xf32> to vector<2x1x32xf32>
    %756 = vector.shape_cast %735 : vector<2x32xf32> to vector<2x1x32xf32>
    %757 = vector.shape_cast %737 : vector<2x32xf32> to vector<2x1x32xf32>
    %758 = vector.shape_cast %739 : vector<2x32xf32> to vector<2x1x32xf32>
    %759 = vector.shape_cast %741 : vector<2x32xf32> to vector<2x1x32xf32>
    %760 = vector.shape_cast %743 : vector<2x32xf32> to vector<2x1x32xf32>
    %761 = vector.shape_cast %745 : vector<2x32xf32> to vector<2x1x32xf32>
    %762 = tpu.concatenate %746, %747, %748, %749, %750, %751, %752, %753, %754, %755, %756, %757, %758, %759, %760, %761 in 1 : vector<2x1x32xf32>, vector<2x1x32xf32>, vector<2x1x32xf32>, vector<2x1x32xf32>, vector<2x1x32xf32>, vector<2x1x32xf32>, vector<2x1x32xf32>, vector<2x1x32xf32>, vector<2x1x32xf32>, vector<2x1x32xf32>, vector<2x1x32xf32>, vector<2x1x32xf32>, vector<2x1x32xf32>, vector<2x1x32xf32>, vector<2x1x32xf32>, vector<2x1x32xf32> -> vector<2x16x32xf32>
    %763 = vector.extract_strided_slice %109 {offsets = [2, 0, 0], sizes = [1, 2, 32], strides = [1, 1, 1]} : vector<3x2x32xf32> to vector<1x2x32xf32>
    %764 = vector.shape_cast %763 : vector<1x2x32xf32> to vector<2x32xf32>
    %765 = vector.extract_strided_slice %146 {offsets = [2, 0, 0], sizes = [1, 2, 32], strides = [1, 1, 1]} : vector<3x2x32xf32> to vector<1x2x32xf32>
    %766 = vector.shape_cast %765 : vector<1x2x32xf32> to vector<2x32xf32>
    %767 = vector.extract_strided_slice %183 {offsets = [2, 0, 0], sizes = [1, 2, 32], strides = [1, 1, 1]} : vector<3x2x32xf32> to vector<1x2x32xf32>
    %768 = vector.shape_cast %767 : vector<1x2x32xf32> to vector<2x32xf32>
    %769 = vector.extract_strided_slice %220 {offsets = [2, 0, 0], sizes = [1, 2, 32], strides = [1, 1, 1]} : vector<3x2x32xf32> to vector<1x2x32xf32>
    %770 = vector.shape_cast %769 : vector<1x2x32xf32> to vector<2x32xf32>
    %771 = vector.extract_strided_slice %257 {offsets = [2, 0, 0], sizes = [1, 2, 32], strides = [1, 1, 1]} : vector<3x2x32xf32> to vector<1x2x32xf32>
    %772 = vector.shape_cast %771 : vector<1x2x32xf32> to vector<2x32xf32>
    %773 = vector.extract_strided_slice %294 {offsets = [2, 0, 0], sizes = [1, 2, 32], strides = [1, 1, 1]} : vector<3x2x32xf32> to vector<1x2x32xf32>
    %774 = vector.shape_cast %773 : vector<1x2x32xf32> to vector<2x32xf32>
    %775 = vector.extract_strided_slice %331 {offsets = [2, 0, 0], sizes = [1, 2, 32], strides = [1, 1, 1]} : vector<3x2x32xf32> to vector<1x2x32xf32>
    %776 = vector.shape_cast %775 : vector<1x2x32xf32> to vector<2x32xf32>
    %777 = vector.extract_strided_slice %368 {offsets = [2, 0, 0], sizes = [1, 2, 32], strides = [1, 1, 1]} : vector<3x2x32xf32> to vector<1x2x32xf32>
    %778 = vector.shape_cast %777 : vector<1x2x32xf32> to vector<2x32xf32>
    %779 = vector.extract_strided_slice %405 {offsets = [2, 0, 0], sizes = [1, 2, 32], strides = [1, 1, 1]} : vector<3x2x32xf32> to vector<1x2x32xf32>
    %780 = vector.shape_cast %779 : vector<1x2x32xf32> to vector<2x32xf32>
    %781 = vector.extract_strided_slice %442 {offsets = [2, 0, 0], sizes = [1, 2, 32], strides = [1, 1, 1]} : vector<3x2x32xf32> to vector<1x2x32xf32>
    %782 = vector.shape_cast %781 : vector<1x2x32xf32> to vector<2x32xf32>
    %783 = vector.extract_strided_slice %479 {offsets = [2, 0, 0], sizes = [1, 2, 32], strides = [1, 1, 1]} : vector<3x2x32xf32> to vector<1x2x32xf32>
    %784 = vector.shape_cast %783 : vector<1x2x32xf32> to vector<2x32xf32>
    %785 = vector.extract_strided_slice %516 {offsets = [2, 0, 0], sizes = [1, 2, 32], strides = [1, 1, 1]} : vector<3x2x32xf32> to vector<1x2x32xf32>
    %786 = vector.shape_cast %785 : vector<1x2x32xf32> to vector<2x32xf32>
    %787 = vector.extract_strided_slice %553 {offsets = [2, 0, 0], sizes = [1, 2, 32], strides = [1, 1, 1]} : vector<3x2x32xf32> to vector<1x2x32xf32>
    %788 = vector.shape_cast %787 : vector<1x2x32xf32> to vector<2x32xf32>
    %789 = vector.extract_strided_slice %590 {offsets = [2, 0, 0], sizes = [1, 2, 32], strides = [1, 1, 1]} : vector<3x2x32xf32> to vector<1x2x32xf32>
    %790 = vector.shape_cast %789 : vector<1x2x32xf32> to vector<2x32xf32>
    %791 = vector.extract_strided_slice %627 {offsets = [2, 0, 0], sizes = [1, 2, 32], strides = [1, 1, 1]} : vector<3x2x32xf32> to vector<1x2x32xf32>
    %792 = vector.shape_cast %791 : vector<1x2x32xf32> to vector<2x32xf32>
    %793 = vector.extract_strided_slice %664 {offsets = [2, 0, 0], sizes = [1, 2, 32], strides = [1, 1, 1]} : vector<3x2x32xf32> to vector<1x2x32xf32>
    %794 = vector.shape_cast %793 : vector<1x2x32xf32> to vector<2x32xf32>
    %795 = vector.shape_cast %764 : vector<2x32xf32> to vector<2x1x32xf32>
    %796 = vector.shape_cast %766 : vector<2x32xf32> to vector<2x1x32xf32>
    %797 = vector.shape_cast %768 : vector<2x32xf32> to vector<2x1x32xf32>
    %798 = vector.shape_cast %770 : vector<2x32xf32> to vector<2x1x32xf32>
    %799 = vector.shape_cast %772 : vector<2x32xf32> to vector<2x1x32xf32>
    %800 = vector.shape_cast %774 : vector<2x32xf32> to vector<2x1x32xf32>
    %801 = vector.shape_cast %776 : vector<2x32xf32> to vector<2x1x32xf32>
    %802 = vector.shape_cast %778 : vector<2x32xf32> to vector<2x1x32xf32>
    %803 = vector.shape_cast %780 : vector<2x32xf32> to vector<2x1x32xf32>
    %804 = vector.shape_cast %782 : vector<2x32xf32> to vector<2x1x32xf32>
    %805 = vector.shape_cast %784 : vector<2x32xf32> to vector<2x1x32xf32>
    %806 = vector.shape_cast %786 : vector<2x32xf32> to vector<2x1x32xf32>
    %807 = vector.shape_cast %788 : vector<2x32xf32> to vector<2x1x32xf32>
    %808 = vector.shape_cast %790 : vector<2x32xf32> to vector<2x1x32xf32>
    %809 = vector.shape_cast %792 : vector<2x32xf32> to vector<2x1x32xf32>
    %810 = vector.shape_cast %794 : vector<2x32xf32> to vector<2x1x32xf32>
    %811 = tpu.concatenate %795, %796, %797, %798, %799, %800, %801, %802, %803, %804, %805, %806, %807, %808, %809, %810 in 1 : vector<2x1x32xf32>, vector<2x1x32xf32>, vector<2x1x32xf32>, vector<2x1x32xf32>, vector<2x1x32xf32>, vector<2x1x32xf32>, vector<2x1x32xf32>, vector<2x1x32xf32>, vector<2x1x32xf32>, vector<2x1x32xf32>, vector<2x1x32xf32>, vector<2x1x32xf32>, vector<2x1x32xf32>, vector<2x1x32xf32>, vector<2x1x32xf32>, vector<2x1x32xf32> -> vector<2x16x32xf32>
    %c0_109 = arith.constant 0 : index
    %c0_110 = arith.constant 0 : index
    %812 = vector.load %arg16[%c0_109, %c0_110] : memref<32x32xf32, #tpu.memory_space<vmem>>, vector<32x32xf32>
    %c0_111 = arith.constant 0 : index
    %c0_112 = arith.constant 0 : index
    %813 = vector.load %arg17[%c0_111, %c0_112] : memref<96x32xf32, #tpu.memory_space<vmem>>, vector<96x32xf32>
    %c0_113 = arith.constant 0 : index
    %c0_114 = arith.constant 0 : index
    %814 = vector.load %arg18[%c0_113, %c0_114] : memref<96x32xf32, #tpu.memory_space<vmem>>, vector<96x32xf32>
    %c0_115 = arith.constant 0 : index
    %c0_116 = arith.constant 0 : index
    %815 = vector.load %arg19[%c0_115, %c0_116] : memref<8x48xf32, #tpu.memory_space<vmem>>, vector<8x48xf32>
    %c0_117 = arith.constant 0 : index
    %c0_118 = arith.constant 0 : index
    %816 = vector.load %arg21[%c0_117, %c0_118] : memref<8x48xf32, #tpu.memory_space<vmem>>, vector<8x48xf32>
    %c0_119 = arith.constant 0 : index
    %c0_120 = arith.constant 0 : index
    %817 = vector.load %arg23[%c0_119, %c0_120] : memref<32x8xf32, #tpu.memory_space<vmem>>, vector<32x8xf32>
    %c0_121 = arith.constant 0 : index
    %c0_122 = arith.constant 0 : index
    %818 = vector.load %arg1[%c0_121, %c0_122] : memref<8x16xf32, #tpu.memory_space<vmem>>, vector<8x16xf32>
    %819 = vector.extract_strided_slice %713 {offsets = [0, 0, 0], sizes = [1, 16, 32], strides = [1, 1, 1]} : vector<2x16x32xf32> to vector<1x16x32xf32>
    %820 = vector.shape_cast %819 : vector<1x16x32xf32> to vector<16x32xf32>
    %821 = vector.extract_strided_slice %762 {offsets = [0, 0, 0], sizes = [1, 16, 32], strides = [1, 1, 1]} : vector<2x16x32xf32> to vector<1x16x32xf32>
    %822 = vector.shape_cast %821 : vector<1x16x32xf32> to vector<16x32xf32>
    %823 = vector.extract_strided_slice %811 {offsets = [0, 0, 0], sizes = [1, 16, 32], strides = [1, 1, 1]} : vector<2x16x32xf32> to vector<1x16x32xf32>
    %824 = vector.shape_cast %823 : vector<1x16x32xf32> to vector<16x32xf32>
    %825 = tpu.concatenate %820, %822 in 0 : vector<16x32xf32>, vector<16x32xf32> -> vector<32x32xf32>
    %826 = tpu.concatenate %822, %824 in 0 : vector<16x32xf32>, vector<16x32xf32> -> vector<32x32xf32>
    %cst_123 = arith.constant dense<0.000000e+00> : vector<32x32xf32>
    %827 = tpu.matmul %825, %812, %cst_123 {dimension_numbers = #tpu.dot_dimension_numbers<[1], [0], [0], [1], [0, 0, 1, 1], [], []>} : vector<32x32xf32>, vector<32x32xf32>, vector<32x32xf32> -> vector<32x32xf32>
    %cst_124 = arith.constant 0.000000e+00 : f32
    %828 = vector.broadcast %cst_124 : f32 to vector<32x32xf32>
    %829 = arith.maximumf %827, %828 : vector<32x32xf32>
    %cst_125 = arith.constant dense<0.000000e+00> : vector<32x32xf32>
    %830 = tpu.matmul %826, %812, %cst_125 {dimension_numbers = #tpu.dot_dimension_numbers<[1], [0], [0], [1], [0, 0, 1, 1], [], []>} : vector<32x32xf32>, vector<32x32xf32>, vector<32x32xf32> -> vector<32x32xf32>
    %cst_126 = arith.constant 0.000000e+00 : f32
    %831 = vector.broadcast %cst_126 : f32 to vector<32x32xf32>
    %832 = arith.maximumf %830, %831 : vector<32x32xf32>
    %833 = tpu.concatenate %820, %829 in 0 : vector<16x32xf32>, vector<32x32xf32> -> vector<48x32xf32>
    %cst_127 = arith.constant 0.000000e+00 : f32
    %834 = vector.broadcast %cst_127 : f32 to vector<2x32xf32>
    %cst_128 = arith.constant 0.000000e+00 : f32
    %835 = vector.broadcast %cst_128 : f32 to vector<2x32xf32>
    %836 = tpu.concatenate %834, %833, %835 in 0 : vector<2x32xf32>, vector<48x32xf32>, vector<2x32xf32> -> vector<52x32xf32>
    %837 = vector.extract_strided_slice %836 {offsets = [0, 0], sizes = [50, 32], strides = [1, 1]} : vector<52x32xf32> to vector<50x32xf32>
    %838 = vector.extract_strided_slice %836 {offsets = [1, 0], sizes = [50, 32], strides = [1, 1]} : vector<52x32xf32> to vector<50x32xf32>
    %839 = vector.extract_strided_slice %836 {offsets = [2, 0], sizes = [50, 32], strides = [1, 1]} : vector<52x32xf32> to vector<50x32xf32>
    %840 = tpu.concatenate %837, %838, %839 in 1 : vector<50x32xf32>, vector<50x32xf32>, vector<50x32xf32> -> vector<50x96xf32>
    %cst_129 = arith.constant dense<0.000000e+00> : vector<50x32xf32>
    %841 = tpu.matmul %840, %813, %cst_129 {dimension_numbers = #tpu.dot_dimension_numbers<[1], [0], [0], [1], [0, 0, 1, 1], [], []>} : vector<50x96xf32>, vector<96x32xf32>, vector<50x32xf32> -> vector<50x32xf32>
    %cst_130 = arith.constant 0.000000e+00 : f32
    %842 = vector.broadcast %cst_130 : f32 to vector<50x32xf32>
    %843 = arith.maximumf %841, %842 : vector<50x32xf32>
    %844 = vector.extract_strided_slice %843 {offsets = [0, 0], sizes = [48, 32], strides = [1, 1]} : vector<50x32xf32> to vector<48x32xf32>
    %845 = vector.extract_strided_slice %843 {offsets = [1, 0], sizes = [48, 32], strides = [1, 1]} : vector<50x32xf32> to vector<48x32xf32>
    %846 = vector.extract_strided_slice %843 {offsets = [2, 0], sizes = [48, 32], strides = [1, 1]} : vector<50x32xf32> to vector<48x32xf32>
    %847 = tpu.concatenate %844, %845, %846 in 1 : vector<48x32xf32>, vector<48x32xf32>, vector<48x32xf32> -> vector<48x96xf32>
    %cst_131 = arith.constant dense<0.000000e+00> : vector<48x32xf32>
    %848 = tpu.matmul %847, %814, %cst_131 {dimension_numbers = #tpu.dot_dimension_numbers<[1], [0], [0], [1], [0, 0, 1, 1], [], []>} : vector<48x96xf32>, vector<96x32xf32>, vector<48x32xf32> -> vector<48x32xf32>
    %849 = arith.addf %848, %833 : vector<48x32xf32>
    %cst_132 = arith.constant 0.000000e+00 : f32
    %850 = vector.broadcast %cst_132 : f32 to vector<48x32xf32>
    %851 = arith.maximumf %849, %850 : vector<48x32xf32>
    %852 = tpu.concatenate %822, %832 in 0 : vector<16x32xf32>, vector<32x32xf32> -> vector<48x32xf32>
    %cst_133 = arith.constant 0.000000e+00 : f32
    %853 = vector.broadcast %cst_133 : f32 to vector<2x32xf32>
    %cst_134 = arith.constant 0.000000e+00 : f32
    %854 = vector.broadcast %cst_134 : f32 to vector<2x32xf32>
    %855 = tpu.concatenate %853, %852, %854 in 0 : vector<2x32xf32>, vector<48x32xf32>, vector<2x32xf32> -> vector<52x32xf32>
    %856 = vector.extract_strided_slice %855 {offsets = [0, 0], sizes = [50, 32], strides = [1, 1]} : vector<52x32xf32> to vector<50x32xf32>
    %857 = vector.extract_strided_slice %855 {offsets = [1, 0], sizes = [50, 32], strides = [1, 1]} : vector<52x32xf32> to vector<50x32xf32>
    %858 = vector.extract_strided_slice %855 {offsets = [2, 0], sizes = [50, 32], strides = [1, 1]} : vector<52x32xf32> to vector<50x32xf32>
    %859 = tpu.concatenate %856, %857, %858 in 1 : vector<50x32xf32>, vector<50x32xf32>, vector<50x32xf32> -> vector<50x96xf32>
    %cst_135 = arith.constant dense<0.000000e+00> : vector<50x32xf32>
    %860 = tpu.matmul %859, %813, %cst_135 {dimension_numbers = #tpu.dot_dimension_numbers<[1], [0], [0], [1], [0, 0, 1, 1], [], []>} : vector<50x96xf32>, vector<96x32xf32>, vector<50x32xf32> -> vector<50x32xf32>
    %cst_136 = arith.constant 0.000000e+00 : f32
    %861 = vector.broadcast %cst_136 : f32 to vector<50x32xf32>
    %862 = arith.maximumf %860, %861 : vector<50x32xf32>
    %863 = vector.extract_strided_slice %862 {offsets = [0, 0], sizes = [48, 32], strides = [1, 1]} : vector<50x32xf32> to vector<48x32xf32>
    %864 = vector.extract_strided_slice %862 {offsets = [1, 0], sizes = [48, 32], strides = [1, 1]} : vector<50x32xf32> to vector<48x32xf32>
    %865 = vector.extract_strided_slice %862 {offsets = [2, 0], sizes = [48, 32], strides = [1, 1]} : vector<50x32xf32> to vector<48x32xf32>
    %866 = tpu.concatenate %863, %864, %865 in 1 : vector<48x32xf32>, vector<48x32xf32>, vector<48x32xf32> -> vector<48x96xf32>
    %cst_137 = arith.constant dense<0.000000e+00> : vector<48x32xf32>
    %867 = tpu.matmul %866, %814, %cst_137 {dimension_numbers = #tpu.dot_dimension_numbers<[1], [0], [0], [1], [0, 0, 1, 1], [], []>} : vector<48x96xf32>, vector<96x32xf32>, vector<48x32xf32> -> vector<48x32xf32>
    %868 = arith.addf %867, %852 : vector<48x32xf32>
    %cst_138 = arith.constant 0.000000e+00 : f32
    %869 = vector.broadcast %cst_138 : f32 to vector<48x32xf32>
    %870 = arith.maximumf %868, %869 : vector<48x32xf32>
    %cst_139 = arith.constant dense<0.000000e+00> : vector<8x32xf32>
    %871 = tpu.matmul %815, %851, %cst_139 {dimension_numbers = #tpu.dot_dimension_numbers<[1], [0], [0], [1], [0, 0, 1, 1], [], []>} : vector<8x48xf32>, vector<48x32xf32>, vector<8x32xf32> -> vector<8x32xf32>
    %c0_140 = arith.constant 0 : index
    %c0_141 = arith.constant 0 : index
    %872 = vector.load %arg20[%c0_140, %c0_141] : memref<8x1xf32, #tpu.memory_space<vmem>>, vector<8x1xf32>
    %873 = vector.broadcast %872 : vector<8x1xf32> to vector<8x32xf32>
    %874 = arith.addf %871, %873 : vector<8x32xf32>
    %cst_142 = arith.constant dense<0.000000e+00> : vector<8x32xf32>
    %875 = tpu.matmul %816, %870, %cst_142 {dimension_numbers = #tpu.dot_dimension_numbers<[1], [0], [0], [1], [0, 0, 1, 1], [], []>} : vector<8x48xf32>, vector<48x32xf32>, vector<8x32xf32> -> vector<8x32xf32>
    %876 = arith.addf %874, %875 : vector<8x32xf32>
    %c0_143 = arith.constant 0 : index
    %c0_144 = arith.constant 0 : index
    %877 = vector.load %arg22[%c0_143, %c0_144] : memref<8x1xf32, #tpu.memory_space<vmem>>, vector<8x1xf32>
    %878 = vector.broadcast %877 : vector<8x1xf32> to vector<8x32xf32>
    %879 = arith.addf %876, %878 : vector<8x32xf32>
    %cst_145 = arith.constant dense<0.000000e+00> : vector<8x8xf32>
    %880 = tpu.matmul %879, %817, %cst_145 {dimension_numbers = #tpu.dot_dimension_numbers<[1], [0], [0], [1], [0, 0, 1, 1], [], []>} : vector<8x32xf32>, vector<32x8xf32>, vector<8x8xf32> -> vector<8x8xf32>
    %cst_146 = arith.constant 0.000000e+00 : f32
    %881 = vector.broadcast %cst_146 : f32 to vector<8x8xf32>
    %882 = arith.maximumf %880, %881 : vector<8x8xf32>
    %883 = vector.extract_strided_slice %0 {offsets = [0, 0, 0], sizes = [1, 16, 8], strides = [1, 1, 1]} : vector<2x16x8xf32> to vector<1x16x8xf32>
    %884 = vector.shape_cast %883 : vector<1x16x8xf32> to vector<16x8xf32>
    %cst_147 = arith.constant dense<0.000000e+00> : vector<8x8xf32>
    %885 = tpu.matmul %818, %884, %cst_147 {dimension_numbers = #tpu.dot_dimension_numbers<[1], [0], [0], [1], [0, 0, 1, 1], [], []>} : vector<8x16xf32>, vector<16x8xf32>, vector<8x8xf32> -> vector<8x8xf32>
    %c0_148 = arith.constant 0 : index
    %c0_149 = arith.constant 0 : index
    %886 = vector.load %arg2[%c0_148, %c0_149] : memref<8x1xf32, #tpu.memory_space<vmem>>, vector<8x1xf32>
    %887 = vector.broadcast %886 : vector<8x1xf32> to vector<8x8xf32>
    %888 = arith.addf %885, %887 : vector<8x8xf32>
    %889 = arith.addf %888, %882 : vector<8x8xf32>
    %c0_150 = arith.constant 0 : index
    %c0_151 = arith.constant 0 : index
    %c0_152 = arith.constant 0 : index
    %890 = vector.load %arg24[%c0_150, %c0_151, %c0_152] : memref<2x8x8xf32, #tpu.memory_space<vmem>>, vector<1x8x8xf32>
    %891 = vector.shape_cast %890 : vector<1x8x8xf32> to vector<8x8xf32>
    %892 = vector.shape_cast %889 : vector<8x8xf32> to vector<1x8x8xf32>
    tpu.vector_store %arg24[%c0_150, %c0_151, %c0_152], %892 {strides = array<i32>} : memref<2x8x8xf32, #tpu.memory_space<vmem>>, vector<1x8x8xf32>,
    %893 = vector.extract_strided_slice %713 {offsets = [1, 0, 0], sizes = [1, 16, 32], strides = [1, 1, 1]} : vector<2x16x32xf32> to vector<1x16x32xf32>
    %894 = vector.shape_cast %893 : vector<1x16x32xf32> to vector<16x32xf32>
    %895 = vector.extract_strided_slice %762 {offsets = [1, 0, 0], sizes = [1, 16, 32], strides = [1, 1, 1]} : vector<2x16x32xf32> to vector<1x16x32xf32>
    %896 = vector.shape_cast %895 : vector<1x16x32xf32> to vector<16x32xf32>
    %897 = vector.extract_strided_slice %811 {offsets = [1, 0, 0], sizes = [1, 16, 32], strides = [1, 1, 1]} : vector<2x16x32xf32> to vector<1x16x32xf32>
    %898 = vector.shape_cast %897 : vector<1x16x32xf32> to vector<16x32xf32>
    %899 = tpu.concatenate %894, %896 in 0 : vector<16x32xf32>, vector<16x32xf32> -> vector<32x32xf32>
    %900 = tpu.concatenate %896, %898 in 0 : vector<16x32xf32>, vector<16x32xf32> -> vector<32x32xf32>
    %cst_153 = arith.constant dense<0.000000e+00> : vector<32x32xf32>
    %901 = tpu.matmul %899, %812, %cst_153 {dimension_numbers = #tpu.dot_dimension_numbers<[1], [0], [0], [1], [0, 0, 1, 1], [], []>} : vector<32x32xf32>, vector<32x32xf32>, vector<32x32xf32> -> vector<32x32xf32>
    %cst_154 = arith.constant 0.000000e+00 : f32
    %902 = vector.broadcast %cst_154 : f32 to vector<32x32xf32>
    %903 = arith.maximumf %901, %902 : vector<32x32xf32>
    %cst_155 = arith.constant dense<0.000000e+00> : vector<32x32xf32>
    %904 = tpu.matmul %900, %812, %cst_155 {dimension_numbers = #tpu.dot_dimension_numbers<[1], [0], [0], [1], [0, 0, 1, 1], [], []>} : vector<32x32xf32>, vector<32x32xf32>, vector<32x32xf32> -> vector<32x32xf32>
    %cst_156 = arith.constant 0.000000e+00 : f32
    %905 = vector.broadcast %cst_156 : f32 to vector<32x32xf32>
    %906 = arith.maximumf %904, %905 : vector<32x32xf32>
    %907 = tpu.concatenate %894, %903 in 0 : vector<16x32xf32>, vector<32x32xf32> -> vector<48x32xf32>
    %cst_157 = arith.constant 0.000000e+00 : f32
    %908 = vector.broadcast %cst_157 : f32 to vector<2x32xf32>
    %cst_158 = arith.constant 0.000000e+00 : f32
    %909 = vector.broadcast %cst_158 : f32 to vector<2x32xf32>
    %910 = tpu.concatenate %908, %907, %909 in 0 : vector<2x32xf32>, vector<48x32xf32>, vector<2x32xf32> -> vector<52x32xf32>
    %911 = vector.extract_strided_slice %910 {offsets = [0, 0], sizes = [50, 32], strides = [1, 1]} : vector<52x32xf32> to vector<50x32xf32>
    %912 = vector.extract_strided_slice %910 {offsets = [1, 0], sizes = [50, 32], strides = [1, 1]} : vector<52x32xf32> to vector<50x32xf32>
    %913 = vector.extract_strided_slice %910 {offsets = [2, 0], sizes = [50, 32], strides = [1, 1]} : vector<52x32xf32> to vector<50x32xf32>
    %914 = tpu.concatenate %911, %912, %913 in 1 : vector<50x32xf32>, vector<50x32xf32>, vector<50x32xf32> -> vector<50x96xf32>
    %cst_159 = arith.constant dense<0.000000e+00> : vector<50x32xf32>
    %915 = tpu.matmul %914, %813, %cst_159 {dimension_numbers = #tpu.dot_dimension_numbers<[1], [0], [0], [1], [0, 0, 1, 1], [], []>} : vector<50x96xf32>, vector<96x32xf32>, vector<50x32xf32> -> vector<50x32xf32>
    %cst_160 = arith.constant 0.000000e+00 : f32
    %916 = vector.broadcast %cst_160 : f32 to vector<50x32xf32>
    %917 = arith.maximumf %915, %916 : vector<50x32xf32>
    %918 = vector.extract_strided_slice %917 {offsets = [0, 0], sizes = [48, 32], strides = [1, 1]} : vector<50x32xf32> to vector<48x32xf32>
    %919 = vector.extract_strided_slice %917 {offsets = [1, 0], sizes = [48, 32], strides = [1, 1]} : vector<50x32xf32> to vector<48x32xf32>
    %920 = vector.extract_strided_slice %917 {offsets = [2, 0], sizes = [48, 32], strides = [1, 1]} : vector<50x32xf32> to vector<48x32xf32>
    %921 = tpu.concatenate %918, %919, %920 in 1 : vector<48x32xf32>, vector<48x32xf32>, vector<48x32xf32> -> vector<48x96xf32>
    %cst_161 = arith.constant dense<0.000000e+00> : vector<48x32xf32>
    %922 = tpu.matmul %921, %814, %cst_161 {dimension_numbers = #tpu.dot_dimension_numbers<[1], [0], [0], [1], [0, 0, 1, 1], [], []>} : vector<48x96xf32>, vector<96x32xf32>, vector<48x32xf32> -> vector<48x32xf32>
    %923 = arith.addf %922, %907 : vector<48x32xf32>
    %cst_162 = arith.constant 0.000000e+00 : f32
    %924 = vector.broadcast %cst_162 : f32 to vector<48x32xf32>
    %925 = arith.maximumf %923, %924 : vector<48x32xf32>
    %926 = tpu.concatenate %896, %906 in 0 : vector<16x32xf32>, vector<32x32xf32> -> vector<48x32xf32>
    %cst_163 = arith.constant 0.000000e+00 : f32
    %927 = vector.broadcast %cst_163 : f32 to vector<2x32xf32>
    %cst_164 = arith.constant 0.000000e+00 : f32
    %928 = vector.broadcast %cst_164 : f32 to vector<2x32xf32>
    %929 = tpu.concatenate %927, %926, %928 in 0 : vector<2x32xf32>, vector<48x32xf32>, vector<2x32xf32> -> vector<52x32xf32>
    %930 = vector.extract_strided_slice %929 {offsets = [0, 0], sizes = [50, 32], strides = [1, 1]} : vector<52x32xf32> to vector<50x32xf32>
    %931 = vector.extract_strided_slice %929 {offsets = [1, 0], sizes = [50, 32], strides = [1, 1]} : vector<52x32xf32> to vector<50x32xf32>
    %932 = vector.extract_strided_slice %929 {offsets = [2, 0], sizes = [50, 32], strides = [1, 1]} : vector<52x32xf32> to vector<50x32xf32>
    %933 = tpu.concatenate %930, %931, %932 in 1 : vector<50x32xf32>, vector<50x32xf32>, vector<50x32xf32> -> vector<50x96xf32>
    %cst_165 = arith.constant dense<0.000000e+00> : vector<50x32xf32>
    %934 = tpu.matmul %933, %813, %cst_165 {dimension_numbers = #tpu.dot_dimension_numbers<[1], [0], [0], [1], [0, 0, 1, 1], [], []>} : vector<50x96xf32>, vector<96x32xf32>, vector<50x32xf32> -> vector<50x32xf32>
    %cst_166 = arith.constant 0.000000e+00 : f32
    %935 = vector.broadcast %cst_166 : f32 to vector<50x32xf32>
    %936 = arith.maximumf %934, %935 : vector<50x32xf32>
    %937 = vector.extract_strided_slice %936 {offsets = [0, 0], sizes = [48, 32], strides = [1, 1]} : vector<50x32xf32> to vector<48x32xf32>
    %938 = vector.extract_strided_slice %936 {offsets = [1, 0], sizes = [48, 32], strides = [1, 1]} : vector<50x32xf32> to vector<48x32xf32>
    %939 = vector.extract_strided_slice %936 {offsets = [2, 0], sizes = [48, 32], strides = [1, 1]} : vector<50x32xf32> to vector<48x32xf32>
    %940 = tpu.concatenate %937, %938, %939 in 1 : vector<48x32xf32>, vector<48x32xf32>, vector<48x32xf32> -> vector<48x96xf32>
    %cst_167 = arith.constant dense<0.000000e+00> : vector<48x32xf32>
    %941 = tpu.matmul %940, %814, %cst_167 {dimension_numbers = #tpu.dot_dimension_numbers<[1], [0], [0], [1], [0, 0, 1, 1], [], []>} : vector<48x96xf32>, vector<96x32xf32>, vector<48x32xf32> -> vector<48x32xf32>
    %942 = arith.addf %941, %926 : vector<48x32xf32>
    %cst_168 = arith.constant 0.000000e+00 : f32
    %943 = vector.broadcast %cst_168 : f32 to vector<48x32xf32>
    %944 = arith.maximumf %942, %943 : vector<48x32xf32>
    %cst_169 = arith.constant dense<0.000000e+00> : vector<8x32xf32>
    %945 = tpu.matmul %815, %925, %cst_169 {dimension_numbers = #tpu.dot_dimension_numbers<[1], [0], [0], [1], [0, 0, 1, 1], [], []>} : vector<8x48xf32>, vector<48x32xf32>, vector<8x32xf32> -> vector<8x32xf32>
    %c0_170 = arith.constant 0 : index
    %c0_171 = arith.constant 0 : index
    %946 = vector.load %arg20[%c0_170, %c0_171] : memref<8x1xf32, #tpu.memory_space<vmem>>, vector<8x1xf32>
    %947 = vector.broadcast %946 : vector<8x1xf32> to vector<8x32xf32>
    %948 = arith.addf %945, %947 : vector<8x32xf32>
    %cst_172 = arith.constant dense<0.000000e+00> : vector<8x32xf32>
    %949 = tpu.matmul %816, %944, %cst_172 {dimension_numbers = #tpu.dot_dimension_numbers<[1], [0], [0], [1], [0, 0, 1, 1], [], []>} : vector<8x48xf32>, vector<48x32xf32>, vector<8x32xf32> -> vector<8x32xf32>
    %950 = arith.addf %948, %949 : vector<8x32xf32>
    %c0_173 = arith.constant 0 : index
    %c0_174 = arith.constant 0 : index
    %951 = vector.load %arg22[%c0_173, %c0_174] : memref<8x1xf32, #tpu.memory_space<vmem>>, vector<8x1xf32>
    %952 = vector.broadcast %951 : vector<8x1xf32> to vector<8x32xf32>
    %953 = arith.addf %950, %952 : vector<8x32xf32>
    %cst_175 = arith.constant dense<0.000000e+00> : vector<8x8xf32>
    %954 = tpu.matmul %953, %817, %cst_175 {dimension_numbers = #tpu.dot_dimension_numbers<[1], [0], [0], [1], [0, 0, 1, 1], [], []>} : vector<8x32xf32>, vector<32x8xf32>, vector<8x8xf32> -> vector<8x8xf32>
    %cst_176 = arith.constant 0.000000e+00 : f32
    %955 = vector.broadcast %cst_176 : f32 to vector<8x8xf32>
    %956 = arith.maximumf %954, %955 : vector<8x8xf32>
    %957 = vector.extract_strided_slice %0 {offsets = [1, 0, 0], sizes = [1, 16, 8], strides = [1, 1, 1]} : vector<2x16x8xf32> to vector<1x16x8xf32>
    %958 = vector.shape_cast %957 : vector<1x16x8xf32> to vector<16x8xf32>
    %cst_177 = arith.constant dense<0.000000e+00> : vector<8x8xf32>
    %959 = tpu.matmul %818, %958, %cst_177 {dimension_numbers = #tpu.dot_dimension_numbers<[1], [0], [0], [1], [0, 0, 1, 1], [], []>} : vector<8x16xf32>, vector<16x8xf32>, vector<8x8xf32> -> vector<8x8xf32>
    %c0_178 = arith.constant 0 : index
    %c0_179 = arith.constant 0 : index
    %960 = vector.load %arg2[%c0_178, %c0_179] : memref<8x1xf32, #tpu.memory_space<vmem>>, vector<8x1xf32>
    %961 = vector.broadcast %960 : vector<8x1xf32> to vector<8x8xf32>
    %962 = arith.addf %959, %961 : vector<8x8xf32>
    %963 = arith.addf %962, %956 : vector<8x8xf32>
    %c1 = arith.constant 1 : index
    %c0_180 = arith.constant 0 : index
    %c0_181 = arith.constant 0 : index
    %964 = vector.load %arg24[%c1, %c0_180, %c0_181] : memref<2x8x8xf32, #tpu.memory_space<vmem>>, vector<1x8x8xf32>
    %965 = vector.shape_cast %964 : vector<1x8x8xf32> to vector<8x8xf32>
    %966 = vector.shape_cast %963 : vector<8x8xf32> to vector<1x8x8xf32>
    tpu.vector_store %arg24[%c1, %c0_180, %c0_181], %966 {strides = array<i32>} : memref<2x8x8xf32, #tpu.memory_space<vmem>>, vector<1x8x8xf32>,
    return
  }
}

</mosaic_0001>

<bundles_post_ra>
// kernel: model_forward.1
= control target key start
LH: loop header
LB: loop body
LE: loop exit
PB: predicated region body
PF: predicated region fallthrough
CT: control target
= control target key end

     0   :  { %s17639_s0 = inlined_call_operand.vmem [shape: f32[2,16,8], index: 0, kind: input, shape index: {}]   ;;  %s17640_s1 = inlined_call_operand.vmem [shape: f32[8,16], index: 1, kind: input, shape index: {}]   ;;  %s17641_s2 = inlined_call_operand.vmem [shape: f32[8,1], index: 2, kind: input, shape index: {}]   ;;  %s17642_s3 = inlined_call_operand.vmem [shape: f32[24,8], index: 3, kind: input, shape index: {}]   ;;  %s17643_s4 = inlined_call_operand.vmem [shape: f32[1,8], index: 4, kind: input, shape index: {}]   ;;  %s17644_s5 = inlined_call_operand.vmem [shape: f32[24,8], index: 5, kind: input, shape index: {}]   ;;  %s17645_s6 = inlined_call_operand.vmem [shape: f32[1,8], index: 6, kind: input, shape index: {}]   ;;  %s17646_s7 = inlined_call_operand.vmem [shape: f32[24,8], index: 7, kind: input, shape index: {}]   ;;  %s17647_s8 = inlined_call_operand.vmem [shape: f32[1,8], index: 8, kind: input, shape index: {}]   ;;  %s17648_s9 = inlined_call_operand.vmem [shape: f32[8,128], index: 9, kind: input, shape index: {}]   ;;  %s17649_s10 = inlined_call_operand.vmem [shape: f32[8,128], index: 10, kind: input, shape index: {}]   ;;  %s17650_s11 = inlined_call_operand.vmem [shape: f32[8,128], index: 11, kind: input, shape index: {}]   ;;  %s17651_s12 = inlined_call_operand.vmem [shape: f32[3,32,128], index: 12, kind: input, shape index: {}]   ;;  %s17652_s13 = inlined_call_operand.vmem [shape: f32[1,128], index: 13, kind: input, shape index: {}]   ;;  %s17653_s14 = inlined_call_operand.vmem [shape: f32[1,128], index: 14, kind: input, shape index: {}]   ;;  %s17654_s15 = inlined_call_operand.vmem [shape: f32[1,128], index: 15, kind: input, shape index: {}]   ;;  %s17655_s16 = inlined_call_operand.vmem [shape: f32[32,32], index: 16, kind: input, shape index: {}]   ;;  %s17656_s17 = inlined_call_operand.vmem [shape: f32[96,32], index: 17, kind: input, shape index: {}]   ;;  %s17657_s18 = inlined_call_operand.vmem [shape: f32[96,32], index: 18, kind: input, shape index: {}]   ;;  %s17658_s19 = inlined_call_operand.vmem [shape: f32[8,48], index: 19, kind: input, shape index: {}]   ;;  %s17659_s20 = inlined_call_operand.vmem [shape: f32[8,1], index: 20, kind: input, shape index: {}]   ;;  %s17660_s21 = inlined_call_operand.vmem [shape: f32[8,48], index: 21, kind: input, shape index: {}]   ;;  %s17661_s22 = inlined_call_operand.vmem [shape: f32[8,1], index: 22, kind: input, shape index: {}]   ;;  %s17662_s23 = inlined_call_operand.vmem [shape: f32[32,8], index: 23, kind: input, shape index: {}]   ;;  %s17663_s24 = inlined_call_operand.hbm [shape: f32[2,8,8], index: 24, kind: output, shape index: {}]  }
   0x1   :  { %17671 = sst [smem:[#allocation6_spill]] %s17639_s0 }
   0x2   :  { %17672 = sst [smem:[#allocation7_spill]] %s17640_s1 }
   0x3   :  { %17673 = sst [smem:[#allocation8_spill]] %s17641_s2 }
   0x4   :  { %17674 = sst [smem:[#allocation9_spill]] %s17642_s3 }
   0x5   :  { %17675 = sst [smem:[#allocation10_spill]] %s17643_s4 }
   0x6   :  { %17676 = sst [smem:[#allocation11_spill]] %s17644_s5 }
   0x7   :  { %17677 = sst [smem:[#allocation12_spill]] %s17645_s6 }
   0x8   :  { %17678 = sst [smem:[#allocation13_spill]] %s17646_s7 }
   0x9   :  { %17679 = sst [smem:[#allocation14_spill]] %s17647_s8 }
   0xa   :  { %s17680_s27 = sld [smem:[#allocation6_spill]]  ;;  %vm99_vm0 = vcmask 1046528   ;;  %s13333_s2 = smov 8  }
   0xb   :  { %s17681_s7 = sld [smem:[#allocation9_spill]] }
  0x10   :  { %v78_v0 = vld [vmem:[%s17680_s27] sm:$0xff]  ;;  %v79_v1 = vld [vmem:[%s17680_s27 + $0x8] sm:$0xff]  ;;  %v80_v5 = vld [vmem:[%s17680_s27 + $0x10] sm:$0xff] }
  0x11   :  { %110 = vrot.lane.b32.xlu0 %v78_v0, %s13333_s2  ;;  %v100_v2 = vrot.slane %v78_v0, 1  ;;  %v101_v3 = vrot.slane %v79_v1, 1  ;;  %v148_v4 = vld [vmem:[%s17681_s7 + $0x10] sm:$0xff]  ;;  %v147_v6 = vld [vmem:[%s17681_s7 + $0x8] sm:$0xff]  ;;  %v81_v8 = vld [vmem:[%s17680_s27 + $0x18] sm:$0xff] }
  0x12   :  { %11391 = vmatprep.subr.mxu0 %v148_v4  ;;  %v146_v9 = vld [vmem:[%s17681_s7] sm:$0xff] }
  0x13   :  { %v102_v7 = vsel %vm99_vm0, %v100_v2, %v101_v3  ;;  %11392 = vmatpush3.msra.mxu0 %v148_v4 }
  0x14   :  { %29 = vsyncpa [#allocation3], 0  ;;  %s13334_s28 = smov 16   ;;  %11393 = vmatprep.subr.mxu0 %v147_v6  ;;  %v108_v10 = vsel %vm99_vm0, %v101_v3, 0.0  ;;  %v103_v11 = vrot.slane %v80_v5, 1  ;;  %v104_v12 = vrot.slane %v81_v8, 1 }
  0x15   :  { %124 = vrot.lane.b32.xlu1 %v102_v7, %s13334_s28  ;;  %112 = vrot.lane.b32.xlu0 %v79_v1, %s13333_s2  ;;  %v87_v15 = vrot.slane %v78_v0, 7  ;;  %vm86_vm1 = vcmask 1040384   ;;  %vm136_vm2 = vcmask 64512   ;;  %v88_v17 = vrot.slane %v79_v1, 7  ;;  %s17682_s0 = sld [smem:[#allocation11_spill]]  ;;  %v600_v55 = vld [vmem:[%s17648_s9] sm:$0xff] }
  0x16   :  { %11394 = vmatpush3.msra.mxu0 %v147_v6  ;;  %v105_v13 = vsel %vm99_vm0, %v103_v11, %v104_v12  ;;  %v109_v14 = vsel %vm99_vm0, %v104_v12, 0.0  ;;  %vm141_vm3 = vcmask 130048   ;;  %vm156_vm4 = vcmask 195584   ;;  %s17683_s1 = sld [smem:[#allocation10_spill]]  ;;  %s13339_s3 = smov 96  }
  0x17   :  { %11395 = vmatprep.subr.mxu0 %v146_v9  ;;  %v97_v16 = vsel %vm86_vm1, 0.0, %v87_v15  ;;  %v89_v20 = vsel %vm86_vm1, %v87_v15, %v88_v17  ;;  %v90_v22 = vrot.slane %v80_v5, 7  ;;  %v91_v28 = vrot.slane %v81_v8, 7  ;;  %s17684_s29 = sld [smem:[#allocation13_spill]] }
  0x18   :  { %11396 = vmatpush3.msra.mxu0 %v146_v9  ;;  %s17685_s4 = sld [smem:[#allocation12_spill]]  ;;  %vm13336_vm5 = vmmov 0   ;;  %vm1298_vm6 = vcmask 1041409   ;;  %vm919_vm7 = vcmask 261120   ;;  %vm7577_vm8 = vcmask 1041408  }
  0x19   :  { %126 = vrot.lane.b32.xlu1 %v108_v10, %s13334_s28  ;;  %114 = vrot.lane.b32.xlu0 %v80_v5, %s13333_s2  ;;  %v98_v27 = vsel %vm86_vm1, 0.0, %v90_v22  ;;  %v92_v33 = vsel %vm86_vm1, %v90_v22, %v91_v28  ;;  %vm7580_vm9 = vcmask 1042432   ;;  %vm7583_vm10 = vcmask 1043456  }
  0x1a   :  { %vm7586_vm11 = vcmask 1044480   ;;  %vm7589_vm12 = vcmask 1045504   ;;  %vm8030_vm13 = vcmask 523264   ;;  %vm8038_vm14 = vcmask 785408  }
  0x1b   :  { %v320_v39 = vld [vmem:[%s17682_s0 + $0x10] sm:$0xff]  ;;  %v319_v40 = vld [vmem:[%s17682_s0 + $0x8] sm:$0xff]  ;;  %v318_v41 = vld [vmem:[%s17682_s0] sm:$0xff]  ;;  %vm8859_vm15 = vcmask 392192  }
  0x1c   :  { %11403 = vmatprep.subr.mxu1 %v320_v39  ;;  %v10644_v42 = vld [vmem:[%s17683_s1] ss:$0 sm:$0xff] }
  0x1d   :  { %116 = vrot.lane.b32.xlu1 %v81_v8, %s13333_s2  ;;  %128 = vrot.lane.b32.xlu0 %v105_v13, %s13334_s28 }
  0x1e   :  { %11404 = vmatpush3.msra.mxu1 %v320_v39 }
  0x1f   :  { %11405 = vmatprep.subr.mxu1 %v319_v40 }
  0x20   :  { %11406 = vmatpush3.msra.mxu1 %v319_v40  ;;  %v701_v40 = vld [vmem:[%s17649_s10] sm:$0xff]  ;;  %s17691_s10 = sld [smem:[#allocation8_spill]] }
  0x21   :  { %130 = vrot.lane.b32.xlu1 %v109_v14, %s13334_s28  ;;  %11407 = vmatprep.subr.mxu1 %v318_v41 }
  0x22   :  { %11408 = vmatpush3.msra.mxu1 %v318_v41 }
  0x23   :  { %11427 = vmatprep.subr.mxu1 %v600_v55 }
  0x83   :  { %v111_v18 = vpop.permute.xlu0 %110 }
  0x84   :  { %v137_v19 = vsel %vm136_vm2, %v97_v16, %v111_v18 }
  0x87   :  { %v125_v21 = vpop.permute.xlu1 %124  ;;  %v113_v23 = vpop.permute.xlu0 %112 }
  0x88   :  { %v142_v24 = vsel %vm141_vm3, %v137_v19, %v125_v21  ;;  %v138_v25 = vsel %vm136_vm2, %v89_v20, %v113_v23 }
  0x89   :  { %11397 = vmatprep.mubr.msk.f32.mxu0 %vm156_vm4, %v142_v24  ;;  %v491_v24 = vld [vmem:[%s17684_s29 + $0x10] sm:$0xff] }
  0x8a   :  { %11415 = vmatprep.subr.mxu0 %v491_v24 }
  0x8b   :  { %v127_v26 = vpop.permute.xlu1 %126  ;;  %v115_v30 = vpop.permute.xlu0 %114 }
  0x8c   :  { %v143_v29 = vsel %vm141_vm3, %v138_v25, %v127_v26  ;;  %v139_v31 = vsel %vm136_vm2, %v98_v27, %v115_v30  ;;  %v490_v25 = vld [vmem:[%s17684_s29 + $0x8] sm:$0xff]  ;;  %v489_v26 = vld [vmem:[%s17684_s29] sm:$0xff] }
  0x8d   :  { %11398 = vmatmul.mubr.msk.f32.vlgmr.msra.gmra.mxu0 %vm156_vm4, %v143_v29  ;;  %v10649_v27 = vld [vmem:[%s17685_s4] ss:$0 sm:$0xff]  ;;  %s17686_s4 = sld [smem:[#allocation14_spill]] }
  0x8e   :  { %11416 = vmatpush3.msra.mxu0 %v491_v24  ;;  %v13692_v24 = vld [vmem:[%s17651_s12 + $0x40] sm:$0xff] }
  0x8f   :  { %v117_v32 = vpop.permute.xlu1 %116  ;;  %v129_v34 = vpop.permute.xlu0 %128  ;;  %11417 = vmatprep.subr.mxu0 %v490_v25 }
  0x90   :  { %v144_v35 = vsel %vm141_vm3, %v139_v31, %v129_v34  ;;  %v140_v36 = vsel %vm136_vm2, %v92_v33, %v117_v32  ;;  %11418 = vmatpush3.msra.mxu0 %v490_v25  ;;  %v13698_v25 = vld [vmem:[%s17651_s12 + $0x38] sm:$0xff] }
  0x91   :  { %11400 = vmatprep.mubr.msk.f32.mxu0 %vm156_vm4, %v144_v35  ;;  %11419 = vmatprep.subr.mxu0 %v489_v26 }
  0x92   :  { %11420 = vmatpush3.msra.mxu0 %v489_v26  ;;  %v13708_v26 = vld [vmem:[%s17651_s12 + $0x30] sm:$0xff] }
  0x93   :  { %v131_v37 = vpop.permute.xlu1 %130  ;;  %11435 = vmatprep.subr.mxu0 %v701_v40 }
  0x94   :  { %v145_v38 = vsel %vm141_vm3, %v140_v36, %v131_v37 }
  0x95   :  { %11401 = vmatmul.mubr.msk.f32.gmra.mxu0 %vm156_vm4, %v145_v38 }
 0x14d   :  { %v11399_v43 = vpop.f32.mrf.mxu0 }
 0x14e   :  { %v241_v44 = vadd.f32 %v11399_v43, %v10644_v42 }
 0x14f   :  { %v235_v45 = vpop.f32.mrf.mxu0 }
 0x150   :  { %v255_v46 = vmax.f32 %v241_v44, 0.0  ;;  %v236_v47 = vadd.f32 %v10644_v42, %v235_v45 }
 0x152   :  { %v254_v48 = vmax.f32 %v236_v47, 0.0  ;;  %286 = vrot.lane.b32.xlu1 %v255_v46, %s13333_s2  ;;  %v275_v49 = vrot.slane %v255_v46, 1  ;;  %v263_v3 = vrot.slane %v255_v46, 7 }
 0x154   :  { %284 = vrot.lane.b32.xlu0 %v254_v48, %s13333_s2  ;;  %v282_v50 = vsel %vm99_vm0, %v275_v49, 0.0  ;;  %v274_v51 = vrot.slane %v254_v48, 1  ;;  %v262_v1 = vrot.slane %v254_v48, 7 }
 0x155   :  { %v11402_v52 = vpop.f32.mrf.mxu0 }
 0x156   :  { %v251_v53 = vadd.f32 %v11402_v52, %v10644_v42  ;;  %300 = vrot.lane.b32.xlu1 %v282_v50, %s13334_s28  ;;  %v276_v54 = vsel %vm99_vm0, %v274_v51, %v275_v49  ;;  %v272_v5 = vsel %vm86_vm1, 0.0, %v262_v1  ;;  %v264_v6 = vsel %vm86_vm1, %v262_v1, %v263_v3 }
 0x157   :  { %v245_v56 = vpop.f32.mrf.mxu0 }
 0x158   :  { %v257_v57 = vmax.f32 %v251_v53, 0.0  ;;  %v246_v58 = vadd.f32 %v10644_v42, %v245_v56  ;;  %298 = vrot.lane.b32.xlu0 %v276_v54, %s13334_s28  ;;  %v13591_v42 = vld [vmem:[%s17652_s13] ss:$0 sm:$0xff] }
 0x15a   :  { %v256_v59 = vmax.f32 %v246_v58, 0.0  ;;  %290 = vrot.lane.b32.xlu1 %v257_v57, %s13333_s2  ;;  %v278_v60 = vrot.slane %v257_v57, 1  ;;  %v266_v15 = vrot.slane %v257_v57, 7 }
 0x15c   :  { %288 = vrot.lane.b32.xlu0 %v256_v59, %s13333_s2  ;;  %v283_v61 = vsel %vm99_vm0, %v278_v60, 0.0  ;;  %v277_v62 = vrot.slane %v256_v59, 1  ;;  %v265_v13 = vrot.slane %v256_v59, 7 }
 0x15e   :  { %304 = vrot.lane.b32.xlu1 %v283_v61, %s13334_s28  ;;  %v279_v63 = vsel %vm99_vm0, %v277_v62, %v278_v60  ;;  %v273_v16 = vsel %vm86_vm1, 0.0, %v265_v13  ;;  %v267_v18 = vsel %vm86_vm1, %v265_v13, %v266_v15 }
 0x160   :  { %302 = vrot.lane.b32.xlu0 %v279_v63, %s13334_s28 }
 0x1c4   :  { %v287_v0 = vpop.permute.xlu1 %286 }
 0x1c5   :  { %v311_v9 = vsel %vm136_vm2, %v264_v6, %v287_v0  ;;  %v17669_v6 = vmov 0.0  }
 0x1c6   :  { %v285_v2 = vpop.permute.xlu0 %284 }
 0x1c7   :  { %v310_v7 = vsel %vm136_vm2, %v272_v5, %v285_v2 }
 0x1c8   :  { %v301_v4 = vpop.permute.xlu1 %300 }
 0x1c9   :  { %v315_v11 = vsel %vm141_vm3, %v311_v9, %v301_v4 }
 0x1ca   :  { %v299_v8 = vpop.permute.xlu0 %298 }
 0x1cb   :  { %v314_v10 = vsel %vm141_vm3, %v310_v7, %v299_v8 }
 0x1cc   :  { %v291_v12 = vpop.permute.xlu1 %290  ;;  %11409 = vmatprep.mubr.msk.f32.mxu1 %vm156_vm4, %v314_v10 }
 0x1cd   :  { %11410 = vmatmul.mubr.msk.f32.vlgmr.msra.gmra.mxu1 %vm156_vm4, %v315_v11  ;;  %v313_v21 = vsel %vm136_vm2, %v267_v18, %v291_v12  ;;  %v13645_v18 = vld [vmem:[%s17651_s12 + $0x8] sm:$0xff] }
 0x1ce   :  { %v289_v14 = vpop.permute.xlu0 %288  ;;  %11428 = vmatpush3.msra.mxu1 %v600_v55 }
 0x1cf   :  { %v312_v19 = vsel %vm136_vm2, %v273_v16, %v289_v14  ;;  %v13630_v16 = vld [vmem:[%s17651_s12 + $0x18] sm:$0xff] }
 0x1d0   :  { %v305_v17 = vpop.permute.xlu1 %304 }
 0x1d1   :  { %v317_v23 = vsel %vm141_vm3, %v313_v21, %v305_v17  ;;  %v13637_v17 = vld [vmem:[%s17651_s12 + $0x10] sm:$0xff]  ;;  %v802_v21 = vld [vmem:[%s17650_s11] sm:$0xff] }
 0x1d2   :  { %v303_v20 = vpop.permute.xlu0 %302  ;;  %11443 = vmatprep.subr.mxu1 %v802_v21 }
 0x1d3   :  { %v316_v22 = vsel %vm141_vm3, %v312_v19, %v303_v20  ;;  %v13653_v19 = vld [vmem:[%s17651_s12] sm:$0xff]  ;;  %v13667_v20 = vld [vmem:[%s17651_s12 + $0x58] sm:$0xff] }
 0x1d4   :  { %11412 = vmatprep.mubr.msk.f32.mxu1 %vm156_vm4, %v316_v22  ;;  %v13677_v22 = vld [vmem:[%s17651_s12 + $0x50] sm:$0xff] }
 0x1d5   :  { %11413 = vmatmul.mubr.msk.f32.gmra.mxu1 %vm156_vm4, %v317_v23  ;;  %v13684_v23 = vld [vmem:[%s17651_s12 + $0x48] sm:$0xff] }
 0x1d6   :  { %11429 = vmatprep.mubr.msk.f32.mxu1 %vm136_vm2, %v254_v48 }
 0x1d9   :  { %11430 = vmatmul.mubr.msk.f32.vlgmr.msra.gmra.mxu1 %vm136_vm2, %v255_v46 }
 0x1da   :  { %11432 = vmatprep.mubr.msk.f32.mxu1 %vm136_vm2, %v256_v59  ;;  %11444 = vmatpush3.msra.mxu1 %v802_v21 }
 0x1db   :  { %11462 = vmatprep.subr.mxu1 %v17669_v6 }
 0x1dd   :  { %11433 = vmatmul.mubr.msk.f32.gmra.mxu1 %vm136_vm2, %v257_v57 }
 0x28d   :  { %v11411_v28 = vpop.f32.mrf.mxu1 }
 0x28e   :  { %v412_v29 = vadd.f32 %v11411_v28, %v10649_v27  ;;  %v13722_v28 = vld [vmem:[%s17651_s12 + $0x20] sm:$0xff] }
 0x28f   :  { %v406_v30 = vpop.f32.mrf.mxu1 }
 0x290   :  { %v13576_v31 = vmax.f32 %v412_v29, 0.0  ;;  %v407_v32 = vadd.f32 %v10649_v27, %v406_v30  ;;  %v10654_v29 = vld [vmem:[%s17686_s4] ss:$0 sm:$0xff] }
 0x292   :  { %v425_v33 = vmax.f32 %v407_v32, 0.0  ;;  %457 = vrot.lane.b32.xlu1 %v13576_v31, %s13333_s2  ;;  %v446_v34 = vrot.slane %v13576_v31, 1  ;;  %v434_v58 = vrot.slane %v13576_v31, 7 }
 0x294   :  { %455 = vrot.lane.b32.xlu0 %v425_v33, %s13333_s2  ;;  %v453_v35 = vsel %vm99_vm0, %v446_v34, 0.0  ;;  %v445_v36 = vrot.slane %v425_v33, 1  ;;  %v433_v56 = vrot.slane %v425_v33, 7 }
 0x295   :  { %v11414_v37 = vpop.f32.mrf.mxu1 }
 0x296   :  { %v422_v38 = vadd.f32 %v11414_v37, %v10649_v27  ;;  %471 = vrot.lane.b32.xlu1 %v453_v35, %s13334_s28  ;;  %v447_v39 = vsel %vm99_vm0, %v445_v36, %v446_v34  ;;  %v443_v60 = vsel %vm86_vm1, 0.0, %v433_v56  ;;  %v435_v61 = vsel %vm86_vm1, %v433_v56, %v434_v58 }
 0x297   :  { %v416_v41 = vpop.f32.mrf.mxu1 }
 0x298   :  { %v428_v43 = vmax.f32 %v422_v38, 0.0  ;;  %v417_v44 = vadd.f32 %v10649_v27, %v416_v41  ;;  %469 = vrot.lane.b32.xlu0 %v447_v39, %s13334_s28  ;;  %v13715_v27 = vld [vmem:[%s17651_s12 + $0x28] sm:$0xff]  ;;  %v13736_v39 = vld [vmem:[%s17653_s14] ss:$0 sm:$0xff]  ;;  %s13337_s14 = smov 64  }
 0x299   :  { %v11431_v45 = vpop.f32.mrf.mxu1 }
 0x29a   :  { %v427_v46 = vmax.f32 %v417_v44, 0.0  ;;  %v13595_v47 = vadd.f32 %v11431_v45, %v13591_v42  ;;  %461 = vrot.lane.b32.xlu1 %v428_v43, %s13333_s2  ;;  %v449_v48 = vrot.slane %v428_v43, 1  ;;  %v437_v7 = vrot.slane %v428_v43, 7 }
 0x29b   :  { %v13598_v49 = vpop.f32.mrf.mxu1 }
 0x29c   :  { %459 = vrot.lane.b32.xlu0 %v427_v46, %s13333_s2  ;;  %v454_v50 = vsel %vm99_vm0, %v449_v48, 0.0  ;;  %v448_v51 = vrot.slane %v427_v46, 1  ;;  %v436_v4 = vrot.slane %v427_v46, 7 }
 0x29d   :  { %v11434_v52 = vpop.f32.mrf.mxu1 }
 0x29e   :  { %v13603_v53 = vadd.f32 %v11434_v52, %v13591_v42  ;;  %475 = vrot.lane.b32.xlu1 %v454_v50, %s13334_s28  ;;  %v450_v54 = vsel %vm99_vm0, %v448_v51, %v449_v48  ;;  %v444_v8 = vsel %vm86_vm1, 0.0, %v436_v4  ;;  %v438_v10 = vsel %vm86_vm1, %v436_v4, %v437_v7 }
 0x29f   :  { %v692_v51 = vpop.f32.mrf.mxu1 }
 0x2a0   :  { %473 = vrot.lane.b32.xlu0 %v450_v54, %s13334_s28  ;;  %v13757_v54 = vadd.f32 %v13591_v42, %v13598_v49  ;;  %v13761_v56 = vadd.f32 %v13591_v42, %v692_v51  ;;  %s17689_s28 = sld [smem:[#allocation7_spill]] }
 0x304   :  { %v458_v55 = vpop.permute.xlu1 %457 }
 0x305   :  { %v482_v0 = vsel %vm136_vm2, %v435_v61, %v458_v55 }
 0x306   :  { %v456_v57 = vpop.permute.xlu0 %455 }
 0x307   :  { %v481_v62 = vsel %vm136_vm2, %v443_v60, %v456_v57 }
 0x308   :  { %v472_v59 = vpop.permute.xlu1 %471 }
 0x309   :  { %v486_v2 = vsel %vm141_vm3, %v482_v0, %v472_v59 }
 0x30a   :  { %v470_v63 = vpop.permute.xlu0 %469 }
 0x30b   :  { %v485_v1 = vsel %vm141_vm3, %v481_v62, %v470_v63 }
 0x30c   :  { %v462_v3 = vpop.permute.xlu1 %461  ;;  %11421 = vmatprep.mubr.msk.f32.mxu0 %vm156_vm4, %v485_v1  ;;  %v13782_v1 = vld [vmem:[%s17654_s15] ss:$0 sm:$0xff]  ;;  %s13338_s15 = smov 32  }
 0x30d   :  { %11422 = vmatmul.mubr.msk.f32.vlgmr.msra.gmra.mxu0 %vm156_vm4, %v486_v2  ;;  %v484_v13 = vsel %vm136_vm2, %v438_v10, %v462_v3 }
 0x30e   :  { %v460_v5 = vpop.permute.xlu0 %459  ;;  %11436 = vmatpush3.msra.mxu0 %v701_v40 }
 0x30f   :  { %11451 = vmatprep.subr.mxu0 %v17669_v6  ;;  %v483_v11 = vsel %vm136_vm2, %v444_v8, %v460_v5 }
 0x310   :  { %v476_v9 = vpop.permute.xlu1 %475 }
 0x311   :  { %v488_v15 = vsel %vm141_vm3, %v484_v13, %v476_v9 }
 0x312   :  { %v474_v12 = vpop.permute.xlu0 %473 }
 0x313   :  { %v487_v14 = vsel %vm141_vm3, %v483_v11, %v474_v12 }
 0x314   :  { %11424 = vmatprep.mubr.msk.f32.mxu0 %vm156_vm4, %v487_v14 }
 0x315   :  { %11425 = vmatmul.mubr.msk.f32.gmra.mxu0 %vm156_vm4, %v488_v15 }
 0x316   :  { %11437 = vmatprep.mubr.msk.f32.mxu0 %vm136_vm2, %v425_v33 }
 0x319   :  { %11438 = vmatmul.mubr.msk.f32.vlgmr.msra.gmra.mxu0 %vm136_vm2, %v13576_v31 }
 0x31a   :  { %11440 = vmatprep.mubr.msk.f32.mxu0 %vm136_vm2, %v427_v46  ;;  %11452 = vmatpush3.msra.mxu0 %v13630_v16 }
 0x31b   :  { %11453 = vmatprep.subr.mxu0 %v17669_v6 }
 0x31c   :  { %11454 = vmatpush3.msra.mxu0 %v13637_v17 }
 0x31d   :  { %11441 = vmatmul.mubr.msk.f32.gmra.mxu0 %vm136_vm2, %v428_v43  ;;  %11455 = vmatprep.subr.mxu0 %v17669_v6 }
 0x31e   :  { %11456 = vmatpush3.msra.mxu0 %v13645_v18  ;;  %11459 = vmatprep.mubr.msk.f32.mxu0 %vm13336_vm5, %v17669_v6 }
 0x31f   :  { %11457 = vmatprep.subr.mxu0 %v17669_v6 }
 0x320   :  { %11458 = vmatpush3.msra.mxu0 %v13653_v19 }
 0x321   :  { %11460 = vmatmul.mubr.f32.vlgmr.msra.gmra.mxu0 %v17669_v6  ;;  %11473 = vmatprep.subr.mxu0 %v17669_v6 }
 0x322   :  { %11481 = vmatprep.mubr.msk.f32.mxu0 %vm13336_vm5, %v17669_v6  ;;  %11474 = vmatpush3.msra.mxu0 %v13667_v20 }
 0x323   :  { %11475 = vmatprep.subr.mxu0 %v17669_v6 }
 0x324   :  { %11476 = vmatpush3.msra.mxu0 %v13677_v22 }
 0x325   :  { %11477 = vmatprep.subr.mxu0 %v17669_v6 }
 0x326   :  { %11478 = vmatpush3.msra.mxu0 %v13684_v23 }
 0x327   :  { %11479 = vmatprep.subr.mxu0 %v17669_v6 }
 0x328   :  { %11480 = vmatpush3.msra.mxu0 %v13692_v24 }
 0x329   :  { %11482 = vmatmul.mubr.f32.vlgmr.msra.gmra.mxu0 %v17669_v6  ;;  %11495 = vmatprep.subr.mxu0 %v17669_v6 }
 0x32a   :  { %11496 = vmatpush3.msra.mxu0 %v13698_v25  ;;  %11503 = vmatprep.mubr.msk.f32.mxu0 %vm13336_vm5, %v17669_v6 }
 0x32b   :  { %11497 = vmatprep.subr.mxu0 %v17669_v6 }
 0x32c   :  { %11498 = vmatpush3.msra.mxu0 %v13708_v26 }
 0x32d   :  { %11499 = vmatprep.subr.mxu0 %v17669_v6 }
 0x32e   :  { %11500 = vmatpush3.msra.mxu0 %v13715_v27 }
 0x32f   :  { %11501 = vmatprep.subr.mxu0 %v17669_v6 }
 0x330   :  { %11502 = vmatpush3.msra.mxu0 %v13722_v28 }
 0x331   :  { %11517 = vmatprep.subr.mxu0 %v17669_v6 }
 0x3cd   :  { %v11423_v30 = vpop.f32.mrf.mxu0 }
 0x3ce   :  { %v583_v31 = vadd.f32 %v11423_v30, %v10654_v29 }
 0x3cf   :  { %v577_v32 = vpop.f32.mrf.mxu0 }
 0x3d0   :  { %v578_v33 = vadd.f32 %v10654_v29, %v577_v32  ;;  %v597_v35 = vmax.f32 %v583_v31, 0.0 }
 0x3d2   :  { %v596_v34 = vmax.f32 %v578_v33, 0.0 }
 0x3d4   :  { %11445 = vmatprep.mubr.msk.f32.mxu1 %vm136_vm2, %v596_v34 }
 0x3d5   :  { %v11426_v36 = vpop.f32.mrf.mxu0  ;;  %11446 = vmatmul.mubr.msk.f32.vlgmr.msra.gmra.mxu1 %vm136_vm2, %v597_v35 }
 0x3d6   :  { %11463 = vmatpush3.msra.mxu1 %v13698_v25  ;;  %v593_v37 = vadd.f32 %v11426_v36, %v10654_v29 }
 0x3d7   :  { %v587_v38 = vpop.f32.mrf.mxu0  ;;  %11464 = vmatprep.subr.mxu1 %v17669_v6 }
 0x3d8   :  { %v588_v40 = vadd.f32 %v10654_v29, %v587_v38  ;;  %11465 = vmatpush3.msra.mxu1 %v13708_v26  ;;  %v599_v45 = vmax.f32 %v593_v37, 0.0 }
 0x3d9   :  { %v11439_v41 = vpop.f32.mrf.mxu0  ;;  %11466 = vmatprep.subr.mxu1 %v17669_v6 }
 0x3da   :  { %v598_v43 = vmax.f32 %v588_v40, 0.0  ;;  %v13742_v44 = vadd.f32 %v11439_v41, %v13736_v39  ;;  %11467 = vmatpush3.msra.mxu1 %v13715_v27 }
 0x3db   :  { %v783_v46 = vpop.f32.mrf.mxu0  ;;  %11468 = vmatprep.subr.mxu1 %v17669_v6 }
 0x3dc   :  { %11448 = vmatprep.mubr.msk.f32.mxu1 %vm136_vm2, %v598_v43  ;;  %11469 = vmatpush3.msra.mxu1 %v13722_v28  ;;  %v13796_v11 = vadd.f32 %v13736_v39, %v783_v46 }
 0x3dd   :  { %v11442_v48 = vpop.f32.mrf.mxu0  ;;  %11449 = vmatmul.mubr.msk.f32.gmra.mxu1 %vm136_vm2, %v599_v45  ;;  %11484 = vmatprep.subr.mxu1 %v17669_v6 }
 0x3de   :  { %v13751_v50 = vadd.f32 %v11442_v48, %v13736_v39  ;;  %11470 = vmatprep.mubr.msk.f32.mxu1 %vm13336_vm5, %v17669_v6 }
 0x3df   :  { %v793_v52 = vpop.f32.mrf.mxu0 }
 0x3e0   :  { %v13800_v21 = vadd.f32 %v13736_v39, %v793_v52 }
 0x3e1   :  { %v989_v55 = vpop.f32.mrf.mxu0  ;;  %11471 = vmatmul.mubr.f32.vlgmr.msra.gmra.mxu1 %v17669_v6 }
 0x3e2   :  { %v1136_v57 = vrot.slane %v989_v55, 1  ;;  %v1145_v58 = vadd.f32 %v989_v55, %v13757_v54  ;;  %11485 = vmatpush3.msra.mxu1 %v13630_v16  ;;  %11492 = vmatprep.mubr.msk.f32.mxu1 %vm13336_vm5, %v17669_v6 }
 0x3e3   :  { %v11461_v59 = vpop.f32.mrf.mxu0  ;;  %11486 = vmatprep.subr.mxu1 %v17669_v6 }
 0x3e4   :  { %v1146_v49 = vadd.f32 %v1136_v57, %v13761_v56  ;;  %12455 = vtanh.f32 %v1145_v58  ;;  %11487 = vmatpush3.msra.mxu1 %v13637_v17  ;;  %v10674_v63 = vmul.f32 -1.442695, %v1145_v58 }
 0x3e5   :  { %11488 = vmatprep.subr.mxu1 %v17669_v6 }
 0x3e6   :  { %11489 = vmatpush3.msra.mxu1 %v13645_v18  ;;  %12457 = vtanh.f32 %v1146_v49  ;;  %v10675_v0 = vmul.f32 -1.442695, %v1146_v49 }
 0x3e7   :  { %11490 = vmatprep.subr.mxu1 %v17669_v6  ;;  %12459 = vpow2.f32 %v10674_v63 }
 0x3e8   :  { %11491 = vmatpush3.msra.mxu1 %v13653_v19  ;;  %12461 = vpow2.f32 %v10675_v0 }
 0x3e9   :  { %11506 = vmatprep.subr.mxu1 %v17669_v6  ;;  %v13777_v61 = vpop.f32.mrf.mxu0 }
 0x3eb   :  { %v11483_v62 = vpop.f32.mrf.mxu0 }
 0x3f1   :  { %v12456_v42 = vpop.eup %12455 }
 0x3f2   :  { %1205 = vrot.lane.b32.xlu1 %v12456_v42, %s13337_s14 }
 0x3f3   :  { %v12458_v60 = vpop.eup %12457 }
 0x3f4   :  { %1207 = vrot.lane.b32.xlu0 %v12458_v60, %s13337_s14  ;;  %v12460_v9 = vpop.eup %12459 }
 0x3f5   :  { %v1169_v13 = vadd.f32 1.0, %v12460_v9  ;;  %v12462_v30 = vpop.eup %12461 }
 0x3f6   :  { %v1170_v32 = vadd.f32 1.0, %v12462_v30  ;;  %v1138_v30 = vrot.slane %v13777_v61, 1 }
 0x464   :  { %v1206_v34 = vpop.permute.xlu1 %1205 }
 0x466   :  { %v1208_v38 = vpop.permute.xlu0 %1207 }
 0x495   :  { %v11447_v2 = vpop.f32.mrf.mxu1 }
 0x496   :  { %v13785_v3 = vadd.f32 %v11447_v2, %v13782_v1 }
 0x497   :  { %v888_v4 = vpop.f32.mrf.mxu1 }
 0x498   :  { %v13788_v5 = vadd.f32 %v13782_v1, %v888_v4 }
 0x49d   :  { %v11450_v7 = vpop.f32.mrf.mxu1 }
 0x49e   :  { %v13791_v8 = vadd.f32 %v11450_v7, %v13782_v1 }
 0x49f   :  { %v13793_v10 = vpop.f32.mrf.mxu1 }
 0x4a1   :  { %v1059_v12 = vpop.f32.mrf.mxu1 }
 0x4a2   :  { %v1137_v14 = vrot.slane %v1059_v12, 1  ;;  %v1147_v15 = vadd.f32 %v1059_v12, %v13796_v11 }
 0x4a3   :  { %v11472_v29 = vpop.f32.mrf.mxu1 }
 0x4a4   :  { %12463 = vtanh.f32 %v1147_v15  ;;  %v1148_v31 = vadd.f32 %v1137_v14, %v13800_v21  ;;  %v10676_v41 = vmul.f32 -1.442695, %v1147_v15 }
 0x4a5   :  { %12465 = vrcp.f32 %v1169_v13 }
 0x4a6   :  { %12467 = vtanh.f32 %v1148_v31  ;;  %v10677_v43 = vmul.f32 -1.442695, %v1148_v31  ;;  %v13826_v31 = vadd.f32 %v13782_v1, %v13793_v10 }
 0x4a7   :  { %12469 = vrcp.f32 %v1170_v32 }
 0x4a8   :  { %12471 = vpow2.f32 %v10676_v41  ;;  %v1150_v32 = vadd.f32 %v1138_v30, %v13826_v31 }
 0x4a9   :  { %12473 = vpow2.f32 %v10677_v43 }
 0x4aa   :  { %v10679_v43 = vmul.f32 -1.442695, %v1150_v32 }
 0x4b1   :  { %v12464_v33 = vpop.eup %12463 }
 0x4b2   :  { %1209 = vrot.lane.b32.xlu1 %v12464_v33, %s13337_s14  ;;  %v12466_v35 = vpop.eup %12465 }
 0x4b3   :  { %v1223_v36 = vmul.f32 %v12466_v35, %v1206_v34  ;;  %v12468_v37 = vpop.eup %12467  ;;  %v1193_v58 = vmul.f32 0.0, %v12466_v35 }
 0x4b4   :  { %1211 = vrot.lane.b32.xlu0 %v12468_v37, %s13337_s14  ;;  %v12470_v39 = vpop.eup %12469 }
 0x4b5   :  { %v1224_v40 = vmul.f32 %v12470_v39, %v1208_v38  ;;  %v12472_v45 = vpop.eup %12471  ;;  %v1194_v63 = vmul.f32 0.0, %v12470_v39 }
 0x4b6   :  { %1235 = vrot.lane.b32.xlu1 %v1223_v36, %s13338_s15  ;;  %v1171_v46 = vadd.f32 1.0, %v12472_v45  ;;  %v12474_v48 = vpop.eup %12473 }
 0x4b7   :  { %v1172_v51 = vadd.f32 1.0, %v12474_v48 }
 0x4b8   :  { %1237 = vrot.lane.b32.xlu0 %v1224_v40, %s13338_s15  ;;  %12475 = vrcp.f32 %v1171_v46 }
 0x4b9   :  { %12477 = vrcp.f32 %v1172_v51 }
 0x4c5   :  { %v12476_v52 = vpop.eup %12475 }
 0x4c6   :  { %v12478_v49 = vpop.eup %12477  ;;  %v1195_v9 = vmul.f32 0.0, %v12476_v52 }
 0x4c7   :  { %v1196_v14 = vmul.f32 0.0, %v12478_v49 }
 0x524   :  { %v1210_v55 = vpop.permute.xlu1 %1209 }
 0x525   :  { %v1225_v57 = vmul.f32 %v12476_v52, %v1210_v55 }
 0x526   :  { %v1212_v42 = vpop.permute.xlu0 %1211 }
 0x527   :  { %1239 = vrot.lane.b32.xlu1 %v1225_v57, %s13338_s15  ;;  %v1226_v62 = vmul.f32 %v12478_v49, %v1212_v42 }
 0x528   :  { %v1236_v59 = vpop.permute.xlu1 %1235 }
 0x529   :  { %v13808_v60 = vadd.f32 %v1236_v59, %v1193_v58  ;;  %1241 = vrot.lane.b32.xlu0 %v1226_v62, %s13338_s15 }
 0x52a   :  { %v1238_v0 = vpop.permute.xlu0 %1237 }
 0x52b   :  { %12479 = vtanh.f32 %v13808_v60  ;;  %v13812_v2 = vadd.f32 %v1238_v0, %v1194_v63 }
 0x52d   :  { %12481 = vtanh.f32 %v13812_v2 }
 0x538   :  { %v12480_v4 = vpop.eup %12479 }
 0x539   :  { %1271 = vrot.lane.b32.xlu1 %v12480_v4, %s13337_s14 }
 0x53a   :  { %v12482_v7 = vpop.eup %12481 }
 0x53b   :  { %1273 = vrot.lane.b32.xlu0 %v12482_v7, %s13337_s14 }
 0x599   :  { %v1240_v12 = vpop.permute.xlu1 %1239 }
 0x59a   :  { %v13817_v13 = vadd.f32 %v1240_v12, %v1195_v9 }
 0x59b   :  { %v1242_v15 = vpop.permute.xlu0 %1241 }
 0x59c   :  { %12483 = vtanh.f32 %v13817_v13  ;;  %v13820_v29 = vadd.f32 %v1242_v15, %v1196_v14 }
 0x59e   :  { %12485 = vtanh.f32 %v13820_v29 }
 0x59f   :  { %12487 = vtanh.f32 %v1150_v32 }
 0x5a0   :  { %12489 = vpow2.f32 %v10679_v43 }
 0x5a9   :  { %v12484_v33 = vpop.eup %12483 }
 0x5aa   :  { %1275 = vrot.lane.b32.xlu1 %v12484_v33, %s13337_s14 }
 0x5ab   :  { %v12486_v34 = vpop.eup %12485  ;;  %v1272_v36 = vpop.permute.xlu1 %1271 }
 0x5ac   :  { %1277 = vrot.lane.b32.xlu0 %v12486_v34, %s13337_s14  ;;  %v13833_v40 = vmul.f32 %v12466_v35, %v1272_v36  ;;  %v12488_v10 = vpop.eup %12487 }
 0x5ad   :  { %v1274_v37 = vpop.permute.xlu0 %1273  ;;  %v12490_v45 = vpop.eup %12489 }
 0x5ae   :  { %v13831_v38 = vmul.f32 %v12470_v39, %v1274_v37  ;;  %v1149_v39 = vadd.f32 %v13777_v61, %v13788_v5  ;;  %v1174_v46 = vadd.f32 1.0, %v12490_v45 }
 0x5b0   :  { %v1297_v41 = vrot.slane %v13831_v38, 7  ;;  %12491 = vtanh.f32 %v1149_v39  ;;  %v10678_v62 = vmul.f32 -1.442695, %v1149_v39 }
 0x5b1   :  { %12493 = vrcp.f32 %v1174_v46 }
 0x5b2   :  { %v1299_v1 = vsel %vm1298_vm6, %v1297_v41, %v13833_v40  ;;  %12495 = vpow2.f32 %v10678_v62 }
 0x5b3   :  { %1300 = vrot.lane.b32.xlu0 %v1299_v1, %s13338_s15 }
 0x5b7   :  { %1215 = vrot.lane.b32.xlu0 %v12488_v10, %s13337_s14 }
 0x5bd   :  { %v12492_v61 = vpop.eup %12491 }
 0x61c   :  { %v1276_v35 = vpop.permute.xlu1 %1275 }
 0x61d   :  { %v13844_v55 = vmul.f32 %v12476_v52, %v1276_v35  ;;  %v13856_v52 = vpop.eup %12493 }
 0x61e   :  { %v1278_v48 = vpop.permute.xlu0 %1277  ;;  %v12496_v63 = vpop.eup %12495  ;;  %v1198_v14 = vmul.f32 0.0, %v13856_v52 }
 0x61f   :  { %v13842_v51 = vmul.f32 %v12478_v49, %v1278_v48  ;;  %v1173_v0 = vadd.f32 1.0, %v12496_v63 }
 0x621   :  { %v1376_v57 = vrot.slane %v13842_v51, 7  ;;  %12497 = vrcp.f32 %v1173_v0 }
 0x623   :  { %v1377_v58 = vsel %vm1298_vm6, %v1376_v57, %v13844_v55 }
 0x624   :  { %1378 = vrot.lane.b32.xlu1 %v1377_v58, %s13338_s15 }
 0x625   :  { %v1301_v59 = vpop.permute.xlu0 %1300 }
 0x626   :  { %11493 = vmatmul.mubr.msk.f32.vlgmr.msra.gmra.mxu1 %vm919_vm7, %v1301_v59 }
 0x627   :  { %11507 = vmatpush3.msra.mxu1 %v13667_v20  ;;  %11514 = vmatprep.mubr.msk.f32.mxu1 %vm13336_vm5, %v17669_v6 }
 0x628   :  { %1213 = vrot.lane.b32.xlu1 %v12492_v61, %s13337_s14  ;;  %11508 = vmatprep.subr.mxu1 %v17669_v6 }
 0x629   :  { %v1216_v49 = vpop.permute.xlu0 %1215  ;;  %11509 = vmatpush3.msra.mxu1 %v13677_v22 }
 0x62a   :  { %v1228_v42 = vmul.f32 %v13856_v52, %v1216_v49  ;;  %11510 = vmatprep.subr.mxu1 %v17669_v6 }
 0x62b   :  { %11511 = vmatpush3.msra.mxu1 %v13684_v23 }
 0x62c   :  { %1245 = vrot.lane.b32.xlu0 %v1228_v42, %s13338_s15  ;;  %11512 = vmatprep.subr.mxu1 %v17669_v6 }
 0x62d   :  { %11513 = vmatpush3.msra.mxu1 %v13692_v24 }
 0x62e   :  { %11528 = vmatprep.subr.mxu1 %v17669_v6  ;;  %v12498_v7 = vpop.eup %12497 }
 0x62f   :  { %v1197_v1 = vmul.f32 0.0, %v12498_v7 }
 0x696   :  { %v1379_v4 = vpop.permute.xlu1 %1378 }
 0x697   :  { %11504 = vmatmul.mubr.msk.f32.vlgmr.msra.gmra.mxu0 %vm919_vm7, %v1379_v4 }
 0x698   :  { %11518 = vmatpush3.msra.mxu0 %v13630_v16  ;;  %11525 = vmatprep.mubr.msk.f32.mxu0 %vm13336_vm5, %v17669_v6 }
 0x699   :  { %11519 = vmatprep.subr.mxu0 %v17669_v6 }
 0x69a   :  { %v1214_v9 = vpop.permute.xlu1 %1213  ;;  %11520 = vmatpush3.msra.mxu0 %v13637_v17 }
 0x69b   :  { %v1227_v12 = vmul.f32 %v12498_v7, %v1214_v9  ;;  %11521 = vmatprep.subr.mxu0 %v17669_v6 }
 0x69c   :  { %11522 = vmatpush3.msra.mxu0 %v13645_v18 }
 0x69d   :  { %1243 = vrot.lane.b32.xlu1 %v1227_v12, %s13338_s15  ;;  %11523 = vmatprep.subr.mxu0 %v17669_v6 }
 0x69e   :  { %v1246_v15 = vpop.permute.xlu0 %1245  ;;  %11524 = vmatpush3.msra.mxu0 %v13653_v19 }
 0x69f   :  { %v13878_v30 = vadd.f32 %v1246_v15, %v1198_v14  ;;  %11539 = vmatprep.subr.mxu0 %v17669_v6 }
 0x6a1   :  { %12499 = vtanh.f32 %v13878_v30 }
 0x6ae   :  { %v12500_v32 = vpop.eup %12499 }
 0x6af   :  { %1281 = vrot.lane.b32.xlu0 %v12500_v32, %s13337_s14 }
 0x6e6   :  { %v1370_v33 = vpop.f32.mrf.mxu1 }
 0x6e7   :  { %v1533_v34 = vrot.slane %v1370_v33, 7  ;;  %v1543_v45 = vadd.f32 %v1370_v33, %v13761_v56 }
 0x6e8   :  { %v11494_v36 = vpop.f32.mrf.mxu1 }
 0x6e9   :  { %v1542_v37 = vadd.f32 %v1533_v34, %v13757_v54  ;;  %v10684_v14 = vmul.f32 -1.442695, %v1543_v45 }
 0x6eb   :  { %12501 = vtanh.f32 %v1542_v37  ;;  %v10683_v35 = vmul.f32 -1.442695, %v1542_v37 }
 0x6f8   :  { %v12502_v41 = vpop.eup %12501 }
 0x6f9   :  { %1620 = vrot.lane.b32.xlu0 %v12502_v41, %s13337_s14 }
 0x70f   :  { %v1244_v10 = vpop.permute.xlu1 %1243 }
 0x710   :  { %v13885_v43 = vadd.f32 %v1244_v10, %v1197_v1 }
 0x712   :  { %12503 = vtanh.f32 %v13885_v43 }
 0x713   :  { %12505 = vtanh.f32 %v1543_v45 }
 0x714   :  { %12507 = vpow2.f32 %v10683_v35 }
 0x71f   :  { %v12504_v39 = vpop.eup %12503 }
 0x720   :  { %1279 = vrot.lane.b32.xlu1 %v12504_v39, %s13337_s14  ;;  %v12506_v46 = vpop.eup %12505 }
 0x721   :  { %v12508_v57 = vpop.eup %12507  ;;  %v1282_v63 = vpop.permute.xlu0 %1281 }
 0x722   :  { %v1566_v42 = vadd.f32 1.0, %v12508_v57  ;;  %v13900_v33 = vmul.f32 %v13856_v52, %v1282_v63 }
 0x724   :  { %1622 = vrot.lane.b32.xlu1 %v12506_v46, %s13337_s14  ;;  %v1454_v36 = vrot.slane %v13900_v33, 7 }
 0x757   :  { %v1448_v48 = vpop.f32.mrf.mxu0 }
 0x758   :  { %v1534_v58 = vrot.slane %v1448_v48, 7  ;;  %v1545_v59 = vadd.f32 %v1448_v48, %v13800_v21 }
 0x759   :  { %v11505_v61 = vpop.f32.mrf.mxu0 }
 0x75a   :  { %v1544_v49 = vadd.f32 %v1534_v58, %v13796_v11  ;;  %12509 = vtanh.f32 %v1545_v59  ;;  %v10686_v39 = vmul.f32 -1.442695, %v1545_v59  ;;  %v1596_v59 = vrot.slane %v13808_v60, 7 }
 0x75c   :  { %12511 = vtanh.f32 %v1544_v49  ;;  %v10685_v52 = vmul.f32 -1.442695, %v1544_v49 }
 0x75d   :  { %12513 = vrcp.f32 %v1566_v42 }
 0x75e   :  { %12515 = vpow2.f32 %v10684_v14 }
 0x767   :  { %v12510_v62 = vpop.eup %12509 }
 0x768   :  { %1626 = vrot.lane.b32.xlu1 %v12510_v62, %s13337_s14 }
 0x769   :  { %v12512_v0 = vpop.eup %12511 }
 0x76a   :  { %1624 = vrot.lane.b32.xlu0 %v12512_v0, %s13337_s14  ;;  %v13895_v4 = vpop.eup %12513 }
 0x76b   :  { %v1621_v9 = vpop.permute.xlu0 %1620  ;;  %v12516_v15 = vpop.eup %12515  ;;  %v1608_v63 = vmul.f32 %v13895_v4, %v1596_v59 }
 0x76c   :  { %v1638_v12 = vmul.f32 %v13895_v4, %v1621_v9  ;;  %v1567_v32 = vadd.f32 1.0, %v12516_v15  ;;  %v1597_v15 = vrot.slane %v13812_v2, 7 }
 0x76e   :  { %1650 = vrot.lane.b32.xlu1 %v1638_v12, %s13338_s15  ;;  %12517 = vrcp.f32 %v1567_v32 }
 0x76f   :  { %12519 = vpow2.f32 %v10686_v39 }
 0x770   :  { %12521 = vpow2.f32 %v10685_v52 }
 0x77b   :  { %v13907_v1 = vpop.eup %12517 }
 0x77c   :  { %v12520_v46 = vpop.eup %12519  ;;  %v1609_v60 = vmul.f32 %v13907_v1, %v1597_v15 }
 0x77d   :  { %v12522_v35 = vpop.eup %12521 }
 0x77e   :  { %v1568_v48 = vadd.f32 1.0, %v12522_v35 }
 0x792   :  { %v1280_v34 = vpop.permute.xlu1 %1279 }
 0x793   :  { %v13903_v37 = vmul.f32 %v12498_v7, %v1280_v34  ;;  %v1569_v7 = vadd.f32 1.0, %v12520_v46 }
 0x795   :  { %v1455_v41 = vsel %vm1298_vm6, %v1454_v36, %v13903_v37  ;;  %12523 = vrcp.f32 %v1569_v7  ;;  %v1599_v36 = vrot.slane %v13820_v29, 7 }
 0x796   :  { %1456 = vrot.lane.b32.xlu0 %v1455_v41, %s13338_s15  ;;  %v1623_v10 = vpop.permute.xlu1 %1622  ;;  %12525 = vrcp.f32 %v1568_v48 }
 0x797   :  { %v1639_v45 = vmul.f32 %v13907_v1, %v1623_v10  ;;  %v1598_v10 = vrot.slane %v13817_v13, 7 }
 0x79a   :  { %1652 = vrot.lane.b32.xlu0 %v1639_v45, %s13338_s15 }
 0x7a2   :  { %v13912_v57 = vpop.eup %12523 }
 0x7a3   :  { %v12526_v42 = vpop.eup %12525  ;;  %v1611_v41 = vmul.f32 %v13912_v57, %v1599_v36 }
 0x7a4   :  { %v1610_v52 = vmul.f32 %v12526_v42, %v1598_v10 }
 0x7da   :  { %v1627_v58 = vpop.permute.xlu1 %1626 }
 0x7db   :  { %v1641_v61 = vmul.f32 %v13912_v57, %v1627_v58 }
 0x7dc   :  { %v1625_v62 = vpop.permute.xlu0 %1624 }
 0x7dd   :  { %1656 = vrot.lane.b32.xlu0 %v1641_v61, %s13338_s15  ;;  %v1640_v49 = vmul.f32 %v12526_v42, %v1625_v62 }
 0x7df   :  { %1654 = vrot.lane.b32.xlu1 %v1640_v49, %s13338_s15 }
 0x7e0   :  { %v1651_v0 = vpop.permute.xlu1 %1650 }
 0x7e1   :  { %v13919_v9 = vadd.f32 %v1651_v0, %v1608_v63 }
 0x7e3   :  { %12527 = vtanh.f32 %v13919_v9 }
 0x7f0   :  { %v12528_v12 = vpop.eup %12527 }
 0x7f1   :  { %1686 = vrot.lane.b32.xlu1 %v12528_v12, %s13337_s14 }
 0x808   :  { %v1457_v14 = vpop.permute.xlu0 %1456 }
 0x809   :  { %11515 = vmatmul.mubr.msk.f32.vlgmr.msra.gmra.mxu1 %vm919_vm7, %v1457_v14 }
 0x80a   :  { %11529 = vmatpush3.msra.mxu1 %v13698_v25  ;;  %11536 = vmatprep.mubr.msk.f32.mxu1 %vm13336_vm5, %v17669_v6 }
 0x80b   :  { %11530 = vmatprep.subr.mxu1 %v17669_v6 }
 0x80c   :  { %v1653_v32 = vpop.permute.xlu0 %1652  ;;  %11531 = vmatpush3.msra.mxu1 %v13708_v26 }
 0x80d   :  { %v13931_v34 = vadd.f32 %v1653_v32, %v1609_v60  ;;  %11532 = vmatprep.subr.mxu1 %v17669_v6 }
 0x80e   :  { %11533 = vmatpush3.msra.mxu1 %v13715_v27 }
 0x80f   :  { %12529 = vtanh.f32 %v13931_v34  ;;  %11534 = vmatprep.subr.mxu1 %v17669_v6 }
 0x810   :  { %11535 = vmatpush3.msra.mxu1 %v13722_v28 }
 0x811   :  { %11550 = vmatprep.subr.mxu1 %v17669_v6 }
 0x81c   :  { %v12530_v2 = vpop.eup %12529 }
 0x81d   :  { %1688 = vrot.lane.b32.xlu0 %v12530_v2, %s13337_s14 }
 0x84f   :  { %v1657_v45 = vpop.permute.xlu0 %1656 }
 0x850   :  { %v13943_v39 = vadd.f32 %v1657_v45, %v1611_v41 }
 0x851   :  { %v1655_v46 = vpop.permute.xlu1 %1654 }
 0x852   :  { %12531 = vtanh.f32 %v13943_v39  ;;  %v13946_v35 = vadd.f32 %v1655_v46, %v1610_v52 }
 0x854   :  { %12533 = vtanh.f32 %v13946_v35 }
 0x85f   :  { %v12532_v7 = vpop.eup %12531 }
 0x860   :  { %1692 = vrot.lane.b32.xlu0 %v12532_v7, %s13337_s14 }
 0x861   :  { %v12534_v48 = vpop.eup %12533 }
 0x862   :  { %1690 = vrot.lane.b32.xlu1 %v12534_v48, %s13337_s14 }
 0x863   :  { %v1687_v29 = vpop.permute.xlu1 %1686 }
 0x864   :  { %v13952_v13 = vmul.f32 %v13895_v4, %v1687_v29 }
 0x866   :  { %v1712_v61 = vrot.slane %v13952_v13, 1 }
 0x88f   :  { %v1689_v58 = vpop.permute.xlu0 %1688 }
 0x890   :  { %v13956_v62 = vmul.f32 %v13907_v1, %v1689_v58 }
 0x892   :  { %v1713_v59 = vsel %vm1298_vm6, %v13956_v62, %v1712_v61 }
 0x893   :  { %1714 = vrot.lane.b32.xlu1 %v1713_v59, %s13338_s15 }
 0x8c9   :  { %v1526_v49 = vpop.f32.mrf.mxu1 }
 0x8ca   :  { %v1535_v63 = vrot.slane %v1526_v49, 7  ;;  %v1547_v14 = vadd.f32 %v1526_v49, %v13826_v31 }
 0x8cb   :  { %v11516_v0 = vpop.f32.mrf.mxu1 }
 0x8cc   :  { %v1546_v12 = vadd.f32 %v1535_v63, %v13788_v5 }
 0x8ce   :  { %12535 = vtanh.f32 %v1546_v12 }
 0x8cf   :  { %12537 = vtanh.f32 %v1547_v14 }
 0x8d2   :  { %v1693_v4 = vpop.permute.xlu0 %1692 }
 0x8d3   :  { %v13966_v1 = vmul.f32 %v13912_v57, %v1693_v4  ;;  %v10687_v57 = vmul.f32 -1.442695, %v1546_v12 }
 0x8d4   :  { %v1691_v15 = vpop.permute.xlu1 %1690 }
 0x8d5   :  { %v13963_v60 = vmul.f32 %v12526_v42, %v1691_v15  ;;  %v10688_v42 = vmul.f32 -1.442695, %v1547_v14  ;;  %12539 = vpow2.f32 %v10687_v57 }
 0x8d7   :  { %v1790_v32 = vrot.slane %v13963_v60, 1  ;;  %12541 = vpow2.f32 %v10688_v42 }
 0x8d9   :  { %v1791_v2 = vsel %vm1298_vm6, %v13966_v1, %v1790_v32 }
 0x8da   :  { %1792 = vrot.lane.b32.xlu0 %v1791_v2, %s13338_s15 }
 0x8db   :  { %v12536_v36 = vpop.eup %12535 }
 0x8dc   :  { %1628 = vrot.lane.b32.xlu1 %v12536_v36, %s13337_s14  ;;  %v12538_v41 = vpop.eup %12537 }
 0x8de   :  { %1630 = vrot.lane.b32.xlu0 %v12538_v41, %s13337_s14 }
 0x905   :  { %v1715_v10 = vpop.permute.xlu1 %1714 }
 0x906   :  { %11526 = vmatmul.mubr.msk.f32.vlgmr.msra.gmra.mxu0 %vm919_vm7, %v1715_v10 }
 0x907   :  { %11540 = vmatpush3.msra.mxu0 %v13667_v20  ;;  %11547 = vmatprep.mubr.msk.f32.mxu0 %vm13336_vm5, %v17669_v6  ;;  %v12540_v20 = vpop.eup %12539 }
 0x908   :  { %11541 = vmatprep.subr.mxu0 %v17669_v6  ;;  %v12542_v45 = vpop.eup %12541  ;;  %v1570_v52 = vadd.f32 1.0, %v12540_v20 }
 0x909   :  { %11542 = vmatpush3.msra.mxu0 %v13677_v22  ;;  %v1571_v46 = vadd.f32 1.0, %v12542_v45 }
 0x90a   :  { %11543 = vmatprep.subr.mxu0 %v17669_v6  ;;  %12543 = vrcp.f32 %v1570_v52 }
 0x90b   :  { %11544 = vmatpush3.msra.mxu0 %v13684_v23  ;;  %12545 = vrcp.f32 %v1571_v46 }
 0x90c   :  { %11545 = vmatprep.subr.mxu0 %v17669_v6 }
 0x90d   :  { %11546 = vmatpush3.msra.mxu0 %v13692_v24 }
 0x90e   :  { %11561 = vmatprep.subr.mxu0 %v17669_v6 }
 0x917   :  { %v13986_v23 = vpop.eup %12543 }
 0x918   :  { %v13993_v48 = vpop.eup %12545 }
 0x94c   :  { %v1793_v22 = vpop.permute.xlu0 %1792 }
 0x94d   :  { %11537 = vmatmul.mubr.msk.f32.vlgmr.msra.gmra.mxu1 %vm919_vm7, %v1793_v22 }
 0x94e   :  { %v1629_v7 = vpop.permute.xlu1 %1628  ;;  %11551 = vmatpush3.msra.mxu1 %v13630_v16  ;;  %11558 = vmatprep.mubr.msk.f32.mxu1 %vm13336_vm5, %v17669_v6  ;;  %v1600_v16 = vrot.slane %v13885_v43, 7 }
 0x94f   :  { %v1642_v24 = vmul.f32 %v13986_v23, %v1629_v7  ;;  %11552 = vmatprep.subr.mxu1 %v17669_v6 }
 0x950   :  { %v1631_v29 = vpop.permute.xlu0 %1630  ;;  %11553 = vmatpush3.msra.mxu1 %v13637_v17  ;;  %v1601_v17 = vrot.slane %v13878_v30, 7  ;;  %v1612_v61 = vmul.f32 %v13986_v23, %v1600_v16 }
 0x951   :  { %v1643_v58 = vmul.f32 %v13993_v48, %v1631_v29  ;;  %1658 = vrot.lane.b32.xlu1 %v1642_v24, %s13338_s15  ;;  %11554 = vmatprep.subr.mxu1 %v17669_v6 }
 0x952   :  { %11555 = vmatpush3.msra.mxu1 %v13645_v18  ;;  %v1613_v63 = vmul.f32 %v13993_v48, %v1601_v17 }
 0x953   :  { %1660 = vrot.lane.b32.xlu0 %v1643_v58, %s13338_s15  ;;  %11556 = vmatprep.subr.mxu1 %v17669_v6 }
 0x954   :  { %11557 = vmatpush3.msra.mxu1 %v13653_v19 }
 0x955   :  { %11572 = vmatprep.subr.mxu1 %v17669_v6 }
 0x9c3   :  { %v1659_v59 = vpop.permute.xlu1 %1658 }
 0x9c4   :  { %v14007_v49 = vadd.f32 %v1659_v59, %v1612_v61 }
 0x9c5   :  { %v1661_v18 = vpop.permute.xlu0 %1660 }
 0x9c6   :  { %v1784_v0 = vpop.f32.mrf.mxu0  ;;  %12547 = vtanh.f32 %v14007_v49  ;;  %v14011_v12 = vadd.f32 %v1661_v18, %v1613_v63 }
 0x9c7   :  { %v1947_v19 = vrot.slane %v1784_v0, 6  ;;  %v1948_v14 = vrot.slane %v1784_v0, 7 }
 0x9c8   :  { %v11527_v4 = vpop.f32.mrf.mxu0  ;;  %12549 = vtanh.f32 %v14011_v12 }
 0x9c9   :  { %v1959_v30 = vadd.f32 %v1947_v19, %v13757_v54  ;;  %v1960_v43 = vadd.f32 %v1948_v14, %v13761_v56 }
 0x9cb   :  { %12551 = vtanh.f32 %v1959_v30  ;;  %v10692_v22 = vmul.f32 -1.442695, %v1959_v30  ;;  %v10693_v7 = vmul.f32 -1.442695, %v1960_v43 }
 0x9cc   :  { %12553 = vtanh.f32 %v1960_v43 }
 0x9d3   :  { %v12548_v15 = vpop.eup %12547 }
 0x9d4   :  { %1694 = vrot.lane.b32.xlu1 %v12548_v15, %s13337_s14 }
 0x9d5   :  { %v12550_v32 = vpop.eup %12549 }
 0x9d6   :  { %1696 = vrot.lane.b32.xlu0 %v12550_v32, %s13337_s14 }
 0x9d8   :  { %v12552_v2 = vpop.eup %12551 }
 0x9d9   :  { %v12554_v36 = vpop.eup %12553  ;;  %2037 = vrot.lane.b32.xlu1 %v12552_v2, %s13337_s14 }
 0x9da   :  { %2039 = vrot.lane.b32.xlu0 %v12554_v36, %s13337_s14 }
 0xa0d   :  { %v1862_v41 = vpop.f32.mrf.mxu1 }
 0xa0e   :  { %v1949_v10 = vrot.slane %v1862_v41, 6  ;;  %v1950_v57 = vrot.slane %v1862_v41, 7 }
 0xa0f   :  { %v11538_v42 = vpop.f32.mrf.mxu1 }
 0xa10   :  { %v1961_v20 = vadd.f32 %v1949_v10, %v13796_v11  ;;  %v1962_v45 = vadd.f32 %v1950_v57, %v13800_v21 }
 0xa12   :  { %12555 = vtanh.f32 %v1961_v20  ;;  %v10695_v15 = vmul.f32 -1.442695, %v1962_v45 }
 0xa13   :  { %12557 = vtanh.f32 %v1962_v45 }
 0xa14   :  { %12559 = vpow2.f32 %v10692_v22 }
 0xa15   :  { %12561 = vpow2.f32 %v10693_v7 }
 0xa1f   :  { %v12556_v52 = vpop.eup %12555 }
 0xa20   :  { %v12558_v46 = vpop.eup %12557  ;;  %2041 = vrot.lane.b32.xlu1 %v12556_v52, %s13337_s14 }
 0xa21   :  { %2043 = vrot.lane.b32.xlu0 %v12558_v46, %s13337_s14  ;;  %v12560_v24 = vpop.eup %12559 }
 0xa22   :  { %v12562_v29 = vpop.eup %12561  ;;  %v1983_v58 = vadd.f32 1.0, %v12560_v24  ;;  %v2014_v24 = vrot.slane %v13931_v34, 7 }
 0xa23   :  { %v1984_v16 = vadd.f32 1.0, %v12562_v29 }
 0xa24   :  { %12563 = vrcp.f32 %v1983_v58 }
 0xa25   :  { %12565 = vrcp.f32 %v1984_v16 }
 0xa31   :  { %v14031_v0 = vpop.eup %12563 }
 0xa32   :  { %v14036_v30 = vpop.eup %12565 }
 0xa33   :  { %v2026_v16 = vmul.f32 %v14036_v30, %v2014_v24 }
 0xa46   :  { %v1695_v17 = vpop.permute.xlu1 %1694 }
 0xa47   :  { %v14025_v61 = vmul.f32 %v13986_v23, %v1695_v17 }
 0xa48   :  { %v1697_v59 = vpop.permute.xlu0 %1696 }
 0xa49   :  { %v1868_v63 = vrot.slane %v14025_v61, 1  ;;  %v14029_v18 = vmul.f32 %v13993_v48, %v1697_v59  ;;  %v10694_v48 = vmul.f32 -1.442695, %v1961_v20  ;;  %v2013_v20 = vrot.slane %v13919_v9, 7 }
 0xa4a   :  { %v2016_v59 = vrot.slane %v13943_v39, 7 }
 0xa4b   :  { %v2038_v19 = vpop.permute.xlu1 %2037  ;;  %v1869_v4 = vsel %vm1298_vm6, %v14029_v18, %v1868_v63  ;;  %12567 = vpow2.f32 %v10694_v48  ;;  %v2025_v7 = vmul.f32 %v14031_v0, %v2013_v20  ;;  %v7575_v48 = vsel %vm86_vm1, %v13833_v40, %v13952_v13 }
 0xa4c   :  { %v2055_v14 = vmul.f32 %v14031_v0, %v2038_v19  ;;  %v2040_v43 = vpop.permute.xlu0 %2039  ;;  %1870 = vrot.lane.b32.xlu1 %v1869_v4, %s13338_s15  ;;  %12569 = vpow2.f32 %v10695_v15 }
 0xa4d   :  { %v2056_v23 = vmul.f32 %v14036_v30, %v2040_v43 }
 0xa4e   :  { %2067 = vrot.lane.b32.xlu0 %v2055_v14, %s13338_s15 }
 0xa50   :  { %2069 = vrot.lane.b32.xlu1 %v2056_v23, %s13338_s15 }
 0xa58   :  { %v12568_v32 = vpop.eup %12567 }
 0xa59   :  { %v12570_v2 = vpop.eup %12569  ;;  %v1985_v36 = vadd.f32 1.0, %v12568_v32 }
 0xa5a   :  { %v1986_v41 = vadd.f32 1.0, %v12570_v2 }
 0xa5b   :  { %12571 = vrcp.f32 %v1985_v36  ;;  %v7576_v36 = vsel %vm86_vm1, %v13831_v38, %v13956_v62 }
 0xa5c   :  { %12573 = vrcp.f32 %v1986_v41 }
 0xa68   :  { %v14042_v10 = vpop.eup %12571 }
 0xa69   :  { %v14044_v42 = vpop.eup %12573 }
 0xa6a   :  { %v2028_v19 = vmul.f32 %v14044_v42, %v2016_v59  ;;  %v14148_v59 = vld [vmem:[%s17651_s12 + $0x40] sm:$0xff] }
 0xa92   :  { %v2042_v57 = vpop.permute.xlu1 %2041 }
 0xa93   :  { %v2044_v52 = vpop.permute.xlu0 %2043  ;;  %v2057_v46 = vmul.f32 %v14042_v10, %v2042_v57 }
 0xa94   :  { %v2058_v22 = vmul.f32 %v14044_v42, %v2044_v52 }
 0xa95   :  { %2071 = vrot.lane.b32.xlu0 %v2057_v46, %s13338_s15 }
 0xa96   :  { %2073 = vrot.lane.b32.xlu1 %v2058_v22, %s13338_s15 }
 0xabe   :  { %v1871_v45 = vpop.permute.xlu1 %1870 }
 0xabf   :  { %11548 = vmatmul.mubr.msk.f32.vlgmr.msra.gmra.mxu0 %vm919_vm7, %v1871_v45 }
 0xac0   :  { %v2068_v29 = vpop.permute.xlu0 %2067  ;;  %11562 = vmatpush3.msra.mxu0 %v13698_v25  ;;  %11569 = vmatprep.mubr.msk.f32.mxu0 %vm13336_vm5, %v17669_v6 }
 0xac1   :  { %v14054_v58 = vadd.f32 %v2068_v29, %v2025_v7  ;;  %11563 = vmatprep.subr.mxu0 %v17669_v6  ;;  %v7608_v7 = vsel %vm86_vm1, %v13844_v55, %v13963_v60  ;;  %v7609_v29 = vsel %vm86_vm1, %v13842_v51, %v13966_v1  ;;  %v14125_v51 = vld [vmem:[%s17651_s12 + $0x58] sm:$0xff]  ;;  %v14134_v1 = vld [vmem:[%s17651_s12 + $0x50] sm:$0xff] }
 0xac2   :  { %v2070_v9 = vpop.permute.xlu1 %2069  ;;  %11564 = vmatpush3.msra.mxu0 %v13708_v26  ;;  %v2015_v26 = vrot.slane %v13946_v35, 7 }
 0xac3   :  { %12575 = vtanh.f32 %v14054_v58  ;;  %v14063_v34 = vadd.f32 %v2070_v9, %v2026_v16  ;;  %11565 = vmatprep.subr.mxu0 %v17669_v6 }
 0xac4   :  { %11566 = vmatpush3.msra.mxu0 %v13715_v27  ;;  %v2027_v27 = vmul.f32 %v14042_v10, %v2015_v26 }
 0xac5   :  { %12577 = vtanh.f32 %v14063_v34  ;;  %11567 = vmatprep.subr.mxu0 %v17669_v6 }
 0xac6   :  { %11568 = vmatpush3.msra.mxu0 %v13722_v28 }
 0xac7   :  { %11583 = vmatprep.subr.mxu0 %v17669_v6 }
 0xad0   :  { %v12576_v25 = vpop.eup %12575 }
 0xad1   :  { %2103 = vrot.lane.b32.xlu0 %v12576_v25, %s13337_s14 }
 0xad2   :  { %v12578_v17 = vpop.eup %12577 }
 0xad3   :  { %2105 = vrot.lane.b32.xlu1 %v12578_v17, %s13337_s14 }
 0xb07   :  { %v2072_v63 = vpop.permute.xlu0 %2071 }
 0xb08   :  { %v14077_v14 = vadd.f32 %v2072_v63, %v2027_v27  ;;  %v2074_v28 = vpop.permute.xlu1 %2073 }
 0xb09   :  { %v14079_v4 = vadd.f32 %v2074_v28, %v2028_v19 }
 0xb0a   :  { %12579 = vtanh.f32 %v14077_v14 }
 0xb0b   :  { %12581 = vtanh.f32 %v14079_v4 }
 0xb17   :  { %v12580_v43 = vpop.eup %12579 }
 0xb18   :  { %v12582_v23 = vpop.eup %12581  ;;  %2107 = vrot.lane.b32.xlu0 %v12580_v43, %s13337_s14 }
 0xb19   :  { %2109 = vrot.lane.b32.xlu1 %v12582_v23, %s13337_s14 }
 0xb43   :  { %v2104_v39 = vpop.permute.xlu0 %2103 }
 0xb44   :  { %v2121_v35 = vmul.f32 %v14031_v0, %v2104_v39 }
 0xb45   :  { %v2106_v32 = vpop.permute.xlu1 %2105 }
 0xb46   :  { %v14090_v15 = vsel %vm7577_vm8, %v7575_v48, %v2121_v35  ;;  %v2122_v2 = vmul.f32 %v14036_v30, %v2106_v32  ;;  %v2129_v41 = vrot.slane %v2121_v35, 2 }
 0xb48   :  { %v2130_v57 = vrot.slane %v2122_v2, 1  ;;  %v14097_v52 = vsel %vm7577_vm8, %v7576_v36, %v2122_v2  ;;  %v14159_v2 = vld [vmem:[%s17651_s12 + $0x18] sm:$0xff] }
 0xb4a   :  { %v2131_v0 = vsel %vm1298_vm6, %v2130_v57, %v2129_v41  ;;  %v14171_v57 = vld [vmem:[%s17651_s12 + $0x10] sm:$0xff] }
 0xb4b   :  { %2132 = vrot.lane.b32.xlu0 %v2131_v0, %s13338_s15 }
 0xb7f   :  { %v1940_v40 = vpop.f32.mrf.mxu0 }
 0xb80   :  { %v1951_v13 = vrot.slane %v1940_v40, 6  ;;  %v1952_v46 = vrot.slane %v1940_v40, 7  ;;  %v14179_v40 = vld [vmem:[%s17651_s12 + $0x8] sm:$0xff] }
 0xb81   :  { %v11549_v22 = vpop.f32.mrf.mxu0 }
 0xb82   :  { %v1963_v20 = vadd.f32 %v1951_v13, %v13788_v5  ;;  %v1964_v30 = vadd.f32 %v1952_v46, %v13826_v31  ;;  %v14187_v13 = vld [vmem:[%s17651_s12] sm:$0xff]  ;;  %v2017_v46 = vrot.slane %v14007_v49, 7 }
 0xb84   :  { %12583 = vtanh.f32 %v1963_v20  ;;  %v10696_v27 = vmul.f32 -1.442695, %v1963_v20  ;;  %v10697_v63 = vmul.f32 -1.442695, %v1964_v30  ;;  %v2018_v20 = vrot.slane %v14011_v12, 7 }
 0xb85   :  { %12585 = vtanh.f32 %v1964_v30 }
 0xb86   :  { %12587 = vpow2.f32 %v10696_v27 }
 0xb87   :  { %12589 = vpow2.f32 %v10697_v63 }
 0xb8a   :  { %v2108_v38 = vpop.permute.xlu0 %2107 }
 0xb8b   :  { %v2123_v62 = vmul.f32 %v14042_v10, %v2108_v38  ;;  %v2110_v45 = vpop.permute.xlu1 %2109 }
 0xb8c   :  { %v2124_v24 = vmul.f32 %v14044_v42, %v2110_v45  ;;  %v14141_v42 = vld [vmem:[%s17651_s12 + $0x48] sm:$0xff] }
 0xb8d   :  { %v2208_v16 = vrot.slane %v2123_v62, 2  ;;  %v14112_v9 = vsel %vm7577_vm8, %v7608_v7, %v2123_v62 }
 0xb8e   :  { %v2209_v25 = vrot.slane %v2124_v24, 1  ;;  %v14115_v17 = vsel %vm7577_vm8, %v7609_v29, %v2124_v24 }
 0xb90   :  { %v2210_v10 = vsel %vm1298_vm6, %v2209_v25, %v2208_v16 }
 0xb91   :  { %v12584_v26 = vpop.eup %12583  ;;  %2211 = vrot.lane.b32.xlu1 %v2210_v10, %s13338_s15 }
 0xb92   :  { %2045 = vrot.lane.b32.xlu0 %v12584_v26, %s13337_s14  ;;  %v12586_v55 = vpop.eup %12585 }
 0xb93   :  { %v12588_v19 = vpop.eup %12587 }
 0xb94   :  { %v12590_v28 = vpop.eup %12589  ;;  %v1987_v43 = vadd.f32 1.0, %v12588_v19 }
 0xb95   :  { %2047 = vrot.lane.b32.xlu1 %v12586_v55, %s13337_s14  ;;  %v1988_v23 = vadd.f32 1.0, %v12590_v28 }
 0xb96   :  { %12591 = vrcp.f32 %v1987_v43 }
 0xb97   :  { %12593 = vrcp.f32 %v1988_v23 }
 0xba3   :  { %v14152_v35 = vpop.eup %12591 }
 0xba4   :  { %v14165_v36 = vpop.eup %12593  ;;  %v2029_v22 = vmul.f32 %v14152_v35, %v2017_v46 }
 0xba5   :  { %v2030_v62 = vmul.f32 %v14165_v36, %v2018_v20 }
 0xbbd   :  { %v2133_v60 = vpop.permute.xlu0 %2132 }
 0xbbe   :  { %11559 = vmatmul.mubr.msk.f32.vlgmr.msra.gmra.mxu1 %vm919_vm7, %v2133_v60 }
 0xbbf   :  { %11573 = vmatpush3.msra.mxu1 %v14125_v51  ;;  %11580 = vmatprep.mubr.msk.f32.mxu1 %vm13336_vm5, %v17669_v6 }
 0xbc0   :  { %11574 = vmatprep.subr.mxu1 %v17669_v6 }
 0xbc1   :  { %11575 = vmatpush3.msra.mxu1 %v14134_v1 }
 0xbc2   :  { %11576 = vmatprep.subr.mxu1 %v17669_v6 }
 0xbc3   :  { %11577 = vmatpush3.msra.mxu1 %v14141_v42 }
 0xbc4   :  { %11578 = vmatprep.subr.mxu1 %v17669_v6 }
 0xbc5   :  { %11579 = vmatpush3.msra.mxu1 %v14148_v59 }
 0xbc6   :  { %11594 = vmatprep.subr.mxu1 %v17669_v6 }
 0xc03   :  { %v2212_v39 = vpop.permute.xlu1 %2211 }
 0xc04   :  { %11570 = vmatmul.mubr.msk.f32.vlgmr.msra.gmra.mxu0 %vm919_vm7, %v2212_v39  ;;  %v2046_v48 = vpop.permute.xlu0 %2045 }
 0xc05   :  { %v2059_v32 = vmul.f32 %v14152_v35, %v2046_v48  ;;  %11584 = vmatpush3.msra.mxu0 %v14159_v2  ;;  %11591 = vmatprep.mubr.msk.f32.mxu0 %vm13336_vm5, %v17669_v6 }
 0xc06   :  { %11585 = vmatprep.subr.mxu0 %v17669_v6 }
 0xc07   :  { %v2048_v41 = vpop.permute.xlu1 %2047  ;;  %2075 = vrot.lane.b32.xlu0 %v2059_v32, %s13338_s15  ;;  %11586 = vmatpush3.msra.mxu0 %v14171_v57 }
 0xc08   :  { %v2060_v0 = vmul.f32 %v14165_v36, %v2048_v41  ;;  %11587 = vmatprep.subr.mxu0 %v17669_v6 }
 0xc09   :  { %11588 = vmatpush3.msra.mxu0 %v14179_v40 }
 0xc0a   :  { %2077 = vrot.lane.b32.xlu1 %v2060_v0, %s13338_s15  ;;  %11589 = vmatprep.subr.mxu0 %v17669_v6 }
 0xc0b   :  { %11590 = vmatpush3.msra.mxu0 %v14187_v13 }
 0xc0c   :  { %11605 = vmatprep.subr.mxu0 %v17669_v6 }
 0xc79   :  { %v2076_v30 = vpop.permute.xlu0 %2075 }
 0xc7a   :  { %v14194_v38 = vadd.f32 %v2076_v30, %v2029_v22 }
 0xc7c   :  { %12595 = vtanh.f32 %v14194_v38  ;;  %v2078_v45 = vpop.permute.xlu1 %2077 }
 0xc7d   :  { %v14198_v7 = vadd.f32 %v2078_v45, %v2030_v62  ;;  %v7636_v45 = vsel %vm86_vm1, %v13903_v37, %v14025_v61 }
 0xc7e   :  { %v2202_v24 = vpop.f32.mrf.mxu1 }
 0xc7f   :  { %12597 = vtanh.f32 %v14198_v7  ;;  %v2367_v29 = vrot.slane %v2202_v24, 5  ;;  %v2368_v16 = vrot.slane %v2202_v24, 6 }
 0xc80   :  { %v11560_v49 = vpop.f32.mrf.mxu1 }
 0xc81   :  { %v2379_v25 = vadd.f32 %v2367_v29, %v13757_v54  ;;  %v2380_v12 = vadd.f32 %v2368_v16, %v13761_v56  ;;  %v7637_v49 = vsel %vm86_vm1, %v13900_v33, %v14029_v18 }
 0xc83   :  { %12599 = vtanh.f32 %v2379_v25  ;;  %v10701_v32 = vmul.f32 -1.442695, %v2379_v25  ;;  %v10702_v41 = vmul.f32 -1.442695, %v2380_v12 }
 0xc84   :  { %12601 = vtanh.f32 %v2380_v12 }
 0xc89   :  { %v12596_v10 = vpop.eup %12595 }
 0xc8a   :  { %2111 = vrot.lane.b32.xlu0 %v12596_v10, %s13337_s14 }
 0xc8c   :  { %v12598_v26 = vpop.eup %12597 }
 0xc8d   :  { %2113 = vrot.lane.b32.xlu1 %v12598_v26, %s13337_s14 }
 0xc90   :  { %v12600_v55 = vpop.eup %12599 }
 0xc91   :  { %v12602_v60 = vpop.eup %12601  ;;  %2457 = vrot.lane.b32.xlu0 %v12600_v55, %s13337_s14 }
 0xc92   :  { %2459 = vrot.lane.b32.xlu1 %v12602_v60, %s13337_s14 }
 0xcc4   :  { %v2281_v27 = vpop.f32.mrf.mxu0 }
 0xcc5   :  { %v2369_v63 = vrot.slane %v2281_v27, 5  ;;  %v2370_v19 = vrot.slane %v2281_v27, 6 }
 0xcc6   :  { %v11571_v28 = vpop.f32.mrf.mxu0 }
 0xcc7   :  { %v2381_v43 = vadd.f32 %v2369_v63, %v13796_v11  ;;  %v2382_v23 = vadd.f32 %v2370_v19, %v13800_v21 }
 0xcc9   :  { %12603 = vtanh.f32 %v2381_v43  ;;  %v10703_v18 = vmul.f32 -1.442695, %v2381_v43  ;;  %v10704_v60 = vmul.f32 -1.442695, %v2382_v23  ;;  %v2433_v43 = vrot.slane %v14054_v58, 7 }
 0xcca   :  { %12605 = vtanh.f32 %v2382_v23 }
 0xccb   :  { %12607 = vpow2.f32 %v10701_v32 }
 0xccc   :  { %12609 = vpow2.f32 %v10702_v41 }
 0xcd6   :  { %v12604_v39 = vpop.eup %12603 }
 0xcd7   :  { %v12606_v48 = vpop.eup %12605  ;;  %2461 = vrot.lane.b32.xlu0 %v12604_v39, %s13337_s14 }
 0xcd8   :  { %2463 = vrot.lane.b32.xlu1 %v12606_v48, %s13337_s14  ;;  %v12608_v0 = vpop.eup %12607 }
 0xcd9   :  { %v12610_v46 = vpop.eup %12609  ;;  %v2403_v22 = vadd.f32 1.0, %v12608_v0 }
 0xcda   :  { %v2404_v20 = vadd.f32 1.0, %v12610_v46 }
 0xcdb   :  { %12611 = vrcp.f32 %v2403_v22 }
 0xcdc   :  { %12613 = vrcp.f32 %v2404_v20  ;;  %v2434_v20 = vrot.slane %v14063_v34, 7 }
 0xcdd   :  { %12615 = vpow2.f32 %v10703_v18 }
 0xcde   :  { %12617 = vpow2.f32 %v10704_v60 }
 0xcfc   :  { %v2112_v30 = vpop.permute.xlu0 %2111 }
 0xcfd   :  { %v2125_v62 = vmul.f32 %v14152_v35, %v2112_v30  ;;  %v14225_v35 = vpop.eup %12611 }
 0xcfe   :  { %v2445_v22 = vmul.f32 %v14225_v35, %v2433_v43 }
 0xcff   :  { %v14216_v24 = vsel %vm7577_vm8, %v7636_v45, %v2125_v62  ;;  %v2114_v29 = vpop.permute.xlu1 %2113  ;;  %v2287_v25 = vrot.slane %v2125_v62, 2  ;;  %v14252_v45 = vld [vmem:[%s17651_s12 + $0x38] sm:$0xff] }
 0xd00   :  { %v2126_v16 = vmul.f32 %v14165_v36, %v2114_v29  ;;  %v14230_v36 = vpop.eup %12613  ;;  %v14263_v29 = vld [vmem:[%s17651_s12 + $0x30] sm:$0xff] }
 0xd01   :  { %v12616_v27 = vpop.eup %12615  ;;  %v2446_v58 = vmul.f32 %v14230_v36, %v2434_v20 }
 0xd02   :  { %v2288_v12 = vrot.slane %v2126_v16, 1  ;;  %v14223_v10 = vsel %vm7577_vm8, %v7637_v49, %v2126_v16  ;;  %v12618_v63 = vpop.eup %12617  ;;  %v2405_v19 = vadd.f32 1.0, %v12616_v27  ;;  %v14272_v49 = vld [vmem:[%s17651_s12 + $0x28] sm:$0xff] }
 0xd03   :  { %v2458_v26 = vpop.permute.xlu0 %2457  ;;  %v2406_v28 = vadd.f32 1.0, %v12618_v63 }
 0xd04   :  { %v2475_v37 = vmul.f32 %v14225_v35, %v2458_v26  ;;  %v2460_v61 = vpop.permute.xlu1 %2459  ;;  %v2289_v55 = vsel %vm1298_vm6, %v2288_v12, %v2287_v25  ;;  %12619 = vrcp.f32 %v2405_v19  ;;  %v14280_v25 = vld [vmem:[%s17651_s12 + $0x20] sm:$0xff] }
 0xd05   :  { %2290 = vrot.lane.b32.xlu0 %v2289_v55, %s13338_s15  ;;  %v2476_v33 = vmul.f32 %v14230_v36, %v2460_v61  ;;  %12621 = vrcp.f32 %v2406_v28  ;;  %v2436_v61 = vrot.slane %v14079_v4, 7 }
 0xd06   :  { %2487 = vrot.lane.b32.xlu1 %v2475_v37, %s13338_s15  ;;  %v2435_v37 = vrot.slane %v14077_v14, 7 }
 0xd09   :  { %2489 = vrot.lane.b32.xlu0 %v2476_v33, %s13338_s15 }
 0xd11   :  { %v14235_v39 = vpop.eup %12619 }
 0xd12   :  { %v14237_v32 = vpop.eup %12621  ;;  %v2447_v55 = vmul.f32 %v14235_v39, %v2435_v37 }
 0xd13   :  { %v2448_v33 = vmul.f32 %v14237_v32, %v2436_v61 }
 0xd49   :  { %v2462_v48 = vpop.permute.xlu0 %2461 }
 0xd4a   :  { %v2477_v41 = vmul.f32 %v14235_v39, %v2462_v48  ;;  %v2464_v0 = vpop.permute.xlu1 %2463 }
 0xd4b   :  { %v2478_v46 = vmul.f32 %v14237_v32, %v2464_v0 }
 0xd4c   :  { %2491 = vrot.lane.b32.xlu1 %v2477_v41, %s13338_s15 }
 0xd4d   :  { %2493 = vrot.lane.b32.xlu0 %v2478_v46, %s13338_s15 }
 0xd77   :  { %v2291_v23 = vpop.permute.xlu0 %2290 }
 0xd78   :  { %11581 = vmatmul.mubr.msk.f32.vlgmr.msra.gmra.mxu1 %vm919_vm7, %v2291_v23  ;;  %v2488_v30 = vpop.permute.xlu1 %2487 }
 0xd79   :  { %v14247_v62 = vadd.f32 %v2488_v30, %v2445_v22  ;;  %11595 = vmatpush3.msra.mxu1 %v14252_v45  ;;  %11602 = vmatprep.mubr.msk.f32.mxu1 %vm13336_vm5, %v17669_v6 }
 0xd7a   :  { %11596 = vmatprep.subr.mxu1 %v17669_v6 }
 0xd7b   :  { %12623 = vtanh.f32 %v14247_v62  ;;  %v2490_v34 = vpop.permute.xlu0 %2489  ;;  %11597 = vmatpush3.msra.mxu1 %v14263_v29 }
 0xd7c   :  { %v14266_v16 = vadd.f32 %v2490_v34, %v2446_v58  ;;  %11598 = vmatprep.subr.mxu1 %v17669_v6 }
 0xd7d   :  { %11599 = vmatpush3.msra.mxu1 %v14272_v49 }
 0xd7e   :  { %12625 = vtanh.f32 %v14266_v16  ;;  %11600 = vmatprep.subr.mxu1 %v17669_v6 }
 0xd7f   :  { %11601 = vmatpush3.msra.mxu1 %v14280_v25 }
 0xd80   :  { %11616 = vmatprep.subr.mxu1 %v17669_v6 }
 0xd88   :  { %v12624_v12 = vpop.eup %12623 }
 0xd89   :  { %2523 = vrot.lane.b32.xlu1 %v12624_v12, %s13337_s14 }
 0xd8b   :  { %v12626_v26 = vpop.eup %12625 }
 0xd8c   :  { %2525 = vrot.lane.b32.xlu0 %v12626_v26, %s13337_s14 }
 0xdbe   :  { %v2492_v18 = vpop.permute.xlu1 %2491 }
 0xdbf   :  { %v2494_v60 = vpop.permute.xlu0 %2493  ;;  %v14290_v27 = vadd.f32 %v2492_v18, %v2447_v55 }
 0xdc0   :  { %v14292_v63 = vadd.f32 %v2494_v60, %v2448_v33 }
 0xdc1   :  { %12627 = vtanh.f32 %v14290_v27 }
 0xdc2   :  { %12629 = vtanh.f32 %v14292_v63 }
 0xdce   :  { %v12628_v19 = vpop.eup %12627 }
 0xdcf   :  { %v12630_v28 = vpop.eup %12629  ;;  %2527 = vrot.lane.b32.xlu1 %v12628_v19, %s13337_s14 }
 0xdd0   :  { %2529 = vrot.lane.b32.xlu0 %v12630_v28, %s13337_s14 }
 0xdfb   :  { %v2524_v14 = vpop.permute.xlu1 %2523 }
 0xdfc   :  { %v2541_v4 = vmul.f32 %v14225_v35, %v2524_v14 }
 0xdfe   :  { %v14301_v48 = vsel %vm7580_vm9, %v14090_v15, %v2541_v4  ;;  %v2526_v41 = vpop.permute.xlu0 %2525  ;;  %v2549_v46 = vrot.slane %v2541_v4, 3 }
 0xdff   :  { %v2542_v0 = vmul.f32 %v14230_v36, %v2526_v41 }
 0xe01   :  { %v2550_v43 = vrot.slane %v2542_v0, 2  ;;  %v14306_v23 = vsel %vm7580_vm9, %v14097_v52, %v2542_v0 }
 0xe03   :  { %v2551_v22 = vsel %vm1298_vm6, %v2550_v43, %v2549_v46 }
 0xe04   :  { %2552 = vrot.lane.b32.xlu1 %v2551_v22, %s13338_s15 }
 0xe38   :  { %v2360_v20 = vpop.f32.mrf.mxu1 }
 0xe39   :  { %v2371_v30 = vrot.slane %v2360_v20, 5  ;;  %v2372_v35 = vrot.slane %v2360_v20, 6 }
 0xe3a   :  { %v11582_v58 = vpop.f32.mrf.mxu1 }
 0xe3b   :  { %v2383_v15 = vadd.f32 %v2371_v30, %v13788_v5  ;;  %v2384_v34 = vadd.f32 %v2372_v35, %v13826_v31  ;;  %v2437_v35 = vrot.slane %v14194_v38, 7  ;;  %v2438_v58 = vrot.slane %v14198_v7, 7 }
 0xe3d   :  { %12631 = vtanh.f32 %v2383_v15 }
 0xe3e   :  { %12633 = vtanh.f32 %v2384_v34 }
 0xe41   :  { %v2528_v36 = vpop.permute.xlu1 %2527 }
 0xe42   :  { %v2530_v12 = vpop.permute.xlu0 %2529  ;;  %v2543_v26 = vmul.f32 %v14235_v39, %v2528_v36 }
 0xe43   :  { %v2544_v52 = vmul.f32 %v14237_v32, %v2530_v12 }
 0xe44   :  { %v2628_v37 = vrot.slane %v2543_v26, 3  ;;  %v14316_v61 = vsel %vm7580_vm9, %v14112_v9, %v2543_v26  ;;  %v10705_v9 = vmul.f32 -1.442695, %v2383_v15 }
 0xe45   :  { %v2629_v55 = vrot.slane %v2544_v52, 2  ;;  %v14320_v33 = vsel %vm7580_vm9, %v14115_v17, %v2544_v52  ;;  %v10706_v17 = vmul.f32 -1.442695, %v2384_v34 }
 0xe46   :  { %12635 = vpow2.f32 %v10705_v9 }
 0xe47   :  { %v2630_v18 = vsel %vm1298_vm6, %v2629_v55, %v2628_v37  ;;  %12637 = vpow2.f32 %v10706_v17 }
 0xe48   :  { %2631 = vrot.lane.b32.xlu0 %v2630_v18, %s13338_s15 }
 0xe4a   :  { %v12632_v60 = vpop.eup %12631 }
 0xe4b   :  { %v12634_v19 = vpop.eup %12633  ;;  %2465 = vrot.lane.b32.xlu1 %v12632_v60, %s13337_s14 }
 0xe4c   :  { %2467 = vrot.lane.b32.xlu0 %v12634_v19, %s13337_s14 }
 0xe53   :  { %v12636_v32 = vpop.eup %12635 }
 0xe54   :  { %v12638_v28 = vpop.eup %12637  ;;  %v2407_v14 = vadd.f32 1.0, %v12636_v32 }
 0xe55   :  { %v2408_v4 = vadd.f32 1.0, %v12638_v28 }
 0xe56   :  { %12639 = vrcp.f32 %v2407_v14 }
 0xe57   :  { %12641 = vrcp.f32 %v2408_v4 }
 0xe63   :  { %v14341_v0 = vpop.eup %12639 }
 0xe64   :  { %v14344_v43 = vpop.eup %12641  ;;  %v2449_v15 = vmul.f32 %v14341_v0, %v2437_v35 }
 0xe65   :  { %v2450_v34 = vmul.f32 %v14344_v43, %v2438_v58 }
 0xe76   :  { %v2553_v39 = vpop.permute.xlu1 %2552 }
 0xe77   :  { %11592 = vmatmul.mubr.msk.f32.vlgmr.msra.gmra.mxu0 %vm919_vm7, %v2553_v39 }
 0xe78   :  { %11606 = vmatpush3.msra.mxu0 %v14125_v51  ;;  %11613 = vmatprep.mubr.msk.f32.mxu0 %vm13336_vm5, %v17669_v6 }
 0xe79   :  { %11607 = vmatprep.subr.mxu0 %v17669_v6 }
 0xe7a   :  { %11608 = vmatpush3.msra.mxu0 %v14134_v1 }
 0xe7b   :  { %11609 = vmatprep.subr.mxu0 %v17669_v6 }
 0xe7c   :  { %11610 = vmatpush3.msra.mxu0 %v14141_v42 }
 0xe7d   :  { %11611 = vmatprep.subr.mxu0 %v17669_v6 }
 0xe7e   :  { %11612 = vmatpush3.msra.mxu0 %v14148_v59 }
 0xe7f   :  { %11627 = vmatprep.subr.mxu0 %v17669_v6 }
 0xeba   :  { %v2632_v41 = vpop.permute.xlu0 %2631 }
 0xebb   :  { %11603 = vmatmul.mubr.msk.f32.vlgmr.msra.gmra.mxu1 %vm919_vm7, %v2632_v41 }
 0xebc   :  { %11617 = vmatpush3.msra.mxu1 %v14159_v2  ;;  %11624 = vmatprep.mubr.msk.f32.mxu1 %vm13336_vm5, %v17669_v6 }
 0xebd   :  { %v2466_v46 = vpop.permute.xlu1 %2465  ;;  %11618 = vmatprep.subr.mxu1 %v17669_v6 }
 0xebe   :  { %v2468_v22 = vpop.permute.xlu0 %2467  ;;  %v2479_v20 = vmul.f32 %v14341_v0, %v2466_v46  ;;  %11619 = vmatpush3.msra.mxu1 %v14171_v57 }
 0xebf   :  { %v2480_v30 = vmul.f32 %v14344_v43, %v2468_v22  ;;  %11620 = vmatprep.subr.mxu1 %v17669_v6 }
 0xec0   :  { %2495 = vrot.lane.b32.xlu1 %v2479_v20, %s13338_s15  ;;  %11621 = vmatpush3.msra.mxu1 %v14179_v40 }
 0xec1   :  { %2497 = vrot.lane.b32.xlu0 %v2480_v30, %s13338_s15  ;;  %11622 = vmatprep.subr.mxu1 %v17669_v6 }
 0xec2   :  { %11623 = vmatpush3.msra.mxu1 %v14187_v13 }
 0xec3   :  { %11638 = vmatprep.subr.mxu1 %v17669_v6 }
 0xf32   :  { %v2496_v36 = vpop.permute.xlu1 %2495 }
 0xf33   :  { %v2498_v12 = vpop.permute.xlu0 %2497  ;;  %v14360_v26 = vadd.f32 %v2496_v36, %v2449_v15 }
 0xf34   :  { %v14362_v52 = vadd.f32 %v2498_v12, %v2450_v34 }
 0xf35   :  { %12643 = vtanh.f32 %v14360_v26 }
 0xf36   :  { %12645 = vtanh.f32 %v14362_v52 }
 0xf37   :  { %v2622_v37 = vpop.f32.mrf.mxu0 }
 0xf38   :  { %v2787_v55 = vrot.slane %v2622_v37, 4  ;;  %v2788_v18 = vrot.slane %v2622_v37, 5 }
 0xf39   :  { %v11593_v38 = vpop.f32.mrf.mxu0 }
 0xf3a   :  { %v2799_v7 = vadd.f32 %v2787_v55, %v13757_v54  ;;  %v2800_v60 = vadd.f32 %v2788_v18, %v13761_v56 }
 0xf3c   :  { %12647 = vtanh.f32 %v2799_v7  ;;  %v10710_v30 = vmul.f32 -1.442695, %v2799_v7  ;;  %v10711_v35 = vmul.f32 -1.442695, %v2800_v60 }
 0xf3d   :  { %12649 = vtanh.f32 %v2800_v60 }
 0xf42   :  { %v12644_v19 = vpop.eup %12643 }
 0xf43   :  { %v12646_v39 = vpop.eup %12645  ;;  %2531 = vrot.lane.b32.xlu1 %v12644_v19, %s13337_s14 }
 0xf44   :  { %2533 = vrot.lane.b32.xlu0 %v12646_v39, %s13337_s14 }
 0xf49   :  { %v12648_v9 = vpop.eup %12647 }
 0xf4a   :  { %v12650_v17 = vpop.eup %12649  ;;  %2877 = vrot.lane.b32.xlu1 %v12648_v9, %s13337_s14 }
 0xf4b   :  { %2879 = vrot.lane.b32.xlu0 %v12650_v17, %s13337_s14 }
 0xf7b   :  { %v2701_v32 = vpop.f32.mrf.mxu1 }
 0xf7c   :  { %v2789_v28 = vrot.slane %v2701_v32, 4  ;;  %v2790_v14 = vrot.slane %v2701_v32, 5 }
 0xf7d   :  { %v11604_v4 = vpop.f32.mrf.mxu1 }
 0xf7e   :  { %v2801_v41 = vadd.f32 %v2789_v28, %v13796_v11  ;;  %v2802_v46 = vadd.f32 %v2790_v14, %v13800_v21 }
 0xf80   :  { %12651 = vtanh.f32 %v2801_v41  ;;  %v10713_v28 = vmul.f32 -1.442695, %v2802_v46 }
 0xf81   :  { %12653 = vtanh.f32 %v2802_v46 }
 0xf82   :  { %12655 = vpow2.f32 %v10710_v30 }
 0xf83   :  { %12657 = vpow2.f32 %v10711_v35 }
 0xf8d   :  { %v12652_v22 = vpop.eup %12651 }
 0xf8e   :  { %v12654_v20 = vpop.eup %12653  ;;  %2881 = vrot.lane.b32.xlu1 %v12652_v22, %s13337_s14 }
 0xf8f   :  { %2883 = vrot.lane.b32.xlu0 %v12654_v20, %s13337_s14  ;;  %v12656_v58 = vpop.eup %12655 }
 0xf90   :  { %v12658_v15 = vpop.eup %12657  ;;  %v2823_v34 = vadd.f32 1.0, %v12656_v58 }
 0xf91   :  { %v2824_v36 = vadd.f32 1.0, %v12658_v15 }
 0xf92   :  { %12659 = vrcp.f32 %v2823_v34 }
 0xf93   :  { %12661 = vrcp.f32 %v2824_v36 }
 0xf9f   :  { %v14387_v9 = vpop.eup %12659 }
 0xfb5   :  { %v2532_v12 = vpop.permute.xlu1 %2531 }
 0xfb6   :  { %v2534_v37 = vpop.permute.xlu0 %2533  ;;  %v2545_v55 = vmul.f32 %v14341_v0, %v2532_v12  ;;  %v14390_v0 = vpop.eup %12661  ;;  %v2854_v12 = vrot.slane %v14266_v16, 7 }
 0xfb7   :  { %v2546_v18 = vmul.f32 %v14344_v43, %v2534_v37 }
 0xfb8   :  { %v2707_v38 = vrot.slane %v2545_v55, 3  ;;  %v14380_v19 = vsel %vm7580_vm9, %v14216_v24, %v2545_v55 }
 0xfb9   :  { %v2708_v7 = vrot.slane %v2546_v18, 2  ;;  %v14384_v60 = vsel %vm7580_vm9, %v14223_v10, %v2546_v18  ;;  %v10712_v10 = vmul.f32 -1.442695, %v2801_v41  ;;  %v2853_v41 = vrot.slane %v14247_v62, 7 }
 0xfba   :  { %v2866_v18 = vmul.f32 %v14390_v0, %v2854_v12 }
 0xfbb   :  { %v2709_v39 = vsel %vm1298_vm6, %v2708_v7, %v2707_v38  ;;  %12663 = vpow2.f32 %v10712_v10  ;;  %v2865_v37 = vmul.f32 %v14387_v9, %v2853_v41 }
 0xfbc   :  { %2710 = vrot.lane.b32.xlu1 %v2709_v39, %s13338_s15  ;;  %v2878_v17 = vpop.permute.xlu1 %2877  ;;  %12665 = vpow2.f32 %v10713_v28 }
 0xfbd   :  { %v2880_v43 = vpop.permute.xlu0 %2879  ;;  %v2895_v32 = vmul.f32 %v14387_v9, %v2878_v17  ;;  %v2855_v17 = vrot.slane %v14290_v27, 7 }
 0xfbe   :  { %v2896_v24 = vmul.f32 %v14390_v0, %v2880_v43  ;;  %v2856_v43 = vrot.slane %v14292_v63, 7 }
 0xfbf   :  { %2907 = vrot.lane.b32.xlu0 %v2895_v32, %s13338_s15 }
 0xfc0   :  { %2909 = vrot.lane.b32.xlu1 %v2896_v24, %s13338_s15 }
 0xfc8   :  { %v12664_v14 = vpop.eup %12663 }
 0xfc9   :  { %v12666_v4 = vpop.eup %12665  ;;  %v2825_v22 = vadd.f32 1.0, %v12664_v14 }
 0xfca   :  { %v2826_v20 = vadd.f32 1.0, %v12666_v4 }
 0xfcb   :  { %12667 = vrcp.f32 %v2825_v22 }
 0xfcc   :  { %12669 = vrcp.f32 %v2826_v20 }
 0xfd8   :  { %v14396_v30 = vpop.eup %12667 }
 0xfd9   :  { %v14398_v58 = vpop.eup %12669  ;;  %v2867_v32 = vmul.f32 %v14396_v30, %v2855_v17 }
 0xfda   :  { %v2868_v10 = vmul.f32 %v14398_v58, %v2856_v43 }
0x1000   :  { %v2882_v35 = vpop.permute.xlu1 %2881 }
0x1001   :  { %v2884_v15 = vpop.permute.xlu0 %2883  ;;  %v2897_v34 = vmul.f32 %v14396_v30, %v2882_v35 }
0x1002   :  { %v2898_v36 = vmul.f32 %v14398_v58, %v2884_v15 }
0x1003   :  { %2911 = vrot.lane.b32.xlu0 %v2897_v34, %s13338_s15 }
0x1004   :  { %2913 = vrot.lane.b32.xlu1 %v2898_v36, %s13338_s15 }
0x102e   :  { %v2711_v46 = vpop.permute.xlu1 %2710 }
0x102f   :  { %11614 = vmatmul.mubr.msk.f32.vlgmr.msra.gmra.mxu0 %vm919_vm7, %v2711_v46 }
0x1030   :  { %11628 = vmatpush3.msra.mxu0 %v14252_v45  ;;  %11635 = vmatprep.mubr.msk.f32.mxu0 %vm13336_vm5, %v17669_v6 }
0x1031   :  { %v2908_v55 = vpop.permute.xlu0 %2907  ;;  %11629 = vmatprep.subr.mxu0 %v17669_v6 }
0x1032   :  { %v14413_v38 = vadd.f32 %v2908_v55, %v2865_v37  ;;  %v2910_v62 = vpop.permute.xlu1 %2909  ;;  %11630 = vmatpush3.msra.mxu0 %v14263_v29 }
0x1033   :  { %v14416_v16 = vadd.f32 %v2910_v62, %v2866_v18  ;;  %11631 = vmatprep.subr.mxu0 %v17669_v6 }
0x1034   :  { %12671 = vtanh.f32 %v14413_v38  ;;  %11632 = vmatpush3.msra.mxu0 %v14272_v49 }
0x1035   :  { %12673 = vtanh.f32 %v14416_v16  ;;  %11633 = vmatprep.subr.mxu0 %v17669_v6 }
0x1036   :  { %11634 = vmatpush3.msra.mxu0 %v14280_v25 }
0x1037   :  { %11649 = vmatprep.subr.mxu0 %v17669_v6 }
0x1041   :  { %v12672_v7 = vpop.eup %12671 }
0x1042   :  { %v12674_v39 = vpop.eup %12673  ;;  %2943 = vrot.lane.b32.xlu0 %v12672_v7, %s13337_s14 }
0x1043   :  { %2945 = vrot.lane.b32.xlu1 %v12674_v39, %s13337_s14 }
0x1075   :  { %v2912_v24 = vpop.permute.xlu0 %2911 }
0x1076   :  { %v14431_v28 = vadd.f32 %v2912_v24, %v2867_v32  ;;  %v2914_v14 = vpop.permute.xlu1 %2913 }
0x1077   :  { %v14433_v4 = vadd.f32 %v2914_v14, %v2868_v10 }
0x1078   :  { %12675 = vtanh.f32 %v14431_v28 }
0x1079   :  { %12677 = vtanh.f32 %v14433_v4 }
0x1085   :  { %v12676_v22 = vpop.eup %12675 }
0x1086   :  { %v12678_v20 = vpop.eup %12677  ;;  %2947 = vrot.lane.b32.xlu0 %v12676_v22, %s13337_s14 }
0x1087   :  { %2949 = vrot.lane.b32.xlu1 %v12678_v20, %s13337_s14 }
0x10b4   :  { %v2944_v27 = vpop.permute.xlu0 %2943 }
0x10b5   :  { %v2961_v63 = vmul.f32 %v14387_v9, %v2944_v27  ;;  %v2946_v35 = vpop.permute.xlu1 %2945 }
0x10b6   :  { %v2962_v15 = vmul.f32 %v14390_v0, %v2946_v35 }
0x10b7   :  { %v2969_v34 = vrot.slane %v2961_v63, 4  ;;  %v14443_v36 = vsel %vm7583_vm10, %v14301_v48, %v2961_v63 }
0x10b8   :  { %v2970_v41 = vrot.slane %v2962_v15, 3  ;;  %v14447_v46 = vsel %vm7583_vm10, %v14306_v23, %v2962_v15 }
0x10ba   :  { %v2971_v12 = vsel %vm1298_vm6, %v2970_v41, %v2969_v34 }
0x10bb   :  { %2972 = vrot.lane.b32.xlu0 %v2971_v12, %s13338_s15 }
0x10ef   :  { %v2780_v37 = vpop.f32.mrf.mxu0 }
0x10f0   :  { %v2791_v55 = vrot.slane %v2780_v37, 4  ;;  %v2792_v9 = vrot.slane %v2780_v37, 5 }
0x10f1   :  { %v11615_v18 = vpop.f32.mrf.mxu0 }
0x10f2   :  { %v2803_v0 = vadd.f32 %v2791_v55, %v13788_v5  ;;  %v2804_v62 = vadd.f32 %v2792_v9, %v13826_v31 }
0x10f4   :  { %12679 = vtanh.f32 %v2803_v0 }
0x10f5   :  { %12681 = vtanh.f32 %v2804_v62 }
0x10f8   :  { %v2948_v48 = vpop.permute.xlu0 %2947 }
0x10f9   :  { %v2963_v7 = vmul.f32 %v14396_v30, %v2948_v48  ;;  %v2950_v39 = vpop.permute.xlu1 %2949 }
0x10fa   :  { %v2964_v23 = vmul.f32 %v14398_v58, %v2950_v39 }
0x10fb   :  { %v3048_v17 = vrot.slane %v2963_v7, 4  ;;  %v14457_v43 = vsel %vm7583_vm10, %v14316_v61, %v2963_v7  ;;  %v10714_v61 = vmul.f32 -1.442695, %v2803_v0 }
0x10fc   :  { %v3049_v32 = vrot.slane %v2964_v23, 3  ;;  %v14461_v24 = vsel %vm7583_vm10, %v14320_v33, %v2964_v23  ;;  %v10715_v33 = vmul.f32 -1.442695, %v2804_v62 }
0x10fd   :  { %12683 = vpow2.f32 %v10714_v61 }
0x10fe   :  { %v3050_v10 = vsel %vm1298_vm6, %v3049_v32, %v3048_v17  ;;  %12685 = vpow2.f32 %v10715_v33 }
0x10ff   :  { %3051 = vrot.lane.b32.xlu1 %v3050_v10, %s13338_s15 }
0x1101   :  { %v12680_v14 = vpop.eup %12679 }
0x1102   :  { %v12682_v22 = vpop.eup %12681  ;;  %2885 = vrot.lane.b32.xlu0 %v12680_v14, %s13337_s14 }
0x1103   :  { %2887 = vrot.lane.b32.xlu1 %v12682_v22, %s13337_s14 }
0x112d   :  { %v2973_v30 = vpop.permute.xlu0 %2972 }
0x112e   :  { %11625 = vmatmul.mubr.msk.f32.vlgmr.msra.gmra.mxu1 %vm919_vm7, %v2973_v30 }
0x112f   :  { %11639 = vmatpush3.msra.mxu1 %v14125_v51  ;;  %11646 = vmatprep.mubr.msk.f32.mxu1 %vm13336_vm5, %v17669_v6  ;;  %v12684_v51 = vpop.eup %12683 }
0x1130   :  { %11640 = vmatprep.subr.mxu1 %v17669_v6  ;;  %v12686_v58 = vpop.eup %12685  ;;  %v2827_v20 = vadd.f32 1.0, %v12684_v51 }
0x1131   :  { %11641 = vmatpush3.msra.mxu1 %v14134_v1  ;;  %v2828_v27 = vadd.f32 1.0, %v12686_v58 }
0x1132   :  { %11642 = vmatprep.subr.mxu1 %v17669_v6  ;;  %12687 = vrcp.f32 %v2827_v20 }
0x1133   :  { %11643 = vmatpush3.msra.mxu1 %v14141_v42  ;;  %12689 = vrcp.f32 %v2828_v27 }
0x1134   :  { %11644 = vmatprep.subr.mxu1 %v17669_v6 }
0x1135   :  { %11645 = vmatpush3.msra.mxu1 %v14148_v59 }
0x1136   :  { %11660 = vmatprep.subr.mxu1 %v17669_v6 }
0x113f   :  { %v14482_v42 = vpop.eup %12687 }
0x1140   :  { %v14485_v63 = vpop.eup %12689 }
0x1171   :  { %v3052_v1 = vpop.permute.xlu1 %3051 }
0x1172   :  { %11636 = vmatmul.mubr.msk.f32.vlgmr.msra.gmra.mxu0 %vm919_vm7, %v3052_v1 }
0x1173   :  { %11650 = vmatpush3.msra.mxu0 %v14159_v2  ;;  %11657 = vmatprep.mubr.msk.f32.mxu0 %vm13336_vm5, %v17669_v6  ;;  %v2857_v2 = vrot.slane %v14360_v26, 7 }
0x1174   :  { %v2886_v59 = vpop.permute.xlu0 %2885  ;;  %11651 = vmatprep.subr.mxu0 %v17669_v6 }
0x1175   :  { %v2899_v35 = vmul.f32 %v14482_v42, %v2886_v59  ;;  %v2888_v15 = vpop.permute.xlu1 %2887  ;;  %11652 = vmatpush3.msra.mxu0 %v14171_v57  ;;  %v2858_v57 = vrot.slane %v14362_v52, 7  ;;  %v2869_v41 = vmul.f32 %v14482_v42, %v2857_v2 }
0x1176   :  { %v2900_v34 = vmul.f32 %v14485_v63, %v2888_v15  ;;  %11653 = vmatprep.subr.mxu0 %v17669_v6 }
0x1177   :  { %2915 = vrot.lane.b32.xlu0 %v2899_v35, %s13338_s15  ;;  %11654 = vmatpush3.msra.mxu0 %v14179_v40  ;;  %v2870_v37 = vmul.f32 %v14485_v63, %v2858_v57 }
0x1178   :  { %2917 = vrot.lane.b32.xlu1 %v2900_v34, %s13338_s15  ;;  %11655 = vmatprep.subr.mxu0 %v17669_v6 }
0x1179   :  { %11656 = vmatpush3.msra.mxu0 %v14187_v13 }
0x117a   :  { %11671 = vmatprep.subr.mxu0 %v17669_v6 }
0x11e9   :  { %v2916_v12 = vpop.permute.xlu0 %2915 }
0x11ea   :  { %v14501_v55 = vadd.f32 %v2916_v12, %v2869_v41  ;;  %v2918_v40 = vpop.permute.xlu1 %2917 }
0x11eb   :  { %v14503_v9 = vadd.f32 %v2918_v40, %v2870_v37 }
0x11ec   :  { %12691 = vtanh.f32 %v14501_v55 }
0x11ed   :  { %12693 = vtanh.f32 %v14503_v9 }
0x11ee   :  { %v3042_v13 = vpop.f32.mrf.mxu1 }
0x11ef   :  { %v3207_v18 = vrot.slane %v3042_v13, 3  ;;  %v3208_v0 = vrot.slane %v3042_v13, 4 }
0x11f0   :  { %v11626_v26 = vpop.f32.mrf.mxu1 }
0x11f1   :  { %v3219_v52 = vadd.f32 %v3207_v18, %v13757_v54  ;;  %v3220_v62 = vadd.f32 %v3208_v0, %v13761_v56 }
0x11f3   :  { %12695 = vtanh.f32 %v3219_v52  ;;  %v10719_v51 = vmul.f32 -1.442695, %v3219_v52  ;;  %v10720_v58 = vmul.f32 -1.442695, %v3220_v62 }
0x11f4   :  { %12697 = vtanh.f32 %v3220_v62 }
0x11f9   :  { %v12692_v48 = vpop.eup %12691 }
0x11fa   :  { %v12694_v7 = vpop.eup %12693  ;;  %2951 = vrot.lane.b32.xlu0 %v12692_v48, %s13337_s14 }
0x11fb   :  { %2953 = vrot.lane.b32.xlu1 %v12694_v7, %s13337_s14 }
0x1200   :  { %v12696_v39 = vpop.eup %12695 }
0x1201   :  { %v12698_v23 = vpop.eup %12697  ;;  %3297 = vrot.lane.b32.xlu0 %v12696_v39, %s13337_s14 }
0x1202   :  { %3299 = vrot.lane.b32.xlu1 %v12698_v23, %s13337_s14 }
0x1232   :  { %v3121_v17 = vpop.f32.mrf.mxu0 }
0x1233   :  { %v3209_v32 = vrot.slane %v3121_v17, 3  ;;  %v3210_v10 = vrot.slane %v3121_v17, 4 }
0x1234   :  { %v11637_v14 = vpop.f32.mrf.mxu0 }
0x1235   :  { %v3221_v22 = vadd.f32 %v3209_v32, %v13796_v11  ;;  %v3222_v30 = vadd.f32 %v3210_v10, %v13800_v21 }
0x1237   :  { %12699 = vtanh.f32 %v3221_v22  ;;  %v10722_v26 = vmul.f32 -1.442695, %v3222_v30 }
0x1238   :  { %12701 = vtanh.f32 %v3222_v30 }
0x1239   :  { %12703 = vpow2.f32 %v10719_v51 }
0x123a   :  { %12705 = vpow2.f32 %v10720_v58 }
0x1244   :  { %v12700_v61 = vpop.eup %12699 }
0x1245   :  { %v12702_v33 = vpop.eup %12701  ;;  %3301 = vrot.lane.b32.xlu0 %v12700_v61, %s13337_s14  ;;  %v3274_v61 = vrot.slane %v14416_v16, 7 }
0x1246   :  { %3303 = vrot.lane.b32.xlu1 %v12702_v33, %s13337_s14  ;;  %v12704_v20 = vpop.eup %12703 }
0x1247   :  { %v12706_v27 = vpop.eup %12705  ;;  %v3243_v1 = vadd.f32 1.0, %v12704_v20 }
0x1248   :  { %v3244_v59 = vadd.f32 1.0, %v12706_v27 }
0x1249   :  { %12707 = vrcp.f32 %v3243_v1  ;;  %v3276_v1 = vrot.slane %v14433_v4, 7 }
0x124a   :  { %12709 = vrcp.f32 %v3244_v59 }
0x1256   :  { %v14528_v13 = vpop.eup %12707 }
0x1257   :  { %v14531_v18 = vpop.eup %12709 }
0x1258   :  { %v3286_v51 = vmul.f32 %v14531_v18, %v3274_v61 }
0x126c   :  { %v2952_v35 = vpop.permute.xlu0 %2951 }
0x126d   :  { %v2965_v15 = vmul.f32 %v14482_v42, %v2952_v35  ;;  %v2954_v34 = vpop.permute.xlu1 %2953 }
0x126e   :  { %v2966_v2 = vmul.f32 %v14485_v63, %v2954_v34 }
0x126f   :  { %v3127_v57 = vrot.slane %v2965_v15, 4  ;;  %v14521_v41 = vsel %vm7583_vm10, %v14380_v19, %v2965_v15 }
0x1270   :  { %v3128_v12 = vrot.slane %v2966_v2, 3  ;;  %v14525_v37 = vsel %vm7583_vm10, %v14384_v60, %v2966_v2  ;;  %v10721_v60 = vmul.f32 -1.442695, %v3221_v22  ;;  %v3273_v22 = vrot.slane %v14413_v38, 7 }
0x1272   :  { %v3129_v40 = vsel %vm1298_vm6, %v3128_v12, %v3127_v57  ;;  %12711 = vpow2.f32 %v10721_v60  ;;  %v3285_v33 = vmul.f32 %v14528_v13, %v3273_v22 }
0x1273   :  { %3130 = vrot.lane.b32.xlu0 %v3129_v40, %s13338_s15  ;;  %v3298_v42 = vpop.permute.xlu0 %3297  ;;  %12713 = vpow2.f32 %v10722_v26 }
0x1274   :  { %v3315_v63 = vmul.f32 %v14528_v13, %v3298_v42  ;;  %v3300_v0 = vpop.permute.xlu1 %3299 }
0x1275   :  { %v3316_v19 = vmul.f32 %v14531_v18, %v3300_v0 }
0x1276   :  { %3327 = vrot.lane.b32.xlu1 %v3315_v63, %s13338_s15 }
0x1277   :  { %3329 = vrot.lane.b32.xlu0 %v3316_v19, %s13338_s15 }
0x127f   :  { %v12712_v52 = vpop.eup %12711 }
0x1280   :  { %v12714_v62 = vpop.eup %12713  ;;  %v3245_v48 = vadd.f32 1.0, %v12712_v52 }
0x1281   :  { %v3246_v7 = vadd.f32 1.0, %v12714_v62 }
0x1282   :  { %12715 = vrcp.f32 %v3245_v48 }
0x1283   :  { %12717 = vrcp.f32 %v3246_v7 }
0x128f   :  { %v14537_v39 = vpop.eup %12715 }
0x1290   :  { %v14539_v17 = vpop.eup %12717 }
0x1291   :  { %v3288_v59 = vmul.f32 %v14539_v17, %v3276_v1 }
0x12b7   :  { %v3302_v23 = vpop.permute.xlu0 %3301 }
0x12b8   :  { %v3317_v32 = vmul.f32 %v14537_v39, %v3302_v23  ;;  %v3304_v10 = vpop.permute.xlu1 %3303 }
0x12b9   :  { %v3318_v14 = vmul.f32 %v14539_v17, %v3304_v10 }
0x12ba   :  { %3331 = vrot.lane.b32.xlu1 %v3317_v32, %s13338_s15 }
0x12bb   :  { %3333 = vrot.lane.b32.xlu0 %v3318_v14, %s13338_s15 }
0x12e5   :  { %v3131_v30 = vpop.permute.xlu0 %3130 }
0x12e6   :  { %11647 = vmatmul.mubr.msk.f32.vlgmr.msra.gmra.mxu1 %vm919_vm7, %v3131_v30 }
0x12e7   :  { %11661 = vmatpush3.msra.mxu1 %v14252_v45  ;;  %11668 = vmatprep.mubr.msk.f32.mxu1 %vm13336_vm5, %v17669_v6 }
0x12e8   :  { %v3328_v58 = vpop.permute.xlu1 %3327  ;;  %11662 = vmatprep.subr.mxu1 %v17669_v6 }
0x12e9   :  { %v3330_v20 = vpop.permute.xlu0 %3329  ;;  %v14554_v27 = vadd.f32 %v3328_v58, %v3285_v33  ;;  %11663 = vmatpush3.msra.mxu1 %v14263_v29  ;;  %v3275_v29 = vrot.slane %v14431_v28, 7 }
0x12ea   :  { %v14557_v38 = vadd.f32 %v3330_v20, %v3286_v51  ;;  %11664 = vmatprep.subr.mxu1 %v17669_v6  ;;  %v14635_v51 = vld [vmem:[%s17651_s12 + $0x40] sm:$0xff] }
0x12eb   :  { %12719 = vtanh.f32 %v14554_v27  ;;  %11665 = vmatpush3.msra.mxu1 %v14272_v49  ;;  %v3287_v49 = vmul.f32 %v14537_v39, %v3275_v29 }
0x12ec   :  { %12721 = vtanh.f32 %v14557_v38  ;;  %11666 = vmatprep.subr.mxu1 %v17669_v6 }
0x12ed   :  { %11667 = vmatpush3.msra.mxu1 %v14280_v25 }
0x12ee   :  { %11682 = vmatprep.subr.mxu1 %v17669_v6 }
0x12f8   :  { %v12720_v45 = vpop.eup %12719 }
0x12f9   :  { %v12722_v16 = vpop.eup %12721  ;;  %3363 = vrot.lane.b32.xlu1 %v12720_v45, %s13337_s14 }
0x12fa   :  { %3365 = vrot.lane.b32.xlu0 %v12722_v16, %s13337_s14 }
0x132c   :  { %v3332_v35 = vpop.permute.xlu1 %3331 }
0x132d   :  { %v3334_v15 = vpop.permute.xlu0 %3333  ;;  %v14572_v34 = vadd.f32 %v3332_v35, %v3287_v49 }
0x132e   :  { %v14574_v25 = vadd.f32 %v3334_v15, %v3288_v59  ;;  %v14643_v59 = vld [vmem:[%s17651_s12 + $0x18] sm:$0xff] }
0x132f   :  { %12723 = vtanh.f32 %v14572_v34 }
0x1330   :  { %12725 = vtanh.f32 %v14574_v25 }
0x133c   :  { %v12724_v2 = vpop.eup %12723 }
0x133d   :  { %v12726_v57 = vpop.eup %12725  ;;  %3367 = vrot.lane.b32.xlu1 %v12724_v2, %s13337_s14 }
0x133e   :  { %3369 = vrot.lane.b32.xlu0 %v12726_v57, %s13337_s14 }
0x136b   :  { %v3364_v28 = vpop.permute.xlu1 %3363 }
0x136c   :  { %v3366_v4 = vpop.permute.xlu0 %3365  ;;  %v3381_v12 = vmul.f32 %v14528_v13, %v3364_v28 }
0x136d   :  { %v3382_v40 = vmul.f32 %v14531_v18, %v3366_v4  ;;  %v14657_v4 = vld [vmem:[%s17651_s12 + $0x10] sm:$0xff] }
0x136e   :  { %v3389_v42 = vrot.slane %v3381_v12, 5  ;;  %v14584_v63 = vsel %vm7586_vm11, %v14443_v36, %v3381_v12 }
0x136f   :  { %v3390_v0 = vrot.slane %v3382_v40, 4  ;;  %v14588_v19 = vsel %vm7586_vm11, %v14447_v46, %v3382_v40  ;;  %v14666_v40 = vld [vmem:[%s17651_s12 + $0x8] sm:$0xff] }
0x1371   :  { %v3391_v60 = vsel %vm1298_vm6, %v3390_v0, %v3389_v42  ;;  %v14674_v42 = vld [vmem:[%s17651_s12] sm:$0xff]  ;;  %v3277_v0 = vrot.slane %v14501_v55, 7 }
0x1372   :  { %3392 = vrot.lane.b32.xlu1 %v3391_v60, %s13338_s15  ;;  %v3278_v60 = vrot.slane %v14503_v9, 7 }
0x13a6   :  { %v3200_v26 = vpop.f32.mrf.mxu1 }
0x13a7   :  { %v3211_v52 = vrot.slane %v3200_v26, 3  ;;  %v3212_v62 = vrot.slane %v3200_v26, 4 }
0x13a8   :  { %v11648_v13 = vpop.f32.mrf.mxu1 }
0x13a9   :  { %v3223_v18 = vadd.f32 %v3211_v52, %v13788_v5  ;;  %v3224_v48 = vadd.f32 %v3212_v62, %v13826_v31 }
0x13ab   :  { %12727 = vtanh.f32 %v3223_v18  ;;  %v10723_v58 = vmul.f32 -1.442695, %v3223_v18  ;;  %v10724_v20 = vmul.f32 -1.442695, %v3224_v48 }
0x13ac   :  { %12729 = vtanh.f32 %v3224_v48 }
0x13ad   :  { %12731 = vpow2.f32 %v10723_v58 }
0x13ae   :  { %12733 = vpow2.f32 %v10724_v20 }
0x13af   :  { %v3368_v36 = vpop.permute.xlu1 %3367 }
0x13b0   :  { %v3370_v7 = vpop.permute.xlu0 %3369  ;;  %v3383_v23 = vmul.f32 %v14537_v39, %v3368_v36 }
0x13b1   :  { %v3384_v46 = vmul.f32 %v14539_v17, %v3370_v7  ;;  %v14628_v17 = vld [vmem:[%s17651_s12 + $0x48] sm:$0xff] }
0x13b2   :  { %v3468_v32 = vrot.slane %v3383_v23, 5  ;;  %v14598_v10 = vsel %vm7586_vm11, %v14457_v43, %v3383_v23  ;;  %v14612_v43 = vld [vmem:[%s17651_s12 + $0x58] sm:$0xff] }
0x13b3   :  { %v3469_v14 = vrot.slane %v3384_v46, 4  ;;  %v14602_v22 = vsel %vm7586_vm11, %v14461_v24, %v3384_v46  ;;  %v14621_v24 = vld [vmem:[%s17651_s12 + $0x50] sm:$0xff] }
0x13b5   :  { %v3470_v30 = vsel %vm1298_vm6, %v3469_v14, %v3468_v32 }
0x13b6   :  { %3471 = vrot.lane.b32.xlu0 %v3470_v30, %s13338_s15 }
0x13b8   :  { %v12728_v61 = vpop.eup %12727 }
0x13b9   :  { %v12730_v33 = vpop.eup %12729  ;;  %3305 = vrot.lane.b32.xlu1 %v12728_v61, %s13337_s14 }
0x13ba   :  { %3307 = vrot.lane.b32.xlu0 %v12730_v33, %s13337_s14  ;;  %v12732_v45 = vpop.eup %12731 }
0x13bb   :  { %v12734_v16 = vpop.eup %12733  ;;  %v3247_v29 = vadd.f32 1.0, %v12732_v45 }
0x13bc   :  { %v3248_v1 = vadd.f32 1.0, %v12734_v16 }
0x13bd   :  { %12735 = vrcp.f32 %v3247_v29 }
0x13be   :  { %12737 = vrcp.f32 %v3248_v1 }
0x13ca   :  { %v14648_v35 = vpop.eup %12735 }
0x13cb   :  { %v14651_v2 = vpop.eup %12737  ;;  %v3289_v26 = vmul.f32 %v14648_v35, %v3277_v0 }
0x13cc   :  { %v3290_v52 = vmul.f32 %v14651_v2, %v3278_v60 }
0x13e4   :  { %v3393_v39 = vpop.permute.xlu1 %3392 }
0x13e5   :  { %11658 = vmatmul.mubr.msk.f32.vlgmr.msra.gmra.mxu0 %vm919_vm7, %v3393_v39 }
0x13e6   :  { %11672 = vmatpush3.msra.mxu0 %v14612_v43  ;;  %11679 = vmatprep.mubr.msk.f32.mxu0 %vm13336_vm5, %v17669_v6 }
0x13e7   :  { %11673 = vmatprep.subr.mxu0 %v17669_v6 }
0x13e8   :  { %11674 = vmatpush3.msra.mxu0 %v14621_v24 }
0x13e9   :  { %11675 = vmatprep.subr.mxu0 %v17669_v6 }
0x13ea   :  { %11676 = vmatpush3.msra.mxu0 %v14628_v17 }
0x13eb   :  { %11677 = vmatprep.subr.mxu0 %v17669_v6 }
0x13ec   :  { %11678 = vmatpush3.msra.mxu0 %v14635_v51 }
0x13ed   :  { %11693 = vmatprep.subr.mxu0 %v17669_v6 }
0x1428   :  { %v3472_v49 = vpop.permute.xlu0 %3471 }
0x1429   :  { %11669 = vmatmul.mubr.msk.f32.vlgmr.msra.gmra.mxu1 %vm919_vm7, %v3472_v49 }
0x142a   :  { %11683 = vmatpush3.msra.mxu1 %v14643_v59  ;;  %11690 = vmatprep.mubr.msk.f32.mxu1 %vm13336_vm5, %v17669_v6 }
0x142b   :  { %v3306_v15 = vpop.permute.xlu1 %3305  ;;  %11684 = vmatprep.subr.mxu1 %v17669_v6 }
0x142c   :  { %v3308_v57 = vpop.permute.xlu0 %3307  ;;  %v3319_v28 = vmul.f32 %v14648_v35, %v3306_v15  ;;  %11685 = vmatpush3.msra.mxu1 %v14657_v4 }
0x142d   :  { %v3320_v12 = vmul.f32 %v14651_v2, %v3308_v57  ;;  %11686 = vmatprep.subr.mxu1 %v17669_v6 }
0x142e   :  { %3335 = vrot.lane.b32.xlu1 %v3319_v28, %s13338_s15  ;;  %11687 = vmatpush3.msra.mxu1 %v14666_v40 }
0x142f   :  { %3337 = vrot.lane.b32.xlu0 %v3320_v12, %s13338_s15  ;;  %11688 = vmatprep.subr.mxu1 %v17669_v6 }
0x1430   :  { %11689 = vmatpush3.msra.mxu1 %v14674_v42 }
0x1431   :  { %11704 = vmatprep.subr.mxu1 %v17669_v6 }
0x14a0   :  { %v3336_v62 = vpop.permute.xlu1 %3335 }
0x14a1   :  { %v3338_v13 = vpop.permute.xlu0 %3337  ;;  %v14682_v18 = vadd.f32 %v3336_v62, %v3289_v26 }
0x14a2   :  { %v14684_v48 = vadd.f32 %v3338_v13, %v3290_v52 }
0x14a3   :  { %12739 = vtanh.f32 %v14682_v18 }
0x14a4   :  { %12741 = vtanh.f32 %v14684_v48 }
0x14a5   :  { %v3462_v36 = vpop.f32.mrf.mxu0 }
0x14a6   :  { %v3627_v7 = vrot.slane %v3462_v36, 2  ;;  %v3628_v23 = vrot.slane %v3462_v36, 3 }
0x14a7   :  { %v11659_v55 = vpop.f32.mrf.mxu0 }
0x14a8   :  { %v3639_v9 = vadd.f32 %v3627_v7, %v13757_v54  ;;  %v3640_v46 = vadd.f32 %v3628_v23, %v13761_v56 }
0x14aa   :  { %12743 = vtanh.f32 %v3639_v9  ;;  %v10728_v49 = vmul.f32 -1.442695, %v3639_v9  ;;  %v10729_v15 = vmul.f32 -1.442695, %v3640_v46 }
0x14ab   :  { %12745 = vtanh.f32 %v3640_v46 }
0x14b0   :  { %v12740_v32 = vpop.eup %12739 }
0x14b1   :  { %v12742_v14 = vpop.eup %12741  ;;  %3371 = vrot.lane.b32.xlu1 %v12740_v32, %s13337_s14 }
0x14b2   :  { %3373 = vrot.lane.b32.xlu0 %v12742_v14, %s13337_s14 }
0x14b7   :  { %v12744_v30 = vpop.eup %12743 }
0x14b8   :  { %v12746_v61 = vpop.eup %12745  ;;  %3717 = vrot.lane.b32.xlu1 %v12744_v30, %s13337_s14 }
0x14b9   :  { %3719 = vrot.lane.b32.xlu0 %v12746_v61, %s13337_s14 }
0x14e9   :  { %v3541_v33 = vpop.f32.mrf.mxu1 }
0x14ea   :  { %v3629_v39 = vrot.slane %v3541_v33, 2  ;;  %v3630_v58 = vrot.slane %v3541_v33, 3 }
0x14eb   :  { %v11670_v20 = vpop.f32.mrf.mxu1 }
0x14ec   :  { %v3641_v45 = vadd.f32 %v3629_v39, %v13796_v11  ;;  %v3642_v16 = vadd.f32 %v3630_v58, %v13800_v21 }
0x14ee   :  { %12747 = vtanh.f32 %v3641_v45  ;;  %v10731_v14 = vmul.f32 -1.442695, %v3642_v16 }
0x14ef   :  { %12749 = vtanh.f32 %v3642_v16 }
0x14f0   :  { %12751 = vpow2.f32 %v10728_v49 }
0x14f1   :  { %12753 = vpow2.f32 %v10729_v15 }
0x14fb   :  { %v12748_v29 = vpop.eup %12747 }
0x14fc   :  { %v12750_v1 = vpop.eup %12749  ;;  %3721 = vrot.lane.b32.xlu1 %v12748_v29, %s13337_s14 }
0x14fd   :  { %3723 = vrot.lane.b32.xlu0 %v12750_v1, %s13337_s14  ;;  %v12752_v57 = vpop.eup %12751 }
0x14fe   :  { %v12754_v28 = vpop.eup %12753  ;;  %v3663_v12 = vadd.f32 1.0, %v12752_v57  ;;  %v3694_v57 = vrot.slane %v14557_v38, 7 }
0x14ff   :  { %v3664_v0 = vadd.f32 1.0, %v12754_v28 }
0x1500   :  { %12755 = vrcp.f32 %v3663_v12  ;;  %v14733_v12 = vld [vmem:[%s17651_s12 + $0x38] sm:$0xff] }
0x1501   :  { %12757 = vrcp.f32 %v3664_v0 }
0x150d   :  { %v14709_v9 = vpop.eup %12755 }
0x1523   :  { %v3372_v60 = vpop.permute.xlu1 %3371 }
0x1524   :  { %v3374_v26 = vpop.permute.xlu0 %3373  ;;  %v3385_v52 = vmul.f32 %v14648_v35, %v3372_v60  ;;  %v14712_v35 = vpop.eup %12757 }
0x1525   :  { %v3386_v62 = vmul.f32 %v14651_v2, %v3374_v26  ;;  %v14745_v26 = vld [vmem:[%s17651_s12 + $0x30] sm:$0xff] }
0x1526   :  { %v3547_v13 = vrot.slane %v3385_v52, 5  ;;  %v14702_v36 = vsel %vm7586_vm11, %v14521_v41, %v3385_v52 }
0x1527   :  { %v3548_v7 = vrot.slane %v3386_v62, 4  ;;  %v14706_v23 = vsel %vm7586_vm11, %v14525_v37, %v3386_v62  ;;  %v10730_v37 = vmul.f32 -1.442695, %v3641_v45  ;;  %v3693_v45 = vrot.slane %v14554_v27, 7  ;;  %v14755_v62 = vld [vmem:[%s17651_s12 + $0x28] sm:$0xff] }
0x1528   :  { %v3706_v27 = vmul.f32 %v14712_v35, %v3694_v57 }
0x1529   :  { %v3549_v55 = vsel %vm1298_vm6, %v3548_v7, %v3547_v13  ;;  %12759 = vpow2.f32 %v10730_v37  ;;  %v3705_v28 = vmul.f32 %v14709_v9, %v3693_v45  ;;  %v14763_v13 = vld [vmem:[%s17651_s12 + $0x20] sm:$0xff] }
0x152a   :  { %3550 = vrot.lane.b32.xlu1 %v3549_v55, %s13338_s15  ;;  %v3718_v46 = vpop.permute.xlu1 %3717  ;;  %12761 = vpow2.f32 %v10731_v14 }
0x152b   :  { %v3720_v2 = vpop.permute.xlu0 %3719  ;;  %v3735_v32 = vmul.f32 %v14709_v9, %v3718_v46  ;;  %v3695_v46 = vrot.slane %v14572_v34, 7 }
0x152c   :  { %v3736_v41 = vmul.f32 %v14712_v35, %v3720_v2  ;;  %v3696_v2 = vrot.slane %v14574_v25, 7 }
0x152d   :  { %3747 = vrot.lane.b32.xlu0 %v3735_v32, %s13338_s15 }
0x152e   :  { %3749 = vrot.lane.b32.xlu1 %v3736_v41, %s13338_s15 }
0x1536   :  { %v12760_v30 = vpop.eup %12759 }
0x1537   :  { %v12762_v61 = vpop.eup %12761  ;;  %v3665_v33 = vadd.f32 1.0, %v12760_v30 }
0x1538   :  { %v3666_v39 = vadd.f32 1.0, %v12762_v61 }
0x1539   :  { %12763 = vrcp.f32 %v3665_v33 }
0x153a   :  { %12765 = vrcp.f32 %v3666_v39 }
0x1546   :  { %v14718_v58 = vpop.eup %12763 }
0x1547   :  { %v14720_v29 = vpop.eup %12765  ;;  %v3707_v32 = vmul.f32 %v14718_v58, %v3695_v46 }
0x1548   :  { %v3708_v37 = vmul.f32 %v14720_v29, %v3696_v2 }
0x156e   :  { %v3722_v20 = vpop.permute.xlu1 %3721 }
0x156f   :  { %v3724_v1 = vpop.permute.xlu0 %3723  ;;  %v3737_v49 = vmul.f32 %v14718_v58, %v3722_v20 }
0x1570   :  { %v3738_v15 = vmul.f32 %v14720_v29, %v3724_v1 }
0x1571   :  { %3751 = vrot.lane.b32.xlu0 %v3737_v49, %s13338_s15 }
0x1572   :  { %3753 = vrot.lane.b32.xlu1 %v3738_v15, %s13338_s15 }
0x159c   :  { %v3551_v16 = vpop.permute.xlu1 %3550 }
0x159d   :  { %11680 = vmatmul.mubr.msk.f32.vlgmr.msra.gmra.mxu0 %vm919_vm7, %v3551_v16 }
0x159e   :  { %11694 = vmatpush3.msra.mxu0 %v14733_v12  ;;  %11701 = vmatprep.mubr.msk.f32.mxu0 %vm13336_vm5, %v17669_v6 }
0x159f   :  { %v3748_v0 = vpop.permute.xlu0 %3747  ;;  %11695 = vmatprep.subr.mxu0 %v17669_v6 }
0x15a0   :  { %v14740_v38 = vadd.f32 %v3748_v0, %v3705_v28  ;;  %v3750_v60 = vpop.permute.xlu1 %3749  ;;  %11696 = vmatpush3.msra.mxu0 %v14745_v26 }
0x15a1   :  { %v14748_v52 = vadd.f32 %v3750_v60, %v3706_v27  ;;  %11697 = vmatprep.subr.mxu0 %v17669_v6 }
0x15a2   :  { %12767 = vtanh.f32 %v14740_v38  ;;  %11698 = vmatpush3.msra.mxu0 %v14755_v62 }
0x15a3   :  { %12769 = vtanh.f32 %v14748_v52  ;;  %11699 = vmatprep.subr.mxu0 %v17669_v6 }
0x15a4   :  { %11700 = vmatpush3.msra.mxu0 %v14763_v13 }
0x15a5   :  { %11715 = vmatprep.subr.mxu0 %v17669_v6 }
0x15af   :  { %v12768_v7 = vpop.eup %12767 }
0x15b0   :  { %v12770_v55 = vpop.eup %12769  ;;  %3783 = vrot.lane.b32.xlu0 %v12768_v7, %s13337_s14 }
0x15b1   :  { %3785 = vrot.lane.b32.xlu1 %v12770_v55, %s13337_s14 }
0x15e3   :  { %v3752_v41 = vpop.permute.xlu0 %3751 }
0x15e4   :  { %v14773_v14 = vadd.f32 %v3752_v41, %v3707_v32  ;;  %v3754_v30 = vpop.permute.xlu1 %3753 }
0x15e5   :  { %v14775_v61 = vadd.f32 %v3754_v30, %v3708_v37 }
0x15e6   :  { %12771 = vtanh.f32 %v14773_v14 }
0x15e7   :  { %12773 = vtanh.f32 %v14775_v61 }
0x15f3   :  { %v12772_v33 = vpop.eup %12771 }
0x15f4   :  { %v12774_v39 = vpop.eup %12773  ;;  %3787 = vrot.lane.b32.xlu0 %v12772_v33, %s13337_s14 }
0x15f5   :  { %3789 = vrot.lane.b32.xlu1 %v12774_v39, %s13337_s14 }
0x1622   :  { %v3784_v34 = vpop.permute.xlu0 %3783 }
0x1623   :  { %v3801_v25 = vmul.f32 %v14709_v9, %v3784_v34  ;;  %v3786_v20 = vpop.permute.xlu1 %3785 }
0x1624   :  { %v3802_v1 = vmul.f32 %v14712_v35, %v3786_v20 }
0x1625   :  { %v3809_v49 = vrot.slane %v3801_v25, 6  ;;  %v14785_v15 = vsel %vm7589_vm12, %v14584_v63, %v3801_v25 }
0x1626   :  { %v3810_v45 = vrot.slane %v3802_v1, 5  ;;  %v14789_v16 = vsel %vm7589_vm12, %v14588_v19, %v3802_v1 }
0x1628   :  { %v3811_v57 = vsel %vm1298_vm6, %v3810_v45, %v3809_v49 }
0x1629   :  { %3812 = vrot.lane.b32.xlu0 %v3811_v57, %s13338_s15 }
0x165d   :  { %v3620_v28 = vpop.f32.mrf.mxu0 }
0x165e   :  { %v3631_v0 = vrot.slane %v3620_v28, 2  ;;  %v3632_v9 = vrot.slane %v3620_v28, 3 }
0x165f   :  { %v11681_v27 = vpop.f32.mrf.mxu0 }
0x1660   :  { %v3643_v35 = vadd.f32 %v3631_v0, %v13788_v5  ;;  %v3644_v60 = vadd.f32 %v3632_v9, %v13826_v31  ;;  %v3697_v9 = vrot.slane %v14682_v18, 7  ;;  %v3698_v27 = vrot.slane %v14684_v48, 7 }
0x1662   :  { %12775 = vtanh.f32 %v3643_v35 }
0x1663   :  { %12777 = vtanh.f32 %v3644_v60 }
0x1666   :  { %v3788_v63 = vpop.permute.xlu0 %3787 }
0x1667   :  { %v3803_v7 = vmul.f32 %v14718_v58, %v3788_v63  ;;  %v3790_v55 = vpop.permute.xlu1 %3789 }
0x1668   :  { %v3804_v19 = vmul.f32 %v14720_v29, %v3790_v55 }
0x1669   :  { %v3888_v46 = vrot.slane %v3803_v7, 6  ;;  %v14799_v2 = vsel %vm7589_vm12, %v14598_v10, %v3803_v7  ;;  %v10732_v10 = vmul.f32 -1.442695, %v3643_v35 }
0x166a   :  { %v3889_v32 = vrot.slane %v3804_v19, 5  ;;  %v14803_v41 = vsel %vm7589_vm12, %v14602_v22, %v3804_v19  ;;  %v10733_v22 = vmul.f32 -1.442695, %v3644_v60 }
0x166b   :  { %12779 = vpow2.f32 %v10732_v10 }
0x166c   :  { %v3890_v37 = vsel %vm1298_vm6, %v3889_v32, %v3888_v46  ;;  %12781 = vpow2.f32 %v10733_v22 }
0x166d   :  { %3891 = vrot.lane.b32.xlu1 %v3890_v37, %s13338_s15 }
0x166f   :  { %v12776_v30 = vpop.eup %12775 }
0x1670   :  { %v12778_v33 = vpop.eup %12777  ;;  %3725 = vrot.lane.b32.xlu0 %v12776_v30, %s13337_s14 }
0x1671   :  { %3727 = vrot.lane.b32.xlu1 %v12778_v33, %s13337_s14 }
0x1678   :  { %v12780_v29 = vpop.eup %12779 }
0x1679   :  { %v12782_v39 = vpop.eup %12781  ;;  %v3667_v34 = vadd.f32 1.0, %v12780_v29 }
0x167a   :  { %v3668_v25 = vadd.f32 1.0, %v12782_v39 }
0x167b   :  { %12783 = vrcp.f32 %v3667_v34 }
0x167c   :  { %12785 = vrcp.f32 %v3668_v25 }
0x1688   :  { %v14824_v1 = vpop.eup %12783 }
0x1689   :  { %v14827_v45 = vpop.eup %12785  ;;  %v3709_v35 = vmul.f32 %v14824_v1, %v3697_v9 }
0x168a   :  { %v3710_v63 = vmul.f32 %v14827_v45, %v3698_v27 }
0x169b   :  { %v3813_v58 = vpop.permute.xlu0 %3812 }
0x169c   :  { %11691 = vmatmul.mubr.msk.f32.vlgmr.msra.gmra.mxu1 %vm919_vm7, %v3813_v58 }
0x169d   :  { %11705 = vmatpush3.msra.mxu1 %v14612_v43  ;;  %11712 = vmatprep.mubr.msk.f32.mxu1 %vm13336_vm5, %v17669_v6 }
0x169e   :  { %11706 = vmatprep.subr.mxu1 %v17669_v6 }
0x169f   :  { %11707 = vmatpush3.msra.mxu1 %v14621_v24 }
0x16a0   :  { %11708 = vmatprep.subr.mxu1 %v17669_v6 }
0x16a1   :  { %11709 = vmatpush3.msra.mxu1 %v14628_v17 }
0x16a2   :  { %11710 = vmatprep.subr.mxu1 %v17669_v6 }
0x16a3   :  { %11711 = vmatpush3.msra.mxu1 %v14635_v51 }
0x16a4   :  { %11726 = vmatprep.subr.mxu1 %v17669_v6 }
0x16df   :  { %v3892_v20 = vpop.permute.xlu1 %3891 }
0x16e0   :  { %11702 = vmatmul.mubr.msk.f32.vlgmr.msra.gmra.mxu0 %vm919_vm7, %v3892_v20 }
0x16e1   :  { %11716 = vmatpush3.msra.mxu0 %v14643_v59  ;;  %11723 = vmatprep.mubr.msk.f32.mxu0 %vm13336_vm5, %v17669_v6 }
0x16e2   :  { %v3726_v49 = vpop.permute.xlu0 %3725  ;;  %11717 = vmatprep.subr.mxu0 %v17669_v6 }
0x16e3   :  { %v3739_v57 = vmul.f32 %v14824_v1, %v3726_v49  ;;  %v3728_v28 = vpop.permute.xlu1 %3727  ;;  %11718 = vmatpush3.msra.mxu0 %v14657_v4 }
0x16e4   :  { %v3740_v0 = vmul.f32 %v14827_v45, %v3728_v28  ;;  %11719 = vmatprep.subr.mxu0 %v17669_v6 }
0x16e5   :  { %3755 = vrot.lane.b32.xlu0 %v3739_v57, %s13338_s15  ;;  %11720 = vmatpush3.msra.mxu0 %v14666_v40 }
0x16e6   :  { %3757 = vrot.lane.b32.xlu1 %v3740_v0, %s13338_s15  ;;  %11721 = vmatprep.subr.mxu0 %v17669_v6 }
0x16e7   :  { %11722 = vmatpush3.msra.mxu0 %v14674_v42 }
0x16e8   :  { %11737 = vmatprep.subr.mxu0 %v17669_v6 }
0x1757   :  { %v3756_v60 = vpop.permute.xlu0 %3755 }
0x1758   :  { %v14843_v7 = vadd.f32 %v3756_v60, %v3709_v35  ;;  %v3758_v55 = vpop.permute.xlu1 %3757 }
0x1759   :  { %v14845_v19 = vadd.f32 %v3758_v55, %v3710_v63 }
0x175a   :  { %12787 = vtanh.f32 %v14843_v7 }
0x175b   :  { %12789 = vtanh.f32 %v14845_v19 }
0x175c   :  { %v3882_v46 = vpop.f32.mrf.mxu1 }
0x175d   :  { %v4047_v32 = vrot.slane %v3882_v46, 1  ;;  %v4048_v37 = vrot.slane %v3882_v46, 2 }
0x175e   :  { %v11692_v18 = vpop.f32.mrf.mxu1 }
0x175f   :  { %v4059_v48 = vadd.f32 %v4047_v32, %v13757_v54  ;;  %v4060_v30 = vadd.f32 %v4048_v37, %v13761_v56 }
0x1761   :  { %12791 = vtanh.f32 %v4059_v48  ;;  %v10737_v57 = vmul.f32 -1.442695, %v4059_v48  ;;  %v10738_v28 = vmul.f32 -1.442695, %v4060_v30 }
0x1762   :  { %12793 = vtanh.f32 %v4060_v30 }
0x1767   :  { %v12788_v33 = vpop.eup %12787 }
0x1768   :  { %v12790_v58 = vpop.eup %12789  ;;  %3791 = vrot.lane.b32.xlu0 %v12788_v33, %s13337_s14 }
0x1769   :  { %3793 = vrot.lane.b32.xlu1 %v12790_v58, %s13337_s14 }
0x176e   :  { %v12792_v10 = vpop.eup %12791 }
0x176f   :  { %v12794_v22 = vpop.eup %12793  ;;  %4137 = vrot.lane.b32.xlu0 %v12792_v10, %s13337_s14 }
0x1770   :  { %4139 = vrot.lane.b32.xlu1 %v12794_v22, %s13337_s14 }
0x17a0   :  { %v3961_v29 = vpop.f32.mrf.mxu0 }
0x17a1   :  { %v4049_v39 = vrot.slane %v3961_v29, 1  ;;  %v4050_v34 = vrot.slane %v3961_v29, 2 }
0x17a2   :  { %v11703_v54 = vpop.f32.mrf.mxu0 }
0x17a3   :  { %v4061_v56 = vadd.f32 %v4049_v39, %v13796_v11  ;;  %v4062_v25 = vadd.f32 %v4050_v34, %v13800_v21 }
0x17a5   :  { %12795 = vtanh.f32 %v4061_v56  ;;  %v10740_v58 = vmul.f32 -1.442695, %v4062_v25 }
0x17a6   :  { %12797 = vtanh.f32 %v4062_v25 }
0x17a7   :  { %12799 = vpow2.f32 %v10737_v57 }
0x17a8   :  { %12801 = vpow2.f32 %v10738_v28 }
0x17b2   :  { %v12796_v20 = vpop.eup %12795 }
0x17b3   :  { %v12798_v49 = vpop.eup %12797  ;;  %4141 = vrot.lane.b32.xlu0 %v12796_v20, %s13337_s14 }
0x17b4   :  { %4143 = vrot.lane.b32.xlu1 %v12798_v49, %s13337_s14  ;;  %v12800_v0 = vpop.eup %12799 }
0x17b5   :  { %v12802_v9 = vpop.eup %12801  ;;  %v4083_v27 = vadd.f32 1.0, %v12800_v0  ;;  %v4114_v0 = vrot.slane %v14748_v52, 7 }
0x17b6   :  { %v4084_v35 = vadd.f32 1.0, %v12802_v9 }
0x17b7   :  { %12803 = vrcp.f32 %v4083_v27 }
0x17b8   :  { %12805 = vrcp.f32 %v4084_v35 }
0x17c4   :  { %v14870_v48 = vpop.eup %12803 }
0x17c5   :  { %v14873_v30 = vpop.eup %12805 }
0x17c6   :  { %v4126_v27 = vmul.f32 %v14873_v30, %v4114_v0 }
0x17da   :  { %v3792_v11 = vpop.permute.xlu0 %3791 }
0x17db   :  { %v3805_v21 = vmul.f32 %v14824_v1, %v3792_v11  ;;  %v3794_v60 = vpop.permute.xlu1 %3793 }
0x17dc   :  { %v3806_v63 = vmul.f32 %v14827_v45, %v3794_v60 }
0x17dd   :  { %v3967_v55 = vrot.slane %v3805_v21, 6  ;;  %v14863_v46 = vsel %vm7589_vm12, %v14702_v36, %v3805_v21 }
0x17de   :  { %v3968_v32 = vrot.slane %v3806_v63, 5  ;;  %v14867_v37 = vsel %vm7589_vm12, %v14706_v23, %v3806_v63  ;;  %v10739_v23 = vmul.f32 -1.442695, %v4061_v56  ;;  %v4113_v56 = vrot.slane %v14740_v38, 7 }
0x17df   :  { %v4115_v63 = vrot.slane %v14773_v14, 7 }
0x17e0   :  { %v3969_v18 = vsel %vm1298_vm6, %v3968_v32, %v3967_v55  ;;  %12807 = vpow2.f32 %v10739_v23  ;;  %v4125_v9 = vmul.f32 %v14870_v48, %v4113_v56  ;;  %v4116_v55 = vrot.slane %v14775_v61, 7 }
0x17e1   :  { %3970 = vrot.lane.b32.xlu0 %v3969_v18, %s13338_s15  ;;  %v4138_v1 = vpop.permute.xlu0 %4137  ;;  %12809 = vpow2.f32 %v10740_v58 }
0x17e2   :  { %v4155_v45 = vmul.f32 %v14870_v48, %v4138_v1  ;;  %v4140_v33 = vpop.permute.xlu1 %4139 }
0x17e3   :  { %v4156_v36 = vmul.f32 %v14873_v30, %v4140_v33 }
0x17e4   :  { %4167 = vrot.lane.b32.xlu1 %v4155_v45, %s13338_s15 }
0x17e5   :  { %4169 = vrot.lane.b32.xlu0 %v4156_v36, %s13338_s15 }
0x17ed   :  { %v12808_v10 = vpop.eup %12807 }
0x17ee   :  { %v12810_v22 = vpop.eup %12809  ;;  %v4085_v29 = vadd.f32 1.0, %v12808_v10 }
0x17ef   :  { %v4086_v39 = vadd.f32 1.0, %v12810_v22 }
0x17f0   :  { %12811 = vrcp.f32 %v4085_v29 }
0x17f1   :  { %12813 = vrcp.f32 %v4086_v39 }
0x17fd   :  { %v14879_v34 = vpop.eup %12811 }
0x17fe   :  { %v14881_v20 = vpop.eup %12813  ;;  %v4127_v32 = vmul.f32 %v14879_v34, %v4115_v63 }
0x17ff   :  { %v4128_v18 = vmul.f32 %v14881_v20, %v4116_v55 }
0x1825   :  { %v4142_v54 = vpop.permute.xlu0 %4141 }
0x1826   :  { %v4157_v49 = vmul.f32 %v14879_v34, %v4142_v54  ;;  %v4144_v57 = vpop.permute.xlu1 %4143 }
0x1827   :  { %v4158_v28 = vmul.f32 %v14881_v20, %v4144_v57 }
0x1828   :  { %4171 = vrot.lane.b32.xlu1 %v4157_v49, %s13338_s15 }
0x1829   :  { %4173 = vrot.lane.b32.xlu0 %v4158_v28, %s13338_s15 }
0x1853   :  { %v3971_v25 = vpop.permute.xlu0 %3970 }
0x1854   :  { %11713 = vmatmul.mubr.msk.f32.vlgmr.msra.gmra.mxu1 %vm919_vm7, %v3971_v25 }
0x1855   :  { %11727 = vmatpush3.msra.mxu1 %v14733_v12  ;;  %11734 = vmatprep.mubr.msk.f32.mxu1 %vm13336_vm5, %v17669_v6 }
0x1856   :  { %v4168_v35 = vpop.permute.xlu1 %4167  ;;  %11728 = vmatprep.subr.mxu1 %v17669_v6 }
0x1857   :  { %v4170_v11 = vpop.permute.xlu0 %4169  ;;  %v14896_v21 = vadd.f32 %v4168_v35, %v4125_v9  ;;  %11729 = vmatpush3.msra.mxu1 %v14745_v26 }
0x1858   :  { %v14899_v38 = vadd.f32 %v4170_v11, %v4126_v27  ;;  %11730 = vmatprep.subr.mxu1 %v17669_v6 }
0x1859   :  { %12815 = vtanh.f32 %v14896_v21  ;;  %11731 = vmatpush3.msra.mxu1 %v14755_v62 }
0x185a   :  { %12817 = vtanh.f32 %v14899_v38  ;;  %11732 = vmatprep.subr.mxu1 %v17669_v6 }
0x185b   :  { %11733 = vmatpush3.msra.mxu1 %v14763_v13 }
0x185c   :  { %11748 = vmatprep.subr.mxu1 %v17669_v6 }
0x1866   :  { %v12816_v52 = vpop.eup %12815 }
0x1867   :  { %v12818_v60 = vpop.eup %12817  ;;  %4203 = vrot.lane.b32.xlu1 %v12816_v52, %s13337_s14 }
0x1868   :  { %4205 = vrot.lane.b32.xlu0 %v12818_v60, %s13337_s14 }
0x189a   :  { %v4172_v1 = vpop.permute.xlu1 %4171 }
0x189b   :  { %v4174_v45 = vpop.permute.xlu0 %4173  ;;  %v14914_v33 = vadd.f32 %v4172_v1, %v4127_v32 }
0x189c   :  { %v14916_v36 = vadd.f32 %v4174_v45, %v4128_v18 }
0x189d   :  { %12819 = vtanh.f32 %v14914_v33 }
0x189e   :  { %12821 = vtanh.f32 %v14916_v36 }
0x18aa   :  { %v12820_v23 = vpop.eup %12819 }
0x18ab   :  { %v12822_v58 = vpop.eup %12821  ;;  %4207 = vrot.lane.b32.xlu1 %v12820_v23, %s13337_s14 }
0x18ac   :  { %4209 = vrot.lane.b32.xlu0 %v12822_v58, %s13337_s14  ;;  %v4118_v58 = vrot.slane %v14845_v19, 7 }
0x18d9   :  { %v4204_v14 = vpop.permute.xlu1 %4203 }
0x18da   :  { %v4206_v61 = vpop.permute.xlu0 %4205  ;;  %v4221_v10 = vmul.f32 %v14870_v48, %v4204_v14 }
0x18db   :  { %v4222_v22 = vmul.f32 %v14873_v30, %v4206_v61 }
0x18dc   :  { %v4229_v29 = vrot.slane %v4221_v10, 7  ;;  %v14926_v39 = vsel %vm99_vm0, %v14785_v15, %v4221_v10 }
0x18dd   :  { %v4230_v54 = vrot.slane %v4222_v22, 6  ;;  %v14930_v49 = vsel %vm99_vm0, %v14789_v16, %v4222_v22 }
0x18df   :  { %v4231_v57 = vsel %vm1298_vm6, %v4230_v54, %v4229_v29 }
0x18e0   :  { %4232 = vrot.lane.b32.xlu1 %v4231_v57, %s13338_s15 }
0x1914   :  { %v4040_v28 = vpop.f32.mrf.mxu1 }
0x1915   :  { %v4051_v56 = vrot.slane %v4040_v28, 1  ;;  %v4052_v25 = vrot.slane %v4040_v28, 2 }
0x1916   :  { %v11714_v48 = vpop.f32.mrf.mxu1 }
0x1917   :  { %v4063_v30 = vadd.f32 %v4051_v56, %v13788_v5  ;;  %v4064_v0 = vadd.f32 %v4052_v25, %v13826_v31 }
0x1919   :  { %12823 = vtanh.f32 %v4063_v30 }
0x191a   :  { %12825 = vtanh.f32 %v4064_v0 }
0x191d   :  { %v4208_v15 = vpop.permute.xlu1 %4207 }
0x191e   :  { %v4210_v9 = vpop.permute.xlu0 %4209  ;;  %v4223_v27 = vmul.f32 %v14879_v34, %v4208_v15 }
0x191f   :  { %v4224_v16 = vmul.f32 %v14881_v20, %v4210_v9 }
0x1920   :  { %v4308_v35 = vrot.slane %v4223_v27, 7  ;;  %v14940_v11 = vsel %vm99_vm0, %v14799_v2, %v4223_v27  ;;  %v10741_v2 = vmul.f32 -1.442695, %v4063_v30 }
0x1921   :  { %v4309_v52 = vrot.slane %v4224_v16, 6  ;;  %v14944_v60 = vsel %vm99_vm0, %v14803_v41, %v4224_v16  ;;  %v10742_v41 = vmul.f32 -1.442695, %v4064_v0 }
0x1922   :  { %12827 = vpow2.f32 %v10741_v2 }
0x1923   :  { %v4310_v5 = vsel %vm1298_vm6, %v4309_v52, %v4308_v35  ;;  %12829 = vpow2.f32 %v10742_v41 }
0x1924   :  { %4311 = vrot.lane.b32.xlu0 %v4310_v5, %s13338_s15 }
0x1926   :  { %v12824_v31 = vpop.eup %12823 }
0x1927   :  { %v12826_v63 = vpop.eup %12825  ;;  %4145 = vrot.lane.b32.xlu1 %v12824_v31, %s13337_s14 }
0x1928   :  { %4147 = vrot.lane.b32.xlu0 %v12826_v63, %s13337_s14 }
0x1952   :  { %v4233_v34 = vpop.permute.xlu1 %4232 }
0x1953   :  { %11724 = vmatmul.mubr.msk.f32.vlgmr.msra.gmra.mxu0 %vm919_vm7, %v4233_v34 }
0x1954   :  { %11738 = vmatpush3.msra.mxu0 %v14612_v43  ;;  %11745 = vmatprep.mubr.msk.f32.mxu0 %vm13336_vm5, %v17669_v6  ;;  %v12828_v43 = vpop.eup %12827 }
0x1955   :  { %11739 = vmatprep.subr.mxu0 %v17669_v6  ;;  %v12830_v20 = vpop.eup %12829  ;;  %v4087_v55 = vadd.f32 1.0, %v12828_v43 }
0x1956   :  { %11740 = vmatpush3.msra.mxu0 %v14621_v24  ;;  %v4088_v32 = vadd.f32 1.0, %v12830_v20 }
0x1957   :  { %11741 = vmatprep.subr.mxu0 %v17669_v6  ;;  %12831 = vrcp.f32 %v4087_v55 }
0x1958   :  { %11742 = vmatpush3.msra.mxu0 %v14628_v17  ;;  %12833 = vrcp.f32 %v4088_v32 }
0x1959   :  { %11743 = vmatprep.subr.mxu0 %v17669_v6 }
0x195a   :  { %11744 = vmatpush3.msra.mxu0 %v14635_v51 }
0x195b   :  { %11759 = vmatprep.subr.mxu0 %v17669_v6 }
0x1964   :  { %v14965_v17 = vpop.eup %12831 }
0x1965   :  { %v12834_v18 = vpop.eup %12833 }
0x1966   :  { %v4130_v14 = vmul.f32 %v12834_v18, %v4118_v58 }
0x1996   :  { %v4312_v24 = vpop.permute.xlu0 %4311 }
0x1997   :  { %11735 = vmatmul.mubr.msk.f32.vlgmr.msra.gmra.mxu1 %vm919_vm7, %v4312_v24 }
0x1998   :  { %11749 = vmatpush3.msra.mxu1 %v14643_v59  ;;  %11756 = vmatprep.mubr.msk.f32.mxu1 %vm13336_vm5, %v17669_v6  ;;  %v4117_v59 = vrot.slane %v14843_v7, 7 }
0x1999   :  { %v4146_v51 = vpop.permute.xlu1 %4145  ;;  %11750 = vmatprep.subr.mxu1 %v17669_v6 }
0x199a   :  { %v4148_v1 = vpop.permute.xlu0 %4147  ;;  %v4159_v45 = vmul.f32 %v14965_v17, %v4146_v51  ;;  %11751 = vmatpush3.msra.mxu1 %v14657_v4  ;;  %v4129_v4 = vmul.f32 %v14965_v17, %v4117_v59 }
0x199b   :  { %v4160_v23 = vmul.f32 %v12834_v18, %v4148_v1  ;;  %11752 = vmatprep.subr.mxu1 %v17669_v6 }
0x199c   :  { %4175 = vrot.lane.b32.xlu1 %v4159_v45, %s13338_s15  ;;  %11753 = vmatpush3.msra.mxu1 %v14666_v40 }
0x199d   :  { %4177 = vrot.lane.b32.xlu0 %v4160_v23, %s13338_s15  ;;  %11754 = vmatprep.subr.mxu1 %v17669_v6 }
0x199e   :  { %11755 = vmatpush3.msra.mxu1 %v14674_v42 }
0x199f   :  { %11770 = vmatprep.subr.mxu1 %v17669_v6 }
0x1a0e   :  { %v4176_v61 = vpop.permute.xlu1 %4175 }
0x1a0f   :  { %v4178_v10 = vpop.permute.xlu0 %4177  ;;  %v14980_v22 = vadd.f32 %v4176_v61, %v4129_v4 }
0x1a10   :  { %v14982_v40 = vadd.f32 %v4178_v10, %v4130_v14 }
0x1a11   :  { %12835 = vtanh.f32 %v14980_v22 }
0x1a12   :  { %12837 = vtanh.f32 %v14982_v40 }
0x1a13   :  { %v4302_v42 = vpop.f32.mrf.mxu0 }
0x1a14   :  { %v4467_v29 = vrot.slane %v4302_v42, 1  ;;  %v4476_v54 = vadd.f32 %v4302_v42, %v13595_v47 }
0x1a15   :  { %v11725_v7 = vpop.f32.mrf.mxu0 }
0x1a16   :  { %v4477_v19 = vadd.f32 %v4467_v29, %v13603_v53  ;;  %12839 = vtanh.f32 %v4476_v54  ;;  %v10746_v35 = vmul.f32 -1.442695, %v4476_v54 }
0x1a18   :  { %12841 = vtanh.f32 %v4477_v19  ;;  %v10747_v52 = vmul.f32 -1.442695, %v4477_v19 }
0x1a1e   :  { %v12836_v57 = vpop.eup %12835 }
0x1a1f   :  { %v12838_v28 = vpop.eup %12837  ;;  %4211 = vrot.lane.b32.xlu1 %v12836_v57, %s13337_s14 }
0x1a20   :  { %4213 = vrot.lane.b32.xlu0 %v12838_v28, %s13337_s14 }
0x1a23   :  { %v12840_v56 = vpop.eup %12839 }
0x1a24   :  { %4554 = vrot.lane.b32.xlu0 %v12840_v56, %s13337_s14  ;;  %v4531_v56 = vrot.slane %v14899_v38, 7 }
0x1a25   :  { %v12842_v25 = vpop.eup %12841 }
0x1a26   :  { %4556 = vrot.lane.b32.xlu1 %v12842_v25, %s13337_s14  ;;  %v4530_v25 = vrot.slane %v14896_v21, 7 }
0x1a57   :  { %v4381_v48 = vpop.f32.mrf.mxu1 }
0x1a58   :  { %v4468_v30 = vrot.slane %v4381_v48, 1  ;;  %v4478_v0 = vadd.f32 %v4381_v48, %v13742_v44 }
0x1a59   :  { %v11736_v15 = vpop.f32.mrf.mxu1 }
0x1a5a   :  { %v4479_v9 = vadd.f32 %v4468_v30, %v13751_v50  ;;  %12843 = vtanh.f32 %v4478_v0 }
0x1a5c   :  { %12845 = vtanh.f32 %v4479_v9  ;;  %v10749_v58 = vmul.f32 -1.442695, %v4479_v9  ;;  %v4532_v9 = vrot.slane %v14914_v33, 7 }
0x1a5d   :  { %12847 = vpow2.f32 %v10746_v35 }
0x1a5e   :  { %12849 = vpow2.f32 %v10747_v52 }
0x1a67   :  { %v12844_v27 = vpop.eup %12843 }
0x1a68   :  { %4558 = vrot.lane.b32.xlu0 %v12844_v27, %s13337_s14  ;;  %v4533_v27 = vrot.slane %v14916_v36, 7 }
0x1a69   :  { %v12846_v16 = vpop.eup %12845 }
0x1a6a   :  { %4560 = vrot.lane.b32.xlu1 %v12846_v16, %s13337_s14  ;;  %v12848_v5 = vpop.eup %12847 }
0x1a6b   :  { %v12850_v31 = vpop.eup %12849  ;;  %v4500_v63 = vadd.f32 1.0, %v12848_v5 }
0x1a6c   :  { %v4501_v34 = vadd.f32 1.0, %v12850_v31 }
0x1a6d   :  { %12851 = vrcp.f32 %v4500_v63 }
0x1a6e   :  { %12853 = vrcp.f32 %v4501_v34 }
0x1a7a   :  { %v15006_v23 = vpop.eup %12851 }
0x1a7b   :  { %v15009_v59 = vpop.eup %12853  ;;  %v4542_v30 = vmul.f32 %v15006_v23, %v4530_v25 }
0x1a7c   :  { %v4543_v48 = vmul.f32 %v15009_v59, %v4531_v56 }
0x1a91   :  { %v4212_v2 = vpop.permute.xlu1 %4211 }
0x1a92   :  { %v4214_v41 = vpop.permute.xlu0 %4213  ;;  %v4225_v43 = vmul.f32 %v14965_v17, %v4212_v2 }
0x1a93   :  { %v4226_v20 = vmul.f32 %v12834_v18, %v4214_v41 }
0x1a94   :  { %v4387_v55 = vrot.slane %v4225_v43, 7  ;;  %v14999_v32 = vsel %vm99_vm0, %v14863_v46, %v4225_v43 }
0x1a95   :  { %v4388_v24 = vrot.slane %v4226_v20, 6  ;;  %v15003_v51 = vsel %vm99_vm0, %v14867_v37, %v4226_v20  ;;  %v10748_v37 = vmul.f32 -1.442695, %v4478_v0 }
0x1a96   :  { %17687 = vst [vmem:[#allocation5_spill] sm:$0xff] %v15003_v51  ;;  %v4555_v1 = vpop.permute.xlu0 %4554 }
0x1a97   :  { %v4389_v45 = vsel %vm1298_vm6, %v4388_v24, %v4387_v55  ;;  %v4572_v18 = vmul.f32 %v15006_v23, %v4555_v1  ;;  %12855 = vpow2.f32 %v10748_v37 }
0x1a98   :  { %4390 = vrot.lane.b32.xlu1 %v4389_v45, %s13338_s15  ;;  %v4557_v17 = vpop.permute.xlu1 %4556  ;;  %12857 = vpow2.f32 %v10749_v58 }
0x1a99   :  { %v4573_v46 = vmul.f32 %v15009_v59, %v4557_v17 }
0x1a9b   :  { %4586 = vrot.lane.b32.xlu0 %v4573_v46, %s13338_s15 }
0x1a9c   :  { %4584 = vrot.lane.b32.xlu1 %v4572_v18, %s13338_s15 }
0x1aa4   :  { %v12856_v4 = vpop.eup %12855 }
0x1aa5   :  { %v12858_v14 = vpop.eup %12857  ;;  %v4502_v61 = vadd.f32 1.0, %v12856_v4 }
0x1aa6   :  { %v4503_v10 = vadd.f32 1.0, %v12858_v14 }
0x1aa7   :  { %12859 = vrcp.f32 %v4502_v61  ;;  %v15081_v61 = vld [vmem:[%s17651_s12 + $0x58] sm:$0xff] }
0x1aa8   :  { %12861 = vrcp.f32 %v4503_v10  ;;  %v15090_v10 = vld [vmem:[%s17651_s12 + $0x50] sm:$0xff] }
0x1ab4   :  { %v15015_v42 = vpop.eup %12859 }
0x1ab5   :  { %v12862_v7 = vpop.eup %12861 }
0x1ab6   :  { %v4545_v52 = vmul.f32 %v12862_v7, %v4533_v27  ;;  %v15134_v27 = vld [vmem:[%s17651_s12 + $0x8] sm:$0xff] }
0x1ada   :  { %v4559_v29 = vpop.permute.xlu0 %4558 }
0x1adb   :  { %v4574_v54 = vmul.f32 %v15015_v42, %v4559_v29  ;;  %v15104_v29 = vld [vmem:[%s17651_s12 + $0x40] sm:$0xff] }
0x1adc   :  { %v4561_v19 = vpop.permute.xlu1 %4560 }
0x1add   :  { %4588 = vrot.lane.b32.xlu1 %v4574_v54, %s13338_s15  ;;  %v4575_v57 = vmul.f32 %v12862_v7, %v4561_v19 }
0x1adf   :  { %4590 = vrot.lane.b32.xlu0 %v4575_v57, %s13338_s15 }
0x1b0a   :  { %v4391_v28 = vpop.permute.xlu1 %4390 }
0x1b0b   :  { %11746 = vmatmul.mubr.msk.f32.vlgmr.msra.gmra.mxu0 %vm919_vm7, %v4391_v28 }
0x1b0c   :  { %11760 = vmatpush3.msra.mxu0 %v14733_v12  ;;  %11767 = vmatprep.mubr.msk.f32.mxu0 %vm13336_vm5, %v17669_v6 }
0x1b0d   :  { %11761 = vmatprep.subr.mxu0 %v17669_v6  ;;  %v4587_v0 = vpop.permute.xlu0 %4586 }
0x1b0e   :  { %v4585_v15 = vpop.permute.xlu1 %4584  ;;  %11762 = vmatpush3.msra.mxu0 %v14745_v26  ;;  %v15030_v38 = vadd.f32 %v4587_v0, %v4543_v48  ;;  %v15112_v48 = vld [vmem:[%s17651_s12 + $0x18] sm:$0xff] }
0x1b0f   :  { %v15032_v21 = vadd.f32 %v4585_v15, %v4542_v30  ;;  %11763 = vmatprep.subr.mxu0 %v17669_v6 }
0x1b10   :  { %11764 = vmatpush3.msra.mxu0 %v14755_v62  ;;  %12863 = vtanh.f32 %v15030_v38  ;;  %v4544_v62 = vmul.f32 %v15015_v42, %v4532_v9 }
0x1b11   :  { %11765 = vmatprep.subr.mxu0 %v17669_v6  ;;  %12865 = vtanh.f32 %v15032_v21 }
0x1b12   :  { %11766 = vmatpush3.msra.mxu0 %v14763_v13 }
0x1b13   :  { %11781 = vmatprep.subr.mxu0 %v17669_v6 }
0x1b1d   :  { %v12864_v12 = vpop.eup %12863 }
0x1b1e   :  { %v12866_v26 = vpop.eup %12865  ;;  %4622 = vrot.lane.b32.xlu0 %v12864_v12, %s13337_s14 }
0x1b1f   :  { %4620 = vrot.lane.b32.xlu1 %v12866_v26, %s13337_s14  ;;  %v15125_v26 = vld [vmem:[%s17651_s12 + $0x10] sm:$0xff] }
0x1b4f   :  { %v4589_v16 = vpop.permute.xlu1 %4588 }
0x1b50   :  { %v15046_v35 = vadd.f32 %v4589_v16, %v4544_v62  ;;  %v15143_v16 = vld [vmem:[%s17651_s12] sm:$0xff] }
0x1b51   :  { %v4591_v13 = vpop.permute.xlu0 %4590 }
0x1b52   :  { %12867 = vtanh.f32 %v15046_v35  ;;  %v15049_v5 = vadd.f32 %v4591_v13, %v4545_v52  ;;  %v4535_v52 = vrot.slane %v14982_v40, 7  ;;  %v4534_v13 = vrot.slane %v14980_v22, 7 }
0x1b54   :  { %12869 = vtanh.f32 %v15049_v5 }
0x1b5f   :  { %v12868_v31 = vpop.eup %12867 }
0x1b60   :  { %4624 = vrot.lane.b32.xlu1 %v12868_v31, %s13337_s14 }
0x1b61   :  { %v12870_v63 = vpop.eup %12869 }
0x1b62   :  { %4626 = vrot.lane.b32.xlu0 %v12870_v63, %s13337_s14 }
0x1b90   :  { %v4623_v33 = vpop.permute.xlu0 %4622 }
0x1b91   :  { %v15055_v36 = vmul.f32 %v15009_v59, %v4623_v33  ;;  %v4621_v34 = vpop.permute.xlu1 %4620 }
0x1b92   :  { %v15059_v41 = vmul.f32 %v15006_v23, %v4621_v34 }
0x1b93   :  { %v4646_v2 = vrot.slane %v15055_v36, 7 }
0x1b95   :  { %v4647_v43 = vsel %vm1298_vm6, %v4646_v2, %v15059_v41 }
0x1b96   :  { %4648 = vrot.lane.b32.xlu0 %v4647_v43, %s13338_s15 }
0x1bcb   :  { %v4460_v20 = vpop.f32.mrf.mxu0 }
0x1bcc   :  { %v4469_v55 = vrot.slane %v4460_v20, 1  ;;  %v4480_v24 = vadd.f32 %v4460_v20, %v13785_v3 }
0x1bcd   :  { %v11747_v1 = vpop.f32.mrf.mxu0 }
0x1bce   :  { %v4481_v45 = vadd.f32 %v4469_v55, %v13791_v8  ;;  %12871 = vtanh.f32 %v4480_v24  ;;  %v10750_v54 = vmul.f32 -1.442695, %v4480_v24 }
0x1bd0   :  { %12873 = vtanh.f32 %v4481_v45 }
0x1bd1   :  { %12875 = vpow2.f32 %v10750_v54 }
0x1bd2   :  { %v4625_v59 = vpop.permute.xlu1 %4624 }
0x1bd3   :  { %v15069_v23 = vmul.f32 %v15015_v42, %v4625_v59  ;;  %v15097_v42 = vld [vmem:[%s17651_s12 + $0x48] sm:$0xff] }
0x1bd4   :  { %v4627_v17 = vpop.permute.xlu0 %4626 }
0x1bd5   :  { %v15066_v18 = vmul.f32 %v12862_v7, %v4627_v17  ;;  %v10751_v7 = vmul.f32 -1.442695, %v4481_v45 }
0x1bd7   :  { %v4724_v46 = vrot.slane %v15066_v18, 7  ;;  %12877 = vpow2.f32 %v10751_v7 }
0x1bd9   :  { %v4725_v37 = vsel %vm1298_vm6, %v4724_v46, %v15069_v23 }
0x1bda   :  { %4726 = vrot.lane.b32.xlu1 %v4725_v37, %s13338_s15 }
0x1bdb   :  { %v12872_v58 = vpop.eup %12871 }
0x1bdd   :  { %v12874_v4 = vpop.eup %12873 }
0x1bde   :  { %4564 = vrot.lane.b32.xlu0 %v12874_v4, %s13337_s14  ;;  %4562 = vrot.lane.b32.xlu1 %v12872_v58, %s13337_s14  ;;  %v12876_v19 = vpop.eup %12875 }
0x1bdf   :  { %v4504_v28 = vadd.f32 1.0, %v12876_v19 }
0x1be1   :  { %12879 = vrcp.f32 %v4504_v28 }
0x1be4   :  { %v12878_v57 = vpop.eup %12877 }
0x1be5   :  { %v4505_v56 = vadd.f32 1.0, %v12878_v57 }
0x1be7   :  { %12881 = vrcp.f32 %v4505_v56 }
0x1bee   :  { %v15117_v30 = vpop.eup %12879 }
0x1bef   :  { %v4546_v63 = vmul.f32 %v15117_v30, %v4534_v13 }
0x1bf4   :  { %v15120_v0 = vpop.eup %12881 }
0x1bf5   :  { %v4547_v31 = vmul.f32 %v15120_v0, %v4535_v52 }
0x1c08   :  { %v4649_v14 = vpop.permute.xlu0 %4648 }
0x1c09   :  { %11757 = vmatmul.mubr.msk.f32.vlgmr.msra.gmra.mxu1 %vm919_vm7, %v4649_v14 }
0x1c0a   :  { %11771 = vmatpush3.msra.mxu1 %v15081_v61  ;;  %11778 = vmatprep.mubr.msk.f32.mxu1 %vm13336_vm5, %v17669_v6 }
0x1c0b   :  { %11772 = vmatprep.subr.mxu1 %v17669_v6 }
0x1c0c   :  { %11773 = vmatpush3.msra.mxu1 %v15090_v10 }
0x1c0d   :  { %11774 = vmatprep.subr.mxu1 %v17669_v6 }
0x1c0e   :  { %11775 = vmatpush3.msra.mxu1 %v15097_v42 }
0x1c0f   :  { %11776 = vmatprep.subr.mxu1 %v17669_v6 }
0x1c10   :  { %11777 = vmatpush3.msra.mxu1 %v15104_v29 }
0x1c11   :  { %11792 = vmatprep.subr.mxu1 %v17669_v6 }
0x1c4c   :  { %v4727_v25 = vpop.permute.xlu1 %4726 }
0x1c4d   :  { %11768 = vmatmul.mubr.msk.f32.vlgmr.msra.gmra.mxu0 %vm919_vm7, %v4727_v25 }
0x1c4e   :  { %11782 = vmatpush3.msra.mxu0 %v15112_v48  ;;  %11789 = vmatprep.mubr.msk.f32.mxu0 %vm13336_vm5, %v17669_v6 }
0x1c4f   :  { %11783 = vmatprep.subr.mxu0 %v17669_v6 }
0x1c50   :  { %v4565_v15 = vpop.permute.xlu0 %4564  ;;  %v4563_v12 = vpop.permute.xlu1 %4562  ;;  %11784 = vmatpush3.msra.mxu0 %v15125_v26 }
0x1c51   :  { %v4577_v9 = vmul.f32 %v15120_v0, %v4565_v15  ;;  %v4576_v62 = vmul.f32 %v15117_v30, %v4563_v12  ;;  %11785 = vmatprep.subr.mxu0 %v17669_v6 }
0x1c52   :  { %11786 = vmatpush3.msra.mxu0 %v15134_v27 }
0x1c53   :  { %4594 = vrot.lane.b32.xlu0 %v4577_v9, %s13338_s15  ;;  %4592 = vrot.lane.b32.xlu1 %v4576_v62, %s13338_s15 }
0x1c54   :  { %11787 = vmatprep.subr.mxu0 %v17669_v6 }
0x1c55   :  { %11788 = vmatpush3.msra.mxu0 %v15143_v16 }
0x1c56   :  { %11803 = vmatprep.subr.mxu0 %v17669_v6 }
0x1cc5   :  { %v4595_v33 = vpop.permute.xlu0 %4594  ;;  %v4593_v34 = vpop.permute.xlu1 %4592 }
0x1cc6   :  { %v15151_v2 = vadd.f32 %v4595_v33, %v4547_v31  ;;  %v15153_v43 = vadd.f32 %v4593_v34, %v4546_v63 }
0x1cc8   :  { %12883 = vtanh.f32 %v15151_v2 }
0x1cc9   :  { %12885 = vtanh.f32 %v15153_v43  ;;  %v4718_v20 = vpop.f32.mrf.mxu1 }
0x1cca   :  { %v4881_v55 = vrot.slane %v4718_v20, 7  ;;  %v4891_v40 = vadd.f32 %v4718_v20, %v13603_v53 }
0x1ccb   :  { %v11758_v24 = vpop.f32.mrf.mxu1 }
0x1ccc   :  { %v4890_v22 = vadd.f32 %v4881_v55, %v13595_v47  ;;  %12887 = vtanh.f32 %v4891_v40  ;;  %v10756_v19 = vmul.f32 -1.442695, %v4891_v40 }
0x1cce   :  { %12889 = vtanh.f32 %v4890_v22  ;;  %v10755_v57 = vmul.f32 -1.442695, %v4890_v22 }
0x1cd5   :  { %v12884_v1 = vpop.eup %12883 }
0x1cd6   :  { %v12886_v45 = vpop.eup %12885  ;;  %4630 = vrot.lane.b32.xlu0 %v12884_v1, %s13337_s14 }
0x1cd7   :  { %4628 = vrot.lane.b32.xlu1 %v12886_v45, %s13337_s14 }
0x1cd9   :  { %v12888_v59 = vpop.eup %12887 }
0x1cdb   :  { %4970 = vrot.lane.b32.xlu1 %v12888_v59, %s13337_s14  ;;  %v12890_v17 = vpop.eup %12889 }
0x1cdc   :  { %4968 = vrot.lane.b32.xlu0 %v12890_v17, %s13337_s14 }
0x1d0d   :  { %v4796_v46 = vpop.f32.mrf.mxu0 }
0x1d0e   :  { %v4882_v37 = vrot.slane %v4796_v46, 7  ;;  %v4893_v58 = vadd.f32 %v4796_v46, %v13751_v50 }
0x1d0f   :  { %v11769_v4 = vpop.f32.mrf.mxu0 }
0x1d10   :  { %v4892_v14 = vadd.f32 %v4882_v37, %v13742_v44  ;;  %12891 = vtanh.f32 %v4893_v58 }
0x1d12   :  { %12893 = vtanh.f32 %v4892_v14  ;;  %v10757_v40 = vmul.f32 -1.442695, %v4892_v14 }
0x1d13   :  { %12895 = vpow2.f32 %v10756_v19  ;;  %v15199_v19 = vld [vmem:[%s17651_s12 + $0x38] sm:$0xff] }
0x1d14   :  { %12897 = vpow2.f32 %v10755_v57 }
0x1d1d   :  { %v12892_v54 = vpop.eup %12891 }
0x1d1e   :  { %4974 = vrot.lane.b32.xlu1 %v12892_v54, %s13337_s14  ;;  %v4945_v54 = vrot.slane %v15030_v38, 7 }
0x1d1f   :  { %v12894_v7 = vpop.eup %12893 }
0x1d20   :  { %4972 = vrot.lane.b32.xlu0 %v12894_v7, %s13337_s14  ;;  %v12896_v28 = vpop.eup %12895  ;;  %v4944_v7 = vrot.slane %v15032_v21, 7 }
0x1d21   :  { %v12898_v56 = vpop.eup %12897  ;;  %v4915_v25 = vadd.f32 1.0, %v12896_v28 }
0x1d22   :  { %v4914_v15 = vadd.f32 1.0, %v12898_v56  ;;  %v15210_v56 = vld [vmem:[%s17651_s12 + $0x30] sm:$0xff] }
0x1d23   :  { %12899 = vrcp.f32 %v4915_v25 }
0x1d24   :  { %12901 = vrcp.f32 %v4914_v15 }
0x1d30   :  { %v15176_v33 = vpop.eup %12899 }
0x1d31   :  { %v15179_v34 = vpop.eup %12901  ;;  %v4957_v57 = vmul.f32 %v15176_v33, %v4945_v54 }
0x1d32   :  { %v4956_v28 = vmul.f32 %v15179_v34, %v4944_v7 }
0x1d48   :  { %v4631_v12 = vpop.permute.xlu0 %4630 }
0x1d49   :  { %v15168_v9 = vmul.f32 %v15120_v0, %v4631_v12  ;;  %v4629_v62 = vpop.permute.xlu1 %4628  ;;  %v15221_v12 = vld [vmem:[%s17651_s12 + $0x28] sm:$0xff] }
0x1d4a   :  { %v15172_v13 = vmul.f32 %v15117_v30, %v4629_v62  ;;  %v10758_v30 = vmul.f32 -1.442695, %v4893_v58  ;;  %v15230_v62 = vld [vmem:[%s17651_s12 + $0x20] sm:$0xff] }
0x1d4b   :  { %v4802_v52 = vrot.slane %v15168_v9, 7 }
0x1d4c   :  { %12903 = vpow2.f32 %v10758_v30 }
0x1d4d   :  { %v4971_v31 = vpop.permute.xlu1 %4970  ;;  %v4803_v63 = vsel %vm1298_vm6, %v4802_v52, %v15172_v13  ;;  %12905 = vpow2.f32 %v10757_v40 }
0x1d4e   :  { %4804 = vrot.lane.b32.xlu0 %v4803_v63, %s13338_s15  ;;  %v4969_v20 = vpop.permute.xlu0 %4968  ;;  %v4987_v0 = vmul.f32 %v15176_v33, %v4971_v31  ;;  %v4947_v63 = vrot.slane %v15049_v5, 7 }
0x1d4f   :  { %v4986_v55 = vmul.f32 %v15179_v34, %v4969_v20 }
0x1d51   :  { %4998 = vrot.lane.b32.xlu1 %v4986_v55, %s13338_s15 }
0x1d52   :  { %5000 = vrot.lane.b32.xlu0 %v4987_v0, %s13338_s15  ;;  %v4946_v0 = vrot.slane %v15046_v35, 7 }
0x1d59   :  { %v12904_v24 = vpop.eup %12903 }
0x1d5a   :  { %v12906_v22 = vpop.eup %12905  ;;  %v4917_v1 = vadd.f32 1.0, %v12904_v24 }
0x1d5b   :  { %v4916_v45 = vadd.f32 1.0, %v12906_v22 }
0x1d5c   :  { %12907 = vrcp.f32 %v4917_v1 }
0x1d5d   :  { %12909 = vrcp.f32 %v4916_v45 }
0x1d69   :  { %v15185_v59 = vpop.eup %12907 }
0x1d6a   :  { %v15188_v37 = vpop.eup %12909  ;;  %v4959_v20 = vmul.f32 %v15185_v59, %v4947_v63 }
0x1d6b   :  { %v4958_v40 = vmul.f32 %v15188_v37, %v4946_v0 }
0x1d90   :  { %v4975_v17 = vpop.permute.xlu1 %4974 }
0x1d91   :  { %v4989_v46 = vmul.f32 %v15185_v59, %v4975_v17 }
0x1d92   :  { %v4973_v4 = vpop.permute.xlu0 %4972 }
0x1d93   :  { %5004 = vrot.lane.b32.xlu0 %v4989_v46, %s13338_s15  ;;  %v4988_v58 = vmul.f32 %v15188_v37, %v4973_v4 }
0x1d95   :  { %5002 = vrot.lane.b32.xlu1 %v4988_v58, %s13338_s15 }
0x1dc0   :  { %v4805_v14 = vpop.permute.xlu0 %4804 }
0x1dc1   :  { %11779 = vmatmul.mubr.msk.f32.vlgmr.msra.gmra.mxu1 %vm919_vm7, %v4805_v14 }
0x1dc2   :  { %11793 = vmatpush3.msra.mxu1 %v15199_v19  ;;  %11800 = vmatprep.mubr.msk.f32.mxu1 %vm13336_vm5, %v17669_v6 }
0x1dc3   :  { %11794 = vmatprep.subr.mxu1 %v17669_v6  ;;  %v4999_v21 = vpop.permute.xlu1 %4998 }
0x1dc4   :  { %v5001_v38 = vpop.permute.xlu0 %5000  ;;  %11795 = vmatpush3.msra.mxu1 %v15210_v56  ;;  %v15215_v15 = vadd.f32 %v4999_v21, %v4956_v28 }
0x1dc5   :  { %v15213_v25 = vadd.f32 %v5001_v38, %v4957_v57  ;;  %11796 = vmatprep.subr.mxu1 %v17669_v6 }
0x1dc6   :  { %11797 = vmatpush3.msra.mxu1 %v15221_v12 }
0x1dc7   :  { %12911 = vtanh.f32 %v15213_v25  ;;  %11798 = vmatprep.subr.mxu1 %v17669_v6 }
0x1dc8   :  { %12913 = vtanh.f32 %v15215_v15  ;;  %11799 = vmatpush3.msra.mxu1 %v15230_v62 }
0x1dc9   :  { %11814 = vmatprep.subr.mxu1 %v17669_v6 }
0x1dd4   :  { %v12912_v52 = vpop.eup %12911 }
0x1dd5   :  { %v12914_v31 = vpop.eup %12913  ;;  %5036 = vrot.lane.b32.xlu0 %v12912_v52, %s13337_s14 }
0x1dd6   :  { %5034 = vrot.lane.b32.xlu1 %v12914_v31, %s13337_s14 }
0x1e05   :  { %v5005_v55 = vpop.permute.xlu0 %5004 }
0x1e06   :  { %v15239_v30 = vadd.f32 %v5005_v55, %v4959_v20 }
0x1e07   :  { %v5003_v24 = vpop.permute.xlu1 %5002 }
0x1e08   :  { %12915 = vtanh.f32 %v15239_v30  ;;  %v15243_v22 = vadd.f32 %v5003_v24, %v4958_v40 }
0x1e0a   :  { %12917 = vtanh.f32 %v15243_v22 }
0x1e15   :  { %v12916_v1 = vpop.eup %12915 }
0x1e16   :  { %5040 = vrot.lane.b32.xlu0 %v12916_v1, %s13337_s14 }
0x1e17   :  { %v12918_v5 = vpop.eup %12917 }
0x1e18   :  { %5038 = vrot.lane.b32.xlu1 %v12918_v5, %s13337_s14 }
0x1e47   :  { %v5037_v45 = vpop.permute.xlu0 %5036 }
0x1e48   :  { %v5035_v35 = vpop.permute.xlu1 %5034  ;;  %v15252_v46 = vmul.f32 %v15176_v33, %v5037_v45 }
0x1e49   :  { %v15249_v17 = vmul.f32 %v15179_v34, %v5035_v35 }
0x1e4b   :  { %v5060_v4 = vrot.slane %v15249_v17, 1 }
0x1e4d   :  { %v5061_v58 = vsel %vm1298_vm6, %v15252_v46, %v5060_v4 }
0x1e4e   :  { %5062 = vrot.lane.b32.xlu1 %v5061_v58, %s13338_s15 }
0x1e81   :  { %v4874_v14 = vpop.f32.mrf.mxu1 }
0x1e82   :  { %v4883_v54 = vrot.slane %v4874_v14, 7  ;;  %v4895_v7 = vadd.f32 %v4874_v14, %v13791_v8 }
0x1e83   :  { %v11780_v57 = vpop.f32.mrf.mxu1 }
0x1e84   :  { %v4894_v28 = vadd.f32 %v4883_v54, %v13785_v3  ;;  %12919 = vtanh.f32 %v4895_v7  ;;  %v4948_v57 = vrot.slane %v15153_v43, 7 }
0x1e86   :  { %12921 = vtanh.f32 %v4894_v28 }
0x1e88   :  { %v5041_v34 = vpop.permute.xlu0 %5040 }
0x1e89   :  { %v15264_v21 = vmul.f32 %v15185_v59, %v5041_v34  ;;  %v10760_v59 = vmul.f32 -1.442695, %v4895_v7  ;;  %v4949_v7 = vrot.slane %v15151_v2, 7 }
0x1e8a   :  { %v5039_v38 = vpop.permute.xlu1 %5038 }
0x1e8b   :  { %v15261_v33 = vmul.f32 %v15188_v37, %v5039_v38  ;;  %v10759_v37 = vmul.f32 -1.442695, %v4894_v28  ;;  %12923 = vpow2.f32 %v10760_v59 }
0x1e8d   :  { %v5138_v52 = vrot.slane %v15261_v33, 1  ;;  %12925 = vpow2.f32 %v10759_v37 }
0x1e8f   :  { %v5139_v31 = vsel %vm1298_vm6, %v15264_v21, %v5138_v52 }
0x1e90   :  { %5140 = vrot.lane.b32.xlu0 %v5139_v31, %s13338_s15 }
0x1e91   :  { %v12920_v63 = vpop.eup %12919 }
0x1e93   :  { %v12922_v20 = vpop.eup %12921 }
0x1e94   :  { %4976 = vrot.lane.b32.xlu1 %v12922_v20, %s13337_s14  ;;  %4978 = vrot.lane.b32.xlu0 %v12920_v63, %s13337_s14 }
0x1e98   :  { %v12924_v55 = vpop.eup %12923 }
0x1e99   :  { %v4919_v24 = vadd.f32 1.0, %v12924_v55 }
0x1e9a   :  { %v12926_v40 = vpop.eup %12925 }
0x1e9b   :  { %v4918_v1 = vadd.f32 1.0, %v12926_v40  ;;  %12927 = vrcp.f32 %v4919_v24 }
0x1e9d   :  { %12929 = vrcp.f32 %v4918_v1 }
0x1ea8   :  { %v15287_v45 = vpop.eup %12927 }
0x1ea9   :  { %v4961_v28 = vmul.f32 %v15287_v45, %v4949_v7 }
0x1eaa   :  { %v15290_v35 = vpop.eup %12929 }
0x1eab   :  { %v4960_v34 = vmul.f32 %v15290_v35, %v4948_v57 }
0x1ec0   :  { %v5063_v0 = vpop.permute.xlu1 %5062 }
0x1ec1   :  { %11790 = vmatmul.mubr.msk.f32.vlgmr.msra.gmra.mxu0 %vm919_vm7, %v5063_v0 }
0x1ec2   :  { %11804 = vmatpush3.msra.mxu0 %v15081_v61  ;;  %11811 = vmatprep.mubr.msk.f32.mxu0 %vm13336_vm5, %v17669_v6 }
0x1ec3   :  { %11805 = vmatprep.subr.mxu0 %v17669_v6 }
0x1ec4   :  { %11806 = vmatpush3.msra.mxu0 %v15090_v10 }
0x1ec5   :  { %11807 = vmatprep.subr.mxu0 %v17669_v6 }
0x1ec6   :  { %11808 = vmatpush3.msra.mxu0 %v15097_v42 }
0x1ec7   :  { %11809 = vmatprep.subr.mxu0 %v17669_v6 }
0x1ec8   :  { %11810 = vmatpush3.msra.mxu0 %v15104_v29 }
0x1ec9   :  { %11825 = vmatprep.subr.mxu0 %v17669_v6 }
0x1f02   :  { %v5141_v5 = vpop.permute.xlu0 %5140 }
0x1f03   :  { %11801 = vmatmul.mubr.msk.f32.vlgmr.msra.gmra.mxu1 %vm919_vm7, %v5141_v5 }
0x1f04   :  { %11815 = vmatpush3.msra.mxu1 %v15112_v48  ;;  %11822 = vmatprep.mubr.msk.f32.mxu1 %vm13336_vm5, %v17669_v6 }
0x1f05   :  { %11816 = vmatprep.subr.mxu1 %v17669_v6 }
0x1f06   :  { %v4979_v4 = vpop.permute.xlu0 %4978  ;;  %v4977_v58 = vpop.permute.xlu1 %4976  ;;  %11817 = vmatpush3.msra.mxu1 %v15125_v26 }
0x1f07   :  { %v4991_v14 = vmul.f32 %v15287_v45, %v4979_v4  ;;  %v4990_v54 = vmul.f32 %v15290_v35, %v4977_v58  ;;  %11818 = vmatprep.subr.mxu1 %v17669_v6 }
0x1f08   :  { %11819 = vmatpush3.msra.mxu1 %v15134_v27 }
0x1f09   :  { %5008 = vrot.lane.b32.xlu0 %v4991_v14, %s13338_s15  ;;  %5006 = vrot.lane.b32.xlu1 %v4990_v54, %s13338_s15 }
0x1f0a   :  { %11820 = vmatprep.subr.mxu1 %v17669_v6 }
0x1f0b   :  { %11821 = vmatpush3.msra.mxu1 %v15143_v16 }
0x1f0c   :  { %11836 = vmatprep.subr.mxu1 %v17669_v6 }
0x1f7b   :  { %v5009_v38 = vpop.permute.xlu0 %5008  ;;  %v5007_v52 = vpop.permute.xlu1 %5006 }
0x1f7c   :  { %v15306_v31 = vadd.f32 %v5009_v38, %v4961_v28  ;;  %v15308_v63 = vadd.f32 %v5007_v52, %v4960_v34 }
0x1f7e   :  { %12931 = vtanh.f32 %v15306_v31 }
0x1f7f   :  { %12933 = vtanh.f32 %v15308_v63 }
0x1f81   :  { %v5132_v20 = vpop.f32.mrf.mxu0 }
0x1f82   :  { %v5295_v0 = vrot.slane %v5132_v20, 6  ;;  %v5296_v59 = vrot.slane %v5132_v20, 7 }
0x1f83   :  { %v11791_v2 = vpop.f32.mrf.mxu0 }
0x1f84   :  { %v5307_v43 = vadd.f32 %v5295_v0, %v13595_v47  ;;  %v5308_v37 = vadd.f32 %v5296_v59, %v13603_v53 }
0x1f86   :  { %12935 = vtanh.f32 %v5307_v43  ;;  %v10764_v34 = vmul.f32 -1.442695, %v5307_v43  ;;  %v10765_v38 = vmul.f32 -1.442695, %v5308_v37 }
0x1f87   :  { %12937 = vtanh.f32 %v5308_v37 }
0x1f8b   :  { %v12932_v55 = vpop.eup %12931 }
0x1f8c   :  { %v12934_v40 = vpop.eup %12933  ;;  %5044 = vrot.lane.b32.xlu0 %v12932_v55, %s13337_s14 }
0x1f8d   :  { %5042 = vrot.lane.b32.xlu1 %v12934_v40, %s13337_s14 }
0x1f93   :  { %v12936_v24 = vpop.eup %12935 }
0x1f94   :  { %v12938_v1 = vpop.eup %12937  ;;  %5385 = vrot.lane.b32.xlu1 %v12936_v24, %s13337_s14 }
0x1f95   :  { %5387 = vrot.lane.b32.xlu0 %v12938_v1, %s13337_s14 }
0x1fc3   :  { %v5210_v5 = vpop.f32.mrf.mxu1 }
0x1fc4   :  { %v5297_v4 = vrot.slane %v5210_v5, 6  ;;  %v5298_v58 = vrot.slane %v5210_v5, 7 }
0x1fc5   :  { %v11802_v14 = vpop.f32.mrf.mxu1 }
0x1fc6   :  { %v5309_v54 = vadd.f32 %v5297_v4, %v13742_v44  ;;  %v5310_v7 = vadd.f32 %v5298_v58, %v13751_v50 }
0x1fc8   :  { %12939 = vtanh.f32 %v5309_v54 }
0x1fc9   :  { %12941 = vtanh.f32 %v5310_v7 }
0x1fca   :  { %12943 = vpow2.f32 %v10764_v34 }
0x1fcb   :  { %12945 = vpow2.f32 %v10765_v38 }
0x1fd5   :  { %v12940_v57 = vpop.eup %12939 }
0x1fd6   :  { %v12942_v28 = vpop.eup %12941  ;;  %5389 = vrot.lane.b32.xlu1 %v12940_v57, %s13337_s14  ;;  %v10767_v57 = vmul.f32 -1.442695, %v5310_v7 }
0x1fd7   :  { %5391 = vrot.lane.b32.xlu0 %v12942_v28, %s13337_s14  ;;  %v12944_v52 = vpop.eup %12943 }
0x1fd8   :  { %v12946_v20 = vpop.eup %12945  ;;  %v5331_v0 = vadd.f32 1.0, %v12944_v52 }
0x1fd9   :  { %v5332_v59 = vadd.f32 1.0, %v12946_v20 }
0x1fda   :  { %12947 = vrcp.f32 %v5331_v0 }
0x1fdb   :  { %12949 = vrcp.f32 %v5332_v59 }
0x1fe7   :  { %v15331_v37 = vpop.eup %12947 }
0x1fe8   :  { %v15334_v4 = vpop.eup %12949 }
0x1ffe   :  { %v5045_v2 = vpop.permute.xlu0 %5044 }
0x1fff   :  { %v5043_v55 = vpop.permute.xlu1 %5042  ;;  %v15326_v24 = vmul.f32 %v15287_v45, %v5045_v2  ;;  %v10766_v45 = vmul.f32 -1.442695, %v5309_v54  ;;  %v5361_v54 = vrot.slane %v15215_v15, 7 }
0x2000   :  { %v15323_v40 = vmul.f32 %v15290_v35, %v5043_v55 }
0x2001   :  { %12951 = vpow2.f32 %v10766_v45 }
0x2002   :  { %v5216_v1 = vrot.slane %v15323_v40, 1  ;;  %12953 = vpow2.f32 %v10767_v57 }
0x2004   :  { %v5217_v43 = vsel %vm1298_vm6, %v15326_v24, %v5216_v1 }
0x2005   :  { %5218 = vrot.lane.b32.xlu1 %v5217_v43, %s13338_s15  ;;  %v5362_v43 = vrot.slane %v15213_v25, 7 }
0x2006   :  { %v5386_v5 = vpop.permute.xlu1 %5385 }
0x2007   :  { %v5388_v58 = vpop.permute.xlu0 %5387  ;;  %v5403_v14 = vmul.f32 %v15331_v37, %v5386_v5  ;;  %v5373_v5 = vmul.f32 %v15331_v37, %v5361_v54 }
0x2008   :  { %v5404_v35 = vmul.f32 %v15334_v4, %v5388_v58 }
0x2009   :  { %5415 = vrot.lane.b32.xlu0 %v5403_v14, %s13338_s15  ;;  %v5374_v14 = vmul.f32 %v15334_v4, %v5362_v43 }
0x200a   :  { %5417 = vrot.lane.b32.xlu1 %v5404_v35, %s13338_s15 }
0x200e   :  { %v12952_v28 = vpop.eup %12951 }
0x200f   :  { %v12954_v34 = vpop.eup %12953  ;;  %v5333_v38 = vadd.f32 1.0, %v12952_v28  ;;  %v5363_v28 = vrot.slane %v15243_v22, 7 }
0x2010   :  { %v5334_v52 = vadd.f32 1.0, %v12954_v34  ;;  %v5364_v34 = vrot.slane %v15239_v30, 7 }
0x2011   :  { %12955 = vrcp.f32 %v5333_v38 }
0x2012   :  { %12957 = vrcp.f32 %v5334_v52 }
0x201e   :  { %v15340_v20 = vpop.eup %12955 }
0x201f   :  { %v15342_v59 = vpop.eup %12957  ;;  %v5375_v38 = vmul.f32 %v15340_v20, %v5363_v28 }
0x2048   :  { %v5390_v0 = vpop.permute.xlu1 %5389 }
0x2049   :  { %v5392_v2 = vpop.permute.xlu0 %5391  ;;  %v5405_v55 = vmul.f32 %v15340_v20, %v5390_v0  ;;  %v5376_v0 = vmul.f32 %v15342_v59, %v5364_v34 }
0x204a   :  { %v5406_v1 = vmul.f32 %v15342_v59, %v5392_v2 }
0x204b   :  { %5419 = vrot.lane.b32.xlu0 %v5405_v55, %s13338_s15 }
0x204c   :  { %5421 = vrot.lane.b32.xlu1 %v5406_v1, %s13338_s15 }
0x2077   :  { %v5219_v7 = vpop.permute.xlu1 %5218 }
0x2078   :  { %11812 = vmatmul.mubr.msk.f32.vlgmr.msra.gmra.mxu0 %vm919_vm7, %v5219_v7 }
0x2079   :  { %11826 = vmatpush3.msra.mxu0 %v15199_v19  ;;  %11833 = vmatprep.mubr.msk.f32.mxu0 %vm13336_vm5, %v17669_v6 }
0x207a   :  { %11827 = vmatprep.subr.mxu0 %v17669_v6 }
0x207b   :  { %v5416_v58 = vpop.permute.xlu0 %5415  ;;  %11828 = vmatpush3.msra.mxu0 %v15210_v56 }
0x207c   :  { %v15357_v35 = vadd.f32 %v5416_v58, %v5373_v5  ;;  %v5418_v15 = vpop.permute.xlu1 %5417  ;;  %11829 = vmatprep.subr.mxu0 %v17669_v6  ;;  %v7594_v5 = vsel %vm86_vm1, %v15059_v41, %v15249_v17 }
0x207d   :  { %v15360_v25 = vadd.f32 %v5418_v15, %v5374_v14  ;;  %11830 = vmatpush3.msra.mxu0 %v15221_v12  ;;  %v7595_v14 = vsel %vm86_vm1, %v15055_v36, %v15252_v46 }
0x207e   :  { %12959 = vtanh.f32 %v15357_v35  ;;  %11831 = vmatprep.subr.mxu0 %v17669_v6 }
0x207f   :  { %12961 = vtanh.f32 %v15360_v25  ;;  %11832 = vmatpush3.msra.mxu0 %v15230_v62 }
0x2080   :  { %11847 = vmatprep.subr.mxu0 %v17669_v6 }
0x208b   :  { %v12960_v45 = vpop.eup %12959 }
0x208c   :  { %v12962_v57 = vpop.eup %12961  ;;  %5451 = vrot.lane.b32.xlu0 %v12960_v45, %s13337_s14 }
0x208d   :  { %5453 = vrot.lane.b32.xlu1 %v12962_v57, %s13337_s14 }
0x20bd   :  { %v5420_v52 = vpop.permute.xlu0 %5419 }
0x20be   :  { %v15375_v2 = vadd.f32 %v5420_v52, %v5375_v38  ;;  %v5422_v55 = vpop.permute.xlu1 %5421 }
0x20bf   :  { %v15377_v1 = vadd.f32 %v5422_v55, %v5376_v0  ;;  %v7622_v55 = vsel %vm86_vm1, %v15069_v23, %v15261_v33 }
0x20c0   :  { %12963 = vtanh.f32 %v15375_v2 }
0x20c1   :  { %12965 = vtanh.f32 %v15377_v1 }
0x20cd   :  { %v12964_v54 = vpop.eup %12963 }
0x20ce   :  { %v12966_v7 = vpop.eup %12965  ;;  %5455 = vrot.lane.b32.xlu0 %v12964_v54, %s13337_s14 }
0x20cf   :  { %5457 = vrot.lane.b32.xlu1 %v12966_v7, %s13337_s14  ;;  %v7623_v7 = vsel %vm86_vm1, %v15066_v18, %v15264_v21 }
0x20fe   :  { %v5452_v30 = vpop.permute.xlu0 %5451 }
0x20ff   :  { %v5469_v22 = vmul.f32 %v15331_v37, %v5452_v30  ;;  %v5454_v43 = vpop.permute.xlu1 %5453 }
0x2100   :  { %v5470_v58 = vmul.f32 %v15334_v4, %v5454_v43 }
0x2101   :  { %v5477_v15 = vrot.slane %v5469_v22, 2  ;;  %v15392_v45 = vsel %vm7577_vm8, %v7594_v5, %v5469_v22 }
0x2102   :  { %v5478_v57 = vrot.slane %v5470_v58, 1  ;;  %v15395_v28 = vsel %vm7577_vm8, %v7595_v14, %v5470_v58 }
0x2104   :  { %v5479_v37 = vsel %vm1298_vm6, %v5478_v57, %v5477_v15 }
0x2105   :  { %5480 = vrot.lane.b32.xlu0 %v5479_v37, %s13338_s15 }
0x2138   :  { %v5288_v34 = vpop.f32.mrf.mxu0 }
0x2139   :  { %v5299_v41 = vrot.slane %v5288_v34, 6  ;;  %v5300_v17 = vrot.slane %v5288_v34, 7 }
0x213a   :  { %v11813_v4 = vpop.f32.mrf.mxu0 }
0x213b   :  { %v5311_v38 = vadd.f32 %v5299_v41, %v13785_v3  ;;  %v5312_v36 = vadd.f32 %v5300_v17, %v13791_v8 }
0x213d   :  { %12967 = vtanh.f32 %v5311_v38  ;;  %v10768_v18 = vmul.f32 -1.442695, %v5311_v38  ;;  %v10769_v21 = vmul.f32 -1.442695, %v5312_v36 }
0x213e   :  { %12969 = vtanh.f32 %v5312_v36 }
0x213f   :  { %12971 = vpow2.f32 %v10768_v18 }
0x2140   :  { %v5456_v46 = vpop.permute.xlu0 %5455  ;;  %12973 = vpow2.f32 %v10769_v21 }
0x2141   :  { %v5471_v52 = vmul.f32 %v15340_v20, %v5456_v46  ;;  %v5458_v0 = vpop.permute.xlu1 %5457 }
0x2142   :  { %v5472_v54 = vmul.f32 %v15342_v59, %v5458_v0 }
0x2143   :  { %v5556_v30 = vrot.slane %v5471_v52, 2  ;;  %v15410_v22 = vsel %vm7577_vm8, %v7622_v55, %v5471_v52 }
0x2144   :  { %v5557_v43 = vrot.slane %v5472_v54, 1  ;;  %v15413_v5 = vsel %vm7577_vm8, %v7623_v7, %v5472_v54 }
0x2146   :  { %v5558_v20 = vsel %vm1298_vm6, %v5557_v43, %v5556_v30 }
0x2147   :  { %5559 = vrot.lane.b32.xlu1 %v5558_v20, %s13338_s15 }
0x214a   :  { %v12968_v58 = vpop.eup %12967 }
0x214b   :  { %v12970_v23 = vpop.eup %12969  ;;  %5393 = vrot.lane.b32.xlu0 %v12968_v58, %s13337_s14 }
0x214c   :  { %5395 = vrot.lane.b32.xlu1 %v12970_v23, %s13337_s14 }
0x2177   :  { %v5481_v33 = vpop.permute.xlu0 %5480 }
0x2178   :  { %11823 = vmatmul.mubr.msk.f32.vlgmr.msra.gmra.mxu1 %vm919_vm7, %v5481_v33 }
0x2179   :  { %11837 = vmatpush3.msra.mxu1 %v15081_v61  ;;  %11844 = vmatprep.mubr.msk.f32.mxu1 %vm13336_vm5, %v17669_v6  ;;  %v12972_v61 = vpop.eup %12971 }
0x217a   :  { %11838 = vmatprep.subr.mxu1 %v17669_v6  ;;  %v12974_v59 = vpop.eup %12973  ;;  %v5335_v14 = vadd.f32 1.0, %v12972_v61 }
0x217b   :  { %11839 = vmatpush3.msra.mxu1 %v15090_v10  ;;  %v5336_v15 = vadd.f32 1.0, %v12974_v59 }
0x217c   :  { %11840 = vmatprep.subr.mxu1 %v17669_v6  ;;  %12975 = vrcp.f32 %v5335_v14 }
0x217d   :  { %11841 = vmatpush3.msra.mxu1 %v15097_v42  ;;  %12977 = vrcp.f32 %v5336_v15 }
0x217e   :  { %11842 = vmatprep.subr.mxu1 %v17669_v6 }
0x217f   :  { %11843 = vmatpush3.msra.mxu1 %v15104_v29 }
0x2180   :  { %11858 = vmatprep.subr.mxu1 %v17669_v6 }
0x2189   :  { %v15435_v42 = vpop.eup %12975 }
0x218a   :  { %v15438_v57 = vpop.eup %12977 }
0x21b9   :  { %v5560_v10 = vpop.permute.xlu1 %5559 }
0x21ba   :  { %11834 = vmatmul.mubr.msk.f32.vlgmr.msra.gmra.mxu0 %vm919_vm7, %v5560_v10 }
0x21bb   :  { %11848 = vmatpush3.msra.mxu0 %v15112_v48  ;;  %11855 = vmatprep.mubr.msk.f32.mxu0 %vm13336_vm5, %v17669_v6  ;;  %v5365_v48 = vrot.slane %v15308_v63, 7 }
0x21bc   :  { %11849 = vmatprep.subr.mxu0 %v17669_v6 }
0x21bd   :  { %v5394_v29 = vpop.permute.xlu0 %5393  ;;  %11850 = vmatpush3.msra.mxu0 %v15125_v26  ;;  %v5366_v26 = vrot.slane %v15306_v31, 7  ;;  %v5377_v17 = vmul.f32 %v15435_v42, %v5365_v48 }
0x21be   :  { %v5407_v37 = vmul.f32 %v15435_v42, %v5394_v29  ;;  %v5396_v34 = vpop.permute.xlu1 %5395  ;;  %11851 = vmatprep.subr.mxu0 %v17669_v6 }
0x21bf   :  { %v5408_v41 = vmul.f32 %v15438_v57, %v5396_v34  ;;  %11852 = vmatpush3.msra.mxu0 %v15134_v27  ;;  %v5378_v38 = vmul.f32 %v15438_v57, %v5366_v26 }
0x21c0   :  { %5423 = vrot.lane.b32.xlu0 %v5407_v37, %s13338_s15  ;;  %11853 = vmatprep.subr.mxu0 %v17669_v6 }
0x21c1   :  { %5425 = vrot.lane.b32.xlu1 %v5408_v41, %s13338_s15  ;;  %11854 = vmatpush3.msra.mxu0 %v15143_v16 }
0x21c2   :  { %11869 = vmatprep.subr.mxu0 %v17669_v6 }
0x2232   :  { %v5424_v4 = vpop.permute.xlu0 %5423 }
0x2233   :  { %v15453_v27 = vadd.f32 %v5424_v4, %v5377_v17  ;;  %v5426_v36 = vpop.permute.xlu1 %5425  ;;  %v7650_v17 = vsel %vm86_vm1, %v15172_v13, %v15323_v40 }
0x2234   :  { %v15455_v46 = vadd.f32 %v5426_v36, %v5378_v38  ;;  %v7651_v38 = vsel %vm86_vm1, %v15168_v9, %v15326_v24 }
0x2235   :  { %12979 = vtanh.f32 %v15453_v27 }
0x2236   :  { %12981 = vtanh.f32 %v15455_v46 }
0x2238   :  { %v5550_v16 = vpop.f32.mrf.mxu1 }
0x2239   :  { %v5715_v52 = vrot.slane %v5550_v16, 5  ;;  %v5716_v0 = vrot.slane %v5550_v16, 6 }
0x223a   :  { %v11824_v63 = vpop.f32.mrf.mxu1 }
0x223b   :  { %v5727_v31 = vadd.f32 %v5715_v52, %v13595_v47  ;;  %v5728_v55 = vadd.f32 %v5716_v0, %v13603_v53 }
0x223d   :  { %12983 = vtanh.f32 %v5727_v31  ;;  %v10773_v14 = vmul.f32 -1.442695, %v5727_v31  ;;  %v10774_v15 = vmul.f32 -1.442695, %v5728_v55 }
0x223e   :  { %12985 = vtanh.f32 %v5728_v55 }
0x2242   :  { %v12980_v54 = vpop.eup %12979 }
0x2243   :  { %v12982_v7 = vpop.eup %12981  ;;  %5459 = vrot.lane.b32.xlu0 %v12980_v54, %s13337_s14 }
0x2244   :  { %5461 = vrot.lane.b32.xlu1 %v12982_v7, %s13337_s14 }
0x224a   :  { %v12984_v30 = vpop.eup %12983 }
0x224b   :  { %v12986_v43 = vpop.eup %12985  ;;  %5805 = vrot.lane.b32.xlu0 %v12984_v30, %s13337_s14 }
0x224c   :  { %5807 = vrot.lane.b32.xlu1 %v12986_v43, %s13337_s14 }
0x227a   :  { %v5629_v20 = vpop.f32.mrf.mxu0 }
0x227b   :  { %v5717_v58 = vrot.slane %v5629_v20, 5  ;;  %v5718_v23 = vrot.slane %v5629_v20, 6 }
0x227c   :  { %v11835_v33 = vpop.f32.mrf.mxu0 }
0x227d   :  { %v5729_v18 = vadd.f32 %v5717_v58, %v13742_v44  ;;  %v5730_v21 = vadd.f32 %v5718_v23, %v13751_v50 }
0x227f   :  { %12987 = vtanh.f32 %v5729_v18  ;;  %v10775_v31 = vmul.f32 -1.442695, %v5729_v18  ;;  %v10776_v55 = vmul.f32 -1.442695, %v5730_v21  ;;  %v5781_v18 = vrot.slane %v15357_v35, 7 }
0x2280   :  { %12989 = vtanh.f32 %v5730_v21 }
0x2281   :  { %12991 = vpow2.f32 %v10773_v14  ;;  %v5782_v14 = vrot.slane %v15360_v25, 7 }
0x2282   :  { %12993 = vpow2.f32 %v10774_v15 }
0x228c   :  { %v12988_v61 = vpop.eup %12987 }
0x228d   :  { %v12990_v59 = vpop.eup %12989  ;;  %5809 = vrot.lane.b32.xlu0 %v12988_v61, %s13337_s14 }
0x228e   :  { %5811 = vrot.lane.b32.xlu1 %v12990_v59, %s13337_s14  ;;  %v12992_v10 = vpop.eup %12991 }
0x228f   :  { %v12994_v29 = vpop.eup %12993  ;;  %v5751_v37 = vadd.f32 1.0, %v12992_v10 }
0x2290   :  { %v5752_v34 = vadd.f32 1.0, %v12994_v29 }
0x2291   :  { %12995 = vrcp.f32 %v5751_v37 }
0x2292   :  { %12997 = vrcp.f32 %v5752_v34 }
0x2293   :  { %12999 = vpow2.f32 %v10775_v31 }
0x2294   :  { %13001 = vpow2.f32 %v10776_v55 }
0x229e   :  { %v15484_v63 = vpop.eup %12995 }
0x229f   :  { %v15487_v40 = vpop.eup %12997  ;;  %v5793_v15 = vmul.f32 %v15484_v63, %v5781_v18 }
0x22a0   :  { %v13000_v54 = vpop.eup %12999  ;;  %v5794_v10 = vmul.f32 %v15487_v40, %v5782_v14 }
0x22a1   :  { %v13002_v7 = vpop.eup %13001  ;;  %v5753_v30 = vadd.f32 1.0, %v13000_v54 }
0x22a2   :  { %v5754_v43 = vadd.f32 1.0, %v13002_v7 }
0x22a3   :  { %13003 = vrcp.f32 %v5753_v30 }
0x22a4   :  { %13005 = vrcp.f32 %v5754_v43 }
0x22b0   :  { %v15493_v20 = vpop.eup %13003 }
0x22b1   :  { %v15495_v23 = vpop.eup %13005 }
0x22b5   :  { %v5460_v41 = vpop.permute.xlu0 %5459 }
0x22b6   :  { %v5473_v48 = vmul.f32 %v15435_v42, %v5460_v41  ;;  %v5462_v26 = vpop.permute.xlu1 %5461  ;;  %v5784_v41 = vrot.slane %v15377_v1, 7 }
0x22b7   :  { %v5474_v4 = vmul.f32 %v15438_v57, %v5462_v26 }
0x22b8   :  { %v5635_v36 = vrot.slane %v5473_v48, 2  ;;  %v15478_v16 = vsel %vm7577_vm8, %v7650_v17, %v5473_v48  ;;  %v5796_v48 = vmul.f32 %v15495_v23, %v5784_v41 }
0x22b9   :  { %v5636_v52 = vrot.slane %v5474_v4, 1  ;;  %v15481_v0 = vsel %vm7577_vm8, %v7651_v38, %v5474_v4 }
0x22bb   :  { %v5637_v42 = vsel %vm1298_vm6, %v5636_v52, %v5635_v36 }
0x22bc   :  { %5638 = vrot.lane.b32.xlu0 %v5637_v42, %s13338_s15 }
0x22bd   :  { %v5806_v13 = vpop.permute.xlu0 %5805 }
0x22be   :  { %v5823_v57 = vmul.f32 %v15484_v63, %v5806_v13  ;;  %v5808_v9 = vpop.permute.xlu1 %5807 }
0x22bf   :  { %v5824_v24 = vmul.f32 %v15487_v40, %v5808_v9 }
0x22c0   :  { %5835 = vrot.lane.b32.xlu1 %v5823_v57, %s13338_s15 }
0x22c1   :  { %5837 = vrot.lane.b32.xlu0 %v5824_v24, %s13338_s15 }
0x22ff   :  { %v5810_v58 = vpop.permute.xlu0 %5809 }
0x2300   :  { %v5825_v33 = vmul.f32 %v15493_v20, %v5810_v58  ;;  %v5812_v61 = vpop.permute.xlu1 %5811 }
0x2301   :  { %v5826_v59 = vmul.f32 %v15495_v23, %v5812_v61 }
0x2302   :  { %5839 = vrot.lane.b32.xlu1 %v5825_v33, %s13338_s15 }
0x2303   :  { %5841 = vrot.lane.b32.xlu0 %v5826_v59, %s13338_s15 }
0x232e   :  { %v5639_v21 = vpop.permute.xlu0 %5638 }
0x232f   :  { %11845 = vmatmul.mubr.msk.f32.vlgmr.msra.gmra.mxu1 %vm919_vm7, %v5639_v21 }
0x2330   :  { %11859 = vmatpush3.msra.mxu1 %v15199_v19  ;;  %11866 = vmatprep.mubr.msk.f32.mxu1 %vm13336_vm5, %v17669_v6 }
0x2331   :  { %11860 = vmatprep.subr.mxu1 %v17669_v6 }
0x2332   :  { %v5836_v29 = vpop.permute.xlu1 %5835  ;;  %11861 = vmatpush3.msra.mxu1 %v15210_v56  ;;  %v5783_v56 = vrot.slane %v15375_v2, 7 }
0x2333   :  { %v5838_v37 = vpop.permute.xlu0 %5837  ;;  %v15510_v34 = vadd.f32 %v5836_v29, %v5793_v15  ;;  %11862 = vmatprep.subr.mxu1 %v17669_v6 }
0x2334   :  { %v15513_v35 = vadd.f32 %v5838_v37, %v5794_v10  ;;  %11863 = vmatpush3.msra.mxu1 %v15221_v12  ;;  %v5795_v12 = vmul.f32 %v15493_v20, %v5783_v56  ;;  %v15591_v10 = vld [vmem:[%s17651_s12 + $0x40] sm:$0xff] }
0x2335   :  { %13007 = vtanh.f32 %v15510_v34  ;;  %11864 = vmatprep.subr.mxu1 %v17669_v6 }
0x2336   :  { %13009 = vtanh.f32 %v15513_v35  ;;  %11865 = vmatpush3.msra.mxu1 %v15230_v62 }
0x2337   :  { %11880 = vmatprep.subr.mxu1 %v17669_v6 }
0x2342   :  { %v13008_v19 = vpop.eup %13007 }
0x2343   :  { %v13010_v25 = vpop.eup %13009  ;;  %5871 = vrot.lane.b32.xlu1 %v13008_v19, %s13337_s14 }
0x2344   :  { %5873 = vrot.lane.b32.xlu0 %v13010_v25, %s13337_s14 }
0x2374   :  { %v5840_v26 = vpop.permute.xlu1 %5839 }
0x2375   :  { %v5842_v17 = vpop.permute.xlu0 %5841  ;;  %v15528_v4 = vadd.f32 %v5840_v26, %v5795_v12 }
0x2376   :  { %v15530_v62 = vadd.f32 %v5842_v17, %v5796_v48  ;;  %v15599_v48 = vld [vmem:[%s17651_s12 + $0x18] sm:$0xff] }
0x2377   :  { %13011 = vtanh.f32 %v15528_v4 }
0x2378   :  { %13013 = vtanh.f32 %v15530_v62 }
0x2384   :  { %v13012_v38 = vpop.eup %13011 }
0x2385   :  { %v13014_v36 = vpop.eup %13013  ;;  %5875 = vrot.lane.b32.xlu1 %v13012_v38, %s13337_s14  ;;  %v15610_v38 = vld [vmem:[%s17651_s12 + $0x10] sm:$0xff] }
0x2386   :  { %5877 = vrot.lane.b32.xlu0 %v13014_v36, %s13337_s14 }
0x23b5   :  { %v5872_v2 = vpop.permute.xlu1 %5871 }
0x23b6   :  { %v5874_v1 = vpop.permute.xlu0 %5873  ;;  %v5889_v52 = vmul.f32 %v15484_v63, %v5872_v2 }
0x23b7   :  { %v5890_v42 = vmul.f32 %v15487_v40, %v5874_v1 }
0x23b8   :  { %v5897_v13 = vrot.slane %v5889_v52, 3  ;;  %v15540_v57 = vsel %vm7580_vm9, %v15392_v45, %v5889_v52 }
0x23b9   :  { %v5898_v9 = vrot.slane %v5890_v42, 2  ;;  %v15544_v24 = vsel %vm7580_vm9, %v15395_v28, %v5890_v42  ;;  %v15621_v42 = vld [vmem:[%s17651_s12 + $0x8] sm:$0xff] }
0x23bb   :  { %v5899_v31 = vsel %vm1298_vm6, %v5898_v9, %v5897_v13  ;;  %v15630_v13 = vld [vmem:[%s17651_s12] sm:$0xff]  ;;  %v5785_v9 = vrot.slane %v15453_v27, 7 }
0x23bc   :  { %5900 = vrot.lane.b32.xlu1 %v5899_v31, %s13338_s15  ;;  %v5786_v31 = vrot.slane %v15455_v46, 7 }
0x23ef   :  { %v5708_v55 = vpop.f32.mrf.mxu1 }
0x23f0   :  { %v5719_v54 = vrot.slane %v5708_v55, 5  ;;  %v5720_v7 = vrot.slane %v5708_v55, 6 }
0x23f1   :  { %v11846_v63 = vpop.f32.mrf.mxu1 }
0x23f2   :  { %v5731_v40 = vadd.f32 %v5719_v54, %v13785_v3  ;;  %v5732_v30 = vadd.f32 %v5720_v7, %v13791_v8 }
0x23f4   :  { %13015 = vtanh.f32 %v5731_v40  ;;  %v10777_v29 = vmul.f32 -1.442695, %v5731_v40  ;;  %v10778_v37 = vmul.f32 -1.442695, %v5732_v30 }
0x23f5   :  { %13017 = vtanh.f32 %v5732_v30 }
0x23f6   :  { %13019 = vpow2.f32 %v10777_v29 }
0x23f7   :  { %v5876_v45 = vpop.permute.xlu1 %5875  ;;  %13021 = vpow2.f32 %v10778_v37 }
0x23f8   :  { %v5878_v43 = vpop.permute.xlu0 %5877  ;;  %v5891_v58 = vmul.f32 %v15493_v20, %v5876_v45 }
0x23f9   :  { %v5892_v28 = vmul.f32 %v15495_v23, %v5878_v43  ;;  %v15584_v23 = vld [vmem:[%s17651_s12 + $0x48] sm:$0xff] }
0x23fa   :  { %v5976_v33 = vrot.slane %v5891_v58, 3  ;;  %v15554_v61 = vsel %vm7580_vm9, %v15410_v22, %v5891_v58  ;;  %v15568_v22 = vld [vmem:[%s17651_s12 + $0x58] sm:$0xff] }
0x23fb   :  { %v5977_v59 = vrot.slane %v5892_v28, 2  ;;  %v15558_v18 = vsel %vm7580_vm9, %v15413_v5, %v5892_v28  ;;  %v15577_v5 = vld [vmem:[%s17651_s12 + $0x50] sm:$0xff] }
0x23fd   :  { %v5978_v21 = vsel %vm1298_vm6, %v5977_v59, %v5976_v33 }
0x23fe   :  { %5979 = vrot.lane.b32.xlu0 %v5978_v21, %s13338_s15 }
0x2401   :  { %v13016_v14 = vpop.eup %13015 }
0x2402   :  { %v13018_v15 = vpop.eup %13017  ;;  %5813 = vrot.lane.b32.xlu1 %v13016_v14, %s13337_s14 }
0x2403   :  { %5815 = vrot.lane.b32.xlu0 %v13018_v15, %s13337_s14  ;;  %v13020_v19 = vpop.eup %13019 }
0x2404   :  { %v13022_v25 = vpop.eup %13021  ;;  %v5755_v56 = vadd.f32 1.0, %v13020_v19 }
0x2405   :  { %v5756_v41 = vadd.f32 1.0, %v13022_v25 }
0x2406   :  { %13023 = vrcp.f32 %v5755_v56 }
0x2407   :  { %13025 = vrcp.f32 %v5756_v41 }
0x2413   :  { %v15605_v26 = vpop.eup %13023 }
0x2414   :  { %v15613_v36 = vpop.eup %13025  ;;  %v5797_v55 = vmul.f32 %v15605_v26, %v5785_v9 }
0x2415   :  { %v5798_v54 = vmul.f32 %v15613_v36, %v5786_v31 }
0x242e   :  { %v5901_v20 = vpop.permute.xlu1 %5900 }
0x242f   :  { %11856 = vmatmul.mubr.msk.f32.vlgmr.msra.gmra.mxu0 %vm919_vm7, %v5901_v20 }
0x2430   :  { %11870 = vmatpush3.msra.mxu0 %v15568_v22  ;;  %11877 = vmatprep.mubr.msk.f32.mxu0 %vm13336_vm5, %v17669_v6 }
0x2431   :  { %11871 = vmatprep.subr.mxu0 %v17669_v6 }
0x2432   :  { %11872 = vmatpush3.msra.mxu0 %v15577_v5 }
0x2433   :  { %11873 = vmatprep.subr.mxu0 %v17669_v6 }
0x2434   :  { %11874 = vmatpush3.msra.mxu0 %v15584_v23 }
0x2435   :  { %11875 = vmatprep.subr.mxu0 %v17669_v6 }
0x2436   :  { %11876 = vmatpush3.msra.mxu0 %v15591_v10 }
0x2437   :  { %11891 = vmatprep.subr.mxu0 %v17669_v6 }
0x2470   :  { %v5980_v12 = vpop.permute.xlu0 %5979 }
0x2471   :  { %11867 = vmatmul.mubr.msk.f32.vlgmr.msra.gmra.mxu1 %vm919_vm7, %v5980_v12 }
0x2472   :  { %11881 = vmatpush3.msra.mxu1 %v15599_v48  ;;  %11888 = vmatprep.mubr.msk.f32.mxu1 %vm13336_vm5, %v17669_v6 }
0x2473   :  { %11882 = vmatprep.subr.mxu1 %v17669_v6 }
0x2474   :  { %v5814_v17 = vpop.permute.xlu1 %5813  ;;  %11883 = vmatpush3.msra.mxu1 %v15610_v38 }
0x2475   :  { %v5816_v2 = vpop.permute.xlu0 %5815  ;;  %v5827_v1 = vmul.f32 %v15605_v26, %v5814_v17  ;;  %11884 = vmatprep.subr.mxu1 %v17669_v6 }
0x2476   :  { %v5828_v52 = vmul.f32 %v15613_v36, %v5816_v2  ;;  %11885 = vmatpush3.msra.mxu1 %v15621_v42 }
0x2477   :  { %5843 = vrot.lane.b32.xlu1 %v5827_v1, %s13338_s15  ;;  %11886 = vmatprep.subr.mxu1 %v17669_v6 }
0x2478   :  { %5845 = vrot.lane.b32.xlu0 %v5828_v52, %s13338_s15  ;;  %11887 = vmatpush3.msra.mxu1 %v15630_v13 }
0x2479   :  { %11902 = vmatprep.subr.mxu1 %v17669_v6 }
0x24e9   :  { %v5844_v7 = vpop.permute.xlu1 %5843 }
0x24ea   :  { %v5846_v63 = vpop.permute.xlu0 %5845  ;;  %v15638_v40 = vadd.f32 %v5844_v7, %v5797_v55 }
0x24eb   :  { %v15640_v30 = vadd.f32 %v5846_v63, %v5798_v54 }
0x24ec   :  { %13027 = vtanh.f32 %v15638_v40 }
0x24ed   :  { %13029 = vtanh.f32 %v15640_v30 }
0x24ef   :  { %v5970_v45 = vpop.f32.mrf.mxu0 }
0x24f0   :  { %v6135_v43 = vrot.slane %v5970_v45, 4  ;;  %v6136_v58 = vrot.slane %v5970_v45, 5 }
0x24f1   :  { %v11857_v27 = vpop.f32.mrf.mxu0 }
0x24f2   :  { %v6147_v46 = vadd.f32 %v6135_v43, %v13595_v47  ;;  %v6148_v28 = vadd.f32 %v6136_v58, %v13603_v53 }
0x24f4   :  { %13031 = vtanh.f32 %v6147_v46  ;;  %v10782_v12 = vmul.f32 -1.442695, %v6147_v46  ;;  %v10783_v17 = vmul.f32 -1.442695, %v6148_v28 }
0x24f5   :  { %13033 = vtanh.f32 %v6148_v28 }
0x24f9   :  { %v13028_v33 = vpop.eup %13027 }
0x24fa   :  { %v13030_v59 = vpop.eup %13029  ;;  %5879 = vrot.lane.b32.xlu1 %v13028_v33, %s13337_s14 }
0x24fb   :  { %5881 = vrot.lane.b32.xlu0 %v13030_v59, %s13337_s14 }
0x2501   :  { %v13032_v21 = vpop.eup %13031 }
0x2502   :  { %v13034_v14 = vpop.eup %13033  ;;  %6225 = vrot.lane.b32.xlu1 %v13032_v21, %s13337_s14 }
0x2503   :  { %6227 = vrot.lane.b32.xlu0 %v13034_v14, %s13337_s14 }
0x2531   :  { %v6049_v15 = vpop.f32.mrf.mxu1 }
0x2532   :  { %v6137_v20 = vrot.slane %v6049_v15, 4  ;;  %v6138_v29 = vrot.slane %v6049_v15, 5 }
0x2533   :  { %v11868_v37 = vpop.f32.mrf.mxu1 }
0x2534   :  { %v6149_v19 = vadd.f32 %v6137_v20, %v13742_v44  ;;  %v6150_v25 = vadd.f32 %v6138_v29, %v13751_v50 }
0x2536   :  { %13035 = vtanh.f32 %v6149_v19  ;;  %v10785_v59 = vmul.f32 -1.442695, %v6150_v25 }
0x2537   :  { %13037 = vtanh.f32 %v6150_v25 }
0x2538   :  { %13039 = vpow2.f32 %v10782_v12 }
0x2539   :  { %13041 = vpow2.f32 %v10783_v17 }
0x2543   :  { %v13036_v56 = vpop.eup %13035 }
0x2544   :  { %v13038_v41 = vpop.eup %13037  ;;  %6229 = vrot.lane.b32.xlu1 %v13036_v56, %s13337_s14 }
0x2545   :  { %6231 = vrot.lane.b32.xlu0 %v13038_v41, %s13337_s14  ;;  %v13040_v2 = vpop.eup %13039 }
0x2546   :  { %v13042_v1 = vpop.eup %13041  ;;  %v6171_v52 = vadd.f32 1.0, %v13040_v2  ;;  %v6202_v2 = vrot.slane %v15513_v35, 7 }
0x2547   :  { %v6172_v9 = vadd.f32 1.0, %v13042_v1 }
0x2548   :  { %13043 = vrcp.f32 %v6171_v52  ;;  %v15689_v52 = vld [vmem:[%s17651_s12 + $0x38] sm:$0xff] }
0x2549   :  { %13045 = vrcp.f32 %v6172_v9 }
0x2555   :  { %v15665_v46 = vpop.eup %13043 }
0x256c   :  { %v5880_v31 = vpop.permute.xlu1 %5879 }
0x256d   :  { %v5882_v55 = vpop.permute.xlu0 %5881  ;;  %v5893_v54 = vmul.f32 %v15605_v26, %v5880_v31  ;;  %v15668_v26 = vpop.eup %13045 }
0x256e   :  { %v5894_v7 = vmul.f32 %v15613_v36, %v5882_v55  ;;  %v15701_v55 = vld [vmem:[%s17651_s12 + $0x30] sm:$0xff] }
0x256f   :  { %v6055_v63 = vrot.slane %v5893_v54, 3  ;;  %v15658_v45 = vsel %vm7580_vm9, %v15478_v16, %v5893_v54 }
0x2570   :  { %v6056_v43 = vrot.slane %v5894_v7, 2  ;;  %v15662_v58 = vsel %vm7580_vm9, %v15481_v0, %v5894_v7  ;;  %v10784_v0 = vmul.f32 -1.442695, %v6149_v19  ;;  %v6201_v19 = vrot.slane %v15510_v34, 7  ;;  %v15711_v7 = vld [vmem:[%s17651_s12 + $0x28] sm:$0xff] }
0x2571   :  { %v6214_v34 = vmul.f32 %v15668_v26, %v6202_v2 }
0x2572   :  { %v6057_v27 = vsel %vm1298_vm6, %v6056_v43, %v6055_v63  ;;  %13047 = vpow2.f32 %v10784_v0  ;;  %v6213_v1 = vmul.f32 %v15665_v46, %v6201_v19  ;;  %v15719_v63 = vld [vmem:[%s17651_s12 + $0x20] sm:$0xff] }
0x2573   :  { %6058 = vrot.lane.b32.xlu1 %v6057_v27, %s13338_s15  ;;  %13049 = vpow2.f32 %v10785_v59 }
0x2574   :  { %v6226_v28 = vpop.permute.xlu1 %6225 }
0x2575   :  { %v6228_v36 = vpop.permute.xlu0 %6227  ;;  %v6243_v33 = vmul.f32 %v15665_v46, %v6226_v28  ;;  %v6203_v28 = vrot.slane %v15528_v4, 7 }
0x2576   :  { %v6244_v16 = vmul.f32 %v15668_v26, %v6228_v36  ;;  %v6204_v36 = vrot.slane %v15530_v62, 7 }
0x2577   :  { %6255 = vrot.lane.b32.xlu0 %v6243_v33, %s13338_s15 }
0x2578   :  { %6257 = vrot.lane.b32.xlu1 %v6244_v16, %s13338_s15 }
0x257f   :  { %v13048_v21 = vpop.eup %13047 }
0x2580   :  { %v13050_v14 = vpop.eup %13049  ;;  %v6173_v15 = vadd.f32 1.0, %v13048_v21 }
0x2581   :  { %v6174_v20 = vadd.f32 1.0, %v13050_v14 }
0x2582   :  { %13051 = vrcp.f32 %v6173_v15 }
0x2583   :  { %13053 = vrcp.f32 %v6174_v20 }
0x258f   :  { %v15674_v29 = vpop.eup %13051 }
0x2590   :  { %v15676_v56 = vpop.eup %13053  ;;  %v6215_v33 = vmul.f32 %v15674_v29, %v6203_v28 }
0x2591   :  { %v6216_v0 = vmul.f32 %v15676_v56, %v6204_v36 }
0x25b6   :  { %v6230_v37 = vpop.permute.xlu1 %6229 }
0x25b7   :  { %v6232_v41 = vpop.permute.xlu0 %6231  ;;  %v6245_v12 = vmul.f32 %v15674_v29, %v6230_v37 }
0x25b8   :  { %v6246_v17 = vmul.f32 %v15676_v56, %v6232_v41 }
0x25b9   :  { %6259 = vrot.lane.b32.xlu0 %v6245_v12, %s13338_s15 }
0x25ba   :  { %6261 = vrot.lane.b32.xlu1 %v6246_v17, %s13338_s15 }
0x25e5   :  { %v6059_v25 = vpop.permute.xlu1 %6058 }
0x25e6   :  { %11878 = vmatmul.mubr.msk.f32.vlgmr.msra.gmra.mxu0 %vm919_vm7, %v6059_v25 }
0x25e7   :  { %11892 = vmatpush3.msra.mxu0 %v15689_v52  ;;  %11899 = vmatprep.mubr.msk.f32.mxu0 %vm13336_vm5, %v17669_v6 }
0x25e8   :  { %11893 = vmatprep.subr.mxu0 %v17669_v6 }
0x25e9   :  { %v6256_v9 = vpop.permute.xlu0 %6255  ;;  %11894 = vmatpush3.msra.mxu0 %v15701_v55 }
0x25ea   :  { %v15696_v35 = vadd.f32 %v6256_v9, %v6213_v1  ;;  %v6258_v31 = vpop.permute.xlu1 %6257  ;;  %11895 = vmatprep.subr.mxu0 %v17669_v6 }
0x25eb   :  { %v15704_v54 = vadd.f32 %v6258_v31, %v6214_v34  ;;  %11896 = vmatpush3.msra.mxu0 %v15711_v7 }
0x25ec   :  { %13055 = vtanh.f32 %v15696_v35  ;;  %11897 = vmatprep.subr.mxu0 %v17669_v6 }
0x25ed   :  { %13057 = vtanh.f32 %v15704_v54  ;;  %11898 = vmatpush3.msra.mxu0 %v15719_v63 }
0x25ee   :  { %11913 = vmatprep.subr.mxu0 %v17669_v6 }
0x25f9   :  { %v13056_v43 = vpop.eup %13055 }
0x25fa   :  { %v13058_v27 = vpop.eup %13057  ;;  %6291 = vrot.lane.b32.xlu0 %v13056_v43, %s13337_s14 }
0x25fb   :  { %6293 = vrot.lane.b32.xlu1 %v13058_v27, %s13337_s14 }
0x262b   :  { %v6260_v16 = vpop.permute.xlu0 %6259 }
0x262c   :  { %v15729_v59 = vadd.f32 %v6260_v16, %v6215_v33  ;;  %v6262_v21 = vpop.permute.xlu1 %6261 }
0x262d   :  { %v15731_v14 = vadd.f32 %v6262_v21, %v6216_v0 }
0x262e   :  { %13059 = vtanh.f32 %v15729_v59 }
0x262f   :  { %13061 = vtanh.f32 %v15731_v14 }
0x263b   :  { %v13060_v15 = vpop.eup %13059 }
0x263c   :  { %v13062_v20 = vpop.eup %13061  ;;  %6295 = vrot.lane.b32.xlu0 %v13060_v15, %s13337_s14 }
0x263d   :  { %6297 = vrot.lane.b32.xlu1 %v13062_v20, %s13337_s14 }
0x266c   :  { %v6292_v4 = vpop.permute.xlu0 %6291 }
0x266d   :  { %v6309_v62 = vmul.f32 %v15665_v46, %v6292_v4  ;;  %v6294_v37 = vpop.permute.xlu1 %6293 }
0x266e   :  { %v6310_v41 = vmul.f32 %v15668_v26, %v6294_v37 }
0x266f   :  { %v6317_v12 = vrot.slane %v6309_v62, 4  ;;  %v15741_v17 = vsel %vm7583_vm10, %v15540_v57, %v6309_v62 }
0x2670   :  { %v6318_v19 = vrot.slane %v6310_v41, 3  ;;  %v15745_v25 = vsel %vm7583_vm10, %v15544_v24, %v6310_v41 }
0x2672   :  { %v6319_v2 = vsel %vm1298_vm6, %v6318_v19, %v6317_v12 }
0x2673   :  { %6320 = vrot.lane.b32.xlu0 %v6319_v2, %s13338_s15 }
0x26a6   :  { %v6128_v1 = vpop.f32.mrf.mxu0 }
0x26a7   :  { %v6139_v9 = vrot.slane %v6128_v1, 4  ;;  %v6140_v46 = vrot.slane %v6128_v1, 5 }
0x26a8   :  { %v11879_v34 = vpop.f32.mrf.mxu0 }
0x26a9   :  { %v6151_v26 = vadd.f32 %v6139_v9, %v13785_v3  ;;  %v6152_v31 = vadd.f32 %v6140_v46, %v13791_v8  ;;  %v6205_v46 = vrot.slane %v15638_v40, 7  ;;  %v6206_v34 = vrot.slane %v15640_v30, 7 }
0x26ab   :  { %13063 = vtanh.f32 %v6151_v26 }
0x26ac   :  { %13065 = vtanh.f32 %v6152_v31 }
0x26ae   :  { %v6296_v57 = vpop.permute.xlu0 %6295 }
0x26af   :  { %v6311_v43 = vmul.f32 %v15674_v29, %v6296_v57  ;;  %v6298_v27 = vpop.permute.xlu1 %6297 }
0x26b0   :  { %v6312_v24 = vmul.f32 %v15676_v56, %v6298_v27 }
0x26b1   :  { %v6396_v28 = vrot.slane %v6311_v43, 4  ;;  %v15755_v36 = vsel %vm7583_vm10, %v15554_v61, %v6311_v43  ;;  %v10786_v61 = vmul.f32 -1.442695, %v6151_v26 }
0x26b2   :  { %v6397_v33 = vrot.slane %v6312_v24, 3  ;;  %v15759_v16 = vsel %vm7583_vm10, %v15558_v18, %v6312_v24  ;;  %v10787_v18 = vmul.f32 -1.442695, %v6152_v31 }
0x26b3   :  { %13067 = vpow2.f32 %v10786_v61 }
0x26b4   :  { %v6398_v0 = vsel %vm1298_vm6, %v6397_v33, %v6396_v28  ;;  %13069 = vpow2.f32 %v10787_v18 }
0x26b5   :  { %6399 = vrot.lane.b32.xlu1 %v6398_v0, %s13338_s15 }
0x26b8   :  { %v13064_v21 = vpop.eup %13063 }
0x26b9   :  { %v13066_v15 = vpop.eup %13065  ;;  %6233 = vrot.lane.b32.xlu0 %v13064_v21, %s13337_s14 }
0x26ba   :  { %6235 = vrot.lane.b32.xlu1 %v13066_v15, %s13337_s14 }
0x26c0   :  { %v13068_v56 = vpop.eup %13067 }
0x26c1   :  { %v13070_v20 = vpop.eup %13069  ;;  %v6175_v4 = vadd.f32 1.0, %v13068_v56 }
0x26c2   :  { %v6176_v62 = vadd.f32 1.0, %v13070_v20 }
0x26c3   :  { %13071 = vrcp.f32 %v6175_v4 }
0x26c4   :  { %13073 = vrcp.f32 %v6176_v62 }
0x26d0   :  { %v15781_v41 = vpop.eup %13071 }
0x26d1   :  { %v13074_v19 = vpop.eup %13073  ;;  %v6217_v26 = vmul.f32 %v15781_v41, %v6205_v46 }
0x26d2   :  { %v6218_v57 = vmul.f32 %v13074_v19, %v6206_v34 }
0x26e5   :  { %v6321_v29 = vpop.permute.xlu0 %6320 }
0x26e6   :  { %11889 = vmatmul.mubr.msk.f32.vlgmr.msra.gmra.mxu1 %vm919_vm7, %v6321_v29 }
0x26e7   :  { %11903 = vmatpush3.msra.mxu1 %v15568_v22  ;;  %11910 = vmatprep.mubr.msk.f32.mxu1 %vm13336_vm5, %v17669_v6 }
0x26e8   :  { %11904 = vmatprep.subr.mxu1 %v17669_v6 }
0x26e9   :  { %11905 = vmatpush3.msra.mxu1 %v15577_v5 }
0x26ea   :  { %11906 = vmatprep.subr.mxu1 %v17669_v6 }
0x26eb   :  { %11907 = vmatpush3.msra.mxu1 %v15584_v23 }
0x26ec   :  { %11908 = vmatprep.subr.mxu1 %v17669_v6 }
0x26ed   :  { %11909 = vmatpush3.msra.mxu1 %v15591_v10 }
0x26ee   :  { %11924 = vmatprep.subr.mxu1 %v17669_v6 }
0x2727   :  { %v6400_v37 = vpop.permute.xlu1 %6399 }
0x2728   :  { %11900 = vmatmul.mubr.msk.f32.vlgmr.msra.gmra.mxu0 %vm919_vm7, %v6400_v37 }
0x2729   :  { %11914 = vmatpush3.msra.mxu0 %v15599_v48  ;;  %11921 = vmatprep.mubr.msk.f32.mxu0 %vm13336_vm5, %v17669_v6 }
0x272a   :  { %11915 = vmatprep.subr.mxu0 %v17669_v6 }
0x272b   :  { %v6234_v12 = vpop.permute.xlu0 %6233  ;;  %11916 = vmatpush3.msra.mxu0 %v15610_v38 }
0x272c   :  { %v6247_v2 = vmul.f32 %v15781_v41, %v6234_v12  ;;  %v6236_v1 = vpop.permute.xlu1 %6235  ;;  %11917 = vmatprep.subr.mxu0 %v17669_v6 }
0x272d   :  { %v6248_v9 = vmul.f32 %v13074_v19, %v6236_v1  ;;  %11918 = vmatpush3.msra.mxu0 %v15621_v42 }
0x272e   :  { %6263 = vrot.lane.b32.xlu0 %v6247_v2, %s13338_s15  ;;  %11919 = vmatprep.subr.mxu0 %v17669_v6 }
0x272f   :  { %6265 = vrot.lane.b32.xlu1 %v6248_v9, %s13338_s15  ;;  %11920 = vmatpush3.msra.mxu0 %v15630_v13 }
0x2730   :  { %11935 = vmatprep.subr.mxu0 %v17669_v6 }
0x27a0   :  { %v6264_v31 = vpop.permute.xlu0 %6263 }
0x27a1   :  { %v15795_v43 = vadd.f32 %v6264_v31, %v6217_v26  ;;  %v6266_v27 = vpop.permute.xlu1 %6265 }
0x27a2   :  { %v15797_v24 = vadd.f32 %v6266_v27, %v6218_v57 }
0x27a3   :  { %13075 = vtanh.f32 %v15795_v43 }
0x27a4   :  { %13077 = vtanh.f32 %v15797_v24 }
0x27a6   :  { %v6390_v28 = vpop.f32.mrf.mxu1 }
0x27a7   :  { %v6555_v33 = vrot.slane %v6390_v28, 3  ;;  %v6556_v0 = vrot.slane %v6390_v28, 4 }
0x27a8   :  { %v11890_v21 = vpop.f32.mrf.mxu1 }
0x27a9   :  { %v6567_v40 = vadd.f32 %v6555_v33, %v13595_v47  ;;  %v6568_v30 = vadd.f32 %v6556_v0, %v13603_v53 }
0x27ab   :  { %13079 = vtanh.f32 %v6567_v40  ;;  %v10791_v9 = vmul.f32 -1.442695, %v6567_v40  ;;  %v10792_v46 = vmul.f32 -1.442695, %v6568_v30 }
0x27ac   :  { %13081 = vtanh.f32 %v6568_v30 }
0x27b0   :  { %v13076_v15 = vpop.eup %13075 }
0x27b1   :  { %v13078_v29 = vpop.eup %13077  ;;  %6299 = vrot.lane.b32.xlu0 %v13076_v15, %s13337_s14 }
0x27b2   :  { %6301 = vrot.lane.b32.xlu1 %v13078_v29, %s13337_s14 }
0x27b8   :  { %v13080_v61 = vpop.eup %13079 }
0x27b9   :  { %v13082_v18 = vpop.eup %13081  ;;  %6645 = vrot.lane.b32.xlu0 %v13080_v61, %s13337_s14 }
0x27ba   :  { %6647 = vrot.lane.b32.xlu1 %v13082_v18, %s13337_s14 }
0x27e8   :  { %v6469_v56 = vpop.f32.mrf.mxu0 }
0x27e9   :  { %v6557_v20 = vrot.slane %v6469_v56, 3  ;;  %v6558_v4 = vrot.slane %v6469_v56, 4 }
0x27ea   :  { %v11901_v62 = vpop.f32.mrf.mxu0 }
0x27eb   :  { %v6569_v37 = vadd.f32 %v6557_v20, %v13742_v44  ;;  %v6570_v12 = vadd.f32 %v6558_v4, %v13751_v50 }
0x27ed   :  { %13083 = vtanh.f32 %v6569_v37  ;;  %v10794_v20 = vmul.f32 -1.442695, %v6570_v12 }
0x27ee   :  { %13085 = vtanh.f32 %v6570_v12 }
0x27ef   :  { %13087 = vpow2.f32 %v10791_v9 }
0x27f0   :  { %13089 = vpow2.f32 %v10792_v46 }
0x27fa   :  { %v13084_v2 = vpop.eup %13083 }
0x27fb   :  { %v13086_v1 = vpop.eup %13085  ;;  %6649 = vrot.lane.b32.xlu0 %v13084_v2, %s13337_s14 }
0x27fc   :  { %6651 = vrot.lane.b32.xlu1 %v13086_v1, %s13337_s14  ;;  %v13088_v34 = vpop.eup %13087 }
0x27fd   :  { %v13090_v26 = vpop.eup %13089  ;;  %v6591_v31 = vadd.f32 1.0, %v13088_v34 }
0x27fe   :  { %v6592_v57 = vadd.f32 1.0, %v13090_v26 }
0x27ff   :  { %13091 = vrcp.f32 %v6591_v31 }
0x2800   :  { %13093 = vrcp.f32 %v6592_v57 }
0x280c   :  { %v15821_v61 = vpop.eup %13091 }
0x2823   :  { %v6300_v27 = vpop.permute.xlu0 %6299 }
0x2824   :  { %v6313_v28 = vmul.f32 %v15781_v41, %v6300_v27  ;;  %v6302_v33 = vpop.permute.xlu1 %6301  ;;  %v15824_v41 = vpop.eup %13093  ;;  %v6622_v27 = vrot.slane %v15704_v54, 7 }
0x2825   :  { %v6314_v0 = vmul.f32 %v13074_v19, %v6302_v33 }
0x2826   :  { %v6475_v21 = vrot.slane %v6313_v28, 4  ;;  %v15814_v15 = vsel %vm7583_vm10, %v15658_v45, %v6313_v28  ;;  %v6634_v33 = vmul.f32 %v15824_v41, %v6622_v27 }
0x2827   :  { %v6476_v40 = vrot.slane %v6314_v0, 3  ;;  %v15818_v30 = vsel %vm7583_vm10, %v15662_v58, %v6314_v0  ;;  %v10793_v58 = vmul.f32 -1.442695, %v6569_v37  ;;  %v6621_v37 = vrot.slane %v15696_v35, 7 }
0x2829   :  { %v6477_v29 = vsel %vm1298_vm6, %v6476_v40, %v6475_v21  ;;  %13095 = vpow2.f32 %v10793_v58  ;;  %v6633_v28 = vmul.f32 %v15821_v61, %v6621_v37 }
0x282a   :  { %6478 = vrot.lane.b32.xlu0 %v6477_v29, %s13338_s15  ;;  %13097 = vpow2.f32 %v10794_v20 }
0x282b   :  { %v6646_v18 = vpop.permute.xlu0 %6645 }
0x282c   :  { %v6663_v19 = vmul.f32 %v15821_v61, %v6646_v18  ;;  %v6648_v56 = vpop.permute.xlu1 %6647  ;;  %v6623_v18 = vrot.slane %v15729_v59, 7 }
0x282d   :  { %v6664_v45 = vmul.f32 %v15824_v41, %v6648_v56 }
0x282e   :  { %6675 = vrot.lane.b32.xlu1 %v6663_v19, %s13338_s15  ;;  %v6624_v19 = vrot.slane %v15731_v14, 7 }
0x282f   :  { %6677 = vrot.lane.b32.xlu0 %v6664_v45, %s13338_s15 }
0x2836   :  { %v13096_v4 = vpop.eup %13095 }
0x2837   :  { %v13098_v62 = vpop.eup %13097  ;;  %v6593_v2 = vadd.f32 1.0, %v13096_v4 }
0x2838   :  { %v6594_v1 = vadd.f32 1.0, %v13098_v62 }
0x2839   :  { %13099 = vrcp.f32 %v6593_v2 }
0x283a   :  { %13101 = vrcp.f32 %v6594_v1 }
0x2846   :  { %v15830_v9 = vpop.eup %13099 }
0x2847   :  { %v15832_v34 = vpop.eup %13101  ;;  %v6635_v56 = vmul.f32 %v15830_v9, %v6623_v18 }
0x2848   :  { %v6636_v45 = vmul.f32 %v15832_v34, %v6624_v19 }
0x286d   :  { %v6650_v46 = vpop.permute.xlu0 %6649 }
0x286e   :  { %v6665_v26 = vmul.f32 %v15830_v9, %v6650_v46  ;;  %v6652_v31 = vpop.permute.xlu1 %6651 }
0x286f   :  { %v6666_v57 = vmul.f32 %v15832_v34, %v6652_v31 }
0x2870   :  { %6679 = vrot.lane.b32.xlu1 %v6665_v26, %s13338_s15 }
0x2871   :  { %6681 = vrot.lane.b32.xlu0 %v6666_v57, %s13338_s15 }
0x289c   :  { %v6479_v12 = vpop.permute.xlu0 %6478 }
0x289d   :  { %11911 = vmatmul.mubr.msk.f32.vlgmr.msra.gmra.mxu1 %vm919_vm7, %v6479_v12 }
0x289e   :  { %11925 = vmatpush3.msra.mxu1 %v15689_v52  ;;  %11932 = vmatprep.mubr.msk.f32.mxu1 %vm13336_vm5, %v17669_v6 }
0x289f   :  { %11926 = vmatprep.subr.mxu1 %v17669_v6 }
0x28a0   :  { %v6676_v0 = vpop.permute.xlu1 %6675  ;;  %11927 = vmatpush3.msra.mxu1 %v15701_v55 }
0x28a1   :  { %v6678_v21 = vpop.permute.xlu0 %6677  ;;  %v15847_v40 = vadd.f32 %v6676_v0, %v6633_v28  ;;  %11928 = vmatprep.subr.mxu1 %v17669_v6 }
0x28a2   :  { %v15850_v35 = vadd.f32 %v6678_v21, %v6634_v33  ;;  %11929 = vmatpush3.msra.mxu1 %v15711_v7 }
0x28a3   :  { %13103 = vtanh.f32 %v15847_v40  ;;  %11930 = vmatprep.subr.mxu1 %v17669_v6 }
0x28a4   :  { %13105 = vtanh.f32 %v15850_v35  ;;  %11931 = vmatpush3.msra.mxu1 %v15719_v63 }
0x28a5   :  { %11946 = vmatprep.subr.mxu1 %v17669_v6 }
0x28b0   :  { %v13104_v54 = vpop.eup %13103 }
0x28b1   :  { %v13106_v29 = vpop.eup %13105  ;;  %6711 = vrot.lane.b32.xlu1 %v13104_v54, %s13337_s14 }
0x28b2   :  { %6713 = vrot.lane.b32.xlu0 %v13106_v29, %s13337_s14 }
0x28e2   :  { %v6680_v58 = vpop.permute.xlu1 %6679 }
0x28e3   :  { %v6682_v20 = vpop.permute.xlu0 %6681  ;;  %v15865_v4 = vadd.f32 %v6680_v58, %v6635_v56 }
0x28e4   :  { %v15867_v62 = vadd.f32 %v6682_v20, %v6636_v45 }
0x28e5   :  { %13107 = vtanh.f32 %v15865_v4 }
0x28e6   :  { %13109 = vtanh.f32 %v15867_v62 }
0x28f2   :  { %v13108_v2 = vpop.eup %13107 }
0x28f3   :  { %v13110_v1 = vpop.eup %13109  ;;  %6715 = vrot.lane.b32.xlu1 %v13108_v2, %s13337_s14 }
0x28f4   :  { %6717 = vrot.lane.b32.xlu0 %v13110_v1, %s13337_s14 }
0x2923   :  { %v6712_v59 = vpop.permute.xlu1 %6711 }
0x2924   :  { %v6714_v14 = vpop.permute.xlu0 %6713  ;;  %v6729_v46 = vmul.f32 %v15821_v61, %v6712_v59 }
0x2925   :  { %v6730_v26 = vmul.f32 %v15824_v41, %v6714_v14 }
0x2926   :  { %v6737_v31 = vrot.slane %v6729_v46, 5  ;;  %v15877_v57 = vsel %vm7586_vm11, %v15741_v17, %v6729_v46 }
0x2927   :  { %v6738_v37 = vrot.slane %v6730_v26, 4  ;;  %v15881_v12 = vsel %vm7586_vm11, %v15745_v25, %v6730_v26 }
0x2929   :  { %v6739_v27 = vsel %vm1298_vm6, %v6738_v37, %v6737_v31 }
0x292a   :  { %6740 = vrot.lane.b32.xlu1 %v6739_v27, %s13338_s15 }
0x295d   :  { %v6548_v28 = vpop.f32.mrf.mxu1 }
0x295e   :  { %v6559_v33 = vrot.slane %v6548_v28, 3  ;;  %v6560_v0 = vrot.slane %v6548_v28, 4 }
0x295f   :  { %v11912_v61 = vpop.f32.mrf.mxu1 }
0x2960   :  { %v6571_v41 = vadd.f32 %v6559_v33, %v13785_v3  ;;  %v6572_v21 = vadd.f32 %v6560_v0, %v13791_v8 }
0x2962   :  { %13111 = vtanh.f32 %v6571_v41 }
0x2963   :  { %13113 = vtanh.f32 %v6572_v21 }
0x2965   :  { %v6716_v17 = vpop.permute.xlu1 %6715 }
0x2966   :  { %v6718_v54 = vpop.permute.xlu0 %6717  ;;  %v6731_v29 = vmul.f32 %v15830_v9, %v6716_v17 }
0x2967   :  { %v6732_v25 = vmul.f32 %v15832_v34, %v6718_v54 }
0x2968   :  { %v6816_v18 = vrot.slane %v6731_v29, 5  ;;  %v15891_v19 = vsel %vm7586_vm11, %v15755_v36, %v6731_v29  ;;  %v10795_v36 = vmul.f32 -1.442695, %v6571_v41 }
0x2969   :  { %v6817_v56 = vrot.slane %v6732_v25, 4  ;;  %v15895_v45 = vsel %vm7586_vm11, %v15759_v16, %v6732_v25  ;;  %v10796_v16 = vmul.f32 -1.442695, %v6572_v21 }
0x296a   :  { %13115 = vpow2.f32 %v10795_v36 }
0x296b   :  { %v6818_v58 = vsel %vm1298_vm6, %v6817_v56, %v6816_v18  ;;  %13117 = vpow2.f32 %v10796_v16 }
0x296c   :  { %6819 = vrot.lane.b32.xlu0 %v6818_v58, %s13338_s15 }
0x296f   :  { %v13112_v20 = vpop.eup %13111 }
0x2970   :  { %v13114_v2 = vpop.eup %13113  ;;  %6653 = vrot.lane.b32.xlu1 %v13112_v20, %s13337_s14 }
0x2971   :  { %6655 = vrot.lane.b32.xlu0 %v13114_v2, %s13337_s14 }
0x299c   :  { %v6741_v9 = vpop.permute.xlu1 %6740 }
0x299d   :  { %11922 = vmatmul.mubr.msk.f32.vlgmr.msra.gmra.mxu0 %vm919_vm7, %v6741_v9 }
0x299e   :  { %11936 = vmatpush3.msra.mxu0 %v15568_v22  ;;  %11943 = vmatprep.mubr.msk.f32.mxu0 %vm13336_vm5, %v17669_v6  ;;  %v13116_v22 = vpop.eup %13115 }
0x299f   :  { %11937 = vmatprep.subr.mxu0 %v17669_v6  ;;  %v13118_v34 = vpop.eup %13117  ;;  %v6595_v1 = vadd.f32 1.0, %v13116_v22 }
0x29a0   :  { %11938 = vmatpush3.msra.mxu0 %v15577_v5  ;;  %v6596_v59 = vadd.f32 1.0, %v13118_v34 }
0x29a1   :  { %11939 = vmatprep.subr.mxu0 %v17669_v6  ;;  %13119 = vrcp.f32 %v6595_v1 }
0x29a2   :  { %11940 = vmatpush3.msra.mxu0 %v15584_v23  ;;  %13121 = vrcp.f32 %v6596_v59 }
0x29a3   :  { %11941 = vmatprep.subr.mxu0 %v17669_v6 }
0x29a4   :  { %11942 = vmatpush3.msra.mxu0 %v15591_v10 }
0x29a5   :  { %11957 = vmatprep.subr.mxu0 %v17669_v6 }
0x29ae   :  { %v15917_v23 = vpop.eup %13119 }
0x29af   :  { %v13122_v14 = vpop.eup %13121 }
0x29de   :  { %v6820_v5 = vpop.permute.xlu0 %6819 }
0x29df   :  { %11933 = vmatmul.mubr.msk.f32.vlgmr.msra.gmra.mxu1 %vm919_vm7, %v6820_v5 }
0x29e0   :  { %11947 = vmatpush3.msra.mxu1 %v15599_v48  ;;  %11954 = vmatprep.mubr.msk.f32.mxu1 %vm13336_vm5, %v17669_v6  ;;  %v6625_v48 = vrot.slane %v15795_v43, 7 }
0x29e1   :  { %11948 = vmatprep.subr.mxu1 %v17669_v6 }
0x29e2   :  { %v6654_v10 = vpop.permute.xlu1 %6653  ;;  %11949 = vmatpush3.msra.mxu1 %v15610_v38  ;;  %v6626_v38 = vrot.slane %v15797_v24, 7  ;;  %v6637_v37 = vmul.f32 %v15917_v23, %v6625_v48 }
0x29e3   :  { %v6656_v46 = vpop.permute.xlu0 %6655  ;;  %v6667_v26 = vmul.f32 %v15917_v23, %v6654_v10  ;;  %11950 = vmatprep.subr.mxu1 %v17669_v6 }
0x29e4   :  { %v6668_v31 = vmul.f32 %v13122_v14, %v6656_v46  ;;  %11951 = vmatpush3.msra.mxu1 %v15621_v42  ;;  %v6638_v27 = vmul.f32 %v13122_v14, %v6626_v38 }
0x29e5   :  { %6683 = vrot.lane.b32.xlu1 %v6667_v26, %s13338_s15  ;;  %11952 = vmatprep.subr.mxu1 %v17669_v6 }
0x29e6   :  { %6685 = vrot.lane.b32.xlu0 %v6668_v31, %s13338_s15  ;;  %11953 = vmatpush3.msra.mxu1 %v15630_v13 }
0x29e7   :  { %11968 = vmatprep.subr.mxu1 %v17669_v6 }
0x2a57   :  { %v6684_v28 = vpop.permute.xlu1 %6683 }
0x2a58   :  { %v6686_v33 = vpop.permute.xlu0 %6685  ;;  %v15931_v42 = vadd.f32 %v6684_v28, %v6637_v37 }
0x2a59   :  { %v15933_v0 = vadd.f32 %v6686_v33, %v6638_v27 }
0x2a5a   :  { %13123 = vtanh.f32 %v15931_v42 }
0x2a5b   :  { %13125 = vtanh.f32 %v15933_v0 }
0x2a5d   :  { %v6810_v13 = vpop.f32.mrf.mxu0 }
0x2a5e   :  { %v6975_v61 = vrot.slane %v6810_v13, 2  ;;  %v6976_v41 = vrot.slane %v6810_v13, 3 }
0x2a5f   :  { %v11923_v21 = vpop.f32.mrf.mxu0 }
0x2a60   :  { %v6987_v43 = vadd.f32 %v6975_v61, %v13595_v47  ;;  %v6988_v24 = vadd.f32 %v6976_v41, %v13603_v53 }
0x2a62   :  { %13127 = vtanh.f32 %v6987_v43  ;;  %v10800_v22 = vmul.f32 -1.442695, %v6987_v43  ;;  %v10801_v34 = vmul.f32 -1.442695, %v6988_v24 }
0x2a63   :  { %13129 = vtanh.f32 %v6988_v24 }
0x2a67   :  { %v13124_v17 = vpop.eup %13123 }
0x2a68   :  { %v13126_v54 = vpop.eup %13125  ;;  %6719 = vrot.lane.b32.xlu1 %v13124_v17, %s13337_s14 }
0x2a69   :  { %6721 = vrot.lane.b32.xlu0 %v13126_v54, %s13337_s14 }
0x2a6f   :  { %v13128_v29 = vpop.eup %13127 }
0x2a70   :  { %v13130_v25 = vpop.eup %13129  ;;  %7065 = vrot.lane.b32.xlu1 %v13128_v29, %s13337_s14 }
0x2a71   :  { %7067 = vrot.lane.b32.xlu0 %v13130_v25, %s13337_s14 }
0x2a9f   :  { %v6889_v18 = vpop.f32.mrf.mxu1 }
0x2aa0   :  { %v6977_v56 = vrot.slane %v6889_v18, 2  ;;  %v6978_v58 = vrot.slane %v6889_v18, 3 }
0x2aa1   :  { %v11934_v20 = vpop.f32.mrf.mxu1 }
0x2aa2   :  { %v6989_v2 = vadd.f32 %v6977_v56, %v13742_v44  ;;  %v6990_v9 = vadd.f32 %v6978_v58, %v13751_v50 }
0x2aa4   :  { %13131 = vtanh.f32 %v6989_v2  ;;  %v10803_v21 = vmul.f32 -1.442695, %v6990_v9 }
0x2aa5   :  { %13133 = vtanh.f32 %v6990_v9 }
0x2aa6   :  { %13135 = vpow2.f32 %v10800_v22 }
0x2aa7   :  { %13137 = vpow2.f32 %v10801_v34 }
0x2ab1   :  { %v13132_v36 = vpop.eup %13131 }
0x2ab2   :  { %v13134_v16 = vpop.eup %13133  ;;  %7069 = vrot.lane.b32.xlu1 %v13132_v36, %s13337_s14  ;;  %v7042_v36 = vrot.slane %v15850_v35, 7 }
0x2ab3   :  { %7071 = vrot.lane.b32.xlu0 %v13134_v16, %s13337_s14  ;;  %v13136_v1 = vpop.eup %13135 }
0x2ab4   :  { %v13138_v59 = vpop.eup %13137  ;;  %v7011_v5 = vadd.f32 1.0, %v13136_v1 }
0x2ab5   :  { %v7012_v10 = vadd.f32 1.0, %v13138_v59 }
0x2ab6   :  { %13139 = vrcp.f32 %v7011_v5  ;;  %v7044_v5 = vrot.slane %v15867_v62, 7 }
0x2ab7   :  { %13141 = vrcp.f32 %v7012_v10 }
0x2ac3   :  { %v15957_v13 = vpop.eup %13139 }
0x2ac4   :  { %v15960_v41 = vpop.eup %13141 }
0x2ac5   :  { %v7054_v34 = vmul.f32 %v15960_v41, %v7042_v36 }
0x2ada   :  { %v6720_v46 = vpop.permute.xlu1 %6719 }
0x2adb   :  { %v6722_v26 = vpop.permute.xlu0 %6721  ;;  %v6733_v31 = vmul.f32 %v15917_v23, %v6720_v46 }
0x2adc   :  { %v6734_v48 = vmul.f32 %v13122_v14, %v6722_v26 }
0x2add   :  { %v6895_v38 = vrot.slane %v6733_v31, 5  ;;  %v15950_v37 = vsel %vm7586_vm11, %v15814_v15, %v6733_v31 }
0x2ade   :  { %v6896_v27 = vrot.slane %v6734_v48, 4  ;;  %v15954_v28 = vsel %vm7586_vm11, %v15818_v30, %v6734_v48  ;;  %v10802_v30 = vmul.f32 -1.442695, %v6989_v2  ;;  %v7041_v2 = vrot.slane %v15847_v40, 7 }
0x2ae0   :  { %v6897_v33 = vsel %vm1298_vm6, %v6896_v27, %v6895_v38  ;;  %13143 = vpow2.f32 %v10802_v30  ;;  %v7053_v16 = vmul.f32 %v15957_v13, %v7041_v2 }
0x2ae1   :  { %6898 = vrot.lane.b32.xlu1 %v6897_v33, %s13338_s15  ;;  %13145 = vpow2.f32 %v10803_v21 }
0x2ae2   :  { %v7066_v61 = vpop.permute.xlu1 %7065 }
0x2ae3   :  { %v7068_v23 = vpop.permute.xlu0 %7067  ;;  %v7083_v14 = vmul.f32 %v15957_v13, %v7066_v61 }
0x2ae4   :  { %v7084_v15 = vmul.f32 %v15960_v41, %v7068_v23 }
0x2ae5   :  { %7095 = vrot.lane.b32.xlu0 %v7083_v14, %s13338_s15 }
0x2ae6   :  { %7097 = vrot.lane.b32.xlu1 %v7084_v15, %s13338_s15 }
0x2aed   :  { %v13144_v43 = vpop.eup %13143 }
0x2aee   :  { %v13146_v24 = vpop.eup %13145  ;;  %v7013_v17 = vadd.f32 1.0, %v13144_v43 }
0x2aef   :  { %v7014_v54 = vadd.f32 1.0, %v13146_v24 }
0x2af0   :  { %13147 = vrcp.f32 %v7013_v17 }
0x2af1   :  { %13149 = vrcp.f32 %v7014_v54 }
0x2afd   :  { %v15966_v29 = vpop.eup %13147 }
0x2afe   :  { %v15968_v18 = vpop.eup %13149 }
0x2b24   :  { %v7070_v25 = vpop.permute.xlu1 %7069 }
0x2b25   :  { %v7072_v56 = vpop.permute.xlu0 %7071  ;;  %v7085_v58 = vmul.f32 %v15966_v29, %v7070_v25 }
0x2b26   :  { %v7086_v20 = vmul.f32 %v15968_v18, %v7072_v56 }
0x2b27   :  { %7099 = vrot.lane.b32.xlu0 %v7085_v58, %s13338_s15 }
0x2b28   :  { %7101 = vrot.lane.b32.xlu1 %v7086_v20, %s13338_s15 }
0x2b53   :  { %v6899_v9 = vpop.permute.xlu1 %6898 }
0x2b54   :  { %11944 = vmatmul.mubr.msk.f32.vlgmr.msra.gmra.mxu0 %vm919_vm7, %v6899_v9 }
0x2b55   :  { %11958 = vmatpush3.msra.mxu0 %v15689_v52  ;;  %11965 = vmatprep.mubr.msk.f32.mxu0 %vm13336_vm5, %v17669_v6 }
0x2b56   :  { %11959 = vmatprep.subr.mxu0 %v17669_v6 }
0x2b57   :  { %v7096_v22 = vpop.permute.xlu0 %7095  ;;  %11960 = vmatpush3.msra.mxu0 %v15701_v55  ;;  %v7043_v55 = vrot.slane %v15865_v4, 7 }
0x2b58   :  { %v15983_v1 = vadd.f32 %v7096_v22, %v7053_v16  ;;  %v7098_v40 = vpop.permute.xlu1 %7097  ;;  %11961 = vmatprep.subr.mxu0 %v17669_v6  ;;  %v13274_v22 = vld [vmem:[%s17651_s12 + $0x40] sm:$0xff] }
0x2b59   :  { %v15986_v35 = vadd.f32 %v7098_v40, %v7054_v34  ;;  %11962 = vmatpush3.msra.mxu0 %v15711_v7  ;;  %v7055_v10 = vmul.f32 %v15966_v29, %v7043_v55  ;;  %v7056_v7 = vmul.f32 %v15968_v18, %v7044_v5 }
0x2b5a   :  { %13151 = vtanh.f32 %v15983_v1  ;;  %11963 = vmatprep.subr.mxu0 %v17669_v6 }
0x2b5b   :  { %13153 = vtanh.f32 %v15986_v35  ;;  %11964 = vmatpush3.msra.mxu0 %v15719_v63 }
0x2b67   :  { %v13152_v52 = vpop.eup %13151 }
0x2b68   :  { %v13154_v59 = vpop.eup %13153  ;;  %7131 = vrot.lane.b32.xlu0 %v13152_v52, %s13337_s14 }
0x2b69   :  { %7133 = vrot.lane.b32.xlu1 %v13154_v59, %s13337_s14 }
0x2b99   :  { %v7100_v46 = vpop.permute.xlu0 %7099 }
0x2b9a   :  { %v16000_v26 = vadd.f32 %v7100_v46, %v7055_v10  ;;  %v7102_v31 = vpop.permute.xlu1 %7101 }
0x2b9b   :  { %v16002_v48 = vadd.f32 %v7102_v31, %v7056_v7 }
0x2b9c   :  { %13155 = vtanh.f32 %v16000_v26 }
0x2b9d   :  { %13157 = vtanh.f32 %v16002_v48 }
0x2ba9   :  { %v13156_v63 = vpop.eup %13155 }
0x2baa   :  { %v13158_v38 = vpop.eup %13157  ;;  %7135 = vrot.lane.b32.xlu0 %v13156_v63, %s13337_s14 }
0x2bab   :  { %7137 = vrot.lane.b32.xlu1 %v13158_v38, %s13337_s14 }
0x2bda   :  { %v7132_v4 = vpop.permute.xlu0 %7131 }
0x2bdb   :  { %v7149_v62 = vmul.f32 %v15957_v13, %v7132_v4  ;;  %v7134_v27 = vpop.permute.xlu1 %7133 }
0x2bdc   :  { %v7150_v33 = vmul.f32 %v15960_v41, %v7134_v27  ;;  %v7046_v27 = vrot.slane %v15933_v0, 7 }
0x2bdd   :  { %v7157_v61 = vrot.slane %v7149_v62, 6  ;;  %v16012_v23 = vsel %vm7589_vm12, %v15877_v57, %v7149_v62  ;;  %v7045_v62 = vrot.slane %v15931_v42, 7 }
0x2bde   :  { %v7158_v14 = vrot.slane %v7150_v33, 5  ;;  %v16016_v15 = vsel %vm7589_vm12, %v15881_v12, %v7150_v33 }
0x2be0   :  { %v7159_v30 = vsel %vm1298_vm6, %v7158_v14, %v7157_v61 }
0x2be1   :  { %7160 = vrot.lane.b32.xlu0 %v7159_v30, %s13338_s15 }
0x2c14   :  { %v6968_v21 = vpop.f32.mrf.mxu0 }
0x2c15   :  { %v6979_v43 = vrot.slane %v6968_v21, 2  ;;  %v6980_v13 = vrot.slane %v6968_v21, 3 }
0x2c16   :  { %v11945_v24 = vpop.f32.mrf.mxu0 }
0x2c17   :  { %v6991_v41 = vadd.f32 %v6979_v43, %v13785_v3  ;;  %v6992_v17 = vadd.f32 %v6980_v13, %v13791_v8 }
0x2c19   :  { %13159 = vtanh.f32 %v6991_v41  ;;  %v10804_v34 = vmul.f32 -1.442695, %v6991_v41  ;;  %v10805_v40 = vmul.f32 -1.442695, %v6992_v17 }
0x2c1a   :  { %13161 = vtanh.f32 %v6992_v17 }
0x2c1b   :  { %13163 = vpow2.f32 %v10804_v34 }
0x2c1c   :  { %v7136_v57 = vpop.permute.xlu0 %7135  ;;  %13165 = vpow2.f32 %v10805_v40 }
0x2c1d   :  { %v7151_v54 = vmul.f32 %v15966_v29, %v7136_v57  ;;  %v7138_v25 = vpop.permute.xlu1 %7137 }
0x2c1e   :  { %v7152_v12 = vmul.f32 %v15968_v18, %v7138_v25  ;;  %v13273_v18 = vld [vmem:[%s17651_s12 + $0x48] sm:$0xff] }
0x2c1f   :  { %v7236_v56 = vrot.slane %v7151_v54, 6  ;;  %v16026_v58 = vsel %vm7589_vm12, %v15891_v19, %v7151_v54  ;;  %v13271_v19 = vld [vmem:[%s17651_s12 + $0x58] sm:$0xff] }
0x2c20   :  { %v7237_v20 = vrot.slane %v7152_v12, 5  ;;  %v16030_v2 = vsel %vm7589_vm12, %v15895_v45, %v7152_v12  ;;  %v13272_v45 = vld [vmem:[%s17651_s12 + $0x50] sm:$0xff] }
0x2c22   :  { %v7238_v9 = vsel %vm1298_vm6, %v7237_v20, %v7236_v56 }
0x2c23   :  { %7239 = vrot.lane.b32.xlu1 %v7238_v9, %s13338_s15 }
0x2c26   :  { %v13160_v36 = vpop.eup %13159 }
0x2c27   :  { %v13162_v16 = vpop.eup %13161  ;;  %7073 = vrot.lane.b32.xlu0 %v13160_v36, %s13337_s14 }
0x2c28   :  { %7075 = vrot.lane.b32.xlu1 %v13162_v16, %s13337_s14  ;;  %v13164_v52 = vpop.eup %13163 }
0x2c29   :  { %v13166_v59 = vpop.eup %13165  ;;  %v7015_v55 = vadd.f32 1.0, %v13164_v52 }
0x2c2a   :  { %v7016_v5 = vadd.f32 1.0, %v13166_v59 }
0x2c2b   :  { %13167 = vrcp.f32 %v7015_v55 }
0x2c2c   :  { %13169 = vrcp.f32 %v7016_v5 }
0x2c38   :  { %v13168_v46 = vpop.eup %13167 }
0x2c39   :  { %v13170_v31 = vpop.eup %13169  ;;  %v7057_v33 = vmul.f32 %v13168_v46, %v7045_v62 }
0x2c3a   :  { %v7058_v14 = vmul.f32 %v13170_v31, %v7046_v27 }
0x2c53   :  { %v7161_v29 = vpop.permute.xlu0 %7160 }
0x2c54   :  { %11955 = vmatmul.mubr.msk.f32.vlgmr.msra.gmra.mxu1 %vm919_vm7, %v7161_v29 }
0x2c55   :  { %11969 = vmatpush3.msra.mxu1 %v13271_v19  ;;  %11976 = vmatprep.mubr.msk.f32.mxu1 %vm13336_vm5, %v17669_v6 }
0x2c56   :  { %11970 = vmatprep.subr.mxu1 %v17669_v6 }
0x2c57   :  { %11971 = vmatpush3.msra.mxu1 %v13272_v45 }
0x2c58   :  { %11972 = vmatprep.subr.mxu1 %v17669_v6 }
0x2c59   :  { %11973 = vmatpush3.msra.mxu1 %v13273_v18 }
0x2c5a   :  { %11974 = vmatprep.subr.mxu1 %v17669_v6 }
0x2c5b   :  { %11975 = vmatpush3.msra.mxu1 %v13274_v22 }
0x2c95   :  { %v7240_v10 = vpop.permute.xlu1 %7239 }
0x2c96   :  { %11966 = vmatmul.mubr.msk.f32.vlgmr.msra.gmra.mxu0 %vm919_vm7, %v7240_v10 }
0x2c99   :  { %v7074_v7 = vpop.permute.xlu0 %7073 }
0x2c9a   :  { %v7087_v63 = vmul.f32 %v13168_v46, %v7074_v7  ;;  %v7076_v38 = vpop.permute.xlu1 %7075 }
0x2c9b   :  { %v7088_v4 = vmul.f32 %v13170_v31, %v7076_v38 }
0x2c9c   :  { %7103 = vrot.lane.b32.xlu0 %v7087_v63, %s13338_s15 }
0x2c9d   :  { %7105 = vrot.lane.b32.xlu1 %v7088_v4, %s13338_s15 }
0x2d0e   :  { %v7104_v61 = vpop.permute.xlu0 %7103 }
0x2d0f   :  { %v16059_v30 = vadd.f32 %v7104_v61, %v7057_v33  ;;  %v7106_v21 = vpop.permute.xlu1 %7105  ;;  %v7463_v33 = vrot.slane %v16000_v26, 7  ;;  %v7665_v26 = vld [vmem:[%s17655_s16 + $0x8] sm:$0xff] }
0x2d10   :  { %v16061_v43 = vadd.f32 %v7106_v21, %v7058_v14 }
0x2d11   :  { %13171 = vtanh.f32 %v16059_v30 }
0x2d12   :  { %13173 = vtanh.f32 %v16061_v43 }
0x2d14   :  { %v16065_v13 = vpop.f32.mrf.mxu1 }
0x2d15   :  { %v7395_v24 = vrot.slane %v16065_v13, 1 }
0x2d16   :  { %v11956_v41 = vpop.f32.mrf.mxu1 }
0x2d17   :  { %v7407_v42 = vadd.f32 %v7395_v24, %v13595_v47  ;;  %v7667_v24 = vld [vmem:[%s17655_s16 + $0x18] sm:$0xff]  ;;  %v7666_v41 = vld [vmem:[%s17655_s16 + $0x10] sm:$0xff] }
0x2d18   :  { %11979 = vmatprep.subr.mxu0 %v7667_v24  ;;  %11993 = vmatprep.subr.mxu1 %v7667_v24 }
0x2d19   :  { %13175 = vtanh.f32 %v7407_v42  ;;  %v10809_v47 = vmul.f32 -1.442695, %v7407_v42  ;;  %11980 = vmatpush3.msra.mxu0 %v7667_v24  ;;  %v7664_v42 = vld [vmem:[%s17655_s16] sm:$0xff] }
0x2d1a   :  { %11981 = vmatprep.subr.mxu0 %v7666_v41 }
0x2d1b   :  { %11982 = vmatpush3.msra.mxu0 %v7666_v41 }
0x2d1c   :  { %11983 = vmatprep.subr.mxu0 %v7665_v26 }
0x2d1d   :  { %11984 = vmatpush3.msra.mxu0 %v7665_v26 }
0x2d1e   :  { %v13172_v0 = vpop.eup %13171  ;;  %11985 = vmatprep.subr.mxu0 %v7664_v42 }
0x2d1f   :  { %v13174_v17 = vpop.eup %13173  ;;  %7139 = vrot.lane.b32.xlu0 %v13172_v0, %s13337_s14  ;;  %11986 = vmatpush3.msra.mxu0 %v7664_v42 }
0x2d20   :  { %7141 = vrot.lane.b32.xlu1 %v13174_v17, %s13337_s14  ;;  %12007 = vmatprep.subr.mxu0 %v17669_v6 }
0x2d26   :  { %v13176_v57 = vpop.eup %13175 }
0x2d27   :  { %7485 = vrot.lane.b32.xlu0 %v13176_v57, %s13337_s14 }
0x2d56   :  { %v16072_v54 = vpop.f32.mrf.mxu0 }
0x2d57   :  { %v7397_v25 = vrot.slane %v16072_v54, 1 }
0x2d58   :  { %v11967_v12 = vpop.f32.mrf.mxu0 }
0x2d59   :  { %v7409_v56 = vadd.f32 %v7397_v25, %v13742_v44 }
0x2d5b   :  { %13177 = vtanh.f32 %v7409_v56  ;;  %v10811_v5 = vmul.f32 -1.442695, %v7409_v56 }
0x2d5c   :  { %13179 = vpow2.f32 %v10809_v47 }
0x2d68   :  { %v13178_v20 = vpop.eup %13177 }
0x2d69   :  { %7489 = vrot.lane.b32.xlu1 %v13178_v20, %s13337_s14  ;;  %v13180_v9 = vpop.eup %13179 }
0x2d6a   :  { %v7431_v36 = vadd.f32 1.0, %v13180_v9 }
0x2d6c   :  { %13181 = vrcp.f32 %v7431_v36 }
0x2d6d   :  { %13183 = vpow2.f32 %v10811_v5 }
0x2d79   :  { %v13182_v52 = vpop.eup %13181 }
0x2d7a   :  { %v13184_v10 = vpop.eup %13183 }
0x2d91   :  { %v7140_v16 = vpop.permute.xlu0 %7139 }
0x2d92   :  { %v7153_v29 = vmul.f32 %v13168_v46, %v7140_v16  ;;  %v7142_v19 = vpop.permute.xlu1 %7141  ;;  %v7433_v46 = vadd.f32 1.0, %v13184_v10 }
0x2d93   :  { %v7154_v45 = vmul.f32 %v13170_v31, %v7142_v19 }
0x2d94   :  { %v7315_v18 = vrot.slane %v7153_v29, 6  ;;  %v16079_v22 = vsel %vm7589_vm12, %v15950_v37, %v7153_v29  ;;  %13185 = vrcp.f32 %v7433_v46 }
0x2d95   :  { %v7316_v34 = vrot.slane %v7154_v45, 5  ;;  %v16083_v44 = vsel %vm7589_vm12, %v15954_v28, %v7154_v45  ;;  %v7461_v28 = vrot.slane %v15983_v1, 7 }
0x2d97   :  { %v7317_v40 = vsel %vm1298_vm6, %v7316_v34, %v7315_v18  ;;  %v7473_v38 = vmul.f32 %v13182_v52, %v7461_v28 }
0x2d98   :  { %7318 = vrot.lane.b32.xlu0 %v7317_v40, %s13338_s15 }
0x2d99   :  { %v7486_v59 = vpop.permute.xlu0 %7485 }
0x2d9a   :  { %v7503_v55 = vmul.f32 %v13182_v52, %v7486_v59  ;;  %v7465_v59 = vrot.slane %v16059_v30, 7 }
0x2d9c   :  { %7515 = vrot.lane.b32.xlu1 %v7503_v55, %s13338_s15 }
0x2da1   :  { %v13186_v37 = vpop.eup %13185 }
0x2da2   :  { %v7475_v61 = vmul.f32 %v13186_v37, %v7463_v33 }
0x2ddb   :  { %v7490_v7 = vpop.permute.xlu1 %7489 }
0x2ddc   :  { %v7505_v31 = vmul.f32 %v13186_v37, %v7490_v7 }
0x2dde   :  { %7519 = vrot.lane.b32.xlu0 %v7505_v31, %s13338_s15 }
0x2e0a   :  { %v7319_v63 = vpop.permute.xlu0 %7318 }
0x2e0b   :  { %11977 = vmatmul.mubr.msk.f32.vlgmr.msra.gmra.mxu1 %vm919_vm7, %v7319_v63 }
0x2e0c   :  { %11994 = vmatpush3.msra.mxu1 %v7667_v24 }
0x2e0d   :  { %11995 = vmatprep.subr.mxu1 %v7666_v41 }
0x2e0e   :  { %v7516_v4 = vpop.permute.xlu1 %7515  ;;  %11996 = vmatpush3.msra.mxu1 %v7666_v41 }
0x2e0f   :  { %v7533_v62 = vadd.f32 %v7516_v4, %v7473_v38  ;;  %11997 = vmatprep.subr.mxu1 %v7665_v26 }
0x2e10   :  { %11998 = vmatpush3.msra.mxu1 %v7665_v26 }
0x2e11   :  { %13187 = vtanh.f32 %v7533_v62  ;;  %11999 = vmatprep.subr.mxu1 %v7664_v42  ;;  %v7919_v62 = vrot.slane %v14926_v39, 6 }
0x2e12   :  { %12000 = vmatpush3.msra.mxu1 %v7664_v42 }
0x2e1e   :  { %v13188_v27 = vpop.eup %13187 }
0x2e1f   :  { %7551 = vrot.lane.b32.xlu1 %v13188_v27, %s13337_s14 }
0x2e23   :  { %7703 = vrot.lane.b32.xlu1 %v14926_v39, %s13338_s15 }
0x2e27   :  { %7707 = vrot.lane.b32.xlu1 %v14940_v11, %s13338_s15 }
0x2e50   :  { %v7520_v1 = vpop.permute.xlu0 %7519 }
0x2e51   :  { %v7535_v14 = vadd.f32 %v7520_v1, %v7475_v61 }
0x2e53   :  { %13189 = vtanh.f32 %v7535_v14 }
0x2e60   :  { %v13190_v21 = vpop.eup %13189 }
0x2e61   :  { %7555 = vrot.lane.b32.xlu0 %v13190_v21, %s13337_s14 }
0x2e91   :  { %v7552_v0 = vpop.permute.xlu1 %7551 }
0x2e92   :  { %v7569_v17 = vmul.f32 %v13182_v52, %v7552_v0 }
0x2e94   :  { %v16113_v57 = vsel %vm99_vm0, %v16012_v23, %v7569_v17 }
0x2e95   :  { %7705 = vrot.lane.b32.xlu0 %v16113_v57, %s13338_s15  ;;  %v16117_v25 = vpop.permute.xlu1 %7703  ;;  %v7920_v33 = vrot.slane %v16113_v57, 6 }
0x2e96   :  { %11987 = vmatprep.mubr.msk.f32.mxu0 %vm919_vm7, %v16117_v25 }
0x2e97   :  { %v7921_v41 = vsel %vm7577_vm8, %v7919_v62, %v7920_v33 }
0x2e99   :  { %v16121_v12 = vpop.permute.xlu1 %7707 }
0x2e9a   :  { %12001 = vmatprep.mubr.msk.f32.mxu1 %vm919_vm7, %v16121_v12 }
0x2ecb   :  { %v16125_v56 = vpop.f32.mrf.mxu1 }
0x2ecc   :  { %v7399_v20 = vrot.slane %v16125_v56, 1 }
0x2ecd   :  { %v11978_v47 = vpop.f32.mrf.mxu1 }
0x2ece   :  { %v7411_v23 = vadd.f32 %v7399_v20, %v13785_v3 }
0x2ed0   :  { %13191 = vtanh.f32 %v7411_v23  ;;  %v10813_v3 = vmul.f32 -1.442695, %v7411_v23  ;;  %v16192_v23 = vld [vmem:[%s17656_s17 + $0x58] sm:$0xff] }
0x2ed2   :  { %13193 = vpow2.f32 %v10813_v3  ;;  %v16218_v3 = vld [vmem:[%s17656_s17 + $0x38] sm:$0xff] }
0x2ed3   :  { %v7556_v9 = vpop.permute.xlu0 %7555 }
0x2ed4   :  { %v7571_v36 = vmul.f32 %v13186_v37, %v7556_v9  ;;  %v16197_v9 = vld [vmem:[%s17656_s17 + $0x50] sm:$0xff] }
0x2ed6   :  { %v16131_v16 = vsel %vm99_vm0, %v16026_v58, %v7571_v36  ;;  %v16204_v36 = vld [vmem:[%s17656_s17 + $0x48] sm:$0xff] }
0x2ed7   :  { %7709 = vrot.lane.b32.xlu0 %v16131_v16, %s13338_s15 }
0x2edd   :  { %v13192_v29 = vpop.eup %13191 }
0x2ede   :  { %7493 = vrot.lane.b32.xlu1 %v13192_v29, %s13337_s14  ;;  %v16211_v29 = vld [vmem:[%s17656_s17 + $0x40] sm:$0xff] }
0x2edf   :  { %v13194_v45 = vpop.eup %13193 }
0x2ee0   :  { %v7435_v18 = vadd.f32 1.0, %v13194_v45  ;;  %v16225_v45 = vld [vmem:[%s17656_s17 + $0x30] sm:$0xff] }
0x2ee2   :  { %13195 = vrcp.f32 %v7435_v18  ;;  %v16232_v18 = vld [vmem:[%s17656_s17 + $0x28] sm:$0xff] }
0x2eef   :  { %v13196_v34 = vpop.eup %13195 }
0x2ef0   :  { %v7477_v55 = vmul.f32 %v13196_v34, %v7465_v59  ;;  %v16260_v59 = vld [vmem:[%s17656_s17 + $0x8] sm:$0xff] }
0x2f07   :  { %v16136_v19 = vpop.permute.xlu0 %7705 }
0x2f08   :  { %11988 = vmatmul.mubr.msk.f32.vlgmr.msra.gmra.mxu0 %vm919_vm7, %v16136_v19 }
0x2f09   :  { %11990 = vmatprep.mubr.msk.f32.mxu0 %vm919_vm7, %v16121_v12  ;;  %12008 = vmatpush3.msra.mxu0 %v16192_v23 }
0x2f0a   :  { %12009 = vmatprep.subr.mxu0 %v17669_v6 }
0x2f0b   :  { %12010 = vmatpush3.msra.mxu0 %v16197_v9 }
0x2f0c   :  { %12011 = vmatprep.subr.mxu0 %v17669_v6 }
0x2f0d   :  { %12012 = vmatpush3.msra.mxu0 %v16204_v36 }
0x2f0e   :  { %12013 = vmatprep.subr.mxu0 %v17669_v6 }
0x2f0f   :  { %12014 = vmatpush3.msra.mxu0 %v16211_v29 }
0x2f10   :  { %12015 = vmatprep.subr.mxu0 %v17669_v6 }
0x2f11   :  { %12016 = vmatpush3.msra.mxu0 %v16218_v3 }
0x2f12   :  { %12017 = vmatprep.subr.mxu0 %v17669_v6 }
0x2f13   :  { %12018 = vmatpush3.msra.mxu0 %v16225_v45 }
0x2f14   :  { %12019 = vmatprep.subr.mxu0 %v17669_v6 }
0x2f15   :  { %12020 = vmatpush3.msra.mxu0 %v16232_v18 }
0x2f16   :  { %12021 = vmatprep.subr.mxu0 %v17669_v6 }
0x2f49   :  { %v16142_v58 = vpop.permute.xlu0 %7709 }
0x2f4a   :  { %11991 = vmatmul.mubr.msk.f32.gmra.mxu0 %vm919_vm7, %v16142_v58  ;;  %12002 = vmatmul.mubr.msk.f32.vlgmr.msra.gmra.mxu1 %vm919_vm7, %v16142_v58 }
0x2f4b   :  { %12031 = vmatprep.mubr.msk.f32.mxu0 %vm13336_vm5, %v17669_v6 }
0x2f50   :  { %v7494_v40 = vpop.permute.xlu1 %7493 }
0x2f51   :  { %v7507_v52 = vmul.f32 %v13196_v34, %v7494_v40  ;;  %v16246_v40 = vld [vmem:[%s17656_s17 + $0x18] sm:$0xff] }
0x2f53   :  { %7523 = vrot.lane.b32.xlu0 %v7507_v52, %s13338_s15  ;;  %v16253_v52 = vld [vmem:[%s17656_s17 + $0x10] sm:$0xff] }
0x2fc5   :  { %v7524_v5 = vpop.permute.xlu0 %7523 }
0x2fc6   :  { %v7537_v10 = vadd.f32 %v7524_v5, %v7477_v55  ;;  %v16269_v55 = vld [vmem:[%s17656_s17] sm:$0xff] }
0x2fc8   :  { %v11989_v46 = vpop.f32.mrf.mxu0  ;;  %13197 = vtanh.f32 %v7537_v10 }
0x2fc9   :  { %v7805_v28 = vmax.f32 %v11989_v46, 0.0 }
0x2fca   :  { %v7785_v37 = vpop.f32.mrf.mxu0 }
0x2fcb   :  { %v7804_v7 = vmax.f32 %v7785_v37, 0.0 }
0x2fcd   :  { %7911 = vrot.lane.b32.xlu0 %v7804_v7, %s13339_s3 }
0x2fd5   :  { %v13198_v31 = vpop.eup %13197 }
0x2fd6   :  { %7559 = vrot.lane.b32.xlu1 %v13198_v31, %s13337_s14 }
0x2fda   :  { %7913 = vrot.lane.b32.xlu1 %v7805_v28, %s13339_s3 }
0x300a   :  { %v11992_v63 = vpop.f32.mrf.mxu0 }
0x300b   :  { %v7807_v38 = vmax.f32 %v11992_v63, 0.0 }
0x300c   :  { %v7795_v4 = vpop.f32.mrf.mxu0 }
0x300d   :  { %v7806_v30 = vmax.f32 %v7795_v4, 0.0  ;;  %7917 = vrot.lane.b32.xlu1 %v7807_v38, %s13339_s3 }
0x300f   :  { %7915 = vrot.lane.b32.xlu0 %v7806_v30, %s13339_s3 }
0x3013   :  { %7810 = vrot.lane.b32.xlu0 %v14999_v32, %s13338_s15 }
0x3017   :  { %7930 = vrot.lane.b32.xlu0 %v7919_v62, %s13338_s15 }
0x303f   :  { %v16161_v27 = vpop.permute.xlu0 %7911 }
0x3040   :  { %v7922_v61 = vrot.slane %v16161_v27, 6 }
0x3042   :  { %v7923_v1 = vsel %vm7577_vm8, %v7920_v33, %v7922_v61 }
0x3043   :  { %7934 = vrot.lane.b32.xlu0 %v7923_v1, %s13338_s15 }
0x3048   :  { %v7560_v14 = vpop.permute.xlu1 %7559 }
0x3049   :  { %v7573_v21 = vmul.f32 %v13196_v34, %v7560_v14  ;;  %v16239_v34 = vld [vmem:[%s17656_s17 + $0x20] sm:$0xff] }
0x304a   :  { %12022 = vmatpush3.msra.mxu0 %v16239_v34 }
0x304b   :  { %v7662_v24 = vsel %vm99_vm0, %v16079_v22, %v7573_v21  ;;  %12023 = vmatprep.subr.mxu0 %v17669_v6 }
0x304c   :  { %7812 = vrot.lane.b32.xlu1 %v7662_v24, %s13338_s15  ;;  %v16170_v39 = vpop.permute.xlu1 %7913  ;;  %12024 = vmatpush3.msra.mxu0 %v16246_v40 }
0x304d   :  { %v7924_v32 = vrot.slane %v16170_v39, 6  ;;  %12025 = vmatprep.subr.mxu0 %v17669_v6 }
0x304e   :  { %12026 = vmatpush3.msra.mxu0 %v16253_v52 }
0x304f   :  { %v7925_v26 = vsel %vm7577_vm8, %v7922_v61, %v7924_v32  ;;  %12027 = vmatprep.subr.mxu0 %v17669_v6 }
0x3050   :  { %7932 = vrot.lane.b32.xlu1 %v7921_v41, %s13338_s15  ;;  %12028 = vmatpush3.msra.mxu0 %v16260_v59 }
0x3051   :  { %12029 = vmatprep.subr.mxu0 %v17669_v6 }
0x3052   :  { %12030 = vmatpush3.msra.mxu0 %v16269_v55 }
0x3054   :  { %7936 = vrot.lane.b32.xlu1 %v7925_v26, %s13338_s15 }
0x307f   :  { %v16177_v42 = vpop.permute.xlu1 %7917 }
0x3080   :  { %v7928_v22 = vrot.slane %v16177_v42, 6 }
0x3081   :  { %v16179_v0 = vpop.permute.xlu0 %7915 }
0x3082   :  { %v7926_v17 = vrot.slane %v16179_v0, 6 }
0x3084   :  { %v7929_v57 = vsel %vm7577_vm8, %v7926_v17, %v7928_v22  ;;  %v7927_v20 = vsel %vm7577_vm8, %v7924_v32, %v7926_v17 }
0x3085   :  { %7940 = vrot.lane.b32.xlu1 %v7929_v57, %s13338_s15  ;;  %7938 = vrot.lane.b32.xlu0 %v7927_v20, %s13338_s15  ;;  %v7811_v47 = vpop.permute.xlu0 %7810 }
0x3086   :  { %12004 = vmatprep.mubr.msk.f32.mxu1 %vm919_vm7, %v7811_v47 }
0x3089   :  { %7942 = vrot.lane.b32.xlu0 %v7928_v22, %s13338_s15  ;;  %v7931_v5 = vpop.permute.xlu0 %7930 }
0x308a   :  { %v7951_v46 = vsel %vm7577_vm8, 0.0, %v7931_v5 }
0x308b   :  { %v7955_v7 = vrot.slane %v7951_v46, 1  ;;  %v7989_v31 = vrot.slane %v7951_v46, 2 }
0x30b5   :  { %v16278_v38 = vpop.permute.xlu0 %7934 }
0x30b6   :  { %v7958_v33 = vrot.slane %v16278_v38, 1  ;;  %v7992_v61 = vrot.slane %v16278_v38, 2 }
0x30be   :  { %v7813_v10 = vpop.permute.xlu1 %7812 }
0x30bf   :  { %12005 = vmatmul.mubr.msk.f32.gmra.mxu1 %vm919_vm7, %v7813_v10 }
0x30c2   :  { %v16274_v37 = vpop.permute.xlu1 %7932 }
0x30c3   :  { %v7956_v28 = vrot.slane %v16274_v37, 1  ;;  %v7990_v63 = vrot.slane %v16274_v37, 2 }
0x30c5   :  { %v7991_v4 = vsel %vm7589_vm12, %v7989_v31, %v7990_v63  ;;  %v7957_v30 = vsel %vm99_vm0, %v7955_v7, %v7956_v28  ;;  %v7993_v21 = vsel %vm7589_vm12, %v7990_v63, %v7992_v61  ;;  %v7959_v24 = vsel %vm99_vm0, %v7956_v28, %v7958_v33 }
0x30c6   :  { %v16282_v62 = vpop.permute.xlu1 %7936  ;;  %8002 = vrot.lane.b32.xlu0 %v7991_v4, %s13337_s14  ;;  %7968 = vrot.lane.b32.xlu1 %v7957_v30, %s13338_s15 }
0x30c7   :  { %v7960_v1 = vrot.slane %v16282_v62, 1  ;;  %v7994_v14 = vrot.slane %v16282_v62, 2 }
0x30c9   :  { %v7995_v32 = vsel %vm7589_vm12, %v7992_v61, %v7994_v14  ;;  %v7961_v41 = vsel %vm99_vm0, %v7958_v33, %v7960_v1  ;;  %v12003_v33 = vpop.f32.mrf.mxu1 }
0x30ca   :  { %8004 = vrot.lane.b32.xlu0 %v7993_v21, %s13337_s14  ;;  %7970 = vrot.lane.b32.xlu1 %v7959_v24, %s13338_s15  ;;  %v7904_v21 = vmax.f32 %v12003_v33, 0.0 }
0x30ce   :  { %8006 = vrot.lane.b32.xlu0 %v7995_v32, %s13337_s14  ;;  %7972 = vrot.lane.b32.xlu1 %v7961_v41, %s13338_s15 }
0x30f7   :  { %v16298_v26 = vpop.permute.xlu1 %7940  ;;  %v7939_v22 = vpop.permute.xlu0 %7938 }
0x30f8   :  { %v7962_v17 = vrot.slane %v7939_v22, 1  ;;  %v7996_v57 = vrot.slane %v7939_v22, 2  ;;  %v7964_v20 = vrot.slane %v16298_v26, 1  ;;  %v7998_v47 = vrot.slane %v16298_v26, 2 }
0x30fa   :  { %v7997_v5 = vsel %vm7589_vm12, %v7994_v14, %v7996_v57  ;;  %v7963_v10 = vsel %vm99_vm0, %v7960_v1, %v7962_v17  ;;  %v7999_v4 = vsel %vm7589_vm12, %v7996_v57, %v7998_v47  ;;  %v7965_v30 = vsel %vm99_vm0, %v7962_v17, %v7964_v20  ;;  %v7884_v14 = vpop.f32.mrf.mxu1 }
0x30fb   :  { %8008 = vrot.lane.b32.xlu0 %v7997_v5, %s13337_s14  ;;  %7974 = vrot.lane.b32.xlu1 %v7963_v10, %s13338_s15  ;;  %v7943_v7 = vpop.permute.xlu0 %7942  ;;  %v7903_v24 = vmax.f32 %v7884_v14, 0.0 }
0x30fc   :  { %v7952_v31 = vsel %vm7577_vm8, %v7943_v7, 0.0 }
0x30fd   :  { %v7966_v28 = vrot.slane %v7952_v31, 1  ;;  %v8000_v63 = vrot.slane %v7952_v31, 2 }
0x30ff   :  { %8010 = vrot.lane.b32.xlu0 %v7999_v4, %s13337_s14  ;;  %7976 = vrot.lane.b32.xlu1 %v7965_v30, %s13338_s15  ;;  %v8001_v61 = vsel %vm7589_vm12, %v7998_v47, %v8000_v63  ;;  %v7967_v1 = vsel %vm99_vm0, %v7964_v20, %v7966_v28 }
0x3103   :  { %8012 = vrot.lane.b32.xlu0 %v8001_v61, %s13337_s14  ;;  %7978 = vrot.lane.b32.xlu1 %v7967_v1, %s13338_s15 }
0x3107   :  { %8014 = vrot.lane.b32.xlu0 %v8000_v63, %s13337_s14  ;;  %7980 = vrot.lane.b32.xlu1 %v7966_v28, %s13338_s15 }
0x310b   :  { %8387 = vrot.lane.b32.xlu0 %v7904_v21, %s13339_s3  ;;  %8385 = vrot.lane.b32.xlu1 %v7903_v24, %s13339_s3 }
0x3138   :  { %v7969_v32 = vpop.permute.xlu1 %7968  ;;  %v8003_v41 = vpop.permute.xlu0 %8002 }
0x3139   :  { %v8023_v17 = vsel %vm919_vm7, %v7951_v46, %v7969_v32 }
0x313a   :  { %v8031_v57 = vsel %vm8030_vm13, %v8023_v17, %v8003_v41 }
0x313b   :  { %12032 = vmatmul.mubr.msk.f32.vlgmr.msra.gmra.mxu0 %vm8038_vm14, %v8031_v57 }
0x313c   :  { %v7971_v20 = vpop.permute.xlu1 %7970  ;;  %v8005_v47 = vpop.permute.xlu0 %8004  ;;  %12034 = vmatprep.mubr.msk.f32.mxu0 %vm13336_vm5, %v17669_v6 }
0x313d   :  { %v8024_v5 = vsel %vm919_vm7, %v16274_v37, %v7971_v20 }
0x313e   :  { %v8032_v10 = vsel %vm8030_vm13, %v8024_v5, %v8005_v47  ;;  %v8394_v5 = vrot.slane %v16131_v16, 6 }
0x313f   :  { %12035 = vmatmul.mubr.msk.f32.gmra.mxu0 %vm8038_vm14, %v8032_v10 }
0x3140   :  { %v7973_v7 = vpop.permute.xlu1 %7972  ;;  %v8007_v28 = vpop.permute.xlu0 %8006  ;;  %12037 = vmatprep.mubr.msk.f32.mxu0 %vm13336_vm5, %v17669_v6 }
0x3141   :  { %v8025_v46 = vsel %vm919_vm7, %v16278_v38, %v7973_v7 }
0x3142   :  { %v8033_v63 = vsel %vm8030_vm13, %v8025_v46, %v8007_v28  ;;  %v8393_v46 = vrot.slane %v14940_v11, 6  ;;  %v7691_v11 = vld [vmem:[%s17657_s18 + $0x58] sm:$0xff] }
0x3143   :  { %12038 = vmatmul.mubr.msk.f32.gmra.mxu0 %vm8038_vm14, %v8033_v63  ;;  %12052 = vmatprep.subr.mxu1 %v7691_v11 }
0x3144   :  { %12040 = vmatprep.mubr.msk.f32.mxu0 %vm13336_vm5, %v17669_v6  ;;  %12130 = vmatprep.subr.mxu0 %v7691_v11 }
0x3145   :  { %12053 = vmatpush3.msra.mxu1 %v7691_v11  ;;  %12131 = vmatpush3.msra.mxu0 %v7691_v11 }
0x316d   :  { %v7975_v37 = vpop.permute.xlu1 %7974  ;;  %v8009_v4 = vpop.permute.xlu0 %8008 }
0x316e   :  { %v8026_v30 = vsel %vm919_vm7, %v16282_v62, %v7975_v37  ;;  %v8395_v37 = vsel %vm7577_vm8, %v8393_v46, %v8394_v5 }
0x316f   :  { %v8034_v33 = vsel %vm8030_vm13, %v8026_v30, %v8009_v4  ;;  %v7690_v30 = vld [vmem:[%s17657_s18 + $0x50] sm:$0xff] }
0x3170   :  { %12041 = vmatmul.mubr.msk.f32.gmra.mxu0 %vm8038_vm14, %v8034_v33  ;;  %12054 = vmatprep.subr.mxu1 %v7690_v30  ;;  %v7689_v33 = vld [vmem:[%s17657_s18 + $0x48] sm:$0xff] }
0x3171   :  { %v7977_v61 = vpop.permute.xlu1 %7976  ;;  %v8011_v1 = vpop.permute.xlu0 %8010  ;;  %12043 = vmatprep.mubr.msk.f32.mxu0 %vm13336_vm5, %v17669_v6  ;;  %12132 = vmatprep.subr.mxu0 %v7690_v30 }
0x3172   :  { %v8027_v38 = vsel %vm919_vm7, %v7939_v22, %v7977_v61  ;;  %12055 = vmatpush3.msra.mxu1 %v7690_v30  ;;  %12133 = vmatpush3.msra.mxu0 %v7690_v30  ;;  %v7688_v61 = vld [vmem:[%s17657_s18 + $0x40] sm:$0xff] }
0x3173   :  { %v8035_v14 = vsel %vm8030_vm13, %v8027_v38, %v8011_v1  ;;  %12056 = vmatprep.subr.mxu1 %v7689_v33  ;;  %12134 = vmatprep.subr.mxu0 %v7689_v33  ;;  %v7687_v1 = vld [vmem:[%s17657_s18 + $0x38] sm:$0xff]  ;;  %v7686_v38 = vld [vmem:[%s17657_s18 + $0x30] sm:$0xff] }
0x3174   :  { %12044 = vmatmul.mubr.msk.f32.gmra.mxu0 %vm8038_vm14, %v8035_v14  ;;  %12057 = vmatpush3.msra.mxu1 %v7689_v33 }
0x3175   :  { %v7979_v21 = vpop.permute.xlu1 %7978  ;;  %v8013_v24 = vpop.permute.xlu0 %8012  ;;  %12046 = vmatprep.mubr.msk.f32.mxu0 %vm13336_vm5, %v17669_v6  ;;  %12135 = vmatpush3.msra.mxu0 %v7689_v33 }
0x3176   :  { %v8028_v62 = vsel %vm919_vm7, %v16298_v26, %v7979_v21  ;;  %12058 = vmatprep.subr.mxu1 %v7688_v61  ;;  %12136 = vmatprep.subr.mxu0 %v7688_v61  ;;  %v7685_v21 = vld [vmem:[%s17657_s18 + $0x28] sm:$0xff] }
0x3177   :  { %v8036_v32 = vsel %vm8030_vm13, %v8028_v62, %v8013_v24  ;;  %12059 = vmatpush3.msra.mxu1 %v7688_v61  ;;  %12137 = vmatpush3.msra.mxu0 %v7688_v61  ;;  %v7684_v24 = vld [vmem:[%s17657_s18 + $0x20] sm:$0xff] }
0x3178   :  { %12047 = vmatmul.mubr.msk.f32.gmra.mxu0 %vm8038_vm14, %v8036_v32  ;;  %12060 = vmatprep.subr.mxu1 %v7687_v1 }
0x3179   :  { %v7981_v41 = vpop.permute.xlu1 %7980  ;;  %v8015_v17 = vpop.permute.xlu0 %8014  ;;  %12049 = vmatprep.mubr.msk.f32.mxu0 %vm13336_vm5, %v17669_v6  ;;  %12138 = vmatprep.subr.mxu0 %v7687_v1 }
0x317a   :  { %v8029_v22 = vsel %vm919_vm7, %v7952_v31, %v7981_v41  ;;  %12061 = vmatpush3.msra.mxu1 %v7687_v1  ;;  %12139 = vmatpush3.msra.mxu0 %v7687_v1 }
0x317b   :  { %v8037_v57 = vsel %vm8030_vm13, %v8029_v22, %v8015_v17  ;;  %12062 = vmatprep.subr.mxu1 %v7686_v38  ;;  %12140 = vmatprep.subr.mxu0 %v7686_v38  ;;  %v7683_v17 = vld [vmem:[%s17657_s18 + $0x18] sm:$0xff] }
0x317c   :  { %12050 = vmatmul.mubr.msk.f32.gmra.mxu0 %vm8038_vm14, %v8037_v57  ;;  %12063 = vmatpush3.msra.mxu1 %v7686_v38 }
0x317d   :  { %v16357_v10 = vpop.permute.xlu1 %8385  ;;  %v16359_v7 = vpop.permute.xlu0 %8387  ;;  %12141 = vmatpush3.msra.mxu0 %v7686_v38  ;;  %12064 = vmatprep.subr.mxu1 %v7685_v21 }
0x317e   :  { %v8396_v31 = vrot.slane %v16357_v10, 6  ;;  %v8398_v63 = vrot.slane %v16359_v7, 6  ;;  %12142 = vmatprep.subr.mxu0 %v7685_v21  ;;  %12065 = vmatpush3.msra.mxu1 %v7685_v21 }
0x317f   :  { %v12006_v20 = vpop.f32.mrf.mxu1  ;;  %12143 = vmatpush3.msra.mxu0 %v7685_v21  ;;  %12066 = vmatprep.subr.mxu1 %v7684_v24 }
0x3180   :  { %v7906_v47 = vmax.f32 %v12006_v20, 0.0  ;;  %v8399_v16 = vsel %vm7577_vm8, %v8396_v31, %v8398_v63  ;;  %v8397_v4 = vsel %vm7577_vm8, %v8394_v5, %v8396_v31  ;;  %12144 = vmatprep.subr.mxu0 %v7684_v24  ;;  %12067 = vmatpush3.msra.mxu1 %v7684_v24  ;;  %v7682_v20 = vld [vmem:[%s17657_s18 + $0x10] sm:$0xff]  ;;  %v7681_v5 = vld [vmem:[%s17657_s18 + $0x8] sm:$0xff] }
0x3181   :  { %v7894_v26 = vpop.f32.mrf.mxu1  ;;  %12145 = vmatpush3.msra.mxu0 %v7684_v24  ;;  %12068 = vmatprep.subr.mxu1 %v7683_v17 }
0x3182   :  { %v7905_v28 = vmax.f32 %v7894_v26, 0.0  ;;  %8391 = vrot.lane.b32.xlu0 %v7906_v47, %s13339_s3  ;;  %12146 = vmatprep.subr.mxu0 %v7683_v17 }
0x3183   :  { %12069 = vmatpush3.msra.mxu1 %v7683_v17  ;;  %12147 = vmatpush3.msra.mxu0 %v7683_v17 }
0x3184   :  { %8389 = vrot.lane.b32.xlu1 %v7905_v28, %s13339_s3  ;;  %12070 = vmatprep.subr.mxu1 %v7682_v20 }
0x3185   :  { %12148 = vmatprep.subr.mxu0 %v7682_v20  ;;  %12071 = vmatpush3.msra.mxu1 %v7682_v20 }
0x3186   :  { %8406 = vrot.lane.b32.xlu0 %v8395_v37, %s13338_s15  ;;  %12072 = vmatprep.subr.mxu1 %v7681_v5 }
0x3187   :  { %12149 = vmatpush3.msra.mxu0 %v7682_v20  ;;  %12073 = vmatpush3.msra.mxu1 %v7681_v5 }
0x3188   :  { %8404 = vrot.lane.b32.xlu1 %v8393_v46, %s13338_s15  ;;  %v7680_v46 = vld [vmem:[%s17657_s18] sm:$0xff]  ;;  %12150 = vmatprep.subr.mxu0 %v7681_v5 }
0x3189   :  { %12074 = vmatprep.subr.mxu1 %v7680_v46  ;;  %12151 = vmatpush3.msra.mxu0 %v7681_v5 }
0x318a   :  { %8410 = vrot.lane.b32.xlu0 %v8399_v16, %s13338_s15  ;;  %12075 = vmatpush3.msra.mxu1 %v7680_v46 }
0x318b   :  { %12085 = vmatprep.subr.mxu1 %v17669_v6  ;;  %12152 = vmatprep.subr.mxu0 %v7680_v46 }
0x318c   :  { %8408 = vrot.lane.b32.xlu1 %v8397_v4, %s13338_s15  ;;  %12153 = vmatpush3.msra.mxu0 %v7680_v46 }
0x318d   :  { %12163 = vmatprep.subr.mxu0 %v17669_v6 }
0x31f4   :  { %v16391_v14 = vpop.permute.xlu0 %8391 }
0x31f5   :  { %v8402_v32 = vrot.slane %v16391_v14, 6 }
0x31f6   :  { %v16399_v62 = vpop.permute.xlu1 %8389 }
0x31f7   :  { %v8400_v41 = vrot.slane %v16399_v62, 6 }
0x31f9   :  { %v8401_v22 = vsel %vm7577_vm8, %v8398_v63, %v8400_v41  ;;  %v8403_v57 = vsel %vm7577_vm8, %v8400_v41, %v8402_v32 }
0x31fa   :  { %8412 = vrot.lane.b32.xlu1 %v8401_v22, %s13338_s15  ;;  %8414 = vrot.lane.b32.xlu0 %v8403_v57, %s13338_s15 }
0x31fb   :  { %v8126_v47 = vpop.f32.mrf.mxu0 }
0x31fc   :  { %v16416_v28 = vmax.f32 %v8126_v47, 0.0 }
0x31fd   :  { %v12033_v26 = vpop.f32.mrf.mxu0 }
0x31fe   :  { %8416 = vrot.lane.b32.xlu1 %v8402_v32, %s13338_s15  ;;  %v8174_v16 = vrot.slane %v16416_v28, 1  ;;  %v8205_v38 = vrot.slane %v16416_v28, 2 }
0x31ff   :  { %v8131_v31 = vpop.f32.mrf.mxu0 }
0x3200   :  { %v16422_v63 = vmax.f32 %v8131_v31, 0.0 }
0x3201   :  { %v12036_v37 = vpop.f32.mrf.mxu0 }
0x3202   :  { %v8175_v4 = vrot.slane %v16422_v63, 1  ;;  %v8206_v30 = vrot.slane %v16422_v63, 2 }
0x3203   :  { %v8136_v11 = vpop.f32.mrf.mxu0 }
0x3204   :  { %v16428_v33 = vmax.f32 %v8136_v11, 0.0  ;;  %v8176_v61 = vsel %vm99_vm0, %v8174_v16, %v8175_v4  ;;  %v8207_v41 = vsel %vm7589_vm12, %v8205_v38, %v8206_v30 }
0x3205   :  { %v12039_v1 = vpop.f32.mrf.mxu0  ;;  %8187 = vrot.lane.b32.xlu0 %v8176_v61, %s13338_s15 }
0x3206   :  { %v8177_v21 = vrot.slane %v16428_v33, 1  ;;  %v8208_v24 = vrot.slane %v16428_v33, 2 }
0x3208   :  { %v8178_v32 = vsel %vm99_vm0, %v8175_v4, %v8177_v21  ;;  %v8209_v17 = vsel %vm7589_vm12, %v8206_v30, %v8208_v24 }
0x3209   :  { %8189 = vrot.lane.b32.xlu1 %v8178_v32, %s13338_s15  ;;  %8218 = vrot.lane.b32.xlu0 %v8207_v41, %s13337_s14 }
0x320d   :  { %8220 = vrot.lane.b32.xlu1 %v8209_v17, %s13337_s14 }
0x3230   :  { %v8141_v22 = vpop.f32.mrf.mxu0 }
0x3231   :  { %v16442_v57 = vmax.f32 %v8141_v22, 0.0 }
0x3232   :  { %v12042_v20 = vpop.f32.mrf.mxu0 }
0x3233   :  { %v8179_v47 = vrot.slane %v16442_v57, 1  ;;  %v8210_v26 = vrot.slane %v16442_v57, 2 }
0x3234   :  { %v8146_v5 = vpop.f32.mrf.mxu0 }
0x3235   :  { %v16446_v46 = vmax.f32 %v8146_v5, 0.0  ;;  %v8180_v31 = vsel %vm99_vm0, %v8177_v21, %v8179_v47  ;;  %v8211_v1 = vsel %vm7589_vm12, %v8208_v24, %v8210_v26  ;;  %v8405_v21 = vpop.permute.xlu1 %8404 }
0x3236   :  { %v12045_v37 = vpop.f32.mrf.mxu0  ;;  %8191 = vrot.lane.b32.xlu0 %v8180_v31, %s13338_s15 }
0x3237   :  { %v8181_v16 = vrot.slane %v16446_v46, 1  ;;  %v8212_v11 = vrot.slane %v16446_v46, 2  ;;  %v16467_v37 = vpop.permute.xlu0 %8406 }
0x3238   :  { %v8151_v4 = vpop.f32.mrf.mxu0 }
0x3239   :  { %v16452_v30 = vmax.f32 %v8151_v4, 0.0  ;;  %v8182_v61 = vsel %vm99_vm0, %v8179_v47, %v8181_v16  ;;  %v8213_v20 = vsel %vm7589_vm12, %v8210_v26, %v8212_v11  ;;  %v16463_v47 = vsel %vm7577_vm8, 0.0, %v8405_v21 }
0x323a   :  { %v12048_v38 = vpop.f32.mrf.mxu0  ;;  %8193 = vrot.lane.b32.xlu1 %v8182_v61, %s13338_s15  ;;  %8222 = vrot.lane.b32.xlu0 %v8211_v1, %s13337_s14  ;;  %v8429_v4 = vrot.slane %v16463_v47, 1  ;;  %v8463_v21 = vrot.slane %v16463_v47, 2 }
0x323b   :  { %v8183_v32 = vrot.slane %v16452_v30, 1  ;;  %v8214_v17 = vrot.slane %v16452_v30, 2  ;;  %v16472_v38 = vpop.permute.xlu1 %8408 }
0x323c   :  { %v8156_v41 = vpop.f32.mrf.mxu0 }
0x323d   :  { %v8166_v22 = vmax.f32 %v8156_v41, 0.0  ;;  %v8184_v5 = vsel %vm99_vm0, %v8181_v16, %v8183_v32  ;;  %v8215_v26 = vsel %vm7589_vm12, %v8212_v11, %v8214_v17  ;;  %v8430_v16 = vrot.slane %v16467_v37, 1 }
0x323e   :  { %v12051_v24 = vpop.f32.mrf.mxu0  ;;  %8224 = vrot.lane.b32.xlu1 %v8213_v20, %s13337_s14  ;;  %8195 = vrot.lane.b32.xlu0 %v8184_v5, %s13338_s15  ;;  %v8432_v41 = vrot.slane %v16472_v38, 1  ;;  %v8464_v11 = vrot.slane %v16467_v37, 2  ;;  %v8466_v5 = vrot.slane %v16472_v38, 2 }
0x323f   :  { %v8185_v31 = vrot.slane %v8166_v22, 1  ;;  %v8216_v61 = vrot.slane %v8166_v22, 2  ;;  %v8431_v22 = vsel %vm99_vm0, %v8429_v4, %v8430_v16 }
0x3240   :  { %v8465_v24 = vsel %vm7589_vm12, %v8463_v21, %v8464_v11  ;;  %v8467_v4 = vsel %vm7589_vm12, %v8464_v11, %v8466_v5 }
0x3241   :  { %v8186_v1 = vsel %vm99_vm0, %v8183_v32, %v8185_v31  ;;  %v8217_v20 = vsel %vm7589_vm12, %v8214_v17, %v8216_v61  ;;  %v16484_v32 = vpop.permute.xlu0 %8410  ;;  %v8433_v31 = vsel %vm99_vm0, %v8430_v16, %v8432_v41 }
0x3242   :  { %8197 = vrot.lane.b32.xlu1 %v8186_v1, %s13338_s15  ;;  %8226 = vrot.lane.b32.xlu0 %v8215_v26, %s13337_s14  ;;  %v8434_v17 = vrot.slane %v16484_v32, 1  ;;  %v8468_v1 = vrot.slane %v16484_v32, 2 }
0x3244   :  { %v8435_v61 = vsel %vm99_vm0, %v8432_v41, %v8434_v17  ;;  %v8469_v26 = vsel %vm7589_vm12, %v8466_v5, %v8468_v1 }
0x3246   :  { %8228 = vrot.lane.b32.xlu1 %v8217_v20, %s13337_s14  ;;  %8442 = vrot.lane.b32.xlu0 %v8431_v22, %s13338_s15 }
0x324a   :  { %8476 = vrot.lane.b32.xlu1 %v8465_v24, %s13337_s14  ;;  %8444 = vrot.lane.b32.xlu0 %v8433_v31, %s13338_s15 }
0x324e   :  { %8478 = vrot.lane.b32.xlu1 %v8467_v4, %s13337_s14  ;;  %8446 = vrot.lane.b32.xlu0 %v8435_v61, %s13338_s15 }
0x3252   :  { %8480 = vrot.lane.b32.xlu1 %v8469_v26, %s13337_s14 }
0x326c   :  { %v16499_v16 = vpop.permute.xlu1 %8412  ;;  %v16501_v21 = vpop.permute.xlu0 %8414 }
0x326d   :  { %v8436_v20 = vrot.slane %v16499_v16, 1  ;;  %v8470_v22 = vrot.slane %v16499_v16, 2  ;;  %v8438_v41 = vrot.slane %v16501_v21, 1  ;;  %v8472_v11 = vrot.slane %v16501_v21, 2 }
0x326f   :  { %v8471_v24 = vsel %vm7589_vm12, %v8468_v1, %v8470_v22  ;;  %v8437_v31 = vsel %vm99_vm0, %v8434_v17, %v8436_v20  ;;  %v8473_v6 = vsel %vm7589_vm12, %v8470_v22, %v8472_v11  ;;  %v8439_v51 = vsel %vm99_vm0, %v8436_v20, %v8438_v41 }
0x3270   :  { %v8417_v4 = vpop.permute.xlu1 %8416  ;;  %8482 = vrot.lane.b32.xlu1 %v8471_v24, %s13337_s14  ;;  %8448 = vrot.lane.b32.xlu0 %v8437_v31, %s13338_s15 }
0x3271   :  { %v16512_v5 = vsel %vm7577_vm8, %v8417_v4, 0.0 }
0x3272   :  { %v8440_v61 = vrot.slane %v16512_v5, 1  ;;  %v8474_v26 = vrot.slane %v16512_v5, 2 }
0x3274   :  { %8484 = vrot.lane.b32.xlu1 %v8473_v6, %s13337_s14  ;;  %8450 = vrot.lane.b32.xlu0 %v8439_v51, %s13338_s15  ;;  %v8475_v1 = vsel %vm7589_vm12, %v8472_v11, %v8474_v26  ;;  %v8441_v24 = vsel %vm99_vm0, %v8438_v41, %v8440_v61 }
0x3277   :  { %v8188_v17 = vpop.permute.xlu0 %8187 }
0x3278   :  { %8486 = vrot.lane.b32.xlu1 %v8475_v1, %s13337_s14  ;;  %8452 = vrot.lane.b32.xlu0 %v8441_v24, %s13338_s15  ;;  %v8236_v31 = vsel %vm919_vm7, %v16416_v28, %v8188_v17  ;;  %v17688_v28 = vmov 0.0  }
0x327b   :  { %v8190_v4 = vpop.permute.xlu1 %8189  ;;  %v8219_v22 = vpop.permute.xlu0 %8218 }
0x327c   :  { %v8242_v20 = vsel %vm8030_vm13, %v8236_v31, %v8219_v22  ;;  %8488 = vrot.lane.b32.xlu1 %v8474_v26, %s13337_s14  ;;  %8454 = vrot.lane.b32.xlu0 %v8440_v61, %s13338_s15  ;;  %v8237_v6 = vsel %vm919_vm7, %v16422_v63, %v8190_v4 }
0x327d   :  { %12076 = vmatprep.mubr.msk.f32.mxu1 %vm8038_vm14, %v8242_v20 }
0x327f   :  { %v8221_v51 = vpop.permute.xlu1 %8220 }
0x3280   :  { %v8243_v41 = vsel %vm8030_vm13, %v8237_v6, %v8221_v51 }
0x3281   :  { %12077 = vmatmul.mubr.msk.f32.vlgmr.msra.gmra.mxu1 %vm8038_vm14, %v8243_v41 }
0x3282   :  { %12086 = vmatpush3.msra.mxu1 %v16192_v23 }
0x3283   :  { %12087 = vmatprep.subr.mxu1 %v17688_v28 }
0x3284   :  { %12088 = vmatpush3.msra.mxu1 %v16197_v9 }
0x3285   :  { %12089 = vmatprep.subr.mxu1 %v17688_v28 }
0x3286   :  { %12090 = vmatpush3.msra.mxu1 %v16204_v36 }
0x3287   :  { %12091 = vmatprep.subr.mxu1 %v17688_v28 }
0x3288   :  { %12092 = vmatpush3.msra.mxu1 %v16211_v29 }
0x3289   :  { %12093 = vmatprep.subr.mxu1 %v17688_v28 }
0x328a   :  { %12094 = vmatpush3.msra.mxu1 %v16218_v3 }
0x328b   :  { %12095 = vmatprep.subr.mxu1 %v17688_v28 }
0x328c   :  { %12096 = vmatpush3.msra.mxu1 %v16225_v45 }
0x328d   :  { %12097 = vmatprep.subr.mxu1 %v17688_v28 }
0x328e   :  { %12098 = vmatpush3.msra.mxu1 %v16232_v18 }
0x328f   :  { %12099 = vmatprep.subr.mxu1 %v17688_v28 }
0x3290   :  { %12100 = vmatpush3.msra.mxu1 %v16239_v34 }
0x3291   :  { %12101 = vmatprep.subr.mxu1 %v17688_v28 }
0x3292   :  { %12102 = vmatpush3.msra.mxu1 %v16246_v40 }
0x3293   :  { %12103 = vmatprep.subr.mxu1 %v17688_v28 }
0x3294   :  { %12104 = vmatpush3.msra.mxu1 %v16253_v52 }
0x3295   :  { %12105 = vmatprep.subr.mxu1 %v17688_v28 }
0x3296   :  { %12106 = vmatpush3.msra.mxu1 %v16260_v59 }
0x3297   :  { %12107 = vmatprep.subr.mxu1 %v17688_v28 }
0x3298   :  { %12108 = vmatpush3.msra.mxu1 %v16269_v55 }
0x3299   :  { %12193 = vmatprep.subr.mxu1 %v17688_v28 }
0x32a8   :  { %v8192_v23 = vpop.permute.xlu0 %8191 }
0x32a9   :  { %v8238_v9 = vsel %vm919_vm7, %v16428_v33, %v8192_v23 }
0x32ac   :  { %v8194_v36 = vpop.permute.xlu1 %8193  ;;  %v8223_v29 = vpop.permute.xlu0 %8222 }
0x32ad   :  { %v8244_v3 = vsel %vm8030_vm13, %v8238_v9, %v8223_v29  ;;  %v8239_v45 = vsel %vm919_vm7, %v16442_v57, %v8194_v36 }
0x32ae   :  { %12079 = vmatprep.mubr.msk.f32.mxu1 %vm8038_vm14, %v8244_v3 }
0x32b0   :  { %v8225_v18 = vpop.permute.xlu1 %8224  ;;  %v8196_v34 = vpop.permute.xlu0 %8195 }
0x32b1   :  { %v8245_v40 = vsel %vm8030_vm13, %v8239_v45, %v8225_v18  ;;  %v8240_v52 = vsel %vm919_vm7, %v16446_v46, %v8196_v34 }
0x32b2   :  { %12080 = vmatmul.mubr.msk.f32.gmra.mxu1 %vm8038_vm14, %v8245_v40 }
0x32b4   :  { %v8198_v59 = vpop.permute.xlu1 %8197  ;;  %v8227_v55 = vpop.permute.xlu0 %8226 }
0x32b5   :  { %v8246_v63 = vsel %vm8030_vm13, %v8240_v52, %v8227_v55  ;;  %v8241_v33 = vsel %vm919_vm7, %v16452_v30, %v8198_v59 }
0x32b6   :  { %12082 = vmatprep.mubr.msk.f32.mxu1 %vm8038_vm14, %v8246_v63 }
0x32b8   :  { %v8229_v11 = vpop.permute.xlu1 %8228  ;;  %v8443_v57 = vpop.permute.xlu0 %8442 }
0x32b9   :  { %v8247_v61 = vsel %vm8030_vm13, %v8241_v33, %v8229_v11  ;;  %v8497_v46 = vsel %vm919_vm7, %v16463_v47, %v8443_v57 }
0x32ba   :  { %12083 = vmatmul.mubr.msk.f32.gmra.mxu1 %vm8038_vm14, %v8247_v61 }
0x32bb   :  { %12109 = vmatprep.mubr.msk.f32.mxu1 %vm13336_vm5, %v17688_v28 }
0x32bc   :  { %v8477_v26 = vpop.permute.xlu1 %8476  ;;  %v8445_v17 = vpop.permute.xlu0 %8444 }
0x32bd   :  { %v8504_v1 = vsel %vm8030_vm13, %v8497_v46, %v8477_v26  ;;  %v8498_v30 = vsel %vm919_vm7, %v16467_v37, %v8445_v17 }
0x32be   :  { %12110 = vmatmul.mubr.msk.f32.vlgmr.msra.gmra.mxu1 %vm8038_vm14, %v8504_v1 }
0x32bf   :  { %12112 = vmatprep.mubr.msk.f32.mxu1 %vm13336_vm5, %v17688_v28 }
0x32c0   :  { %v8479_v24 = vpop.permute.xlu1 %8478  ;;  %v8447_v4 = vpop.permute.xlu0 %8446 }
0x32c1   :  { %v8505_v31 = vsel %vm8030_vm13, %v8498_v30, %v8479_v24  ;;  %v8499_v47 = vsel %vm919_vm7, %v16472_v38, %v8447_v4 }
0x32c2   :  { %12113 = vmatmul.mubr.msk.f32.gmra.mxu1 %vm8038_vm14, %v8505_v31 }
0x32c3   :  { %12115 = vmatprep.mubr.msk.f32.mxu1 %vm13336_vm5, %v17688_v28 }
0x32c4   :  { %v8481_v22 = vpop.permute.xlu1 %8480 }
0x32c5   :  { %v8506_v20 = vsel %vm8030_vm13, %v8499_v47, %v8481_v22 }
0x32c6   :  { %12116 = vmatmul.mubr.msk.f32.gmra.mxu1 %vm8038_vm14, %v8506_v20 }
0x32c7   :  { %12118 = vmatprep.mubr.msk.f32.mxu1 %vm13336_vm5, %v17688_v28 }
0x32e2   :  { %v8483_v37 = vpop.permute.xlu1 %8482  ;;  %v8449_v6 = vpop.permute.xlu0 %8448 }
0x32e3   :  { %v8500_v51 = vsel %vm919_vm7, %v16484_v32, %v8449_v6 }
0x32e4   :  { %v8507_v41 = vsel %vm8030_vm13, %v8500_v51, %v8483_v37 }
0x32e5   :  { %12119 = vmatmul.mubr.msk.f32.gmra.mxu1 %vm8038_vm14, %v8507_v41 }
0x32e6   :  { %v8485_v23 = vpop.permute.xlu1 %8484  ;;  %v8451_v9 = vpop.permute.xlu0 %8450  ;;  %12121 = vmatprep.mubr.msk.f32.mxu1 %vm13336_vm5, %v17688_v28 }
0x32e7   :  { %v8501_v38 = vsel %vm919_vm7, %v16499_v16, %v8451_v9 }
0x32e8   :  { %v8508_v36 = vsel %vm8030_vm13, %v8501_v38, %v8485_v23 }
0x32e9   :  { %12122 = vmatmul.mubr.msk.f32.gmra.mxu1 %vm8038_vm14, %v8508_v36 }
0x32ea   :  { %v8487_v29 = vpop.permute.xlu1 %8486  ;;  %v8453_v3 = vpop.permute.xlu0 %8452  ;;  %12124 = vmatprep.mubr.msk.f32.mxu1 %vm13336_vm5, %v17688_v28 }
0x32eb   :  { %v8502_v32 = vsel %vm919_vm7, %v16501_v21, %v8453_v3 }
0x32ec   :  { %v8509_v45 = vsel %vm8030_vm13, %v8502_v32, %v8487_v29 }
0x32ed   :  { %12125 = vmatmul.mubr.msk.f32.gmra.mxu1 %vm8038_vm14, %v8509_v45 }
0x32ee   :  { %v8489_v18 = vpop.permute.xlu1 %8488  ;;  %v8455_v34 = vpop.permute.xlu0 %8454  ;;  %12127 = vmatprep.mubr.msk.f32.mxu1 %vm13336_vm5, %v17688_v28 }
0x32ef   :  { %v8503_v16 = vsel %vm919_vm7, %v16512_v5, %v8455_v34 }
0x32f0   :  { %v8510_v40 = vsel %vm8030_vm13, %v8503_v16, %v8489_v18 }
0x32f1   :  { %12128 = vmatmul.mubr.msk.f32.gmra.mxu1 %vm8038_vm14, %v8510_v40 }
0x32f2   :  { %12201 = vmatprep.mubr.msk.f32.mxu1 %vm13336_vm5, %v17688_v28 }
0x3341   :  { %v16618_v21 = vpop.f32.mrf.mxu1 }
0x3343   :  { %v16620_v52 = vpop.f32.mrf.mxu1 }
0x3372   :  { %v16622_v59 = vpop.f32.mrf.mxu1 }
0x3374   :  { %v16624_v55 = vpop.f32.mrf.mxu1 }
0x337a   :  { %v16626_v63 = vpop.f32.mrf.mxu1 }
0x337c   :  { %v16628_v33 = vpop.f32.mrf.mxu1 }
0x337e   :  { %v8598_v5 = vpop.f32.mrf.mxu1 }
0x337f   :  { %v16630_v57 = vmax.f32 %v8598_v5, 0.0 }
0x3380   :  { %v12111_v11 = vpop.f32.mrf.mxu1 }
0x3381   :  { %v8646_v17 = vrot.slane %v16630_v57, 1  ;;  %v8677_v22 = vrot.slane %v16630_v57, 2 }
0x3382   :  { %v8603_v61 = vpop.f32.mrf.mxu1 }
0x3383   :  { %v16632_v46 = vmax.f32 %v8603_v61, 0.0 }
0x3384   :  { %v12114_v26 = vpop.f32.mrf.mxu1 }
0x3385   :  { %v8647_v1 = vrot.slane %v16632_v46, 1  ;;  %v8678_v24 = vrot.slane %v16632_v46, 2 }
0x3386   :  { %v8608_v30 = vpop.f32.mrf.mxu1 }
0x3387   :  { %v16637_v31 = vmax.f32 %v8608_v30, 0.0  ;;  %v8648_v4 = vsel %vm99_vm0, %v8646_v17, %v8647_v1  ;;  %v8679_v6 = vsel %vm7589_vm12, %v8677_v22, %v8678_v24 }
0x3388   :  { %8659 = vrot.lane.b32.xlu0 %v8648_v4, %s13338_s15  ;;  %v12117_v47 = vpop.f32.mrf.mxu1 }
0x3389   :  { %v8649_v20 = vrot.slane %v16637_v31, 1  ;;  %v8680_v37 = vrot.slane %v16637_v31, 2 }
0x338b   :  { %v8650_v51 = vsel %vm99_vm0, %v8647_v1, %v8649_v20  ;;  %v8681_v41 = vsel %vm7589_vm12, %v8678_v24, %v8680_v37 }
0x338c   :  { %8690 = vrot.lane.b32.xlu0 %v8679_v6, %s13337_s14  ;;  %8661 = vrot.lane.b32.xlu1 %v8650_v51, %s13338_s15 }
0x3390   :  { %8692 = vrot.lane.b32.xlu1 %v8681_v41, %s13337_s14 }
0x33a5   :  { %v8613_v23 = vpop.f32.mrf.mxu1 }
0x33a6   :  { %v16650_v9 = vmax.f32 %v8613_v23, 0.0 }
0x33a7   :  { %v12120_v38 = vpop.f32.mrf.mxu1 }
0x33a8   :  { %v8651_v36 = vrot.slane %v16650_v9, 1  ;;  %v8682_v3 = vrot.slane %v16650_v9, 2  ;;  %v7398_v38 = vrot.slane %v16072_v54, 2 }
0x33a9   :  { %v8618_v29 = vpop.f32.mrf.mxu1 }
0x33aa   :  { %v16654_v32 = vmax.f32 %v8618_v29, 0.0  ;;  %v8652_v45 = vsel %vm99_vm0, %v8649_v20, %v8651_v36  ;;  %v8683_v11 = vsel %vm7589_vm12, %v8680_v37, %v8682_v3  ;;  %v7396_v37 = vrot.slane %v16065_v13, 2 }
0x33ab   :  { %8663 = vrot.lane.b32.xlu0 %v8652_v45, %s13338_s15  ;;  %v12123_v18 = vpop.f32.mrf.mxu1  ;;  %v7410_v13 = vadd.f32 %v7398_v38, %v13751_v50 }
0x33ac   :  { %v8653_v34 = vrot.slane %v16654_v32, 1  ;;  %v8684_v40 = vrot.slane %v16654_v32, 2  ;;  %v7408_v23 = vadd.f32 %v7396_v37, %v13603_v53 }
0x33ad   :  { %v8623_v16 = vpop.f32.mrf.mxu1  ;;  %v10812_v29 = vmul.f32 -1.442695, %v7410_v13 }
0x33ae   :  { %v16660_v5 = vmax.f32 %v8623_v16, 0.0  ;;  %v8654_v61 = vsel %vm99_vm0, %v8651_v36, %v8653_v34  ;;  %v8685_v4 = vsel %vm7589_vm12, %v8682_v3, %v8684_v40  ;;  %13199 = vtanh.f32 %v7408_v23 }
0x33af   :  { %8694 = vrot.lane.b32.xlu0 %v8683_v11, %s13337_s14  ;;  %8665 = vrot.lane.b32.xlu1 %v8654_v61, %s13338_s15  ;;  %v12126_v26 = vpop.f32.mrf.mxu1  ;;  %13201 = vtanh.f32 %v7410_v13 }
0x33b0   :  { %v8655_v17 = vrot.slane %v16660_v5, 1  ;;  %v8686_v30 = vrot.slane %v16660_v5, 2 }
0x33b1   :  { %v8628_v1 = vpop.f32.mrf.mxu1 }
0x33b2   :  { %v8638_v24 = vmax.f32 %v8628_v1, 0.0  ;;  %v8656_v47 = vsel %vm99_vm0, %v8653_v34, %v8655_v17  ;;  %v8687_v51 = vsel %vm7589_vm12, %v8684_v40, %v8686_v30 }
0x33b3   :  { %8696 = vrot.lane.b32.xlu1 %v8685_v4, %s13337_s14  ;;  %8667 = vrot.lane.b32.xlu0 %v8656_v47, %s13338_s15  ;;  %v12129_v22 = vpop.f32.mrf.mxu1 }
0x33b4   :  { %v8657_v20 = vrot.slane %v8638_v24, 1  ;;  %v8688_v6 = vrot.slane %v8638_v24, 2 }
0x33b6   :  { %v8658_v41 = vsel %vm99_vm0, %v8655_v17, %v8657_v20  ;;  %v8689_v36 = vsel %vm7589_vm12, %v8686_v30, %v8688_v6 }
0x33b7   :  { %8698 = vrot.lane.b32.xlu0 %v8687_v51, %s13337_s14  ;;  %8669 = vrot.lane.b32.xlu1 %v8658_v41, %s13338_s15 }
0x33bb   :  { %8254 = vrot.lane.b32.xlu0 %v16177_v42, %s13338_s15  ;;  %8700 = vrot.lane.b32.xlu1 %v8689_v36, %s13337_s14  ;;  %v13200_v53 = vpop.eup %13199  ;;  %v8352_v36 = vadd.f32 %v16618_v21, %v16136_v19 }
0x33bc   :  { %v13202_v50 = vpop.eup %13201 }
0x33bf   :  { %8250 = vrot.lane.b32.xlu0 %v16170_v39, %s13338_s15  ;;  %8252 = vrot.lane.b32.xlu1 %v16179_v0, %s13338_s15 }
0x33c3   :  { %8726 = vrot.lane.b32.xlu0 %v16391_v14, %s13338_s15  ;;  %8248 = vrot.lane.b32.xlu1 %v16161_v27, %s13338_s15 }
0x33c7   :  { %8722 = vrot.lane.b32.xlu0 %v16359_v7, %s13338_s15  ;;  %8724 = vrot.lane.b32.xlu1 %v16399_v62, %s13338_s15 }
0x33cb   :  { %7487 = vrot.lane.b32.xlu0 %v13200_v53, %s13337_s14  ;;  %8720 = vrot.lane.b32.xlu1 %v16357_v10, %s13338_s15  ;;  %v10810_v10 = vmul.f32 -1.442695, %v7408_v23 }
0x33cd   :  { %13203 = vpow2.f32 %v10810_v10 }
0x33ce   :  { %13205 = vpow2.f32 %v10812_v29 }
0x33cf   :  { %7491 = vrot.lane.b32.xlu1 %v13202_v50, %s13337_s14 }
0x33da   :  { %v13204_v61 = vpop.eup %13203 }
0x33db   :  { %v7432_v30 = vadd.f32 1.0, %v13204_v61  ;;  %v13206_v24 = vpop.eup %13205 }
0x33dd   :  { %13207 = vrcp.f32 %v7432_v30 }
0x33ea   :  { %v16742_v21 = vpop.eup %13207 }
0x33fa   :  { %v8660_v54 = vpop.permute.xlu0 %8659 }
0x33fb   :  { %v8708_v39 = vsel %vm919_vm7, %v16630_v57, %v8660_v54 }
0x33fe   :  { %v8662_v27 = vpop.permute.xlu1 %8661  ;;  %v8691_v42 = vpop.permute.xlu0 %8690 }
0x33ff   :  { %v8714_v0 = vsel %vm8030_vm13, %v8708_v39, %v8691_v42  ;;  %v8709_v7 = vsel %vm919_vm7, %v16632_v46, %v8662_v27  ;;  %v8376_v39 = vmax.f32 %v8352_v36, 0.0  ;;  %v16821_v36 = vld [vmem:[%s17655_s16 + $0x10] sm:$0xff] }
0x3400   :  { %12154 = vmatprep.mubr.msk.f32.mxu0 %vm8038_vm14, %v8714_v0 }
0x3402   :  { %v8693_v14 = vpop.permute.xlu1 %8692 }
0x3403   :  { %v8715_v62 = vsel %vm8030_vm13, %v8709_v7, %v8693_v14  ;;  %v13340_v7 = vmov 0   ;;  %v7692_v14 = vld [vmem:[%s17658_s19] sm:$0xff] }
0x3404   :  { %12155 = vmatmul.mubr.msk.f32.vlgmr.msra.gmra.mxu0 %vm8038_vm14, %v8715_v62  ;;  %12454 = vset.pattern.permute.xlu1 %v13340_v7  ;;  %v7462_v62 = vrot.slane %v15986_v35, 7  ;;  %v8853_v35 = vld [vmem:[%s17659_s20] sm:$0xff] }
0x3405   :  { %12453 = vset.pattern.permute.xlu0 %v13340_v7 }
0x3406   :  { %v7474_v10 = vmul.f32 %v16742_v21, %v7462_v62 }
0x341d   :  { %v8664_v3 = vpop.permute.xlu0 %8663 }
0x341e   :  { %v8710_v57 = vsel %vm919_vm7, %v16637_v31, %v8664_v3  ;;  %v7464_v3 = vrot.slane %v16002_v48, 7 }
0x3421   :  { %v8666_v45 = vpop.permute.xlu1 %8665  ;;  %v8695_v18 = vpop.permute.xlu0 %8694 }
0x3422   :  { %v8716_v34 = vsel %vm8030_vm13, %v8710_v57, %v8695_v18  ;;  %v8711_v46 = vsel %vm919_vm7, %v16650_v9, %v8666_v45 }
0x3423   :  { %12157 = vmatprep.mubr.msk.f32.mxu0 %vm8038_vm14, %v8716_v34 }
0x3425   :  { %v8697_v16 = vpop.permute.xlu1 %8696  ;;  %v8668_v40 = vpop.permute.xlu0 %8667 }
0x3426   :  { %v8717_v11 = vsel %vm8030_vm13, %v8711_v46, %v8697_v16  ;;  %v8712_v26 = vsel %vm919_vm7, %v16654_v32, %v8668_v40  ;;  %v7434_v32 = vadd.f32 1.0, %v13206_v24  ;;  %v7400_v46 = vrot.slane %v16125_v56, 2 }
0x3427   :  { %12158 = vmatmul.mubr.msk.f32.gmra.mxu0 %vm8038_vm14, %v8717_v11  ;;  %v9007_v11 = vld [vmem:[%s17661_s22] sm:$0xff] }
0x3428   :  { %13209 = vrcp.f32 %v7434_v32  ;;  %v16768_v40 = vadd.f32 %v7400_v46, %v13791_v8  ;;  %v7697_v8 = vld [vmem:[%s17662_s23 + $0x18] sm:$0xff]  ;;  %v16908_v46 = vld [vmem:[%s17657_s18 + $0x48] sm:$0xff] }
0x3429   :  { %v8670_v31 = vpop.permute.xlu1 %8669  ;;  %v8699_v17 = vpop.permute.xlu0 %8698  ;;  %12194 = vmatpush3.msra.mxu1 %v7697_v8  ;;  %v16943_v8 = vld [vmem:[%s17657_s18 + $0x20] sm:$0xff] }
0x342a   :  { %v8718_v1 = vsel %vm8030_vm13, %v8712_v26, %v8699_v17  ;;  %v8713_v9 = vsel %vm919_vm7, %v16660_v5, %v8670_v31  ;;  %12195 = vmatprep.subr.mxu1 %v17688_v28 }
0x342b   :  { %12160 = vmatprep.mubr.msk.f32.mxu0 %vm8038_vm14, %v8718_v1 }
0x342d   :  { %v8701_v4 = vpop.permute.xlu1 %8700  ;;  %v8255_v47 = vpop.permute.xlu0 %8254 }
0x342e   :  { %v8719_v22 = vsel %vm8030_vm13, %v8713_v9, %v8701_v4  ;;  %v8372_v20 = vadd.f32 %v16626_v63, %v8255_v47 }
0x342f   :  { %12161 = vmatmul.mubr.msk.f32.gmra.mxu0 %vm8038_vm14, %v8719_v22 }
0x3430   :  { %v8380_v37 = vmax.f32 %v8372_v20, 0.0  ;;  %12175 = vmatprep.mubr.msk.f32.mxu0 %vm13336_vm5, %v17688_v28 }
0x3431   :  { %v8253_v6 = vpop.permute.xlu1 %8252  ;;  %v8251_v51 = vpop.permute.xlu0 %8250 }
0x3432   :  { %v8367_v41 = vadd.f32 %v16628_v33, %v8253_v6  ;;  %v8362_v5 = vadd.f32 %v16622_v59, %v8251_v51  ;;  %12164 = vmatpush3.msra.mxu0 %v8380_v37  ;;  %v8347_v59 = vadd.f32 %v16620_v52, %v16117_v25 }
0x3433   :  { %12165 = vmatprep.subr.mxu0 %v17688_v28 }
0x3434   :  { %v8379_v23 = vmax.f32 %v8367_v41, 0.0  ;;  %v8378_v13 = vmax.f32 %v8362_v5, 0.0  ;;  %v8375_v19 = vmax.f32 %v8347_v59, 0.0  ;;  %v16842_v59 = vld [vmem:[%s17657_s18 + $0x58] sm:$0xff] }
0x3435   :  { %v8249_v63 = vpop.permute.xlu1 %8248  ;;  %v16730_v38 = vpop.permute.xlu0 %8726 }
0x3436   :  { %v8357_v53 = vadd.f32 %v16624_v55, %v8249_v63  ;;  %12166 = vmatpush3.msra.mxu0 %v8379_v23  ;;  %v16748_v52 = vpop.eup %13209  ;;  %v7698_v23 = vld [vmem:[%s17689_s28] sm:$0xff] }
0x3437   :  { %12167 = vmatprep.subr.mxu0 %v17688_v28  ;;  %v7476_v45 = vmul.f32 %v16748_v52, %v7464_v3  ;;  %v13276_v63 = vld [vmem:[%s17680_s27] sm:$0xff] }
0x3438   :  { %v8377_v33 = vmax.f32 %v8357_v53, 0.0  ;;  %12168 = vmatpush3.msra.mxu0 %v8378_v13  ;;  %v16828_v13 = vld [vmem:[%s17655_s16 + $0x8] sm:$0xff]  ;;  %v16835_v53 = vld [vmem:[%s17655_s16] sm:$0xff] }
0x3439   :  { %v16738_v50 = vpop.permute.xlu1 %8724  ;;  %12169 = vmatprep.subr.mxu0 %v17688_v28  ;;  %v8723_v54 = vpop.permute.xlu0 %8722 }
0x343a   :  { %12170 = vmatpush3.msra.mxu0 %v8377_v33  ;;  %v16848_v33 = vld [vmem:[%s17662_s23 + $0x10] sm:$0xff] }
0x343b   :  { %12171 = vmatprep.subr.mxu0 %v17688_v28  ;;  %12196 = vmatpush3.msra.mxu1 %v16848_v33 }
0x343c   :  { %12172 = vmatpush3.msra.mxu0 %v8376_v39  ;;  %12197 = vmatprep.subr.mxu1 %v17688_v28  ;;  %v16861_v39 = vld [vmem:[%s17662_s23] sm:$0xff] }
0x343d   :  { %v8721_v55 = vpop.permute.xlu1 %8720  ;;  %12173 = vmatprep.subr.mxu0 %v17688_v28  ;;  %v7488_v27 = vpop.permute.xlu0 %7487 }
0x343e   :  { %v7504_v25 = vmul.f32 %v16742_v21, %v7488_v27  ;;  %12174 = vmatpush3.msra.mxu0 %v8375_v19 }
0x343f   :  { %12178 = vmatprep.subr.mxu0 %v17688_v28  ;;  %12176 = vmatmul.mubr.msk.f32.vlgmr.msra.gmra.mxu0 %vm8859_vm15, %v7692_v14 }
0x3440   :  { %7517 = vrot.lane.b32.xlu0 %v7504_v25, %s13338_s15  ;;  %12190 = vmatprep.mubr.msk.f32.mxu0 %vm13336_vm5, %v17688_v28 }
0x3441   :  { %v7492_v42 = vpop.permute.xlu1 %7491 }
0x3442   :  { %v7506_v0 = vmul.f32 %v16748_v52, %v7492_v42 }
0x3444   :  { %7521 = vrot.lane.b32.xlu1 %v7506_v0, %s13338_s15 }
0x34b2   :  { %v7518_v29 = vpop.permute.xlu0 %7517 }
0x34b3   :  { %v7534_v57 = vadd.f32 %v7518_v29, %v7474_v10 }
0x34b5   :  { %13211 = vtanh.f32 %v7534_v57 }
0x34b6   :  { %v7522_v18 = vpop.permute.xlu1 %7521 }
0x34b7   :  { %v7536_v34 = vadd.f32 %v7522_v18, %v7476_v45 }
0x34b9   :  { %13213 = vtanh.f32 %v7536_v34  ;;  %v16901_v34 = vld [vmem:[%s17657_s18 + $0x50] sm:$0xff] }
0x34ba   :  { %13215 = vtanh.f32 %v16768_v40 }
0x34c2   :  { %v13212_v16 = vpop.eup %13211 }
0x34c3   :  { %7553 = vrot.lane.b32.xlu0 %v13212_v16, %s13337_s14  ;;  %v16915_v16 = vld [vmem:[%s17657_s18 + $0x40] sm:$0xff] }
0x34c4   :  { %v12156_v61 = vpop.f32.mrf.mxu0 }
0x34c5   :  { %v8824_v32 = vadd.f32 %v12156_v61, %v16142_v58  ;;  %v7693_v58 = vld [vmem:[%s17660_s21] sm:$0xff] }
0x34c6   :  { %v13214_v48 = vpop.eup %13213  ;;  %v8818_v26 = vpop.f32.mrf.mxu0 }
0x34c7   :  { %7557 = vrot.lane.b32.xlu1 %v13214_v48, %s13337_s14  ;;  %8856 = vperm.xlu0 %12453, %v8853_v35   ;;  %v13216_v56 = vpop.eup %13215  ;;  %v8819_v6 = vadd.f32 %v8818_v26, %v16121_v12  ;;  %v8848_v41 = vmax.f32 %v8824_v32, 0.0  ;;  %v13275_v12 = vld [vmem:[%s17680_s27 + $0x8] sm:$0xff]  ;;  %v16922_v35 = vld [vmem:[%s17657_s18 + $0x38] sm:$0xff] }
0x34c8   :  { %v16936_v48 = vld [vmem:[%s17657_s18 + $0x28] sm:$0xff]  ;;  %v16950_v26 = vld [vmem:[%s17657_s18 + $0x18] sm:$0xff] }
0x34c9   :  { %v8847_v5 = vmax.f32 %v8819_v6, 0.0  ;;  %v16998_v32 = vld [vmem:[%s17656_s17 + $0x58] sm:$0xff]  ;;  %v17014_v6 = vld [vmem:[%s17656_s17 + $0x48] sm:$0xff] }
0x34cb   :  { %9010 = vperm.xlu1 %12454, %v9007_v11  }
0x34cf   :  { %9173 = vrot.lane.b32.xlu1 %v14930_v49, %s13338_s15 }
0x34d3   :  { %9177 = vrot.lane.b32.xlu1 %v14944_v60, %s13338_s15 }
0x34d7   :  { %7495 = vrot.lane.b32.xlu1 %v13216_v56, %s13337_s14 }
0x34e7   :  { %v12159_v31 = vpop.f32.mrf.mxu0 }
0x34e8   :  { %v8834_v9 = vadd.f32 %v12159_v31, %v8723_v54  ;;  %v16856_v54 = vld [vmem:[%s17662_s23 + $0x8] sm:$0xff] }
0x34e9   :  { %v8828_v17 = vpop.f32.mrf.mxu0  ;;  %12198 = vmatpush3.msra.mxu1 %v16856_v54 }
0x34ea   :  { %v8829_v22 = vadd.f32 %v8828_v17, %v8721_v55  ;;  %v8850_v37 = vmax.f32 %v8834_v9, 0.0  ;;  %12199 = vmatprep.subr.mxu1 %v17688_v28 }
0x34eb   :  { %12200 = vmatpush3.msra.mxu1 %v16861_v39 }
0x34ec   :  { %v8849_v51 = vmax.f32 %v8829_v22, 0.0 }
0x34ef   :  { %v12162_v1 = vpop.f32.mrf.mxu0 }
0x34f0   :  { %v8844_v30 = vadd.f32 %v12162_v1, %v16730_v38  ;;  %v16814_v38 = vld [vmem:[%s17655_s16 + $0x18] sm:$0xff]  ;;  %v16957_v1 = vld [vmem:[%s17657_s18 + $0x10] sm:$0xff] }
0x34f1   :  { %v8838_v24 = vpop.f32.mrf.mxu0  ;;  %12211 = vmatprep.subr.mxu1 %v16814_v38 }
0x34f2   :  { %v8852_v4 = vmax.f32 %v8844_v30, 0.0  ;;  %v8839_v47 = vadd.f32 %v8838_v24, %v16738_v50  ;;  %v10814_v50 = vmul.f32 -1.442695, %v16768_v40  ;;  %v16929_v40 = vld [vmem:[%s17657_s18 + $0x30] sm:$0xff]  ;;  %v7466_v30 = vrot.slane %v16061_v43, 7  ;;  %v16966_v24 = vld [vmem:[%s17657_s18 + $0x8] sm:$0xff] }
0x34f4   :  { %v8851_v20 = vmax.f32 %v8839_v47, 0.0  ;;  %12179 = vmatpush3.msra.mxu0 %v8852_v4  ;;  %13217 = vpow2.f32 %v10814_v50  ;;  %v16979_v4 = vld [vmem:[%s17657_s18] sm:$0xff] }
0x34f5   :  { %12180 = vmatprep.subr.mxu0 %v17688_v28 }
0x34f6   :  { %12181 = vmatpush3.msra.mxu0 %v8851_v20 }
0x34f7   :  { %12182 = vmatprep.subr.mxu0 %v17688_v28 }
0x34f8   :  { %12183 = vmatpush3.msra.mxu0 %v8850_v37  ;;  %v17005_v37 = vld [vmem:[%s17656_s17 + $0x50] sm:$0xff] }
0x34f9   :  { %12184 = vmatprep.subr.mxu0 %v17688_v28 }
0x34fa   :  { %12185 = vmatpush3.msra.mxu0 %v8849_v51  ;;  %v17023_v51 = vld [vmem:[%s17656_s17 + $0x40] sm:$0xff] }
0x34fb   :  { %12186 = vmatprep.subr.mxu0 %v17688_v28 }
0x34fc   :  { %12187 = vmatpush3.msra.mxu0 %v8848_v41  ;;  %v17030_v41 = vld [vmem:[%s17656_s17 + $0x38] sm:$0xff] }
0x34fd   :  { %12188 = vmatprep.subr.mxu0 %v17688_v28 }
0x34fe   :  { %12189 = vmatpush3.msra.mxu0 %v8847_v5 }
0x34ff   :  { %12191 = vmatmul.mubr.msk.f32.vlgmr.msra.gmra.mxu0 %vm8859_vm15, %v7693_v58  ;;  %12204 = vmatprep.subr.mxu0 %v17688_v28  ;;  %v8929_v19 = vpop.f32.mrf.mxu0  ;;  %v17037_v58 = vld [vmem:[%s17656_s17 + $0x30] sm:$0xff] }
0x3500   :  { %12205 = vmatpush3.msra.mxu0 %v13275_v12  ;;  %12208 = vmatprep.mubr.msk.f32.mxu0 %vm13336_vm5, %v17688_v28  ;;  %v17045_v12 = vld [vmem:[%s17656_s17 + $0x28] sm:$0xff] }
0x3501   :  { %12206 = vmatprep.subr.mxu0 %v17688_v28  ;;  %v12177_v27 = vpop.f32.mrf.mxu0  ;;  %v13218_v62 = vpop.eup %13217 }
0x3502   :  { %12207 = vmatpush3.msra.mxu0 %v13276_v63  ;;  %v7436_v10 = vadd.f32 1.0, %v13218_v62  ;;  %v17059_v63 = vld [vmem:[%s17656_s17 + $0x18] sm:$0xff] }
0x3503   :  { %12209 = vmatmul.mubr.msk.f32.vlgmr.msra.gmra.mxu0 %vm141_vm3, %v7698_v23  ;;  %12225 = vmatprep.subr.mxu0 %v16814_v38  ;;  %v17052_v23 = vld [vmem:[%s17656_s17 + $0x20] sm:$0xff] }
0x3504   :  { %12226 = vmatpush3.msra.mxu0 %v16814_v38  ;;  %13219 = vrcp.f32 %v7436_v10 }
0x3505   :  { %12227 = vmatprep.subr.mxu0 %v16821_v36 }
0x3506   :  { %12228 = vmatpush3.msra.mxu0 %v16821_v36 }
0x3507   :  { %12229 = vmatprep.subr.mxu0 %v16828_v13 }
0x3508   :  { %12230 = vmatpush3.msra.mxu0 %v16828_v13 }
0x3509   :  { %12231 = vmatprep.subr.mxu0 %v16835_v53 }
0x350a   :  { %12232 = vmatpush3.msra.mxu0 %v16835_v53 }
0x350b   :  { %12284 = vmatprep.subr.mxu0 %v16842_v59 }
0x3511   :  { %v16887_v3 = vpop.eup %13219 }
0x3512   :  { %v7478_v9 = vmul.f32 %v16887_v3, %v7466_v30 }
0x3535   :  { %v7554_v55 = vpop.permute.xlu0 %7553 }
0x3536   :  { %v7570_v25 = vmul.f32 %v16742_v21, %v7554_v55 }
0x3538   :  { %v16870_v42 = vsel %vm99_vm0, %v16016_v15, %v7570_v25 }
0x3539   :  { %v7558_v0 = vpop.permute.xlu1 %7557  ;;  %9175 = vrot.lane.b32.xlu0 %v16870_v42, %s13338_s15 }
0x353a   :  { %v7572_v7 = vmul.f32 %v16748_v52, %v7558_v0 }
0x353c   :  { %v16877_v14 = vsel %vm99_vm0, %v16030_v2, %v7572_v7 }
0x353d   :  { %9179 = vrot.lane.b32.xlu0 %v16877_v14, %s13338_s15 }
0x3542   :  { %v8857_v57 = vpop.permute.xlu0 %8856 }
0x3543   :  { %v8930_v11 = vadd.f32 %v8929_v19, %v8857_v57 }
0x3546   :  { %v9011_v21 = vpop.permute.xlu1 %9010 }
0x354a   :  { %v16881_v29 = vpop.permute.xlu1 %9173 }
0x354e   :  { %v16883_v15 = vpop.permute.xlu1 %9177 }
0x354f   :  { %12233 = vmatprep.mubr.msk.f32.mxu0 %vm919_vm7, %v16883_v15 }
0x3552   :  { %v7496_v52 = vpop.permute.xlu1 %7495 }
0x3553   :  { %v7508_v2 = vmul.f32 %v16887_v3, %v7496_v52 }
0x3555   :  { %7525 = vrot.lane.b32.xlu0 %v7508_v2, %s13338_s15  ;;  %v9390_v2 = vrot.slane %v16870_v42, 6 }
0x35ab   :  { %v16891_v45 = vpop.permute.xlu0 %9175 }
0x35af   :  { %v16893_v18 = vpop.permute.xlu0 %9179 }
0x35b0   :  { %12234 = vmatmul.mubr.msk.f32.vlgmr.msra.gmra.mxu0 %vm919_vm7, %v16893_v18 }
0x35b1   :  { %12285 = vmatpush3.msra.mxu0 %v16842_v59 }
0x35b2   :  { %12286 = vmatprep.subr.mxu0 %v16901_v34 }
0x35b3   :  { %12287 = vmatpush3.msra.mxu0 %v16901_v34 }
0x35b4   :  { %12288 = vmatprep.subr.mxu0 %v16908_v46 }
0x35b5   :  { %12289 = vmatpush3.msra.mxu0 %v16908_v46 }
0x35b6   :  { %12290 = vmatprep.subr.mxu0 %v16915_v16 }
0x35b7   :  { %12291 = vmatpush3.msra.mxu0 %v16915_v16 }
0x35b8   :  { %12292 = vmatprep.subr.mxu0 %v16922_v35 }
0x35b9   :  { %12293 = vmatpush3.msra.mxu0 %v16922_v35 }
0x35ba   :  { %12294 = vmatprep.subr.mxu0 %v16929_v40 }
0x35bb   :  { %12295 = vmatpush3.msra.mxu0 %v16929_v40 }
0x35bc   :  { %12296 = vmatprep.subr.mxu0 %v16936_v48 }
0x35bd   :  { %12297 = vmatpush3.msra.mxu0 %v16936_v48 }
0x35be   :  { %12298 = vmatprep.subr.mxu0 %v16943_v8 }
0x35bf   :  { %v9002_v56 = vpop.f32.mrf.mxu0  ;;  %12299 = vmatpush3.msra.mxu0 %v16943_v8 }
0x35c0   :  { %v9006_v61 = vadd.f32 %v9002_v56, %v8930_v11  ;;  %12300 = vmatprep.subr.mxu0 %v16950_v26  ;;  %v9389_v11 = vrot.slane %v14930_v49, 6  ;;  %v17690_v56 = vld [vmem:[#allocation5_spill] sm:$0xff] }
0x35c1   :  { %v12192_v31 = vpop.f32.mrf.mxu0  ;;  %12301 = vmatpush3.msra.mxu0 %v16950_v26 }
0x35c2   :  { %v9013_v17 = vadd.f32 %v9011_v21, %v9006_v61  ;;  %12302 = vmatprep.subr.mxu0 %v16957_v1 }
0x35c3   :  { %12303 = vmatpush3.msra.mxu0 %v16957_v1  ;;  %v16988_v22 = vpop.f32.mrf.mxu0 }
0x35c4   :  { %12202 = vmatmul.mubr.msk.f32.vlgmr.msra.gmra.mxu1 %vm919_vm7, %v9013_v17  ;;  %12304 = vmatprep.subr.mxu0 %v16966_v24 }
0x35c5   :  { %12212 = vmatpush3.msra.mxu1 %v16814_v38  ;;  %12219 = vmatprep.mubr.msk.f32.mxu1 %vm919_vm7, %v16881_v29  ;;  %v12210_v20 = vpop.f32.mrf.mxu0  ;;  %v17066_v38 = vld [vmem:[%s17656_s17 + $0x10] sm:$0xff] }
0x35c6   :  { %12213 = vmatprep.subr.mxu1 %v16821_v36  ;;  %12305 = vmatpush3.msra.mxu0 %v16966_v24 }
0x35c7   :  { %12214 = vmatpush3.msra.mxu1 %v16821_v36  ;;  %v7526_v43 = vpop.permute.xlu0 %7525  ;;  %12306 = vmatprep.subr.mxu0 %v16979_v4  ;;  %v17073_v36 = vld [vmem:[%s17656_s17 + $0x8] sm:$0xff] }
0x35c8   :  { %12215 = vmatprep.subr.mxu1 %v16828_v13  ;;  %v7538_v47 = vadd.f32 %v7526_v43, %v7478_v9  ;;  %12307 = vmatpush3.msra.mxu0 %v16979_v4 }
0x35c9   :  { %12216 = vmatpush3.msra.mxu1 %v16828_v13  ;;  %12317 = vmatprep.subr.mxu0 %v17688_v28  ;;  %v17080_v13 = vld [vmem:[%s17656_s17] sm:$0xff] }
0x35ca   :  { %13221 = vtanh.f32 %v7538_v47  ;;  %12217 = vmatprep.subr.mxu1 %v16835_v53 }
0x35cb   :  { %12218 = vmatpush3.msra.mxu1 %v16835_v53 }
0x35cc   :  { %12220 = vmatmul.mubr.msk.f32.vlgmr.msra.gmra.mxu1 %vm919_vm7, %v16891_v45  ;;  %12239 = vmatprep.subr.mxu1 %v17688_v28 }
0x35cd   :  { %12222 = vmatprep.mubr.msk.f32.mxu1 %vm919_vm7, %v16883_v15  ;;  %12240 = vmatpush3.msra.mxu1 %v16998_v32 }
0x35ce   :  { %12241 = vmatprep.subr.mxu1 %v17688_v28 }
0x35cf   :  { %12242 = vmatpush3.msra.mxu1 %v17005_v37 }
0x35d0   :  { %12223 = vmatmul.mubr.msk.f32.gmra.mxu1 %vm919_vm7, %v16893_v18  ;;  %12243 = vmatprep.subr.mxu1 %v17688_v28 }
0x35d1   :  { %12244 = vmatpush3.msra.mxu1 %v17014_v6  ;;  %12263 = vmatprep.mubr.msk.f32.mxu1 %vm13336_vm5, %v17688_v28 }
0x35d2   :  { %12245 = vmatprep.subr.mxu1 %v17688_v28 }
0x35d3   :  { %12246 = vmatpush3.msra.mxu1 %v17023_v51 }
0x35d4   :  { %12247 = vmatprep.subr.mxu1 %v17688_v28 }
0x35d5   :  { %12248 = vmatpush3.msra.mxu1 %v17030_v41 }
0x35d6   :  { %12249 = vmatprep.subr.mxu1 %v17688_v28 }
0x35d7   :  { %v13222_v5 = vpop.eup %13221  ;;  %12250 = vmatpush3.msra.mxu1 %v17037_v58 }
0x35d8   :  { %7561 = vrot.lane.b32.xlu1 %v13222_v5, %s13337_s14  ;;  %12251 = vmatprep.subr.mxu1 %v17688_v28 }
0x35d9   :  { %12252 = vmatpush3.msra.mxu1 %v17045_v12 }
0x35da   :  { %12253 = vmatprep.subr.mxu1 %v17688_v28 }
0x35db   :  { %12254 = vmatpush3.msra.mxu1 %v17052_v23 }
0x35dc   :  { %12255 = vmatprep.subr.mxu1 %v17688_v28 }
0x35dd   :  { %12256 = vmatpush3.msra.mxu1 %v17059_v63 }
0x35de   :  { %12257 = vmatprep.subr.mxu1 %v17688_v28 }
0x35df   :  { %12258 = vmatpush3.msra.mxu1 %v17066_v38 }
0x35e0   :  { %12259 = vmatprep.subr.mxu1 %v17688_v28 }
0x35e1   :  { %12260 = vmatpush3.msra.mxu1 %v17073_v36 }
0x35e2   :  { %12261 = vmatprep.subr.mxu1 %v17688_v28 }
0x35e3   :  { %12262 = vmatpush3.msra.mxu1 %v17080_v13 }
0x35e4   :  { %12362 = vmatprep.subr.mxu1 %v16842_v59 }
0x364a   :  { %v7562_v25 = vpop.permute.xlu1 %7561 }
0x364b   :  { %v7574_v10 = vmul.f32 %v16887_v3, %v7562_v25  ;;  %v9391_v3 = vsel %vm7577_vm8, %v9389_v11, %v9390_v2 }
0x364d   :  { %v7663_v57 = vsel %vm99_vm0, %v16083_v44, %v7574_v10 }
0x3684   :  { %v17084_v53 = vpop.f32.mrf.mxu1 }
0x3686   :  { %v12203_v50 = vpop.f32.mrf.mxu1 }
0x368c   :  { %v12221_v19 = vpop.f32.mrf.mxu1 }
0x368d   :  { %v9275_v55 = vmax.f32 %v12221_v19, 0.0 }
0x368e   :  { %v9255_v27 = vpop.f32.mrf.mxu1 }
0x368f   :  { %v9274_v0 = vmax.f32 %v9255_v27, 0.0  ;;  %9383 = vrot.lane.b32.xlu1 %v9275_v55, %s13339_s3 }
0x3690   :  { %v12224_v7 = vpop.f32.mrf.mxu1 }
0x3691   :  { %v9277_v62 = vmax.f32 %v12224_v7, 0.0  ;;  %9381 = vrot.lane.b32.xlu0 %v9274_v0, %s13339_s3 }
0x3692   :  { %v9265_v21 = vpop.f32.mrf.mxu1 }
0x3693   :  { %v9276_v52 = vmax.f32 %v9265_v21, 0.0  ;;  %9387 = vrot.lane.b32.xlu1 %v9277_v62, %s13339_s3 }
0x3695   :  { %9385 = vrot.lane.b32.xlu0 %v9276_v52, %s13339_s3 }
0x3697   :  { %9282 = vrot.lane.b32.xlu1 %v7663_v57, %s13338_s15 }
0x3699   :  { %9280 = vrot.lane.b32.xlu0 %v17690_v56, %s13338_s15 }
0x369b   :  { %9402 = vrot.lane.b32.xlu1 %v9391_v3, %s13338_s15 }
0x369d   :  { %9400 = vrot.lane.b32.xlu0 %v9389_v11, %s13338_s15 }
0x3701   :  { %v17101_v61 = vpop.permute.xlu1 %9383 }
0x3702   :  { %v9394_v42 = vrot.slane %v17101_v61, 6 }
0x3703   :  { %v17103_v31 = vpop.permute.xlu0 %9381 }
0x3704   :  { %v9392_v44 = vrot.slane %v17103_v31, 6 }
0x3705   :  { %v17107_v17 = vpop.permute.xlu1 %9387 }
0x3706   :  { %v9395_v49 = vsel %vm7577_vm8, %v9392_v44, %v9394_v42  ;;  %v9393_v30 = vsel %vm7577_vm8, %v9390_v2, %v9392_v44  ;;  %v9398_v43 = vrot.slane %v17107_v17, 6 }
0x3707   :  { %9406 = vrot.lane.b32.xlu1 %v9395_v49, %s13338_s15  ;;  %9404 = vrot.lane.b32.xlu0 %v9393_v30, %s13338_s15  ;;  %v17113_v9 = vpop.permute.xlu0 %9385 }
0x3708   :  { %v9396_v47 = vrot.slane %v17113_v9, 6 }
0x3709   :  { %v9283_v20 = vpop.permute.xlu1 %9282 }
0x370a   :  { %v9399_v5 = vsel %vm7577_vm8, %v9396_v47, %v9398_v43  ;;  %v9397_v50 = vsel %vm7577_vm8, %v9394_v42, %v9396_v47 }
0x370b   :  { %9410 = vrot.lane.b32.xlu1 %v9399_v5, %s13338_s15  ;;  %9408 = vrot.lane.b32.xlu0 %v9397_v50, %s13338_s15  ;;  %v9281_v19 = vpop.permute.xlu0 %9280 }
0x370c   :  { %12236 = vmatprep.mubr.msk.f32.mxu0 %vm919_vm7, %v9281_v19 }
0x370d   :  { %12237 = vmatmul.mubr.msk.f32.gmra.mxu0 %vm919_vm7, %v9283_v20  ;;  %v17123_v55 = vpop.permute.xlu1 %9402 }
0x370e   :  { %v9426_v0 = vrot.slane %v17123_v55, 1  ;;  %v9460_v7 = vrot.slane %v17123_v55, 2 }
0x370f   :  { %9412 = vrot.lane.b32.xlu0 %v9398_v43, %s13338_s15  ;;  %v9401_v27 = vpop.permute.xlu0 %9400 }
0x3710   :  { %v9421_v25 = vsel %vm7577_vm8, 0.0, %v9401_v27 }
0x3711   :  { %v9425_v62 = vrot.slane %v9421_v25, 1  ;;  %v9459_v10 = vrot.slane %v9421_v25, 2 }
0x3713   :  { %v9461_v21 = vsel %vm7589_vm12, %v9459_v10, %v9460_v7  ;;  %v9427_v52 = vsel %vm99_vm0, %v9425_v62, %v9426_v0 }
0x3714   :  { %9472 = vrot.lane.b32.xlu0 %v9461_v21, %s13337_s14  ;;  %9438 = vrot.lane.b32.xlu1 %v9427_v52, %s13338_s15 }
0x3779   :  { %v17133_v2 = vpop.permute.xlu1 %9406  ;;  %v17135_v57 = vpop.permute.xlu0 %9404 }
0x377a   :  { %v9428_v11 = vrot.slane %v17135_v57, 1  ;;  %v9462_v56 = vrot.slane %v17135_v57, 2  ;;  %v9430_v3 = vrot.slane %v17133_v2, 1  ;;  %v9464_v42 = vrot.slane %v17133_v2, 2 }
0x377c   :  { %v9463_v44 = vsel %vm7589_vm12, %v9460_v7, %v9462_v56  ;;  %v9429_v49 = vsel %vm99_vm0, %v9426_v0, %v9428_v11  ;;  %v9465_v5 = vsel %vm7589_vm12, %v9462_v56, %v9464_v42  ;;  %v9431_v50 = vsel %vm99_vm0, %v9428_v11, %v9430_v3 }
0x377d   :  { %9474 = vrot.lane.b32.xlu0 %v9463_v44, %s13337_s14  ;;  %9440 = vrot.lane.b32.xlu1 %v9429_v49, %s13338_s15  ;;  %v17145_v30 = vpop.permute.xlu0 %9408  ;;  %v17147_v43 = vpop.permute.xlu1 %9410 }
0x377e   :  { %v9432_v47 = vrot.slane %v17145_v30, 1  ;;  %v9466_v20 = vrot.slane %v17145_v30, 2  ;;  %v9468_v27 = vrot.slane %v17147_v43, 2  ;;  %v9434_v0 = vrot.slane %v17147_v43, 1 }
0x3780   :  { %v9467_v7 = vsel %vm7589_vm12, %v9464_v42, %v9466_v20  ;;  %v9433_v62 = vsel %vm99_vm0, %v9430_v3, %v9432_v47  ;;  %v9469_v56 = vsel %vm7589_vm12, %v9466_v20, %v9468_v27  ;;  %v9435_v3 = vsel %vm99_vm0, %v9432_v47, %v9434_v0 }
0x3781   :  { %9476 = vrot.lane.b32.xlu0 %v9465_v5, %s13337_s14  ;;  %9442 = vrot.lane.b32.xlu1 %v9431_v50, %s13338_s15  ;;  %v9413_v19 = vpop.permute.xlu0 %9412 }
0x3782   :  { %v17160_v10 = vsel %vm7577_vm8, %v9413_v19, 0.0 }
0x3783   :  { %v9436_v44 = vrot.slane %v17160_v10, 1  ;;  %v9470_v49 = vrot.slane %v17160_v10, 2 }
0x3785   :  { %9478 = vrot.lane.b32.xlu0 %v9467_v7, %s13337_s14  ;;  %9444 = vrot.lane.b32.xlu1 %v9433_v62, %s13338_s15  ;;  %v9471_v20 = vsel %vm7589_vm12, %v9468_v27, %v9470_v49  ;;  %v9437_v5 = vsel %vm99_vm0, %v9434_v0, %v9436_v44 }
0x3786   :  { %v9439_v21 = vpop.permute.xlu1 %9438  ;;  %v9473_v52 = vpop.permute.xlu0 %9472 }
0x3787   :  { %v9493_v11 = vsel %vm919_vm7, %v9421_v25, %v9439_v21  ;;  %v12235_v25 = vpop.f32.mrf.mxu0 }
0x3788   :  { %v9500_v42 = vsel %vm8030_vm13, %v9493_v11, %v9473_v52 }
0x3789   :  { %9480 = vrot.lane.b32.xlu0 %v9469_v56, %s13337_s14  ;;  %9446 = vrot.lane.b32.xlu1 %v9435_v3, %s13338_s15  ;;  %v9354_v47 = vpop.f32.mrf.mxu0 }
0x378a   :  { %12264 = vmatmul.mubr.msk.f32.vlgmr.msra.gmra.mxu1 %vm8038_vm14, %v9500_v42  ;;  %v9373_v50 = vmax.f32 %v9354_v47, 0.0 }
0x378b   :  { %12266 = vmatprep.mubr.msk.f32.mxu1 %vm13336_vm5, %v17688_v28  ;;  %12363 = vmatpush3.msra.mxu1 %v16842_v59  ;;  %v9374_v59 = vmax.f32 %v12235_v25, 0.0 }
0x378c   :  { %12364 = vmatprep.subr.mxu1 %v16901_v34 }
0x378d   :  { %9482 = vrot.lane.b32.xlu0 %v9471_v20, %s13337_s14  ;;  %9448 = vrot.lane.b32.xlu1 %v9437_v5, %s13338_s15 }
0x378e   :  { %12365 = vmatpush3.msra.mxu1 %v16901_v34 }
0x378f   :  { %12366 = vmatprep.subr.mxu1 %v16908_v46 }
0x3790   :  { %12367 = vmatpush3.msra.mxu1 %v16908_v46 }
0x3791   :  { %9484 = vrot.lane.b32.xlu0 %v9470_v49, %s13337_s14  ;;  %9450 = vrot.lane.b32.xlu1 %v9436_v44, %s13338_s15 }
0x3792   :  { %12368 = vmatprep.subr.mxu1 %v16915_v16 }
0x3793   :  { %12369 = vmatpush3.msra.mxu1 %v16915_v16  ;;  %v9862_v16 = vrot.slane %v16877_v14, 6 }
0x3794   :  { %12370 = vmatprep.subr.mxu1 %v16922_v35 }
0x3795   :  { %9855 = vrot.lane.b32.xlu0 %v9374_v59, %s13339_s3  ;;  %9853 = vrot.lane.b32.xlu1 %v9373_v50, %s13339_s3 }
0x3796   :  { %12371 = vmatpush3.msra.mxu1 %v16922_v35 }
0x3797   :  { %12372 = vmatprep.subr.mxu1 %v16929_v40 }
0x3798   :  { %12373 = vmatpush3.msra.mxu1 %v16929_v40 }
0x3799   :  { %12374 = vmatprep.subr.mxu1 %v16936_v48 }
0x379a   :  { %12375 = vmatpush3.msra.mxu1 %v16936_v48  ;;  %v9861_v48 = vrot.slane %v14944_v60, 6 }
0x379b   :  { %12376 = vmatprep.subr.mxu1 %v16943_v8 }
0x379c   :  { %12377 = vmatpush3.msra.mxu1 %v16943_v8  ;;  %v9863_v8 = vsel %vm7577_vm8, %v9861_v48, %v9862_v16 }
0x379d   :  { %12378 = vmatprep.subr.mxu1 %v16950_v26 }
0x379e   :  { %12379 = vmatpush3.msra.mxu1 %v16950_v26 }
0x379f   :  { %12380 = vmatprep.subr.mxu1 %v16957_v1 }
0x37a0   :  { %12381 = vmatpush3.msra.mxu1 %v16957_v1 }
0x37a1   :  { %12382 = vmatprep.subr.mxu1 %v16966_v24 }
0x37a2   :  { %12383 = vmatpush3.msra.mxu1 %v16966_v24 }
0x37a3   :  { %12384 = vmatprep.subr.mxu1 %v16979_v4 }
0x37a4   :  { %12385 = vmatpush3.msra.mxu1 %v16979_v4 }
0x37a5   :  { %12395 = vmatprep.subr.mxu1 %v17688_v28 }
0x37cd   :  { %v12238_v34 = vpop.f32.mrf.mxu0 }
0x37ce   :  { %v9376_v46 = vmax.f32 %v12238_v34, 0.0 }
0x37cf   :  { %v9364_v35 = vpop.f32.mrf.mxu0 }
0x37d0   :  { %v9375_v40 = vmax.f32 %v9364_v35, 0.0  ;;  %9859 = vrot.lane.b32.xlu0 %v9376_v46, %s13339_s3 }
0x37d2   :  { %9857 = vrot.lane.b32.xlu1 %v9375_v40, %s13339_s3 }
0x37d4   :  { %9874 = vrot.lane.b32.xlu0 %v9863_v8, %s13338_s15 }
0x37d6   :  { %9872 = vrot.lane.b32.xlu1 %v9861_v48, %s13338_s15 }
0x37ef   :  { %v9441_v26 = vpop.permute.xlu1 %9440  ;;  %v9475_v1 = vpop.permute.xlu0 %9474 }
0x37f0   :  { %v9494_v24 = vsel %vm919_vm7, %v17123_v55, %v9441_v26 }
0x37f1   :  { %v9501_v14 = vsel %vm8030_vm13, %v9494_v24, %v9475_v1 }
0x37f2   :  { %12267 = vmatmul.mubr.msk.f32.gmra.mxu1 %vm8038_vm14, %v9501_v14 }
0x37f3   :  { %v9443_v4 = vpop.permute.xlu1 %9442  ;;  %v9477_v19 = vpop.permute.xlu0 %9476  ;;  %12269 = vmatprep.mubr.msk.f32.mxu1 %vm13336_vm5, %v17688_v28 }
0x37f4   :  { %v9495_v60 = vsel %vm919_vm7, %v17135_v57, %v9443_v4 }
0x37f5   :  { %v9502_v27 = vsel %vm8030_vm13, %v9495_v60, %v9477_v19 }
0x37f6   :  { %12270 = vmatmul.mubr.msk.f32.gmra.mxu1 %vm8038_vm14, %v9502_v27 }
0x37f7   :  { %v9445_v0 = vpop.permute.xlu1 %9444  ;;  %v9479_v7 = vpop.permute.xlu0 %9478  ;;  %12272 = vmatprep.mubr.msk.f32.mxu1 %vm13336_vm5, %v17688_v28 }
0x37f8   :  { %v9496_v55 = vsel %vm919_vm7, %v17133_v2, %v9445_v0 }
0x37f9   :  { %v9503_v62 = vsel %vm8030_vm13, %v9496_v55, %v9479_v7 }
0x37fa   :  { %12273 = vmatmul.mubr.msk.f32.gmra.mxu1 %vm8038_vm14, %v9503_v62 }
0x37fb   :  { %v9447_v21 = vpop.permute.xlu1 %9446  ;;  %v9481_v52 = vpop.permute.xlu0 %9480  ;;  %12275 = vmatprep.mubr.msk.f32.mxu1 %vm13336_vm5, %v17688_v28 }
0x37fc   :  { %v9497_v57 = vsel %vm919_vm7, %v17145_v30, %v9447_v21 }
0x37fd   :  { %v9504_v11 = vsel %vm8030_vm13, %v9497_v57, %v9481_v52 }
0x37fe   :  { %12276 = vmatmul.mubr.msk.f32.gmra.mxu1 %vm8038_vm14, %v9504_v11 }
0x37ff   :  { %v9449_v56 = vpop.permute.xlu1 %9448  ;;  %v9483_v44 = vpop.permute.xlu0 %9482  ;;  %12278 = vmatprep.mubr.msk.f32.mxu1 %vm13336_vm5, %v17688_v28 }
0x3800   :  { %v9498_v2 = vsel %vm919_vm7, %v17147_v43, %v9449_v56 }
0x3801   :  { %v9505_v49 = vsel %vm8030_vm13, %v9498_v2, %v9483_v44 }
0x3802   :  { %12279 = vmatmul.mubr.msk.f32.gmra.mxu1 %vm8038_vm14, %v9505_v49 }
0x3803   :  { %v9451_v42 = vpop.permute.xlu1 %9450  ;;  %v9485_v3 = vpop.permute.xlu0 %9484  ;;  %12281 = vmatprep.mubr.msk.f32.mxu1 %vm13336_vm5, %v17688_v28 }
0x3804   :  { %v9499_v30 = vsel %vm919_vm7, %v17160_v10, %v9451_v42 }
0x3805   :  { %v9506_v25 = vsel %vm8030_vm13, %v9499_v30, %v9485_v3 }
0x3806   :  { %12282 = vmatmul.mubr.msk.f32.gmra.mxu1 %vm8038_vm14, %v9506_v25 }
0x3807   :  { %v17248_v20 = vpop.permute.xlu1 %9853  ;;  %v17250_v5 = vpop.permute.xlu0 %9855 }
0x3808   :  { %v9864_v43 = vrot.slane %v17248_v20, 6  ;;  %v9866_v47 = vrot.slane %v17250_v5, 6 }
0x380a   :  { %v9865_v59 = vsel %vm7577_vm8, %v9862_v16, %v9864_v43  ;;  %v9867_v50 = vsel %vm7577_vm8, %v9864_v43, %v9866_v47 }
0x380b   :  { %9876 = vrot.lane.b32.xlu1 %v9865_v59, %s13338_s15  ;;  %9878 = vrot.lane.b32.xlu0 %v9867_v50, %s13338_s15 }
0x3842   :  { %v17258_v10 = vpop.permute.xlu0 %9859 }
0x3843   :  { %v9870_v46 = vrot.slane %v17258_v10, 6 }
0x3844   :  { %v17260_v34 = vpop.permute.xlu1 %9857 }
0x3845   :  { %v9868_v35 = vrot.slane %v17260_v34, 6 }
0x3847   :  { %v9869_v40 = vsel %vm7577_vm8, %v9866_v47, %v9868_v35  ;;  %v9871_v48 = vsel %vm7577_vm8, %v9868_v35, %v9870_v46 }
0x3848   :  { %9880 = vrot.lane.b32.xlu1 %v9869_v40, %s13338_s15  ;;  %9882 = vrot.lane.b32.xlu0 %v9871_v48, %s13338_s15 }
0x384a   :  { %v9594_v16 = vpop.f32.mrf.mxu1 }
0x384b   :  { %v17269_v26 = vmax.f32 %v9594_v16, 0.0 }
0x384c   :  { %v12265_v8 = vpop.f32.mrf.mxu1  ;;  %9884 = vrot.lane.b32.xlu1 %v9870_v46, %s13338_s15 }
0x384d   :  { %v9642_v4 = vrot.slane %v17269_v26, 1  ;;  %v9673_v62 = vrot.slane %v17269_v26, 2  ;;  %v9873_v8 = vpop.permute.xlu1 %9872 }
0x38b2   :  { %v9599_v1 = vpop.f32.mrf.mxu1 }
0x38b3   :  { %v17271_v24 = vmax.f32 %v9599_v1, 0.0 }
0x38b4   :  { %v12268_v14 = vpop.f32.mrf.mxu1 }
0x38b5   :  { %v9643_v19 = vrot.slane %v17271_v24, 1  ;;  %v9674_v27 = vrot.slane %v17271_v24, 2 }
0x38b6   :  { %v9604_v60 = vpop.f32.mrf.mxu1 }
0x38b7   :  { %v17276_v0 = vmax.f32 %v9604_v60, 0.0  ;;  %v9644_v7 = vsel %vm99_vm0, %v9642_v4, %v9643_v19  ;;  %v9675_v44 = vsel %vm7589_vm12, %v9673_v62, %v9674_v27 }
0x38b8   :  { %v12271_v55 = vpop.f32.mrf.mxu1  ;;  %9655 = vrot.lane.b32.xlu0 %v9644_v7, %s13338_s15  ;;  %v17310_v7 = vsel %vm7577_vm8, 0.0, %v9873_v8 }
0x38b9   :  { %v9645_v21 = vrot.slane %v17276_v0, 1  ;;  %v9676_v57 = vrot.slane %v17276_v0, 2 }
0x38ba   :  { %v9609_v52 = vpop.f32.mrf.mxu1 }
0x38bb   :  { %v17283_v11 = vmax.f32 %v9609_v52, 0.0  ;;  %v9646_v56 = vsel %vm99_vm0, %v9643_v19, %v9645_v21  ;;  %v9677_v25 = vsel %vm7589_vm12, %v9674_v27, %v9676_v57  ;;  %v9897_v52 = vrot.slane %v17310_v7, 1 }
0x38bc   :  { %v12274_v2 = vpop.f32.mrf.mxu1  ;;  %9657 = vrot.lane.b32.xlu1 %v9646_v56, %s13338_s15  ;;  %9686 = vrot.lane.b32.xlu0 %v9675_v44, %s13337_s14 }
0x38bd   :  { %v9647_v49 = vrot.slane %v17283_v11, 1  ;;  %v9678_v3 = vrot.slane %v17283_v11, 2  ;;  %v17319_v2 = vpop.permute.xlu1 %9876 }
0x38be   :  { %v9614_v42 = vpop.f32.mrf.mxu1 }
0x38bf   :  { %v17291_v30 = vmax.f32 %v9614_v42, 0.0  ;;  %v9648_v43 = vsel %vm99_vm0, %v9645_v21, %v9647_v49  ;;  %v9679_v48 = vsel %vm7589_vm12, %v9676_v57, %v9678_v3  ;;  %v17314_v21 = vpop.permute.xlu0 %9874  ;;  %v9931_v42 = vrot.slane %v17310_v7, 2 }
0x38c0   :  { %v12277_v47 = vpop.f32.mrf.mxu1  ;;  %9688 = vrot.lane.b32.xlu1 %v9677_v25, %s13337_s14  ;;  %9659 = vrot.lane.b32.xlu0 %v9648_v43, %s13338_s15 }
0x38c1   :  { %v9649_v59 = vrot.slane %v17291_v30, 1  ;;  %v9680_v46 = vrot.slane %v17291_v30, 2 }
0x38c2   :  { %v9619_v50 = vpop.f32.mrf.mxu1 }
0x38c3   :  { %v17299_v35 = vmax.f32 %v9619_v50, 0.0  ;;  %v9650_v40 = vsel %vm99_vm0, %v9647_v49, %v9649_v59  ;;  %v9681_v60 = vsel %vm7589_vm12, %v9678_v3, %v9680_v46  ;;  %v9898_v49 = vrot.slane %v17314_v21, 1  ;;  %v17328_v47 = vpop.permute.xlu0 %9878 }
0x38c4   :  { %v12280_v16 = vpop.f32.mrf.mxu1  ;;  %9661 = vrot.lane.b32.xlu1 %v9650_v40, %s13338_s15  ;;  %9690 = vrot.lane.b32.xlu0 %v9679_v48, %s13337_s14  ;;  %v9900_v3 = vrot.slane %v17319_v2, 1  ;;  %v9934_v50 = vrot.slane %v17319_v2, 2  ;;  %v17335_v40 = vpop.permute.xlu1 %9880  ;;  %v9936_v8 = vrot.slane %v17328_v47, 2 }
0x38c5   :  { %v9651_v1 = vrot.slane %v17299_v35, 1  ;;  %v9682_v4 = vrot.slane %v17299_v35, 2  ;;  %v9899_v43 = vsel %vm99_vm0, %v9897_v52, %v9898_v49 }
0x38c6   :  { %v9624_v14 = vpop.f32.mrf.mxu1  ;;  %v9901_v16 = vsel %vm99_vm0, %v9898_v49, %v9900_v3 }
0x38c7   :  { %v9634_v19 = vmax.f32 %v9624_v14, 0.0  ;;  %v9652_v27 = vsel %vm99_vm0, %v9649_v59, %v9651_v1  ;;  %v9683_v44 = vsel %vm7589_vm12, %v9680_v46, %v9682_v4  ;;  %v9932_v59 = vrot.slane %v17314_v21, 2 }
0x38c8   :  { %v12283_v55 = vpop.f32.mrf.mxu1  ;;  %9692 = vrot.lane.b32.xlu1 %v9681_v60, %s13337_s14  ;;  %9663 = vrot.lane.b32.xlu0 %v9652_v27, %s13338_s15  ;;  %v9902_v46 = vrot.slane %v17328_v47, 1  ;;  %v9885_v60 = vpop.permute.xlu1 %9884  ;;  %v9938_v27 = vrot.slane %v17335_v40, 2 }
0x38c9   :  { %v9653_v62 = vrot.slane %v9634_v19, 1  ;;  %v9684_v57 = vrot.slane %v9634_v19, 2  ;;  %v9933_v48 = vsel %vm7589_vm12, %v9931_v42, %v9932_v59  ;;  %v9935_v14 = vsel %vm7589_vm12, %v9932_v59, %v9934_v50  ;;  %v17345_v19 = vpop.permute.xlu0 %9882 }
0x38ca   :  { %v9906_v55 = vrot.slane %v17345_v19, 1  ;;  %v9939_v49 = vsel %vm7589_vm12, %v9936_v8, %v9938_v27 }
0x38cb   :  { %v9654_v56 = vsel %vm99_vm0, %v9651_v1, %v9653_v62  ;;  %v9685_v25 = vsel %vm7589_vm12, %v9682_v4, %v9684_v57  ;;  %v9904_v1 = vrot.slane %v17335_v40, 1  ;;  %v9903_v4 = vsel %vm99_vm0, %v9900_v3, %v9902_v46 }
0x38cc   :  { %9665 = vrot.lane.b32.xlu1 %v9654_v56, %s13338_s15  ;;  %9694 = vrot.lane.b32.xlu0 %v9683_v44, %s13337_s14  ;;  %v9937_v62 = vsel %vm7589_vm12, %v9934_v50, %v9936_v8  ;;  %v17354_v57 = vsel %vm7577_vm8, %v9885_v60, 0.0  ;;  %v9940_v56 = vrot.slane %v17345_v19, 2 }
0x38cd   :  { %v9905_v52 = vsel %vm99_vm0, %v9902_v46, %v9904_v1  ;;  %v9908_v44 = vrot.slane %v17354_v57, 1  ;;  %v9907_v42 = vsel %vm99_vm0, %v9904_v1, %v9906_v55  ;;  %v9942_v3 = vrot.slane %v17354_v57, 2 }
0x38cf   :  { %v9943_v59 = vsel %vm7589_vm12, %v9940_v56, %v9942_v3 }
0x38d0   :  { %9696 = vrot.lane.b32.xlu1 %v9685_v25, %s13337_s14  ;;  %9910 = vrot.lane.b32.xlu0 %v9899_v43, %s13338_s15  ;;  %v9941_v25 = vsel %vm7589_vm12, %v9938_v27, %v9940_v56  ;;  %v9909_v43 = vsel %vm99_vm0, %v9906_v55, %v9908_v44 }
0x38d4   :  { %9944 = vrot.lane.b32.xlu1 %v9933_v48, %s13337_s14  ;;  %9912 = vrot.lane.b32.xlu0 %v9901_v16, %s13338_s15 }
0x38d8   :  { %9946 = vrot.lane.b32.xlu1 %v9935_v14, %s13337_s14  ;;  %9914 = vrot.lane.b32.xlu0 %v9903_v4, %s13338_s15 }
0x38dc   :  { %9948 = vrot.lane.b32.xlu1 %v9937_v62, %s13337_s14  ;;  %9916 = vrot.lane.b32.xlu0 %v9905_v52, %s13338_s15 }
0x38e0   :  { %9950 = vrot.lane.b32.xlu1 %v9939_v49, %s13337_s14  ;;  %9918 = vrot.lane.b32.xlu0 %v9907_v42, %s13338_s15 }
0x38e4   :  { %9952 = vrot.lane.b32.xlu1 %v9941_v25, %s13337_s14  ;;  %9920 = vrot.lane.b32.xlu0 %v9909_v43, %s13338_s15 }
0x38e8   :  { %9954 = vrot.lane.b32.xlu1 %v9943_v59, %s13337_s14  ;;  %9922 = vrot.lane.b32.xlu0 %v9908_v44, %s13338_s15 }
0x38ec   :  { %9956 = vrot.lane.b32.xlu1 %v9942_v3, %s13337_s14 }
0x392a   :  { %v9656_v50 = vpop.permute.xlu0 %9655 }
0x392b   :  { %v9704_v46 = vsel %vm919_vm7, %v17269_v26, %v9656_v50 }
0x392e   :  { %v9658_v48 = vpop.permute.xlu1 %9657  ;;  %v9687_v16 = vpop.permute.xlu0 %9686 }
0x392f   :  { %v9710_v8 = vsel %vm8030_vm13, %v9704_v46, %v9687_v16  ;;  %v9705_v1 = vsel %vm919_vm7, %v17271_v24, %v9658_v48 }
0x3930   :  { %12308 = vmatprep.mubr.msk.f32.mxu0 %vm8038_vm14, %v9710_v8 }
0x3932   :  { %v9689_v14 = vpop.permute.xlu1 %9688  ;;  %v9660_v4 = vpop.permute.xlu0 %9659 }
0x3933   :  { %v9711_v60 = vsel %vm8030_vm13, %v9705_v1, %v9689_v14  ;;  %v9706_v26 = vsel %vm919_vm7, %v17276_v0, %v9660_v4 }
0x3934   :  { %12309 = vmatmul.mubr.msk.f32.vlgmr.msra.gmra.mxu0 %vm8038_vm14, %v9711_v60 }
0x3935   :  { %12318 = vmatpush3.msra.mxu0 %v16998_v32 }
0x3936   :  { %12319 = vmatprep.subr.mxu0 %v17688_v28  ;;  %v9662_v27 = vpop.permute.xlu1 %9661  ;;  %v9691_v55 = vpop.permute.xlu0 %9690 }
0x3937   :  { %12320 = vmatpush3.msra.mxu0 %v17005_v37  ;;  %v9712_v62 = vsel %vm8030_vm13, %v9706_v26, %v9691_v55  ;;  %v9707_v32 = vsel %vm919_vm7, %v17283_v11, %v9662_v27 }
0x3938   :  { %12321 = vmatprep.subr.mxu0 %v17688_v28  ;;  %12311 = vmatprep.mubr.msk.f32.mxu0 %vm8038_vm14, %v9712_v62 }
0x3939   :  { %12322 = vmatpush3.msra.mxu0 %v17014_v6 }
0x393a   :  { %12323 = vmatprep.subr.mxu0 %v17688_v28  ;;  %v9693_v24 = vpop.permute.xlu1 %9692  ;;  %v9664_v0 = vpop.permute.xlu0 %9663 }
0x393b   :  { %v9713_v52 = vsel %vm8030_vm13, %v9707_v32, %v9693_v24  ;;  %12324 = vmatpush3.msra.mxu0 %v17023_v51  ;;  %v9708_v37 = vsel %vm919_vm7, %v17291_v30, %v9664_v0 }
0x393c   :  { %12325 = vmatprep.subr.mxu0 %v17688_v28  ;;  %12312 = vmatmul.mubr.msk.f32.gmra.mxu0 %vm8038_vm14, %v9713_v52 }
0x393d   :  { %12326 = vmatpush3.msra.mxu0 %v17030_v41 }
0x393e   :  { %12327 = vmatprep.subr.mxu0 %v17688_v28  ;;  %v9666_v6 = vpop.permute.xlu1 %9665  ;;  %v9695_v11 = vpop.permute.xlu0 %9694 }
0x393f   :  { %12328 = vmatpush3.msra.mxu0 %v17037_v58  ;;  %v9714_v56 = vsel %vm8030_vm13, %v9708_v37, %v9695_v11  ;;  %v9709_v51 = vsel %vm919_vm7, %v17299_v35, %v9666_v6 }
0x3940   :  { %12329 = vmatprep.subr.mxu0 %v17688_v28  ;;  %12314 = vmatprep.mubr.msk.f32.mxu0 %vm8038_vm14, %v9714_v56 }
0x3941   :  { %12330 = vmatpush3.msra.mxu0 %v17045_v12 }
0x3942   :  { %12331 = vmatprep.subr.mxu0 %v17688_v28  ;;  %v9697_v41 = vpop.permute.xlu1 %9696  ;;  %v9911_v30 = vpop.permute.xlu0 %9910 }
0x3943   :  { %v9715_v44 = vsel %vm8030_vm13, %v9709_v51, %v9697_v41  ;;  %12332 = vmatpush3.msra.mxu0 %v17052_v23  ;;  %v9965_v23 = vsel %vm919_vm7, %v17310_v7, %v9911_v30 }
0x3944   :  { %12333 = vmatprep.subr.mxu0 %v17688_v28  ;;  %12315 = vmatmul.mubr.msk.f32.gmra.mxu0 %vm8038_vm14, %v9715_v44 }
0x3945   :  { %12334 = vmatpush3.msra.mxu0 %v17059_v63  ;;  %12341 = vmatprep.mubr.msk.f32.mxu0 %vm13336_vm5, %v17688_v28 }
0x3946   :  { %12335 = vmatprep.subr.mxu0 %v17688_v28  ;;  %v9945_v58 = vpop.permute.xlu1 %9944  ;;  %v9913_v12 = vpop.permute.xlu0 %9912 }
0x3947   :  { %12336 = vmatpush3.msra.mxu0 %v17066_v38  ;;  %v9972_v49 = vsel %vm8030_vm13, %v9965_v23, %v9945_v58  ;;  %v13305_v38 = vld [vmem:[%s17662_s23 + $0x18] sm:$0xff] }
0x3948   :  { %12337 = vmatprep.subr.mxu0 %v17688_v28 }
0x3949   :  { %12338 = vmatpush3.msra.mxu0 %v17073_v36  ;;  %v9966_v36 = vsel %vm919_vm7, %v17314_v21, %v9913_v12 }
0x394a   :  { %12339 = vmatprep.subr.mxu0 %v17688_v28  ;;  %v9947_v35 = vpop.permute.xlu1 %9946  ;;  %v9915_v63 = vpop.permute.xlu0 %9914 }
0x394b   :  { %12340 = vmatpush3.msra.mxu0 %v17080_v13  ;;  %v9973_v13 = vsel %vm8030_vm13, %v9966_v36, %v9947_v35  ;;  %v9967_v21 = vsel %vm919_vm7, %v17319_v2, %v9915_v63 }
0x394c   :  { %12342 = vmatmul.mubr.msk.f32.vlgmr.msra.gmra.mxu0 %vm8038_vm14, %v9972_v49  ;;  %12425 = vmatprep.subr.mxu0 %v17688_v28 }
0x394d   :  { %12344 = vmatprep.mubr.msk.f32.mxu0 %vm13336_vm5, %v17688_v28  ;;  %12426 = vmatpush3.msra.mxu0 %v13305_v38 }
0x394e   :  { %v9949_v7 = vpop.permute.xlu1 %9948  ;;  %v9917_v42 = vpop.permute.xlu0 %9916  ;;  %12427 = vmatprep.subr.mxu0 %v17688_v28 }
0x394f   :  { %12428 = vmatpush3.msra.mxu0 %v16848_v33  ;;  %v9974_v25 = vsel %vm8030_vm13, %v9967_v21, %v9949_v7  ;;  %v9968_v33 = vsel %vm919_vm7, %v17328_v47, %v9917_v42 }
0x3950   :  { %12345 = vmatmul.mubr.msk.f32.gmra.mxu0 %vm8038_vm14, %v9973_v13  ;;  %12429 = vmatprep.subr.mxu0 %v17688_v28 }
0x3951   :  { %12347 = vmatprep.mubr.msk.f32.mxu0 %vm13336_vm5, %v17688_v28  ;;  %12430 = vmatpush3.msra.mxu0 %v16856_v54 }
0x3952   :  { %v9951_v3 = vpop.permute.xlu1 %9950  ;;  %12431 = vmatprep.subr.mxu0 %v17688_v28  ;;  %v9919_v43 = vpop.permute.xlu0 %9918 }
0x3953   :  { %12432 = vmatpush3.msra.mxu0 %v16861_v39  ;;  %v9975_v59 = vsel %vm8030_vm13, %v9968_v33, %v9951_v3  ;;  %v9969_v39 = vsel %vm919_vm7, %v17335_v40, %v9919_v43 }
0x3954   :  { %12348 = vmatmul.mubr.msk.f32.gmra.mxu0 %vm8038_vm14, %v9974_v25 }
0x3955   :  { %12350 = vmatprep.mubr.msk.f32.mxu0 %vm13336_vm5, %v17688_v28 }
0x3956   :  { %v9953_v54 = vpop.permute.xlu1 %9952  ;;  %v9921_v2 = vpop.permute.xlu0 %9920 }
0x3957   :  { %v9976_v46 = vsel %vm8030_vm13, %v9969_v39, %v9953_v54  ;;  %v9970_v47 = vsel %vm919_vm7, %v17345_v19, %v9921_v2 }
0x3958   :  { %12351 = vmatmul.mubr.msk.f32.gmra.mxu0 %vm8038_vm14, %v9975_v59 }
0x3959   :  { %12353 = vmatprep.mubr.msk.f32.mxu0 %vm13336_vm5, %v17688_v28 }
0x395a   :  { %v9955_v50 = vpop.permute.xlu1 %9954  ;;  %v9923_v16 = vpop.permute.xlu0 %9922 }
0x395b   :  { %v9977_v48 = vsel %vm8030_vm13, %v9970_v47, %v9955_v50  ;;  %v9971_v40 = vsel %vm919_vm7, %v17354_v57, %v9923_v16 }
0x395c   :  { %12354 = vmatmul.mubr.msk.f32.gmra.mxu0 %vm8038_vm14, %v9976_v46 }
0x395d   :  { %12356 = vmatprep.mubr.msk.f32.mxu0 %vm13336_vm5, %v17688_v28 }
0x395e   :  { %v9957_v8 = vpop.permute.xlu1 %9956 }
0x395f   :  { %v9978_v1 = vsel %vm8030_vm13, %v9971_v40, %v9957_v8 }
0x3960   :  { %12357 = vmatmul.mubr.msk.f32.gmra.mxu0 %vm8038_vm14, %v9977_v48 }
0x3961   :  { %12359 = vmatprep.mubr.msk.f32.mxu0 %vm13336_vm5, %v17688_v28 }
0x3964   :  { %12360 = vmatmul.mubr.msk.f32.gmra.mxu0 %vm8038_vm14, %v9978_v1 }
0x3965   :  { %12433 = vmatprep.mubr.msk.f32.mxu0 %vm13336_vm5, %v17688_v28 }
0x39f4   :  { %v17474_v19 = vpop.f32.mrf.mxu0 }
0x39f6   :  { %v17476_v14 = vpop.f32.mrf.mxu0 }
0x39fc   :  { %v17478_v4 = vpop.f32.mrf.mxu0 }
0x39fe   :  { %v17480_v60 = vpop.f32.mrf.mxu0 }
0x3a04   :  { %v17482_v26 = vpop.f32.mrf.mxu0 }
0x3a06   :  { %v17484_v27 = vpop.f32.mrf.mxu0 }
0x3a0c   :  { %v10066_v57 = vpop.f32.mrf.mxu0 }
0x3a0d   :  { %v17486_v62 = vmax.f32 %v10066_v57, 0.0 }
0x3a0e   :  { %v12343_v55 = vpop.f32.mrf.mxu0 }
0x3a0f   :  { %v10114_v52 = vrot.slane %v17486_v62, 1  ;;  %v10145_v30 = vrot.slane %v17486_v62, 2 }
0x3a10   :  { %v10071_v32 = vpop.f32.mrf.mxu0 }
0x3a11   :  { %v17488_v24 = vmax.f32 %v10071_v32, 0.0 }
0x3a12   :  { %v12346_v0 = vpop.f32.mrf.mxu0 }
0x3a13   :  { %v10115_v37 = vrot.slane %v17488_v24, 1  ;;  %v10146_v11 = vrot.slane %v17488_v24, 2 }
0x3a14   :  { %v10076_v6 = vpop.f32.mrf.mxu0 }
0x3a15   :  { %v17493_v56 = vmax.f32 %v10076_v6, 0.0  ;;  %v10116_v51 = vsel %vm99_vm0, %v10114_v52, %v10115_v37  ;;  %v10147_v35 = vsel %vm7589_vm12, %v10145_v30, %v10146_v11 }
0x3a16   :  { %10127 = vrot.lane.b32.xlu0 %v10116_v51, %s13338_s15  ;;  %v12349_v41 = vpop.f32.mrf.mxu0 }
0x3a17   :  { %v10117_v44 = vrot.slane %v17493_v56, 1  ;;  %v10148_v12 = vrot.slane %v17493_v56, 2 }
0x3a18   :  { %v10081_v58 = vpop.f32.mrf.mxu0 }
0x3a19   :  { %v17500_v23 = vmax.f32 %v10081_v58, 0.0  ;;  %v10118_v63 = vsel %vm99_vm0, %v10115_v37, %v10117_v44  ;;  %v10149_v13 = vsel %vm7589_vm12, %v10146_v11, %v10148_v12 }
0x3a1a   :  { %10158 = vrot.lane.b32.xlu0 %v10147_v35, %s13337_s14  ;;  %10129 = vrot.lane.b32.xlu1 %v10118_v63, %s13338_s15  ;;  %v12352_v49 = vpop.f32.mrf.mxu0 }
0x3a1b   :  { %v10119_v38 = vrot.slane %v17500_v23, 1  ;;  %v10150_v7 = vrot.slane %v17500_v23, 2 }
0x3a1c   :  { %v10086_v36 = vpop.f32.mrf.mxu0 }
0x3a1d   :  { %v17508_v42 = vmax.f32 %v10086_v36, 0.0  ;;  %v10120_v21 = vsel %vm99_vm0, %v10117_v44, %v10119_v38  ;;  %v10151_v59 = vsel %vm7589_vm12, %v10148_v12, %v10150_v7 }
0x3a1e   :  { %10160 = vrot.lane.b32.xlu1 %v10149_v13, %s13337_s14  ;;  %10131 = vrot.lane.b32.xlu0 %v10120_v21, %s13338_s15  ;;  %v12355_v3 = vpop.f32.mrf.mxu0 }
0x3a1f   :  { %v10121_v25 = vrot.slane %v17508_v42, 1  ;;  %v10152_v33 = vrot.slane %v17508_v42, 2 }
0x3a20   :  { %v10091_v43 = vpop.f32.mrf.mxu0 }
0x3a21   :  { %v17516_v54 = vmax.f32 %v10091_v43, 0.0  ;;  %v10122_v2 = vsel %vm99_vm0, %v10119_v38, %v10121_v25  ;;  %v10153_v16 = vsel %vm7589_vm12, %v10150_v7, %v10152_v33 }
0x3a22   :  { %10162 = vrot.lane.b32.xlu0 %v10151_v59, %s13337_s14  ;;  %10133 = vrot.lane.b32.xlu1 %v10122_v2, %s13338_s15  ;;  %v12358_v39 = vpop.f32.mrf.mxu0 }
0x3a23   :  { %v10123_v50 = vrot.slane %v17516_v54, 1  ;;  %v10154_v47 = vrot.slane %v17516_v54, 2  ;;  %v9815_v39 = vadd.f32 %v17476_v14, %v16881_v29 }
0x3a24   :  { %v10096_v46 = vpop.f32.mrf.mxu0 }
0x3a25   :  { %v10106_v48 = vmax.f32 %v10096_v46, 0.0  ;;  %v10124_v8 = vsel %vm99_vm0, %v10121_v25, %v10123_v50  ;;  %v10155_v55 = vsel %vm7589_vm12, %v10152_v33, %v10154_v47 }
0x3a26   :  { %10164 = vrot.lane.b32.xlu1 %v10153_v16, %s13337_s14  ;;  %10135 = vrot.lane.b32.xlu0 %v10124_v8, %s13338_s15  ;;  %v12361_v40 = vpop.f32.mrf.mxu0 }
0x3a27   :  { %v10125_v1 = vrot.slane %v10106_v48, 1  ;;  %v10156_v57 = vrot.slane %v10106_v48, 2 }
0x3a29   :  { %v10126_v32 = vsel %vm99_vm0, %v10123_v50, %v10125_v1  ;;  %v10157_v0 = vsel %vm7589_vm12, %v10154_v47, %v10156_v57  ;;  %v9843_v50 = vmax.f32 %v9815_v39, 0.0 }
0x3a2a   :  { %10166 = vrot.lane.b32.xlu0 %v10155_v55, %s13337_s14  ;;  %10137 = vrot.lane.b32.xlu1 %v10126_v32, %s13338_s15 }
0x3a2e   :  { %9722 = vrot.lane.b32.xlu0 %v17107_v17, %s13338_s15  ;;  %10168 = vrot.lane.b32.xlu1 %v10157_v0, %s13337_s14  ;;  %v10321_v17 = vld [vmem:[%s17659_s20] sm:$0xff] }
0x3a32   :  { %9718 = vrot.lane.b32.xlu0 %v17101_v61, %s13338_s15  ;;  %9720 = vrot.lane.b32.xlu1 %v17113_v9, %s13338_s15  ;;  %v9088_v61 = vld [vmem:[%s17691_s10] sm:$0xff] }
0x3a36   :  { %10194 = vrot.lane.b32.xlu0 %v17258_v10, %s13338_s15  ;;  %9716 = vrot.lane.b32.xlu1 %v17103_v31, %s13338_s15  ;;  %v10468_v31 = vld [vmem:[%s17661_s22] sm:$0xff] }
0x3a3a   :  { %10190 = vrot.lane.b32.xlu0 %v17250_v5, %s13338_s15  ;;  %10192 = vrot.lane.b32.xlu1 %v17260_v34, %s13338_s15 }
0x3a3e   :  { %10324 = vperm.xlu0 %12453, %v10321_v17   ;;  %10188 = vrot.lane.b32.xlu1 %v17248_v20, %s13338_s15 }
0x3a42   :  { %9091 = vperm.xlu0 %12453, %v9088_v61   ;;  %10471 = vperm.xlu1 %12454, %v10468_v31  }
0x3a46   :  { %10552 = vperm.xlu1 %12454, %v9088_v61  }
0x3a88   :  { %v10128_v9 = vpop.permute.xlu0 %10127 }
0x3a89   :  { %v10176_v5 = vsel %vm919_vm7, %v17486_v62, %v10128_v9 }
0x3a8c   :  { %v10130_v10 = vpop.permute.xlu1 %10129  ;;  %v10159_v34 = vpop.permute.xlu0 %10158 }
0x3a8d   :  { %v10182_v52 = vsel %vm8030_vm13, %v10176_v5, %v10159_v34  ;;  %v10177_v20 = vsel %vm919_vm7, %v17488_v24, %v10130_v10 }
0x3a8e   :  { %12386 = vmatprep.mubr.msk.f32.mxu1 %vm8038_vm14, %v10182_v52 }
0x3a90   :  { %v10161_v37 = vpop.permute.xlu1 %10160  ;;  %v10132_v6 = vpop.permute.xlu0 %10131 }
0x3a91   :  { %v10183_v11 = vsel %vm8030_vm13, %v10177_v20, %v10161_v37  ;;  %v10178_v51 = vsel %vm919_vm7, %v17493_v56, %v10132_v6  ;;  %v13307_v6 = vld [vmem:[%s17660_s21] sm:$0xff] }
0x3a92   :  { %12387 = vmatmul.mubr.msk.f32.vlgmr.msra.gmra.mxu1 %vm8038_vm14, %v10183_v11 }
0x3a94   :  { %v10134_v41 = vpop.permute.xlu1 %10133  ;;  %v10163_v62 = vpop.permute.xlu0 %10162 }
0x3a95   :  { %v10184_v30 = vsel %vm8030_vm13, %v10178_v51, %v10163_v62  ;;  %v10179_v44 = vsel %vm919_vm7, %v17500_v23, %v10134_v41  ;;  %v13309_v51 = vld [vmem:[%s17680_s27 + $0x10] sm:$0xff]  ;;  %v13310_v41 = vld [vmem:[%s17689_s28] sm:$0xff] }
0x3a96   :  { %12389 = vmatprep.mubr.msk.f32.mxu1 %vm8038_vm14, %v10184_v30 }
0x3a98   :  { %v10165_v58 = vpop.permute.xlu1 %10164  ;;  %v10136_v24 = vpop.permute.xlu0 %10135 }
0x3a99   :  { %v10185_v12 = vsel %vm8030_vm13, %v10179_v44, %v10165_v58  ;;  %v10180_v35 = vsel %vm919_vm7, %v17508_v42, %v10136_v24 }
0x3a9a   :  { %12390 = vmatmul.mubr.msk.f32.gmra.mxu1 %vm8038_vm14, %v10185_v12 }
0x3a9c   :  { %v10138_v63 = vpop.permute.xlu1 %10137  ;;  %v10167_v56 = vpop.permute.xlu0 %10166 }
0x3a9d   :  { %v10186_v49 = vsel %vm8030_vm13, %v10180_v35, %v10167_v56  ;;  %v10181_v38 = vsel %vm919_vm7, %v17516_v54, %v10138_v63 }
0x3a9e   :  { %12392 = vmatprep.mubr.msk.f32.mxu1 %vm8038_vm14, %v10186_v49 }
0x3aa0   :  { %v10169_v36 = vpop.permute.xlu1 %10168  ;;  %v9723_v23 = vpop.permute.xlu0 %9722 }
0x3aa1   :  { %v10187_v7 = vsel %vm8030_vm13, %v10181_v38, %v10169_v36  ;;  %v9840_v13 = vadd.f32 %v17482_v26, %v9723_v23  ;;  %v9820_v26 = vadd.f32 %v17474_v19, %v16891_v45  ;;  %v13306_v45 = vld [vmem:[%s17658_s19] sm:$0xff] }
0x3aa2   :  { %12393 = vmatmul.mubr.msk.f32.gmra.mxu1 %vm8038_vm14, %v10187_v7 }
0x3aa3   :  { %v9848_v21 = vmax.f32 %v9840_v13, 0.0  ;;  %12407 = vmatprep.mubr.msk.f32.mxu1 %vm13336_vm5, %v17688_v28 }
0x3aa4   :  { %v9721_v42 = vpop.permute.xlu1 %9720  ;;  %v9719_v3 = vpop.permute.xlu0 %9718 }
0x3aa5   :  { %v9835_v25 = vadd.f32 %v17484_v27, %v9721_v42  ;;  %v9830_v43 = vadd.f32 %v17478_v4, %v9719_v3  ;;  %12396 = vmatpush3.msra.mxu1 %v9848_v21  ;;  %v9844_v4 = vmax.f32 %v9820_v26, 0.0 }
0x3aa6   :  { %12397 = vmatprep.subr.mxu1 %v17688_v28 }
0x3aa7   :  { %v9847_v33 = vmax.f32 %v9835_v25, 0.0  ;;  %v9846_v59 = vmax.f32 %v9830_v43, 0.0 }
0x3aa8   :  { %v9717_v54 = vpop.permute.xlu1 %9716  ;;  %v10195_v46 = vpop.permute.xlu0 %10194 }
0x3aa9   :  { %v9825_v2 = vadd.f32 %v17480_v60, %v9717_v54  ;;  %12398 = vmatpush3.msra.mxu1 %v9847_v33  ;;  %v9087_v60 = vmax.f32 %v17084_v53, 0.0 }
0x3aaa   :  { %12399 = vmatprep.subr.mxu1 %v17688_v28 }
0x3aab   :  { %v9845_v27 = vmax.f32 %v9825_v2, 0.0  ;;  %12400 = vmatpush3.msra.mxu1 %v9846_v59 }
0x3aac   :  { %12401 = vmatprep.subr.mxu1 %v17688_v28  ;;  %v10191_v29 = vpop.permute.xlu0 %10190  ;;  %v10193_v1 = vpop.permute.xlu1 %10192 }
0x3aad   :  { %12402 = vmatpush3.msra.mxu1 %v9845_v27 }
0x3aae   :  { %12403 = vmatprep.subr.mxu1 %v17688_v28 }
0x3aaf   :  { %12404 = vmatpush3.msra.mxu1 %v9844_v4 }
0x3ab0   :  { %12405 = vmatprep.subr.mxu1 %v17688_v28  ;;  %v10189_v9 = vpop.permute.xlu1 %10188 }
0x3ab1   :  { %12406 = vmatpush3.msra.mxu1 %v9843_v50 }
0x3ab2   :  { %12408 = vmatmul.mubr.msk.f32.vlgmr.msra.gmra.mxu1 %vm8859_vm15, %v13306_v45  ;;  %12410 = vmatprep.subr.mxu1 %v17688_v28 }
0x3ab3   :  { %12422 = vmatprep.mubr.msk.f32.mxu1 %vm13336_vm5, %v17688_v28 }
0x3ab9   :  { %v10325_v19 = vpop.permute.xlu0 %10324 }
0x3abd   :  { %v9092_v14 = vpop.permute.xlu0 %9091  ;;  %v10472_v58 = vpop.permute.xlu1 %10471 }
0x3abe   :  { %v9164_v47 = vadd.f32 %v16988_v22, %v9092_v14 }
0x3ac0   :  { %v9167_v48 = vadd.f32 %v9164_v47, %v9087_v60 }
0x3ac1   :  { %v10553_v63 = vpop.permute.xlu1 %10552 }
0x3ac2   :  { %9168 = vst.msk [vmem:[#allocation2] sm:$0xff] %vm136_vm2, %v9167_v48 }
0x3b52   :  { %v12388_v16 = vpop.f32.mrf.mxu1 }
0x3b53   :  { %v10292_v22 = vadd.f32 %v12388_v16, %v16893_v18 }
0x3b54   :  { %v10286_v8 = vpop.f32.mrf.mxu1 }
0x3b55   :  { %v10287_v34 = vadd.f32 %v10286_v8, %v16883_v15  ;;  %v10316_v20 = vmax.f32 %v10292_v22, 0.0  ;;  %v13308_v15 = vld [vmem:[%s17680_s27 + $0x18] sm:$0xff]  ;;  %s13341_s27 = smov [#allocation2]  }
0x3b56   :  { %s10633_s30 = sshll.u32 %s13341_s27, 4  ;;  %s10634_s30 = int_to_ptr.vmem [resolvable:$true] %s10633_s30 }
0x3b57   :  { %v10315_v37 = vmax.f32 %v10287_v34, 0.0  ;;  %s13311_s28 = scalar_lea.vmem %s10634_s30, 256  ;;  %p13316_p1 = scmp.lt.s32.totalorder %s10634_s30, %s10634_s30 }
0x3b58   :  { %p13312_p0 = scmp.ne.s32.totalorder %s10634_s30, %s13311_s28  ;;  %p13317_p2 = scmp.lt.s32.totalorder %s13311_s28, %s13311_s28 }
0x3b5a   :  { %v12391_v40 = vpop.f32.mrf.mxu1  ;;  %p13318_p3 = por %p13317_p2, %p13316_p1 }
0x3b5b   :  { %v10302_v17 = vadd.f32 %v12391_v40, %v10191_v29 }
0x3b5c   :  { %v10296_v57 = vpop.f32.mrf.mxu1  ;;  %p13319_p4 = pnand %p13318_p3, %p13312_p0 }
0x3b5d   :  { %v10297_v5 = vadd.f32 %v10296_v57, %v10189_v9  ;;  %v10318_v53 = vmax.f32 %v10302_v17, 0.0 }
0x3b5f   :  { %v10317_v52 = vmax.f32 %v10297_v5, 0.0 }
0x3b62   :  { %v12394_v55 = vpop.f32.mrf.mxu1 }
0x3b63   :  { %v10312_v32 = vadd.f32 %v12394_v55, %v10195_v46 }
0x3b64   :  { %v10306_v0 = vpop.f32.mrf.mxu1 }
0x3b65   :  { %v10320_v61 = vmax.f32 %v10312_v32, 0.0  ;;  %v10307_v31 = vadd.f32 %v10306_v0, %v10193_v1 }
0x3b67   :  { %v10319_v10 = vmax.f32 %v10307_v31, 0.0  ;;  %12411 = vmatpush3.msra.mxu1 %v10320_v61 }
0x3b68   :  { %12412 = vmatprep.subr.mxu1 %v17688_v28 }
0x3b69   :  { %12413 = vmatpush3.msra.mxu1 %v10319_v10 }
0x3b6a   :  { %12414 = vmatprep.subr.mxu1 %v17688_v28 }
0x3b6b   :  { %12415 = vmatpush3.msra.mxu1 %v10318_v53 }
0x3b6c   :  { %12416 = vmatprep.subr.mxu1 %v17688_v28 }
0x3b6d   :  { %12417 = vmatpush3.msra.mxu1 %v10317_v52 }
0x3b6e   :  { %12418 = vmatprep.subr.mxu1 %v17688_v28 }
0x3b6f   :  { %12419 = vmatpush3.msra.mxu1 %v10316_v20 }
0x3b70   :  { %12420 = vmatprep.subr.mxu1 %v17688_v28 }
0x3b71   :  { %12421 = vmatpush3.msra.mxu1 %v10315_v37 }
0x3b72   :  { %v10393_v18 = vpop.f32.mrf.mxu1  ;;  %12423 = vmatmul.mubr.msk.f32.vlgmr.msra.gmra.mxu1 %vm8859_vm15, %v13307_v6  ;;  %12436 = vmatprep.subr.mxu1 %v17688_v28 }
0x3b73   :  { %12437 = vmatpush3.msra.mxu1 %v13308_v15  ;;  %12440 = vmatprep.mubr.msk.f32.mxu1 %vm13336_vm5, %v17688_v28  ;;  %v10394_v62 = vadd.f32 %v10393_v18, %v10325_v19 }
0x3b74   :  { %12438 = vmatprep.subr.mxu1 %v17688_v28  ;;  %v12409_v11 = vpop.f32.mrf.mxu1 }
0x3b75   :  { %12439 = vmatpush3.msra.mxu1 %v13309_v51 }
0x3b76   :  { %12441 = vmatmul.mubr.msk.f32.vlgmr.msra.gmra.mxu1 %vm141_vm3, %v13310_v41 }
0x3c32   :  { %v10463_v30 = vpop.f32.mrf.mxu1 }
0x3c33   :  { %v10467_v44 = vadd.f32 %v10463_v30, %v10394_v62 }
0x3c34   :  { %v12424_v24 = vpop.f32.mrf.mxu1 }
0x3c35   :  { %v10474_v12 = vadd.f32 %v10472_v58, %v10467_v44 }
0x3c36   :  { %v10621_v35 = vpop.f32.mrf.mxu1 }
0x3c37   :  { %12434 = vmatmul.mubr.msk.f32.vlgmr.msra.gmra.mxu0 %vm919_vm7, %v10474_v12  ;;  %v10622_v49 = vadd.f32 %v10621_v35, %v10553_v63 }
0x3c38   :  { %v12442_v28 = vpop.f32.mrf.mxu1 }
0x3cf7   :  { %v10544_v56 = vpop.f32.mrf.mxu0 }
0x3cf8   :  { %v10548_v38 = vmax.f32 %v10544_v56, 0.0 }
0x3cf9   :  { %v12435_v36 = vpop.f32.mrf.mxu0 }
0x3cfa   :  { %v10625_v23 = vadd.f32 %v10622_v49, %v10548_v38 }
0x3cfc   :  { %10627 = vst.msk [vmem:[#allocation2 + $0x8] sm:$0xff] %vm136_vm2, %v10625_v23 }
0x3cfd   :  { %13322 = shalt.err (!%p13319_p4)
}
0x3cfe   :  { %s13342_s25 = smov 128  }
0x3cff   :  { %10639 = dma.vmem_to_hbm [thread:$0]  %s10634_s30, 256, %s17663_s24, [#allocation3], %s13342_s25, %s13342_s25, %s13333_s2  }
0x3d00   :  { %13331 = dma.done.wait [#allocation3], 256  }
0x3d01   :  { %13332 = vsyncadd [#allocation3], 4294967040 }
0x3d02   :  { %10643 = vsyncpa [#allocation3], 1 }

</bundles_post_ra>
